<compile_context>
chip_gen: v6e
topology: v6e:2x2x1
jax: 0.10.0
libtpu: 0.0.40
codegen_flags: <defaults>
</compile_context>

<pallas_src>
import jax
import jax.numpy as jnp
from jax import lax
from jax.experimental import pallas as pl
from jax.experimental.pallas import tpu as pltpu

EPSILON = 1e-08
LN_EPS = 1e-5

# ---- scaled-down BART-style configuration ----
BATCH = 2
TGT_LEN = 8           # decoder (targets) sequence length
N_MEMS = 4            # encoder sequence length (number of memory slots)
MEM_SIZE = 8          # per-memory-slot feature size
INPUT_SIZE = 32       # concat width of target keys
D_MODEL = 64          # transformer d_model == output_size
N_HEADS = 4
HEAD_DIM = D_MODEL // N_HEADS
FFN_DIM = 128
N_ENC_LAYERS = 2
N_DEC_LAYERS = 2
Z_SIZE = 16

assert D_MODEL == N_HEADS * HEAD_DIM


# ----------------------------- kernel helpers -----------------------------
def _layer_norm(x, gamma, beta):
    mu = jnp.mean(x, axis=-1, keepdims=True)
    xc = x - mu
    var = jnp.mean(xc * xc, axis=-1, keepdims=True)
    return xc * lax.rsqrt(var + LN_EPS) * gamma + beta


def _softmax(s):
    m = jnp.max(s, axis=-1, keepdims=True)
    e = jnp.exp(s - m)
    return e * pl.reciprocal(jnp.sum(e, axis=-1, keepdims=True), approx=True)


def _mha(q, k, v, mask=None):
    """Multi-head attention: q (Tq, D), k/v (Tk, D); heads are static lane slices."""
    scale = HEAD_DIM ** -0.5
    outs = []
    for h in range(N_HEADS):
        lo, hi = h * HEAD_DIM, (h + 1) * HEAD_DIM
        qh = q[:, lo:hi] * scale
        kh = k[:, lo:hi]
        vh = v[:, lo:hi]
        # (Tq, hd) x (Tk, hd) contracted on hd -> (Tq, Tk); no explicit transpose
        s = lax.dot_general(qh, kh, (((1,), (1,)), ((), ())),
                            preferred_element_type=jnp.float32)
        if mask is not None:
            s = s + mask
        p = _softmax(s)
        outs.append(jnp.dot(p, vh, preferred_element_type=jnp.float32))
    return jnp.concatenate(outs, axis=-1)


# ------------------------------- the kernel -------------------------------
def bart_link_kernel(
    mem_ref, tgt_ref,
    w_m2h_ref, enc_add_ref, w_i2h_ref, dec_add_ref, ln_emb_ref,
    enc_wqkv_ref, enc_bqkv_ref, enc_wo_ref, enc_bo_ref,
    enc_wfc1_ref, enc_bfc1_ref, enc_wfc2_ref, enc_bfc2_ref, enc_ln_ref,
    dec_wqkv_ref, dec_bqkv_ref, dec_wo_ref, dec_bo_ref,
    dec_wqx_ref, dec_bqx_ref, dec_wkvx_ref, dec_bkvx_ref,
    dec_wox_ref, dec_box_ref,
    dec_wfc1_ref, dec_bfc1_ref, dec_wfc2_ref, dec_bfc2_ref, dec_ln_ref,
    w_head_ref, b_head_ref,
    out_ref,
):
    f32 = jnp.float32
    D = D_MODEL

    mem = mem_ref[0].astype(f32)        # (N_MEMS, MEM_SIZE)
    tgt = tgt_ref[0].astype(f32)        # (TGT_LEN, INPUT_SIZE)
    ln_emb = ln_emb_ref[...]            # (4, D): [enc_g, enc_b, dec_g, dec_b]

    # ---------------- encoder ----------------
    # memory_to_hidden; Linear bias + learned positional embedding pre-folded into enc_add
    h = jnp.dot(mem, w_m2h_ref[...], preferred_element_type=f32) + enc_add_ref[...]
    h = _layer_norm(h, ln_emb[0:1, :], ln_emb[1:2, :])          # layernorm_embedding

    for l in range(N_ENC_LAYERS):
        lnp = enc_ln_ref[l]                                      # (4, D)
        # fused QKV projection (one MXU push)
        qkv = (jnp.dot(h, enc_wqkv_ref[l], preferred_element_type=f32)
               + enc_bqkv_ref[l])
        a = _mha(qkv[:, 0:D], qkv[:, D:2 * D], qkv[:, 2 * D:3 * D])
        a = jnp.dot(a, enc_wo_ref[l], preferred_element_type=f32) + enc_bo_ref[l]
        h = _layer_norm(h + a, lnp[0:1, :], lnp[1:2, :])
        # FFN
        f = jax.nn.gelu(jnp.dot(h, enc_wfc1_ref[l], preferred_element_type=f32)
                        + enc_bfc1_ref[l], approximate=True)
        f = jnp.dot(f, enc_wfc2_ref[l], preferred_element_type=f32) + enc_bfc2_ref[l]
        h = _layer_norm(h + f, lnp[2:3, :], lnp[3:4, :])
    enc_out = h                                                  # (N_MEMS, D)

    # ---------------- decoder ----------------
    h = jnp.dot(tgt, w_i2h_ref[...], preferred_element_type=f32) + dec_add_ref[...]
    h = _layer_norm(h, ln_emb[2:3, :], ln_emb[3:4, :])           # layernorm_embedding

    row = lax.broadcasted_iota(jnp.int32, (TGT_LEN, TGT_LEN), 0)
    col = lax.broadcasted_iota(jnp.int32, (TGT_LEN, TGT_LEN), 1)
    causal_mask = jnp.where(col <= row, 0.0, -1e9).astype(f32)

    for l in range(N_DEC_LAYERS):
        lnp = dec_ln_ref[l]                                      # (6, D)
        # causal self-attention (fused QKV)
        qkv = (jnp.dot(h, dec_wqkv_ref[l], preferred_element_type=f32)
               + dec_bqkv_ref[l])
        a = _mha(qkv[:, 0:D], qkv[:, D:2 * D], qkv[:, 2 * D:3 * D], mask=causal_mask)
        a = jnp.dot(a, dec_wo_ref[l], preferred_element_type=f32) + dec_bo_ref[l]
        h = _layer_norm(h + a, lnp[0:1, :], lnp[1:2, :])
        # cross-attention to encoder output (fused K,V projection)
        qx = jnp.dot(h, dec_wqx_ref[l], preferred_element_type=f32) + dec_bqx_ref[l]
        kv = (jnp.dot(enc_out, dec_wkvx_ref[l], preferred_element_type=f32)
              + dec_bkvx_ref[l])
        a = _mha(qx, kv[:, 0:D], kv[:, D:2 * D])
        a = jnp.dot(a, dec_wox_ref[l], preferred_element_type=f32) + dec_box_ref[l]
        h = _layer_norm(h + a, lnp[2:3, :], lnp[3:4, :])
        # FFN
        f = jax.nn.gelu(jnp.dot(h, dec_wfc1_ref[l], preferred_element_type=f32)
                        + dec_bfc1_ref[l], approximate=True)
        f = jnp.dot(f, dec_wfc2_ref[l], preferred_element_type=f32) + dec_bfc2_ref[l]
        h = _layer_norm(h + f, lnp[4:5, :], lnp[5:6, :])

    # ---------------- heads: loc | scale fused into one matmul ----------------
    z = jnp.dot(h, w_head_ref[...], preferred_element_type=f32) + b_head_ref[...]
    loc = z[:, 0:Z_SIZE] + EPSILON
    scale = jax.nn.softplus(z[:, Z_SIZE:2 * Z_SIZE]) + EPSILON
    out_ref[0] = jnp.concatenate([loc, scale], axis=-1)


# ------------------------------- wrapper -----------------------------------
def bart_link_forward(x, weights, memory_keys, target_keys):
    # host-side data plumbing identical to the PyTorch forward
    memory = jnp.concatenate([x[k] for k in memory_keys], axis=-1)[..., 0, :]
    memory = memory.reshape(*memory.shape[:-1], N_MEMS, MEM_SIZE)
    targets = jnp.concatenate([x[k] for k in target_keys], axis=-1)
    if memory.ndim > 3:
        batch_orig_shape = memory.shape[:-2]
        memory = memory.reshape(-1, *memory.shape[-2:])
        targets = targets.reshape(-1, *targets.shape[-2:])
    else:
        batch_orig_shape = None

    B = memory.shape[0]
    w = weights
    args = (
        memory, targets,
        w["w_m2h"], w["enc_add"], w["w_i2h"], w["dec_add"], w["ln_emb"],
        w["enc_wqkv"], w["enc_bqkv"], w["enc_wo"], w["enc_bo"],
        w["enc_wfc1"], w["enc_bfc1"], w["enc_wfc2"], w["enc_bfc2"], w["enc_ln"],
        w["dec_wqkv"], w["dec_bqkv"], w["dec_wo"], w["dec_bo"],
        w["dec_wqx"], w["dec_bqx"], w["dec_wkvx"], w["dec_bkvx"],
        w["dec_wox"], w["dec_box"],
        w["dec_wfc1"], w["dec_bfc1"], w["dec_wfc2"], w["dec_bfc2"], w["dec_ln"],
        w["w_head"], w["b_head"],
    )

    def resident(a):  # full-array block, constant index -> stays resident across grid steps
        nd = a.ndim
        return pl.BlockSpec(a.shape, lambda b, _nd=nd: (0,) * _nd)

    in_specs = [
        pl.BlockSpec((1, N_MEMS, MEM_SIZE), lambda b: (b, 0, 0)),
        pl.BlockSpec((1, TGT_LEN, INPUT_SIZE), lambda b: (b, 0, 0)),
    ] + [resident(a) for a in args[2:]]

    out = pl.pallas_call(
        bart_link_kernel,
        out_shape=jax.ShapeDtypeStruct((B, TGT_LEN, 2 * Z_SIZE), jnp.float32),
        grid_spec=pltpu.PrefetchScalarGridSpec(
            num_scalar_prefetch=0,
            grid=(B,),
            in_specs=in_specs,
            out_specs=pl.BlockSpec((1, TGT_LEN, 2 * Z_SIZE), lambda b: (b, 0, 0)),
        ),
        compiler_params=pltpu.CompilerParams(dimension_semantics=("parallel",)),
    )(*args)

    z_params = {"loc": out[..., :Z_SIZE], "scale": out[..., Z_SIZE:]}
    if batch_orig_shape is not None:
        z_params = {k: v.reshape(*batch_orig_shape, *v.shape[-2:])
                    for k, v in z_params.items()}
    return z_params


# ----------------------------- weight init ----------------------------------
def init_weights(key):
    keys = iter(jax.random.split(key, 128))
    D = D_MODEL

    def lin_w(fan_in, fan_out):   # pre-transposed (in, out), PyTorch-style uniform bound
        b = float(fan_in) ** -0.5
        return jax.random.uniform(next(keys), (fan_in, fan_out), jnp.float32, -b, b)

    def lin_b(fan_in, fan_out):
        b = float(fan_in) ** -0.5
        return jax.random.uniform(next(keys), (1, fan_out), jnp.float32, -b, b)

    def stack(fn, n):
        return jnp.stack([fn() for _ in range(n)], axis=0)

    ln_gb = jnp.concatenate([jnp.ones((1, D), jnp.float32),
                             jnp.zeros((1, D), jnp.float32)], axis=0)   # [gamma; beta]

    w = {}
    # memory_to_hidden / input_to_hidden; bias folded into additive pos-emb term
    w["w_m2h"] = lin_w(MEM_SIZE, D)
    b_m2h = lin_b(MEM_SIZE, D)
    pos_enc = 0.02 * jax.random.normal(next(keys), (N_MEMS, D), jnp.float32)
    w["enc_add"] = pos_enc + b_m2h
    w["w_i2h"] = lin_w(INPUT_SIZE, D)
    b_i2h = lin_b(INPUT_SIZE, D)
    pos_dec = 0.02 * jax.random.normal(next(keys), (TGT_LEN, D), jnp.float32)
    w["dec_add"] = pos_dec + b_i2h
    w["ln_emb"] = jnp.concatenate([ln_gb, ln_gb], axis=0)                # (4, D)

    # encoder layers (packed with a leading layer axis)
    w["enc_wqkv"] = stack(lambda: lin_w(D, 3 * D), N_ENC_LAYERS)
    w["enc_bqkv"] = stack(lambda: lin_b(D, 3 * D), N_ENC_LAYERS)
    w["enc_wo"] = stack(lambda: lin_w(D, D), N_ENC_LAYERS)
    w["enc_bo"] = stack(lambda: lin_b(D, D), N_ENC_LAYERS)
    w["enc_wfc1"] = stack(lambda: lin_w(D, FFN_DIM), N_ENC_LAYERS)
    w["enc_bfc1"] = stack(lambda: lin_b(D, FFN_DIM), N_ENC_LAYERS)
    w["enc_wfc2"] = stack(lambda: lin_w(FFN_DIM, D), N_ENC_LAYERS)
    w["enc_bfc2"] = stack(lambda: lin_b(FFN_DIM, D), N_ENC_LAYERS)
    w["enc_ln"] = jnp.tile(jnp.concatenate([ln_gb, ln_gb], axis=0)[None],
                           (N_ENC_LAYERS, 1, 1))                         # (L, 4, D)

    # decoder layers
    w["dec_wqkv"] = stack(lambda: lin_w(D, 3 * D), N_DEC_LAYERS)
    w["dec_bqkv"] = stack(lambda: lin_b(D, 3 * D), N_DEC_LAYERS)
    w["dec_wo"] = stack(lambda: lin_w(D, D), N_DEC_LAYERS)
    w["dec_bo"] = stack(lambda: lin_b(D, D), N_DEC_LAYERS)
    w["dec_wqx"] = stack(lambda: lin_w(D, D), N_DEC_LAYERS)
    w["dec_bqx"] = stack(lambda: lin_b(D, D), N_DEC_LAYERS)
    w["dec_wkvx"] = stack(lambda: lin_w(D, 2 * D), N_DEC_LAYERS)
    w["dec_bkvx"] = stack(lambda: lin_b(D, 2 * D), N_DEC_LAYERS)
    w["dec_wox"] = stack(lambda: lin_w(D, D), N_DEC_LAYERS)
    w["dec_box"] = stack(lambda: lin_b(D, D), N_DEC_LAYERS)
    w["dec_wfc1"] = stack(lambda: lin_w(D, FFN_DIM), N_DEC_LAYERS)
    w["dec_bfc1"] = stack(lambda: lin_b(D, FFN_DIM), N_DEC_LAYERS)
    w["dec_wfc2"] = stack(lambda: lin_w(FFN_DIM, D), N_DEC_LAYERS)
    w["dec_bfc2"] = stack(lambda: lin_b(FFN_DIM, D), N_DEC_LAYERS)
    w["dec_ln"] = jnp.tile(jnp.concatenate([ln_gb, ln_gb, ln_gb], axis=0)[None],
                           (N_DEC_LAYERS, 1, 1))                         # (L, 6, D)

    # hidden_to_z_params: 'loc' and 'scale' heads fused along the output axis
    w["w_head"] = jnp.concatenate([lin_w(D, Z_SIZE), lin_w(D, Z_SIZE)], axis=1)
    w["b_head"] = jnp.concatenate([lin_b(D, Z_SIZE), lin_b(D, Z_SIZE)], axis=1)
    return w


if __name__ == "__main__":
    key = jax.random.PRNGKey(0)
    k_m1, k_m2, k_t, k_w = jax.random.split(key, 4)

    # dict-of-tensors input, mirroring the PyTorch forward: two memory keys whose
    # concatenation has width n_mems*mem_size = 32, and one target key of width input_size.
    x = {
        "mem_a": jax.random.normal(k_m1, (BATCH, 3, 16), jnp.float32),
        "mem_b": jax.random.normal(k_m2, (BATCH, 3, 16), jnp.float32),
        "x_prev": jax.random.normal(k_t, (BATCH, TGT_LEN, INPUT_SIZE), jnp.float32),
    }
    weights = init_weights(k_w)

    z_params = bart_link_forward(
        x, weights, memory_keys=("mem_a", "mem_b"), target_keys=("x_prev",))
    jax.block_until_ready(z_params)

    assert z_params["loc"].shape == (BATCH, TGT_LEN, Z_SIZE)
    assert z_params["scale"].shape == (BATCH, TGT_LEN, Z_SIZE)
    assert bool(jnp.all(jnp.isfinite(z_params["loc"])))
    assert bool(jnp.all(jnp.isfinite(z_params["scale"])))
    assert bool(jnp.all(z_params["scale"] > 0.0))
    print("KERNEL_OK")
</pallas_src>

<mosaic_0001>
module attributes {stable_mosaic.version = 11 : i64} {
  func.func @bart_link_kernel(%arg0: i32, %arg1: memref<1x4x8xf32, #tpu.memory_space<vmem>>, %arg2: memref<1x8x32xf32, #tpu.memory_space<vmem>>, %arg3: memref<8x64xf32, #tpu.memory_space<vmem>>, %arg4: memref<4x64xf32, #tpu.memory_space<vmem>>, %arg5: memref<32x64xf32, #tpu.memory_space<vmem>>, %arg6: memref<8x64xf32, #tpu.memory_space<vmem>>, %arg7: memref<4x64xf32, #tpu.memory_space<vmem>>, %arg8: memref<2x64x192xf32, #tpu.memory_space<vmem>>, %arg9: memref<2x1x192xf32, #tpu.memory_space<vmem>>, %arg10: memref<2x64x64xf32, #tpu.memory_space<vmem>>, %arg11: memref<2x1x64xf32, #tpu.memory_space<vmem>>, %arg12: memref<2x64x128xf32, #tpu.memory_space<vmem>>, %arg13: memref<2x1x128xf32, #tpu.memory_space<vmem>>, %arg14: memref<2x128x64xf32, #tpu.memory_space<vmem>>, %arg15: memref<2x1x64xf32, #tpu.memory_space<vmem>>, %arg16: memref<2x4x64xf32, #tpu.memory_space<vmem>>, %arg17: memref<2x64x192xf32, #tpu.memory_space<vmem>>, %arg18: memref<2x1x192xf32, #tpu.memory_space<vmem>>, %arg19: memref<2x64x64xf32, #tpu.memory_space<vmem>>, %arg20: memref<2x1x64xf32, #tpu.memory_space<vmem>>, %arg21: memref<2x64x64xf32, #tpu.memory_space<vmem>>, %arg22: memref<2x1x64xf32, #tpu.memory_space<vmem>>, %arg23: memref<2x64x128xf32, #tpu.memory_space<vmem>>, %arg24: memref<2x1x128xf32, #tpu.memory_space<vmem>>, %arg25: memref<2x64x64xf32, #tpu.memory_space<vmem>>, %arg26: memref<2x1x64xf32, #tpu.memory_space<vmem>>, %arg27: memref<2x64x128xf32, #tpu.memory_space<vmem>>, %arg28: memref<2x1x128xf32, #tpu.memory_space<vmem>>, %arg29: memref<2x128x64xf32, #tpu.memory_space<vmem>>, %arg30: memref<2x1x64xf32, #tpu.memory_space<vmem>>, %arg31: memref<2x6x64xf32, #tpu.memory_space<vmem>>, %arg32: memref<64x32xf32, #tpu.memory_space<vmem>>, %arg33: memref<1x32xf32, #tpu.memory_space<vmem>>, %arg34: memref<1x8x32xf32, #tpu.memory_space<vmem>>) attributes {dimension_semantics = [#tpu.dimension_semantics<parallel>], iteration_bounds = array<i64: 2>, scalar_prefetch = 0 : i64, scratch_operands = 0 : i64, tpu.core_type = #tpu.core_type<tc>, window_params = [{transform_indices = @transform_0, window_bounds = array<i64: 1, 4, 8>}, {transform_indices = @transform_1, window_bounds = array<i64: 1, 8, 32>}, {pipeline_mode = #tpu.pipeline_mode<synchronous>, transform_indices = @transform_2, window_bounds = array<i64: 8, 64>}, {pipeline_mode = #tpu.pipeline_mode<synchronous>, transform_indices = @transform_3, window_bounds = array<i64: 4, 64>}, {pipeline_mode = #tpu.pipeline_mode<synchronous>, transform_indices = @transform_4, window_bounds = array<i64: 32, 64>}, {pipeline_mode = #tpu.pipeline_mode<synchronous>, transform_indices = @transform_5, window_bounds = array<i64: 8, 64>}, {pipeline_mode = #tpu.pipeline_mode<synchronous>, transform_indices = @transform_6, window_bounds = array<i64: 4, 64>}, {pipeline_mode = #tpu.pipeline_mode<synchronous>, transform_indices = @transform_7, window_bounds = array<i64: 2, 64, 192>}, {pipeline_mode = #tpu.pipeline_mode<synchronous>, transform_indices = @transform_8, window_bounds = array<i64: 2, 1, 192>}, {pipeline_mode = #tpu.pipeline_mode<synchronous>, transform_indices = @transform_9, window_bounds = array<i64: 2, 64, 64>}, {pipeline_mode = #tpu.pipeline_mode<synchronous>, transform_indices = @transform_10, window_bounds = array<i64: 2, 1, 64>}, {pipeline_mode = #tpu.pipeline_mode<synchronous>, transform_indices = @transform_11, window_bounds = array<i64: 2, 64, 128>}, {pipeline_mode = #tpu.pipeline_mode<synchronous>, transform_indices = @transform_12, window_bounds = array<i64: 2, 1, 128>}, {pipeline_mode = #tpu.pipeline_mode<synchronous>, transform_indices = @transform_13, window_bounds = array<i64: 2, 128, 64>}, {pipeline_mode = #tpu.pipeline_mode<synchronous>, transform_indices = @transform_14, window_bounds = array<i64: 2, 1, 64>}, {pipeline_mode = #tpu.pipeline_mode<synchronous>, transform_indices = @transform_15, window_bounds = array<i64: 2, 4, 64>}, {pipeline_mode = #tpu.pipeline_mode<synchronous>, transform_indices = @transform_16, window_bounds = array<i64: 2, 64, 192>}, {pipeline_mode = #tpu.pipeline_mode<synchronous>, transform_indices = @transform_17, window_bounds = array<i64: 2, 1, 192>}, {pipeline_mode = #tpu.pipeline_mode<synchronous>, transform_indices = @transform_18, window_bounds = array<i64: 2, 64, 64>}, {pipeline_mode = #tpu.pipeline_mode<synchronous>, transform_indices = @transform_19, window_bounds = array<i64: 2, 1, 64>}, {pipeline_mode = #tpu.pipeline_mode<synchronous>, transform_indices = @transform_20, window_bounds = array<i64: 2, 64, 64>}, {pipeline_mode = #tpu.pipeline_mode<synchronous>, transform_indices = @transform_21, window_bounds = array<i64: 2, 1, 64>}, {pipeline_mode = #tpu.pipeline_mode<synchronous>, transform_indices = @transform_22, window_bounds = array<i64: 2, 64, 128>}, {pipeline_mode = #tpu.pipeline_mode<synchronous>, transform_indices = @transform_23, window_bounds = array<i64: 2, 1, 128>}, {pipeline_mode = #tpu.pipeline_mode<synchronous>, transform_indices = @transform_24, window_bounds = array<i64: 2, 64, 64>}, {pipeline_mode = #tpu.pipeline_mode<synchronous>, transform_indices = @transform_25, window_bounds = array<i64: 2, 1, 64>}, {pipeline_mode = #tpu.pipeline_mode<synchronous>, transform_indices = @transform_26, window_bounds = array<i64: 2, 64, 128>}, {pipeline_mode = #tpu.pipeline_mode<synchronous>, transform_indices = @transform_27, window_bounds = array<i64: 2, 1, 128>}, {pipeline_mode = #tpu.pipeline_mode<synchronous>, transform_indices = @transform_28, window_bounds = array<i64: 2, 128, 64>}, {pipeline_mode = #tpu.pipeline_mode<synchronous>, transform_indices = @transform_29, window_bounds = array<i64: 2, 1, 64>}, {pipeline_mode = #tpu.pipeline_mode<synchronous>, transform_indices = @transform_30, window_bounds = array<i64: 2, 6, 64>}, {pipeline_mode = #tpu.pipeline_mode<synchronous>, transform_indices = @transform_31, window_bounds = array<i64: 64, 32>}, {pipeline_mode = #tpu.pipeline_mode<synchronous>, transform_indices = @transform_32, window_bounds = array<i64: 1, 32>}, {transform_indices = @transform_33, window_bounds = array<i64: 1, 8, 32>}]} {
    %c0 = arith.constant 0 : index
    %c0_0 = arith.constant 0 : index
    %c0_1 = arith.constant 0 : index
    %0 = vector.load %arg1[%c0, %c0_0, %c0_1] : memref<1x4x8xf32, #tpu.memory_space<vmem>>, vector<1x4x8xf32>
    %1 = vector.shape_cast %0 : vector<1x4x8xf32> to vector<4x8xf32>
    %c0_2 = arith.constant 0 : index
    %c0_3 = arith.constant 0 : index
    %c0_4 = arith.constant 0 : index
    %2 = vector.load %arg2[%c0_2, %c0_3, %c0_4] : memref<1x8x32xf32, #tpu.memory_space<vmem>>, vector<1x8x32xf32>
    %3 = vector.shape_cast %2 : vector<1x8x32xf32> to vector<8x32xf32>
    %c0_5 = arith.constant 0 : index
    %c0_6 = arith.constant 0 : index
    %4 = vector.load %arg7[%c0_5, %c0_6] : memref<4x64xf32, #tpu.memory_space<vmem>>, vector<4x64xf32>
    %c0_7 = arith.constant 0 : index
    %c0_8 = arith.constant 0 : index
    %5 = vector.load %arg3[%c0_7, %c0_8] : memref<8x64xf32, #tpu.memory_space<vmem>>, vector<8x64xf32>
    %cst = arith.constant dense<0.000000e+00> : vector<4x64xf32>
    %6 = tpu.matmul %1, %5, %cst {dimension_numbers = #tpu.dot_dimension_numbers<[1], [0], [0], [1], [0, 0, 1, 1], [], []>} : vector<4x8xf32>, vector<8x64xf32>, vector<4x64xf32> -> vector<4x64xf32>
    %c0_9 = arith.constant 0 : index
    %c0_10 = arith.constant 0 : index
    %7 = vector.load %arg4[%c0_9, %c0_10] : memref<4x64xf32, #tpu.memory_space<vmem>>, vector<4x64xf32>
    %8 = arith.addf %6, %7 : vector<4x64xf32>
    %9 = vector.extract_strided_slice %4 {offsets = [0, 0], sizes = [1, 64], strides = [1, 1]} : vector<4x64xf32> to vector<1x64xf32>
    %10 = vector.extract_strided_slice %4 {offsets = [1, 0], sizes = [1, 64], strides = [1, 1]} : vector<4x64xf32> to vector<1x64xf32>
    %cst_11 = arith.constant dense<0.000000e+00> : vector<4xf32>
    %11 = vector.multi_reduction <add>, %8, %cst_11 [1] : vector<4x64xf32> to vector<4xf32>
    %12 = vector.shape_cast %11 : vector<4xf32> to vector<4x1xf32>
    %cst_12 = arith.constant 6.400000e+01 : f32
    %13 = vector.broadcast %cst_12 : f32 to vector<4x1xf32>
    %14 = arith.divf %12, %13 : vector<4x1xf32>
    %15 = vector.broadcast %14 : vector<4x1xf32> to vector<4x64xf32>
    %16 = arith.subf %8, %15 : vector<4x64xf32>
    %17 = arith.mulf %16, %16 : vector<4x64xf32>
    %cst_13 = arith.constant dense<0.000000e+00> : vector<4xf32>
    %18 = vector.multi_reduction <add>, %17, %cst_13 [1] : vector<4x64xf32> to vector<4xf32>
    %19 = vector.shape_cast %18 : vector<4xf32> to vector<4x1xf32>
    %cst_14 = arith.constant 6.400000e+01 : f32
    %20 = vector.broadcast %cst_14 : f32 to vector<4x1xf32>
    %21 = arith.divf %19, %20 : vector<4x1xf32>
    %cst_15 = arith.constant 9.99999974E-6 : f32
    %22 = vector.broadcast %cst_15 : f32 to vector<4x1xf32>
    %23 = arith.addf %21, %22 : vector<4x1xf32>
    %24 = math.rsqrt %23 : vector<4x1xf32>
    %25 = vector.broadcast %24 : vector<4x1xf32> to vector<4x64xf32>
    %26 = arith.mulf %16, %25 : vector<4x64xf32>
    %27 = vector.broadcast %9 : vector<1x64xf32> to vector<4x64xf32>
    %28 = arith.mulf %26, %27 : vector<4x64xf32>
    %29 = vector.broadcast %10 : vector<1x64xf32> to vector<4x64xf32>
    %30 = arith.addf %28, %29 : vector<4x64xf32>
    %c0_16 = arith.constant 0 : index
    %c0_17 = arith.constant 0 : index
    %c0_18 = arith.constant 0 : index
    %31 = vector.load %arg16[%c0_16, %c0_17, %c0_18] : memref<2x4x64xf32, #tpu.memory_space<vmem>>, vector<1x4x64xf32>
    %32 = vector.shape_cast %31 : vector<1x4x64xf32> to vector<4x64xf32>
    %c0_19 = arith.constant 0 : index
    %c0_20 = arith.constant 0 : index
    %c0_21 = arith.constant 0 : index
    %33 = vector.load %arg8[%c0_19, %c0_20, %c0_21] : memref<2x64x192xf32, #tpu.memory_space<vmem>>, vector<1x64x192xf32>
    %34 = vector.shape_cast %33 : vector<1x64x192xf32> to vector<64x192xf32>
    %cst_22 = arith.constant dense<0.000000e+00> : vector<4x192xf32>
    %35 = tpu.matmul %30, %34, %cst_22 {dimension_numbers = #tpu.dot_dimension_numbers<[1], [0], [0], [1], [0, 0, 1, 1], [], []>} : vector<4x64xf32>, vector<64x192xf32>, vector<4x192xf32> -> vector<4x192xf32>
    %c0_23 = arith.constant 0 : index
    %c0_24 = arith.constant 0 : index
    %c0_25 = arith.constant 0 : index
    %36 = vector.load %arg9[%c0_23, %c0_24, %c0_25] : memref<2x1x192xf32, #tpu.memory_space<vmem>>, vector<1x1x192xf32>
    %37 = vector.shape_cast %36 : vector<1x1x192xf32> to vector<1x192xf32>
    %38 = vector.broadcast %37 : vector<1x192xf32> to vector<4x192xf32>
    %39 = arith.addf %35, %38 : vector<4x192xf32>
    %40 = vector.extract_strided_slice %39 {offsets = [0, 0], sizes = [4, 64], strides = [1, 1]} : vector<4x192xf32> to vector<4x64xf32>
    %41 = vector.extract_strided_slice %39 {offsets = [0, 64], sizes = [4, 64], strides = [1, 1]} : vector<4x192xf32> to vector<4x64xf32>
    %42 = vector.extract_strided_slice %39 {offsets = [0, 128], sizes = [4, 64], strides = [1, 1]} : vector<4x192xf32> to vector<4x64xf32>
    %43 = vector.extract_strided_slice %40 {offsets = [0, 0], sizes = [4, 16], strides = [1, 1]} : vector<4x64xf32> to vector<4x16xf32>
    %cst_26 = arith.constant 2.500000e-01 : f32
    %44 = vector.broadcast %cst_26 : f32 to vector<4x16xf32>
    %45 = arith.mulf %43, %44 : vector<4x16xf32>
    %46 = vector.extract_strided_slice %41 {offsets = [0, 0], sizes = [4, 16], strides = [1, 1]} : vector<4x64xf32> to vector<4x16xf32>
    %47 = vector.extract_strided_slice %42 {offsets = [0, 0], sizes = [4, 16], strides = [1, 1]} : vector<4x64xf32> to vector<4x16xf32>
    %cst_27 = arith.constant dense<0.000000e+00> : vector<4x4xf32>
    %48 = tpu.matmul %45, %46, %cst_27 {dimension_numbers = #tpu.dot_dimension_numbers<[1], [1], [0], [0], [0, 0, 1, 0], [], []>} : vector<4x16xf32>, vector<4x16xf32>, vector<4x4xf32> -> vector<4x4xf32>
    %cst_28 = arith.constant dense<0xFF800000> : vector<4xf32>
    %49 = vector.multi_reduction <maximumf>, %48, %cst_28 [1] : vector<4x4xf32> to vector<4xf32>
    %50 = vector.shape_cast %49 : vector<4xf32> to vector<4x1xf32>
    %51 = vector.broadcast %50 : vector<4x1xf32> to vector<4x4xf32>
    %52 = arith.subf %48, %51 : vector<4x4xf32>
    %53 = math.exp %52 : vector<4x4xf32>
    %cst_29 = arith.constant dense<0.000000e+00> : vector<4xf32>
    %54 = vector.multi_reduction <add>, %53, %cst_29 [1] : vector<4x4xf32> to vector<4xf32>
    %55 = vector.shape_cast %54 : vector<4xf32> to vector<4x1xf32>
    %56 = tpu.reciprocal %55 {approx = true} : vector<4x1xf32> -> vector<4x1xf32>
    %57 = vector.broadcast %56 : vector<4x1xf32> to vector<4x4xf32>
    %58 = arith.mulf %53, %57 : vector<4x4xf32>
    %cst_30 = arith.constant dense<0.000000e+00> : vector<4x16xf32>
    %59 = tpu.matmul %58, %47, %cst_30 {dimension_numbers = #tpu.dot_dimension_numbers<[1], [0], [0], [1], [0, 0, 1, 1], [], []>} : vector<4x4xf32>, vector<4x16xf32>, vector<4x16xf32> -> vector<4x16xf32>
    %60 = vector.extract_strided_slice %40 {offsets = [0, 16], sizes = [4, 16], strides = [1, 1]} : vector<4x64xf32> to vector<4x16xf32>
    %cst_31 = arith.constant 2.500000e-01 : f32
    %61 = vector.broadcast %cst_31 : f32 to vector<4x16xf32>
    %62 = arith.mulf %60, %61 : vector<4x16xf32>
    %63 = vector.extract_strided_slice %41 {offsets = [0, 16], sizes = [4, 16], strides = [1, 1]} : vector<4x64xf32> to vector<4x16xf32>
    %64 = vector.extract_strided_slice %42 {offsets = [0, 16], sizes = [4, 16], strides = [1, 1]} : vector<4x64xf32> to vector<4x16xf32>
    %cst_32 = arith.constant dense<0.000000e+00> : vector<4x4xf32>
    %65 = tpu.matmul %62, %63, %cst_32 {dimension_numbers = #tpu.dot_dimension_numbers<[1], [1], [0], [0], [0, 0, 1, 0], [], []>} : vector<4x16xf32>, vector<4x16xf32>, vector<4x4xf32> -> vector<4x4xf32>
    %cst_33 = arith.constant dense<0xFF800000> : vector<4xf32>
    %66 = vector.multi_reduction <maximumf>, %65, %cst_33 [1] : vector<4x4xf32> to vector<4xf32>
    %67 = vector.shape_cast %66 : vector<4xf32> to vector<4x1xf32>
    %68 = vector.broadcast %67 : vector<4x1xf32> to vector<4x4xf32>
    %69 = arith.subf %65, %68 : vector<4x4xf32>
    %70 = math.exp %69 : vector<4x4xf32>
    %cst_34 = arith.constant dense<0.000000e+00> : vector<4xf32>
    %71 = vector.multi_reduction <add>, %70, %cst_34 [1] : vector<4x4xf32> to vector<4xf32>
    %72 = vector.shape_cast %71 : vector<4xf32> to vector<4x1xf32>
    %73 = tpu.reciprocal %72 {approx = true} : vector<4x1xf32> -> vector<4x1xf32>
    %74 = vector.broadcast %73 : vector<4x1xf32> to vector<4x4xf32>
    %75 = arith.mulf %70, %74 : vector<4x4xf32>
    %cst_35 = arith.constant dense<0.000000e+00> : vector<4x16xf32>
    %76 = tpu.matmul %75, %64, %cst_35 {dimension_numbers = #tpu.dot_dimension_numbers<[1], [0], [0], [1], [0, 0, 1, 1], [], []>} : vector<4x4xf32>, vector<4x16xf32>, vector<4x16xf32> -> vector<4x16xf32>
    %77 = vector.extract_strided_slice %40 {offsets = [0, 32], sizes = [4, 16], strides = [1, 1]} : vector<4x64xf32> to vector<4x16xf32>
    %cst_36 = arith.constant 2.500000e-01 : f32
    %78 = vector.broadcast %cst_36 : f32 to vector<4x16xf32>
    %79 = arith.mulf %77, %78 : vector<4x16xf32>
    %80 = vector.extract_strided_slice %41 {offsets = [0, 32], sizes = [4, 16], strides = [1, 1]} : vector<4x64xf32> to vector<4x16xf32>
    %81 = vector.extract_strided_slice %42 {offsets = [0, 32], sizes = [4, 16], strides = [1, 1]} : vector<4x64xf32> to vector<4x16xf32>
    %cst_37 = arith.constant dense<0.000000e+00> : vector<4x4xf32>
    %82 = tpu.matmul %79, %80, %cst_37 {dimension_numbers = #tpu.dot_dimension_numbers<[1], [1], [0], [0], [0, 0, 1, 0], [], []>} : vector<4x16xf32>, vector<4x16xf32>, vector<4x4xf32> -> vector<4x4xf32>
    %cst_38 = arith.constant dense<0xFF800000> : vector<4xf32>
    %83 = vector.multi_reduction <maximumf>, %82, %cst_38 [1] : vector<4x4xf32> to vector<4xf32>
    %84 = vector.shape_cast %83 : vector<4xf32> to vector<4x1xf32>
    %85 = vector.broadcast %84 : vector<4x1xf32> to vector<4x4xf32>
    %86 = arith.subf %82, %85 : vector<4x4xf32>
    %87 = math.exp %86 : vector<4x4xf32>
    %cst_39 = arith.constant dense<0.000000e+00> : vector<4xf32>
    %88 = vector.multi_reduction <add>, %87, %cst_39 [1] : vector<4x4xf32> to vector<4xf32>
    %89 = vector.shape_cast %88 : vector<4xf32> to vector<4x1xf32>
    %90 = tpu.reciprocal %89 {approx = true} : vector<4x1xf32> -> vector<4x1xf32>
    %91 = vector.broadcast %90 : vector<4x1xf32> to vector<4x4xf32>
    %92 = arith.mulf %87, %91 : vector<4x4xf32>
    %cst_40 = arith.constant dense<0.000000e+00> : vector<4x16xf32>
    %93 = tpu.matmul %92, %81, %cst_40 {dimension_numbers = #tpu.dot_dimension_numbers<[1], [0], [0], [1], [0, 0, 1, 1], [], []>} : vector<4x4xf32>, vector<4x16xf32>, vector<4x16xf32> -> vector<4x16xf32>
    %94 = vector.extract_strided_slice %40 {offsets = [0, 48], sizes = [4, 16], strides = [1, 1]} : vector<4x64xf32> to vector<4x16xf32>
    %cst_41 = arith.constant 2.500000e-01 : f32
    %95 = vector.broadcast %cst_41 : f32 to vector<4x16xf32>
    %96 = arith.mulf %94, %95 : vector<4x16xf32>
    %97 = vector.extract_strided_slice %41 {offsets = [0, 48], sizes = [4, 16], strides = [1, 1]} : vector<4x64xf32> to vector<4x16xf32>
    %98 = vector.extract_strided_slice %42 {offsets = [0, 48], sizes = [4, 16], strides = [1, 1]} : vector<4x64xf32> to vector<4x16xf32>
    %cst_42 = arith.constant dense<0.000000e+00> : vector<4x4xf32>
    %99 = tpu.matmul %96, %97, %cst_42 {dimension_numbers = #tpu.dot_dimension_numbers<[1], [1], [0], [0], [0, 0, 1, 0], [], []>} : vector<4x16xf32>, vector<4x16xf32>, vector<4x4xf32> -> vector<4x4xf32>
    %cst_43 = arith.constant dense<0xFF800000> : vector<4xf32>
    %100 = vector.multi_reduction <maximumf>, %99, %cst_43 [1] : vector<4x4xf32> to vector<4xf32>
    %101 = vector.shape_cast %100 : vector<4xf32> to vector<4x1xf32>
    %102 = vector.broadcast %101 : vector<4x1xf32> to vector<4x4xf32>
    %103 = arith.subf %99, %102 : vector<4x4xf32>
    %104 = math.exp %103 : vector<4x4xf32>
    %cst_44 = arith.constant dense<0.000000e+00> : vector<4xf32>
    %105 = vector.multi_reduction <add>, %104, %cst_44 [1] : vector<4x4xf32> to vector<4xf32>
    %106 = vector.shape_cast %105 : vector<4xf32> to vector<4x1xf32>
    %107 = tpu.reciprocal %106 {approx = true} : vector<4x1xf32> -> vector<4x1xf32>
    %108 = vector.broadcast %107 : vector<4x1xf32> to vector<4x4xf32>
    %109 = arith.mulf %104, %108 : vector<4x4xf32>
    %cst_45 = arith.constant dense<0.000000e+00> : vector<4x16xf32>
    %110 = tpu.matmul %109, %98, %cst_45 {dimension_numbers = #tpu.dot_dimension_numbers<[1], [0], [0], [1], [0, 0, 1, 1], [], []>} : vector<4x4xf32>, vector<4x16xf32>, vector<4x16xf32> -> vector<4x16xf32>
    %111 = tpu.concatenate %59, %76, %93, %110 in 1 : vector<4x16xf32>, vector<4x16xf32>, vector<4x16xf32>, vector<4x16xf32> -> vector<4x64xf32>
    %c0_46 = arith.constant 0 : index
    %c0_47 = arith.constant 0 : index
    %c0_48 = arith.constant 0 : index
    %112 = vector.load %arg10[%c0_46, %c0_47, %c0_48] : memref<2x64x64xf32, #tpu.memory_space<vmem>>, vector<1x64x64xf32>
    %113 = vector.shape_cast %112 : vector<1x64x64xf32> to vector<64x64xf32>
    %cst_49 = arith.constant dense<0.000000e+00> : vector<4x64xf32>
    %114 = tpu.matmul %111, %113, %cst_49 {dimension_numbers = #tpu.dot_dimension_numbers<[1], [0], [0], [1], [0, 0, 1, 1], [], []>} : vector<4x64xf32>, vector<64x64xf32>, vector<4x64xf32> -> vector<4x64xf32>
    %c0_50 = arith.constant 0 : index
    %c0_51 = arith.constant 0 : index
    %c0_52 = arith.constant 0 : index
    %115 = vector.load %arg11[%c0_50, %c0_51, %c0_52] : memref<2x1x64xf32, #tpu.memory_space<vmem>>, vector<1x1x64xf32>
    %116 = vector.shape_cast %115 : vector<1x1x64xf32> to vector<1x64xf32>
    %117 = vector.broadcast %116 : vector<1x64xf32> to vector<4x64xf32>
    %118 = arith.addf %114, %117 : vector<4x64xf32>
    %119 = arith.addf %30, %118 : vector<4x64xf32>
    %120 = vector.extract_strided_slice %32 {offsets = [0, 0], sizes = [1, 64], strides = [1, 1]} : vector<4x64xf32> to vector<1x64xf32>
    %121 = vector.extract_strided_slice %32 {offsets = [1, 0], sizes = [1, 64], strides = [1, 1]} : vector<4x64xf32> to vector<1x64xf32>
    %cst_53 = arith.constant dense<0.000000e+00> : vector<4xf32>
    %122 = vector.multi_reduction <add>, %119, %cst_53 [1] : vector<4x64xf32> to vector<4xf32>
    %123 = vector.shape_cast %122 : vector<4xf32> to vector<4x1xf32>
    %cst_54 = arith.constant 6.400000e+01 : f32
    %124 = vector.broadcast %cst_54 : f32 to vector<4x1xf32>
    %125 = arith.divf %123, %124 : vector<4x1xf32>
    %126 = vector.broadcast %125 : vector<4x1xf32> to vector<4x64xf32>
    %127 = arith.subf %119, %126 : vector<4x64xf32>
    %128 = arith.mulf %127, %127 : vector<4x64xf32>
    %cst_55 = arith.constant dense<0.000000e+00> : vector<4xf32>
    %129 = vector.multi_reduction <add>, %128, %cst_55 [1] : vector<4x64xf32> to vector<4xf32>
    %130 = vector.shape_cast %129 : vector<4xf32> to vector<4x1xf32>
    %cst_56 = arith.constant 6.400000e+01 : f32
    %131 = vector.broadcast %cst_56 : f32 to vector<4x1xf32>
    %132 = arith.divf %130, %131 : vector<4x1xf32>
    %cst_57 = arith.constant 9.99999974E-6 : f32
    %133 = vector.broadcast %cst_57 : f32 to vector<4x1xf32>
    %134 = arith.addf %132, %133 : vector<4x1xf32>
    %135 = math.rsqrt %134 : vector<4x1xf32>
    %136 = vector.broadcast %135 : vector<4x1xf32> to vector<4x64xf32>
    %137 = arith.mulf %127, %136 : vector<4x64xf32>
    %138 = vector.broadcast %120 : vector<1x64xf32> to vector<4x64xf32>
    %139 = arith.mulf %137, %138 : vector<4x64xf32>
    %140 = vector.broadcast %121 : vector<1x64xf32> to vector<4x64xf32>
    %141 = arith.addf %139, %140 : vector<4x64xf32>
    %c0_58 = arith.constant 0 : index
    %c0_59 = arith.constant 0 : index
    %c0_60 = arith.constant 0 : index
    %142 = vector.load %arg12[%c0_58, %c0_59, %c0_60] : memref<2x64x128xf32, #tpu.memory_space<vmem>>, vector<1x64x128xf32>
    %143 = vector.shape_cast %142 : vector<1x64x128xf32> to vector<64x128xf32>
    %cst_61 = arith.constant dense<0.000000e+00> : vector<4x128xf32>
    %144 = tpu.matmul %141, %143, %cst_61 {dimension_numbers = #tpu.dot_dimension_numbers<[1], [0], [0], [1], [0, 0, 1, 1], [], []>} : vector<4x64xf32>, vector<64x128xf32>, vector<4x128xf32> -> vector<4x128xf32>
    %c0_62 = arith.constant 0 : index
    %c0_63 = arith.constant 0 : index
    %c0_64 = arith.constant 0 : index
    %145 = vector.load %arg13[%c0_62, %c0_63, %c0_64] : memref<2x1x128xf32, #tpu.memory_space<vmem>>, vector<1x1x128xf32>
    %146 = vector.shape_cast %145 : vector<1x1x128xf32> to vector<1x128xf32>
    %147 = vector.broadcast %146 : vector<1x128xf32> to vector<4x128xf32>
    %148 = arith.addf %144, %147 : vector<4x128xf32>
    %149 = arith.mulf %148, %148 : vector<4x128xf32>
    %150 = arith.mulf %148, %149 : vector<4x128xf32>
    %cst_65 = arith.constant 4.471500e-02 : f32
    %151 = vector.broadcast %cst_65 : f32 to vector<4x128xf32>
    %152 = arith.mulf %151, %150 : vector<4x128xf32>
    %153 = arith.addf %148, %152 : vector<4x128xf32>
    %cst_66 = arith.constant 0.797884583 : f32
    %154 = vector.broadcast %cst_66 : f32 to vector<4x128xf32>
    %155 = arith.mulf %154, %153 : vector<4x128xf32>
    %156 = math.tanh %155 : vector<4x128xf32>
    %cst_67 = arith.constant 1.000000e+00 : f32
    %157 = vector.broadcast %cst_67 : f32 to vector<4x128xf32>
    %158 = arith.addf %157, %156 : vector<4x128xf32>
    %cst_68 = arith.constant 5.000000e-01 : f32
    %159 = vector.broadcast %cst_68 : f32 to vector<4x128xf32>
    %160 = arith.mulf %159, %158 : vector<4x128xf32>
    %161 = arith.mulf %148, %160 : vector<4x128xf32>
    %c0_69 = arith.constant 0 : index
    %c0_70 = arith.constant 0 : index
    %c0_71 = arith.constant 0 : index
    %162 = vector.load %arg14[%c0_69, %c0_70, %c0_71] : memref<2x128x64xf32, #tpu.memory_space<vmem>>, vector<1x128x64xf32>
    %163 = vector.shape_cast %162 : vector<1x128x64xf32> to vector<128x64xf32>
    %cst_72 = arith.constant dense<0.000000e+00> : vector<4x64xf32>
    %164 = tpu.matmul %161, %163, %cst_72 {dimension_numbers = #tpu.dot_dimension_numbers<[1], [0], [0], [1], [0, 0, 1, 1], [], []>} : vector<4x128xf32>, vector<128x64xf32>, vector<4x64xf32> -> vector<4x64xf32>
    %c0_73 = arith.constant 0 : index
    %c0_74 = arith.constant 0 : index
    %c0_75 = arith.constant 0 : index
    %165 = vector.load %arg15[%c0_73, %c0_74, %c0_75] : memref<2x1x64xf32, #tpu.memory_space<vmem>>, vector<1x1x64xf32>
    %166 = vector.shape_cast %165 : vector<1x1x64xf32> to vector<1x64xf32>
    %167 = vector.broadcast %166 : vector<1x64xf32> to vector<4x64xf32>
    %168 = arith.addf %164, %167 : vector<4x64xf32>
    %169 = arith.addf %141, %168 : vector<4x64xf32>
    %170 = vector.extract_strided_slice %32 {offsets = [2, 0], sizes = [1, 64], strides = [1, 1]} : vector<4x64xf32> to vector<1x64xf32>
    %171 = vector.extract_strided_slice %32 {offsets = [3, 0], sizes = [1, 64], strides = [1, 1]} : vector<4x64xf32> to vector<1x64xf32>
    %cst_76 = arith.constant dense<0.000000e+00> : vector<4xf32>
    %172 = vector.multi_reduction <add>, %169, %cst_76 [1] : vector<4x64xf32> to vector<4xf32>
    %173 = vector.shape_cast %172 : vector<4xf32> to vector<4x1xf32>
    %cst_77 = arith.constant 6.400000e+01 : f32
    %174 = vector.broadcast %cst_77 : f32 to vector<4x1xf32>
    %175 = arith.divf %173, %174 : vector<4x1xf32>
    %176 = vector.broadcast %175 : vector<4x1xf32> to vector<4x64xf32>
    %177 = arith.subf %169, %176 : vector<4x64xf32>
    %178 = arith.mulf %177, %177 : vector<4x64xf32>
    %cst_78 = arith.constant dense<0.000000e+00> : vector<4xf32>
    %179 = vector.multi_reduction <add>, %178, %cst_78 [1] : vector<4x64xf32> to vector<4xf32>
    %180 = vector.shape_cast %179 : vector<4xf32> to vector<4x1xf32>
    %cst_79 = arith.constant 6.400000e+01 : f32
    %181 = vector.broadcast %cst_79 : f32 to vector<4x1xf32>
    %182 = arith.divf %180, %181 : vector<4x1xf32>
    %cst_80 = arith.constant 9.99999974E-6 : f32
    %183 = vector.broadcast %cst_80 : f32 to vector<4x1xf32>
    %184 = arith.addf %182, %183 : vector<4x1xf32>
    %185 = math.rsqrt %184 : vector<4x1xf32>
    %186 = vector.broadcast %185 : vector<4x1xf32> to vector<4x64xf32>
    %187 = arith.mulf %177, %186 : vector<4x64xf32>
    %188 = vector.broadcast %170 : vector<1x64xf32> to vector<4x64xf32>
    %189 = arith.mulf %187, %188 : vector<4x64xf32>
    %190 = vector.broadcast %171 : vector<1x64xf32> to vector<4x64xf32>
    %191 = arith.addf %189, %190 : vector<4x64xf32>
    %c1 = arith.constant 1 : index
    %c0_81 = arith.constant 0 : index
    %c0_82 = arith.constant 0 : index
    %192 = vector.load %arg16[%c1, %c0_81, %c0_82] : memref<2x4x64xf32, #tpu.memory_space<vmem>>, vector<1x4x64xf32>
    %193 = vector.shape_cast %192 : vector<1x4x64xf32> to vector<4x64xf32>
    %c1_83 = arith.constant 1 : index
    %c0_84 = arith.constant 0 : index
    %c0_85 = arith.constant 0 : index
    %194 = vector.load %arg8[%c1_83, %c0_84, %c0_85] : memref<2x64x192xf32, #tpu.memory_space<vmem>>, vector<1x64x192xf32>
    %195 = vector.shape_cast %194 : vector<1x64x192xf32> to vector<64x192xf32>
    %cst_86 = arith.constant dense<0.000000e+00> : vector<4x192xf32>
    %196 = tpu.matmul %191, %195, %cst_86 {dimension_numbers = #tpu.dot_dimension_numbers<[1], [0], [0], [1], [0, 0, 1, 1], [], []>} : vector<4x64xf32>, vector<64x192xf32>, vector<4x192xf32> -> vector<4x192xf32>
    %c1_87 = arith.constant 1 : index
    %c0_88 = arith.constant 0 : index
    %c0_89 = arith.constant 0 : index
    %197 = vector.load %arg9[%c1_87, %c0_88, %c0_89] : memref<2x1x192xf32, #tpu.memory_space<vmem>>, vector<1x1x192xf32>
    %198 = vector.shape_cast %197 : vector<1x1x192xf32> to vector<1x192xf32>
    %199 = vector.broadcast %198 : vector<1x192xf32> to vector<4x192xf32>
    %200 = arith.addf %196, %199 : vector<4x192xf32>
    %201 = vector.extract_strided_slice %200 {offsets = [0, 0], sizes = [4, 64], strides = [1, 1]} : vector<4x192xf32> to vector<4x64xf32>
    %202 = vector.extract_strided_slice %200 {offsets = [0, 64], sizes = [4, 64], strides = [1, 1]} : vector<4x192xf32> to vector<4x64xf32>
    %203 = vector.extract_strided_slice %200 {offsets = [0, 128], sizes = [4, 64], strides = [1, 1]} : vector<4x192xf32> to vector<4x64xf32>
    %204 = vector.extract_strided_slice %201 {offsets = [0, 0], sizes = [4, 16], strides = [1, 1]} : vector<4x64xf32> to vector<4x16xf32>
    %cst_90 = arith.constant 2.500000e-01 : f32
    %205 = vector.broadcast %cst_90 : f32 to vector<4x16xf32>
    %206 = arith.mulf %204, %205 : vector<4x16xf32>
    %207 = vector.extract_strided_slice %202 {offsets = [0, 0], sizes = [4, 16], strides = [1, 1]} : vector<4x64xf32> to vector<4x16xf32>
    %208 = vector.extract_strided_slice %203 {offsets = [0, 0], sizes = [4, 16], strides = [1, 1]} : vector<4x64xf32> to vector<4x16xf32>
    %cst_91 = arith.constant dense<0.000000e+00> : vector<4x4xf32>
    %209 = tpu.matmul %206, %207, %cst_91 {dimension_numbers = #tpu.dot_dimension_numbers<[1], [1], [0], [0], [0, 0, 1, 0], [], []>} : vector<4x16xf32>, vector<4x16xf32>, vector<4x4xf32> -> vector<4x4xf32>
    %cst_92 = arith.constant dense<0xFF800000> : vector<4xf32>
    %210 = vector.multi_reduction <maximumf>, %209, %cst_92 [1] : vector<4x4xf32> to vector<4xf32>
    %211 = vector.shape_cast %210 : vector<4xf32> to vector<4x1xf32>
    %212 = vector.broadcast %211 : vector<4x1xf32> to vector<4x4xf32>
    %213 = arith.subf %209, %212 : vector<4x4xf32>
    %214 = math.exp %213 : vector<4x4xf32>
    %cst_93 = arith.constant dense<0.000000e+00> : vector<4xf32>
    %215 = vector.multi_reduction <add>, %214, %cst_93 [1] : vector<4x4xf32> to vector<4xf32>
    %216 = vector.shape_cast %215 : vector<4xf32> to vector<4x1xf32>
    %217 = tpu.reciprocal %216 {approx = true} : vector<4x1xf32> -> vector<4x1xf32>
    %218 = vector.broadcast %217 : vector<4x1xf32> to vector<4x4xf32>
    %219 = arith.mulf %214, %218 : vector<4x4xf32>
    %cst_94 = arith.constant dense<0.000000e+00> : vector<4x16xf32>
    %220 = tpu.matmul %219, %208, %cst_94 {dimension_numbers = #tpu.dot_dimension_numbers<[1], [0], [0], [1], [0, 0, 1, 1], [], []>} : vector<4x4xf32>, vector<4x16xf32>, vector<4x16xf32> -> vector<4x16xf32>
    %221 = vector.extract_strided_slice %201 {offsets = [0, 16], sizes = [4, 16], strides = [1, 1]} : vector<4x64xf32> to vector<4x16xf32>
    %cst_95 = arith.constant 2.500000e-01 : f32
    %222 = vector.broadcast %cst_95 : f32 to vector<4x16xf32>
    %223 = arith.mulf %221, %222 : vector<4x16xf32>
    %224 = vector.extract_strided_slice %202 {offsets = [0, 16], sizes = [4, 16], strides = [1, 1]} : vector<4x64xf32> to vector<4x16xf32>
    %225 = vector.extract_strided_slice %203 {offsets = [0, 16], sizes = [4, 16], strides = [1, 1]} : vector<4x64xf32> to vector<4x16xf32>
    %cst_96 = arith.constant dense<0.000000e+00> : vector<4x4xf32>
    %226 = tpu.matmul %223, %224, %cst_96 {dimension_numbers = #tpu.dot_dimension_numbers<[1], [1], [0], [0], [0, 0, 1, 0], [], []>} : vector<4x16xf32>, vector<4x16xf32>, vector<4x4xf32> -> vector<4x4xf32>
    %cst_97 = arith.constant dense<0xFF800000> : vector<4xf32>
    %227 = vector.multi_reduction <maximumf>, %226, %cst_97 [1] : vector<4x4xf32> to vector<4xf32>
    %228 = vector.shape_cast %227 : vector<4xf32> to vector<4x1xf32>
    %229 = vector.broadcast %228 : vector<4x1xf32> to vector<4x4xf32>
    %230 = arith.subf %226, %229 : vector<4x4xf32>
    %231 = math.exp %230 : vector<4x4xf32>
    %cst_98 = arith.constant dense<0.000000e+00> : vector<4xf32>
    %232 = vector.multi_reduction <add>, %231, %cst_98 [1] : vector<4x4xf32> to vector<4xf32>
    %233 = vector.shape_cast %232 : vector<4xf32> to vector<4x1xf32>
    %234 = tpu.reciprocal %233 {approx = true} : vector<4x1xf32> -> vector<4x1xf32>
    %235 = vector.broadcast %234 : vector<4x1xf32> to vector<4x4xf32>
    %236 = arith.mulf %231, %235 : vector<4x4xf32>
    %cst_99 = arith.constant dense<0.000000e+00> : vector<4x16xf32>
    %237 = tpu.matmul %236, %225, %cst_99 {dimension_numbers = #tpu.dot_dimension_numbers<[1], [0], [0], [1], [0, 0, 1, 1], [], []>} : vector<4x4xf32>, vector<4x16xf32>, vector<4x16xf32> -> vector<4x16xf32>
    %238 = vector.extract_strided_slice %201 {offsets = [0, 32], sizes = [4, 16], strides = [1, 1]} : vector<4x64xf32> to vector<4x16xf32>
    %cst_100 = arith.constant 2.500000e-01 : f32
    %239 = vector.broadcast %cst_100 : f32 to vector<4x16xf32>
    %240 = arith.mulf %238, %239 : vector<4x16xf32>
    %241 = vector.extract_strided_slice %202 {offsets = [0, 32], sizes = [4, 16], strides = [1, 1]} : vector<4x64xf32> to vector<4x16xf32>
    %242 = vector.extract_strided_slice %203 {offsets = [0, 32], sizes = [4, 16], strides = [1, 1]} : vector<4x64xf32> to vector<4x16xf32>
    %cst_101 = arith.constant dense<0.000000e+00> : vector<4x4xf32>
    %243 = tpu.matmul %240, %241, %cst_101 {dimension_numbers = #tpu.dot_dimension_numbers<[1], [1], [0], [0], [0, 0, 1, 0], [], []>} : vector<4x16xf32>, vector<4x16xf32>, vector<4x4xf32> -> vector<4x4xf32>
    %cst_102 = arith.constant dense<0xFF800000> : vector<4xf32>
    %244 = vector.multi_reduction <maximumf>, %243, %cst_102 [1] : vector<4x4xf32> to vector<4xf32>
    %245 = vector.shape_cast %244 : vector<4xf32> to vector<4x1xf32>
    %246 = vector.broadcast %245 : vector<4x1xf32> to vector<4x4xf32>
    %247 = arith.subf %243, %246 : vector<4x4xf32>
    %248 = math.exp %247 : vector<4x4xf32>
    %cst_103 = arith.constant dense<0.000000e+00> : vector<4xf32>
    %249 = vector.multi_reduction <add>, %248, %cst_103 [1] : vector<4x4xf32> to vector<4xf32>
    %250 = vector.shape_cast %249 : vector<4xf32> to vector<4x1xf32>
    %251 = tpu.reciprocal %250 {approx = true} : vector<4x1xf32> -> vector<4x1xf32>
    %252 = vector.broadcast %251 : vector<4x1xf32> to vector<4x4xf32>
    %253 = arith.mulf %248, %252 : vector<4x4xf32>
    %cst_104 = arith.constant dense<0.000000e+00> : vector<4x16xf32>
    %254 = tpu.matmul %253, %242, %cst_104 {dimension_numbers = #tpu.dot_dimension_numbers<[1], [0], [0], [1], [0, 0, 1, 1], [], []>} : vector<4x4xf32>, vector<4x16xf32>, vector<4x16xf32> -> vector<4x16xf32>
    %255 = vector.extract_strided_slice %201 {offsets = [0, 48], sizes = [4, 16], strides = [1, 1]} : vector<4x64xf32> to vector<4x16xf32>
    %cst_105 = arith.constant 2.500000e-01 : f32
    %256 = vector.broadcast %cst_105 : f32 to vector<4x16xf32>
    %257 = arith.mulf %255, %256 : vector<4x16xf32>
    %258 = vector.extract_strided_slice %202 {offsets = [0, 48], sizes = [4, 16], strides = [1, 1]} : vector<4x64xf32> to vector<4x16xf32>
    %259 = vector.extract_strided_slice %203 {offsets = [0, 48], sizes = [4, 16], strides = [1, 1]} : vector<4x64xf32> to vector<4x16xf32>
    %cst_106 = arith.constant dense<0.000000e+00> : vector<4x4xf32>
    %260 = tpu.matmul %257, %258, %cst_106 {dimension_numbers = #tpu.dot_dimension_numbers<[1], [1], [0], [0], [0, 0, 1, 0], [], []>} : vector<4x16xf32>, vector<4x16xf32>, vector<4x4xf32> -> vector<4x4xf32>
    %cst_107 = arith.constant dense<0xFF800000> : vector<4xf32>
    %261 = vector.multi_reduction <maximumf>, %260, %cst_107 [1] : vector<4x4xf32> to vector<4xf32>
    %262 = vector.shape_cast %261 : vector<4xf32> to vector<4x1xf32>
    %263 = vector.broadcast %262 : vector<4x1xf32> to vector<4x4xf32>
    %264 = arith.subf %260, %263 : vector<4x4xf32>
    %265 = math.exp %264 : vector<4x4xf32>
    %cst_108 = arith.constant dense<0.000000e+00> : vector<4xf32>
    %266 = vector.multi_reduction <add>, %265, %cst_108 [1] : vector<4x4xf32> to vector<4xf32>
    %267 = vector.shape_cast %266 : vector<4xf32> to vector<4x1xf32>
    %268 = tpu.reciprocal %267 {approx = true} : vector<4x1xf32> -> vector<4x1xf32>
    %269 = vector.broadcast %268 : vector<4x1xf32> to vector<4x4xf32>
    %270 = arith.mulf %265, %269 : vector<4x4xf32>
    %cst_109 = arith.constant dense<0.000000e+00> : vector<4x16xf32>
    %271 = tpu.matmul %270, %259, %cst_109 {dimension_numbers = #tpu.dot_dimension_numbers<[1], [0], [0], [1], [0, 0, 1, 1], [], []>} : vector<4x4xf32>, vector<4x16xf32>, vector<4x16xf32> -> vector<4x16xf32>
    %272 = tpu.concatenate %220, %237, %254, %271 in 1 : vector<4x16xf32>, vector<4x16xf32>, vector<4x16xf32>, vector<4x16xf32> -> vector<4x64xf32>
    %c1_110 = arith.constant 1 : index
    %c0_111 = arith.constant 0 : index
    %c0_112 = arith.constant 0 : index
    %273 = vector.load %arg10[%c1_110, %c0_111, %c0_112] : memref<2x64x64xf32, #tpu.memory_space<vmem>>, vector<1x64x64xf32>
    %274 = vector.shape_cast %273 : vector<1x64x64xf32> to vector<64x64xf32>
    %cst_113 = arith.constant dense<0.000000e+00> : vector<4x64xf32>
    %275 = tpu.matmul %272, %274, %cst_113 {dimension_numbers = #tpu.dot_dimension_numbers<[1], [0], [0], [1], [0, 0, 1, 1], [], []>} : vector<4x64xf32>, vector<64x64xf32>, vector<4x64xf32> -> vector<4x64xf32>
    %c1_114 = arith.constant 1 : index
    %c0_115 = arith.constant 0 : index
    %c0_116 = arith.constant 0 : index
    %276 = vector.load %arg11[%c1_114, %c0_115, %c0_116] : memref<2x1x64xf32, #tpu.memory_space<vmem>>, vector<1x1x64xf32>
    %277 = vector.shape_cast %276 : vector<1x1x64xf32> to vector<1x64xf32>
    %278 = vector.broadcast %277 : vector<1x64xf32> to vector<4x64xf32>
    %279 = arith.addf %275, %278 : vector<4x64xf32>
    %280 = arith.addf %191, %279 : vector<4x64xf32>
    %281 = vector.extract_strided_slice %193 {offsets = [0, 0], sizes = [1, 64], strides = [1, 1]} : vector<4x64xf32> to vector<1x64xf32>
    %282 = vector.extract_strided_slice %193 {offsets = [1, 0], sizes = [1, 64], strides = [1, 1]} : vector<4x64xf32> to vector<1x64xf32>
    %cst_117 = arith.constant dense<0.000000e+00> : vector<4xf32>
    %283 = vector.multi_reduction <add>, %280, %cst_117 [1] : vector<4x64xf32> to vector<4xf32>
    %284 = vector.shape_cast %283 : vector<4xf32> to vector<4x1xf32>
    %cst_118 = arith.constant 6.400000e+01 : f32
    %285 = vector.broadcast %cst_118 : f32 to vector<4x1xf32>
    %286 = arith.divf %284, %285 : vector<4x1xf32>
    %287 = vector.broadcast %286 : vector<4x1xf32> to vector<4x64xf32>
    %288 = arith.subf %280, %287 : vector<4x64xf32>
    %289 = arith.mulf %288, %288 : vector<4x64xf32>
    %cst_119 = arith.constant dense<0.000000e+00> : vector<4xf32>
    %290 = vector.multi_reduction <add>, %289, %cst_119 [1] : vector<4x64xf32> to vector<4xf32>
    %291 = vector.shape_cast %290 : vector<4xf32> to vector<4x1xf32>
    %cst_120 = arith.constant 6.400000e+01 : f32
    %292 = vector.broadcast %cst_120 : f32 to vector<4x1xf32>
    %293 = arith.divf %291, %292 : vector<4x1xf32>
    %cst_121 = arith.constant 9.99999974E-6 : f32
    %294 = vector.broadcast %cst_121 : f32 to vector<4x1xf32>
    %295 = arith.addf %293, %294 : vector<4x1xf32>
    %296 = math.rsqrt %295 : vector<4x1xf32>
    %297 = vector.broadcast %296 : vector<4x1xf32> to vector<4x64xf32>
    %298 = arith.mulf %288, %297 : vector<4x64xf32>
    %299 = vector.broadcast %281 : vector<1x64xf32> to vector<4x64xf32>
    %300 = arith.mulf %298, %299 : vector<4x64xf32>
    %301 = vector.broadcast %282 : vector<1x64xf32> to vector<4x64xf32>
    %302 = arith.addf %300, %301 : vector<4x64xf32>
    %c1_122 = arith.constant 1 : index
    %c0_123 = arith.constant 0 : index
    %c0_124 = arith.constant 0 : index
    %303 = vector.load %arg12[%c1_122, %c0_123, %c0_124] : memref<2x64x128xf32, #tpu.memory_space<vmem>>, vector<1x64x128xf32>
    %304 = vector.shape_cast %303 : vector<1x64x128xf32> to vector<64x128xf32>
    %cst_125 = arith.constant dense<0.000000e+00> : vector<4x128xf32>
    %305 = tpu.matmul %302, %304, %cst_125 {dimension_numbers = #tpu.dot_dimension_numbers<[1], [0], [0], [1], [0, 0, 1, 1], [], []>} : vector<4x64xf32>, vector<64x128xf32>, vector<4x128xf32> -> vector<4x128xf32>
    %c1_126 = arith.constant 1 : index
    %c0_127 = arith.constant 0 : index
    %c0_128 = arith.constant 0 : index
    %306 = vector.load %arg13[%c1_126, %c0_127, %c0_128] : memref<2x1x128xf32, #tpu.memory_space<vmem>>, vector<1x1x128xf32>
    %307 = vector.shape_cast %306 : vector<1x1x128xf32> to vector<1x128xf32>
    %308 = vector.broadcast %307 : vector<1x128xf32> to vector<4x128xf32>
    %309 = arith.addf %305, %308 : vector<4x128xf32>
    %310 = arith.mulf %309, %309 : vector<4x128xf32>
    %311 = arith.mulf %309, %310 : vector<4x128xf32>
    %cst_129 = arith.constant 4.471500e-02 : f32
    %312 = vector.broadcast %cst_129 : f32 to vector<4x128xf32>
    %313 = arith.mulf %312, %311 : vector<4x128xf32>
    %314 = arith.addf %309, %313 : vector<4x128xf32>
    %cst_130 = arith.constant 0.797884583 : f32
    %315 = vector.broadcast %cst_130 : f32 to vector<4x128xf32>
    %316 = arith.mulf %315, %314 : vector<4x128xf32>
    %317 = math.tanh %316 : vector<4x128xf32>
    %cst_131 = arith.constant 1.000000e+00 : f32
    %318 = vector.broadcast %cst_131 : f32 to vector<4x128xf32>
    %319 = arith.addf %318, %317 : vector<4x128xf32>
    %cst_132 = arith.constant 5.000000e-01 : f32
    %320 = vector.broadcast %cst_132 : f32 to vector<4x128xf32>
    %321 = arith.mulf %320, %319 : vector<4x128xf32>
    %322 = arith.mulf %309, %321 : vector<4x128xf32>
    %c1_133 = arith.constant 1 : index
    %c0_134 = arith.constant 0 : index
    %c0_135 = arith.constant 0 : index
    %323 = vector.load %arg14[%c1_133, %c0_134, %c0_135] : memref<2x128x64xf32, #tpu.memory_space<vmem>>, vector<1x128x64xf32>
    %324 = vector.shape_cast %323 : vector<1x128x64xf32> to vector<128x64xf32>
    %cst_136 = arith.constant dense<0.000000e+00> : vector<4x64xf32>
    %325 = tpu.matmul %322, %324, %cst_136 {dimension_numbers = #tpu.dot_dimension_numbers<[1], [0], [0], [1], [0, 0, 1, 1], [], []>} : vector<4x128xf32>, vector<128x64xf32>, vector<4x64xf32> -> vector<4x64xf32>
    %c1_137 = arith.constant 1 : index
    %c0_138 = arith.constant 0 : index
    %c0_139 = arith.constant 0 : index
    %326 = vector.load %arg15[%c1_137, %c0_138, %c0_139] : memref<2x1x64xf32, #tpu.memory_space<vmem>>, vector<1x1x64xf32>
    %327 = vector.shape_cast %326 : vector<1x1x64xf32> to vector<1x64xf32>
    %328 = vector.broadcast %327 : vector<1x64xf32> to vector<4x64xf32>
    %329 = arith.addf %325, %328 : vector<4x64xf32>
    %330 = arith.addf %302, %329 : vector<4x64xf32>
    %331 = vector.extract_strided_slice %193 {offsets = [2, 0], sizes = [1, 64], strides = [1, 1]} : vector<4x64xf32> to vector<1x64xf32>
    %332 = vector.extract_strided_slice %193 {offsets = [3, 0], sizes = [1, 64], strides = [1, 1]} : vector<4x64xf32> to vector<1x64xf32>
    %cst_140 = arith.constant dense<0.000000e+00> : vector<4xf32>
    %333 = vector.multi_reduction <add>, %330, %cst_140 [1] : vector<4x64xf32> to vector<4xf32>
    %334 = vector.shape_cast %333 : vector<4xf32> to vector<4x1xf32>
    %cst_141 = arith.constant 6.400000e+01 : f32
    %335 = vector.broadcast %cst_141 : f32 to vector<4x1xf32>
    %336 = arith.divf %334, %335 : vector<4x1xf32>
    %337 = vector.broadcast %336 : vector<4x1xf32> to vector<4x64xf32>
    %338 = arith.subf %330, %337 : vector<4x64xf32>
    %339 = arith.mulf %338, %338 : vector<4x64xf32>
    %cst_142 = arith.constant dense<0.000000e+00> : vector<4xf32>
    %340 = vector.multi_reduction <add>, %339, %cst_142 [1] : vector<4x64xf32> to vector<4xf32>
    %341 = vector.shape_cast %340 : vector<4xf32> to vector<4x1xf32>
    %cst_143 = arith.constant 6.400000e+01 : f32
    %342 = vector.broadcast %cst_143 : f32 to vector<4x1xf32>
    %343 = arith.divf %341, %342 : vector<4x1xf32>
    %cst_144 = arith.constant 9.99999974E-6 : f32
    %344 = vector.broadcast %cst_144 : f32 to vector<4x1xf32>
    %345 = arith.addf %343, %344 : vector<4x1xf32>
    %346 = math.rsqrt %345 : vector<4x1xf32>
    %347 = vector.broadcast %346 : vector<4x1xf32> to vector<4x64xf32>
    %348 = arith.mulf %338, %347 : vector<4x64xf32>
    %349 = vector.broadcast %331 : vector<1x64xf32> to vector<4x64xf32>
    %350 = arith.mulf %348, %349 : vector<4x64xf32>
    %351 = vector.broadcast %332 : vector<1x64xf32> to vector<4x64xf32>
    %352 = arith.addf %350, %351 : vector<4x64xf32>
    %c0_145 = arith.constant 0 : index
    %c0_146 = arith.constant 0 : index
    %353 = vector.load %arg5[%c0_145, %c0_146] : memref<32x64xf32, #tpu.memory_space<vmem>>, vector<32x64xf32>
    %cst_147 = arith.constant dense<0.000000e+00> : vector<8x64xf32>
    %354 = tpu.matmul %3, %353, %cst_147 {dimension_numbers = #tpu.dot_dimension_numbers<[1], [0], [0], [1], [0, 0, 1, 1], [], []>} : vector<8x32xf32>, vector<32x64xf32>, vector<8x64xf32> -> vector<8x64xf32>
    %c0_148 = arith.constant 0 : index
    %c0_149 = arith.constant 0 : index
    %355 = vector.load %arg6[%c0_148, %c0_149] : memref<8x64xf32, #tpu.memory_space<vmem>>, vector<8x64xf32>
    %356 = arith.addf %354, %355 : vector<8x64xf32>
    %357 = vector.extract_strided_slice %4 {offsets = [2, 0], sizes = [1, 64], strides = [1, 1]} : vector<4x64xf32> to vector<1x64xf32>
    %358 = vector.extract_strided_slice %4 {offsets = [3, 0], sizes = [1, 64], strides = [1, 1]} : vector<4x64xf32> to vector<1x64xf32>
    %cst_150 = arith.constant dense<0.000000e+00> : vector<8xf32>
    %359 = vector.multi_reduction <add>, %356, %cst_150 [1] : vector<8x64xf32> to vector<8xf32>
    %360 = vector.shape_cast %359 : vector<8xf32> to vector<8x1xf32>
    %cst_151 = arith.constant 6.400000e+01 : f32
    %361 = vector.broadcast %cst_151 : f32 to vector<8x1xf32>
    %362 = arith.divf %360, %361 : vector<8x1xf32>
    %363 = vector.broadcast %362 : vector<8x1xf32> to vector<8x64xf32>
    %364 = arith.subf %356, %363 : vector<8x64xf32>
    %365 = arith.mulf %364, %364 : vector<8x64xf32>
    %cst_152 = arith.constant dense<0.000000e+00> : vector<8xf32>
    %366 = vector.multi_reduction <add>, %365, %cst_152 [1] : vector<8x64xf32> to vector<8xf32>
    %367 = vector.shape_cast %366 : vector<8xf32> to vector<8x1xf32>
    %cst_153 = arith.constant 6.400000e+01 : f32
    %368 = vector.broadcast %cst_153 : f32 to vector<8x1xf32>
    %369 = arith.divf %367, %368 : vector<8x1xf32>
    %cst_154 = arith.constant 9.99999974E-6 : f32
    %370 = vector.broadcast %cst_154 : f32 to vector<8x1xf32>
    %371 = arith.addf %369, %370 : vector<8x1xf32>
    %372 = math.rsqrt %371 : vector<8x1xf32>
    %373 = vector.broadcast %372 : vector<8x1xf32> to vector<8x64xf32>
    %374 = arith.mulf %364, %373 : vector<8x64xf32>
    %375 = vector.broadcast %357 : vector<1x64xf32> to vector<8x64xf32>
    %376 = arith.mulf %374, %375 : vector<8x64xf32>
    %377 = vector.broadcast %358 : vector<1x64xf32> to vector<8x64xf32>
    %378 = arith.addf %376, %377 : vector<8x64xf32>
    %379 = tpu.iota {dimensions = array<i32: 0>} : vector<8x8xi32>
    %380 = tpu.iota {dimensions = array<i32: 1>} : vector<8x8xi32>
    %381 = arith.cmpi sle, %380, %379 : vector<8x8xi32>
    %cst_155 = arith.constant 0.000000e+00 : f32
    %cst_156 = arith.constant -1.000000e+09 : f32
    %382 = vector.broadcast %cst_155 : f32 to vector<8x8xf32>
    %383 = vector.broadcast %cst_156 : f32 to vector<8x8xf32>
    %384 = arith.select %381, %382, %383 : vector<8x8xi1>, vector<8x8xf32>
    %c0_157 = arith.constant 0 : index
    %c0_158 = arith.constant 0 : index
    %c0_159 = arith.constant 0 : index
    %385 = vector.load %arg31[%c0_157, %c0_158, %c0_159] : memref<2x6x64xf32, #tpu.memory_space<vmem>>, vector<1x6x64xf32>
    %386 = vector.shape_cast %385 : vector<1x6x64xf32> to vector<6x64xf32>
    %c0_160 = arith.constant 0 : index
    %c0_161 = arith.constant 0 : index
    %c0_162 = arith.constant 0 : index
    %387 = vector.load %arg17[%c0_160, %c0_161, %c0_162] : memref<2x64x192xf32, #tpu.memory_space<vmem>>, vector<1x64x192xf32>
    %388 = vector.shape_cast %387 : vector<1x64x192xf32> to vector<64x192xf32>
    %cst_163 = arith.constant dense<0.000000e+00> : vector<8x192xf32>
    %389 = tpu.matmul %378, %388, %cst_163 {dimension_numbers = #tpu.dot_dimension_numbers<[1], [0], [0], [1], [0, 0, 1, 1], [], []>} : vector<8x64xf32>, vector<64x192xf32>, vector<8x192xf32> -> vector<8x192xf32>
    %c0_164 = arith.constant 0 : index
    %c0_165 = arith.constant 0 : index
    %c0_166 = arith.constant 0 : index
    %390 = vector.load %arg18[%c0_164, %c0_165, %c0_166] : memref<2x1x192xf32, #tpu.memory_space<vmem>>, vector<1x1x192xf32>
    %391 = vector.shape_cast %390 : vector<1x1x192xf32> to vector<1x192xf32>
    %392 = vector.broadcast %391 : vector<1x192xf32> to vector<8x192xf32>
    %393 = arith.addf %389, %392 : vector<8x192xf32>
    %394 = vector.extract_strided_slice %393 {offsets = [0, 0], sizes = [8, 64], strides = [1, 1]} : vector<8x192xf32> to vector<8x64xf32>
    %395 = vector.extract_strided_slice %393 {offsets = [0, 64], sizes = [8, 64], strides = [1, 1]} : vector<8x192xf32> to vector<8x64xf32>
    %396 = vector.extract_strided_slice %393 {offsets = [0, 128], sizes = [8, 64], strides = [1, 1]} : vector<8x192xf32> to vector<8x64xf32>
    %397 = vector.extract_strided_slice %394 {offsets = [0, 0], sizes = [8, 16], strides = [1, 1]} : vector<8x64xf32> to vector<8x16xf32>
    %cst_167 = arith.constant 2.500000e-01 : f32
    %398 = vector.broadcast %cst_167 : f32 to vector<8x16xf32>
    %399 = arith.mulf %397, %398 : vector<8x16xf32>
    %400 = vector.extract_strided_slice %395 {offsets = [0, 0], sizes = [8, 16], strides = [1, 1]} : vector<8x64xf32> to vector<8x16xf32>
    %401 = vector.extract_strided_slice %396 {offsets = [0, 0], sizes = [8, 16], strides = [1, 1]} : vector<8x64xf32> to vector<8x16xf32>
    %cst_168 = arith.constant dense<0.000000e+00> : vector<8x8xf32>
    %402 = tpu.matmul %399, %400, %cst_168 {dimension_numbers = #tpu.dot_dimension_numbers<[1], [1], [0], [0], [0, 0, 1, 0], [], []>} : vector<8x16xf32>, vector<8x16xf32>, vector<8x8xf32> -> vector<8x8xf32>
    %403 = arith.addf %402, %384 : vector<8x8xf32>
    %cst_169 = arith.constant dense<0xFF800000> : vector<8xf32>
    %404 = vector.multi_reduction <maximumf>, %403, %cst_169 [1] : vector<8x8xf32> to vector<8xf32>
    %405 = vector.shape_cast %404 : vector<8xf32> to vector<8x1xf32>
    %406 = vector.broadcast %405 : vector<8x1xf32> to vector<8x8xf32>
    %407 = arith.subf %403, %406 : vector<8x8xf32>
    %408 = math.exp %407 : vector<8x8xf32>
    %cst_170 = arith.constant dense<0.000000e+00> : vector<8xf32>
    %409 = vector.multi_reduction <add>, %408, %cst_170 [1] : vector<8x8xf32> to vector<8xf32>
    %410 = vector.shape_cast %409 : vector<8xf32> to vector<8x1xf32>
    %411 = tpu.reciprocal %410 {approx = true} : vector<8x1xf32> -> vector<8x1xf32>
    %412 = vector.broadcast %411 : vector<8x1xf32> to vector<8x8xf32>
    %413 = arith.mulf %408, %412 : vector<8x8xf32>
    %cst_171 = arith.constant dense<0.000000e+00> : vector<8x16xf32>
    %414 = tpu.matmul %413, %401, %cst_171 {dimension_numbers = #tpu.dot_dimension_numbers<[1], [0], [0], [1], [0, 0, 1, 1], [], []>} : vector<8x8xf32>, vector<8x16xf32>, vector<8x16xf32> -> vector<8x16xf32>
    %415 = vector.extract_strided_slice %394 {offsets = [0, 16], sizes = [8, 16], strides = [1, 1]} : vector<8x64xf32> to vector<8x16xf32>
    %cst_172 = arith.constant 2.500000e-01 : f32
    %416 = vector.broadcast %cst_172 : f32 to vector<8x16xf32>
    %417 = arith.mulf %415, %416 : vector<8x16xf32>
    %418 = vector.extract_strided_slice %395 {offsets = [0, 16], sizes = [8, 16], strides = [1, 1]} : vector<8x64xf32> to vector<8x16xf32>
    %419 = vector.extract_strided_slice %396 {offsets = [0, 16], sizes = [8, 16], strides = [1, 1]} : vector<8x64xf32> to vector<8x16xf32>
    %cst_173 = arith.constant dense<0.000000e+00> : vector<8x8xf32>
    %420 = tpu.matmul %417, %418, %cst_173 {dimension_numbers = #tpu.dot_dimension_numbers<[1], [1], [0], [0], [0, 0, 1, 0], [], []>} : vector<8x16xf32>, vector<8x16xf32>, vector<8x8xf32> -> vector<8x8xf32>
    %421 = arith.addf %420, %384 : vector<8x8xf32>
    %cst_174 = arith.constant dense<0xFF800000> : vector<8xf32>
    %422 = vector.multi_reduction <maximumf>, %421, %cst_174 [1] : vector<8x8xf32> to vector<8xf32>
    %423 = vector.shape_cast %422 : vector<8xf32> to vector<8x1xf32>
    %424 = vector.broadcast %423 : vector<8x1xf32> to vector<8x8xf32>
    %425 = arith.subf %421, %424 : vector<8x8xf32>
    %426 = math.exp %425 : vector<8x8xf32>
    %cst_175 = arith.constant dense<0.000000e+00> : vector<8xf32>
    %427 = vector.multi_reduction <add>, %426, %cst_175 [1] : vector<8x8xf32> to vector<8xf32>
    %428 = vector.shape_cast %427 : vector<8xf32> to vector<8x1xf32>
    %429 = tpu.reciprocal %428 {approx = true} : vector<8x1xf32> -> vector<8x1xf32>
    %430 = vector.broadcast %429 : vector<8x1xf32> to vector<8x8xf32>
    %431 = arith.mulf %426, %430 : vector<8x8xf32>
    %cst_176 = arith.constant dense<0.000000e+00> : vector<8x16xf32>
    %432 = tpu.matmul %431, %419, %cst_176 {dimension_numbers = #tpu.dot_dimension_numbers<[1], [0], [0], [1], [0, 0, 1, 1], [], []>} : vector<8x8xf32>, vector<8x16xf32>, vector<8x16xf32> -> vector<8x16xf32>
    %433 = vector.extract_strided_slice %394 {offsets = [0, 32], sizes = [8, 16], strides = [1, 1]} : vector<8x64xf32> to vector<8x16xf32>
    %cst_177 = arith.constant 2.500000e-01 : f32
    %434 = vector.broadcast %cst_177 : f32 to vector<8x16xf32>
    %435 = arith.mulf %433, %434 : vector<8x16xf32>
    %436 = vector.extract_strided_slice %395 {offsets = [0, 32], sizes = [8, 16], strides = [1, 1]} : vector<8x64xf32> to vector<8x16xf32>
    %437 = vector.extract_strided_slice %396 {offsets = [0, 32], sizes = [8, 16], strides = [1, 1]} : vector<8x64xf32> to vector<8x16xf32>
    %cst_178 = arith.constant dense<0.000000e+00> : vector<8x8xf32>
    %438 = tpu.matmul %435, %436, %cst_178 {dimension_numbers = #tpu.dot_dimension_numbers<[1], [1], [0], [0], [0, 0, 1, 0], [], []>} : vector<8x16xf32>, vector<8x16xf32>, vector<8x8xf32> -> vector<8x8xf32>
    %439 = arith.addf %438, %384 : vector<8x8xf32>
    %cst_179 = arith.constant dense<0xFF800000> : vector<8xf32>
    %440 = vector.multi_reduction <maximumf>, %439, %cst_179 [1] : vector<8x8xf32> to vector<8xf32>
    %441 = vector.shape_cast %440 : vector<8xf32> to vector<8x1xf32>
    %442 = vector.broadcast %441 : vector<8x1xf32> to vector<8x8xf32>
    %443 = arith.subf %439, %442 : vector<8x8xf32>
    %444 = math.exp %443 : vector<8x8xf32>
    %cst_180 = arith.constant dense<0.000000e+00> : vector<8xf32>
    %445 = vector.multi_reduction <add>, %444, %cst_180 [1] : vector<8x8xf32> to vector<8xf32>
    %446 = vector.shape_cast %445 : vector<8xf32> to vector<8x1xf32>
    %447 = tpu.reciprocal %446 {approx = true} : vector<8x1xf32> -> vector<8x1xf32>
    %448 = vector.broadcast %447 : vector<8x1xf32> to vector<8x8xf32>
    %449 = arith.mulf %444, %448 : vector<8x8xf32>
    %cst_181 = arith.constant dense<0.000000e+00> : vector<8x16xf32>
    %450 = tpu.matmul %449, %437, %cst_181 {dimension_numbers = #tpu.dot_dimension_numbers<[1], [0], [0], [1], [0, 0, 1, 1], [], []>} : vector<8x8xf32>, vector<8x16xf32>, vector<8x16xf32> -> vector<8x16xf32>
    %451 = vector.extract_strided_slice %394 {offsets = [0, 48], sizes = [8, 16], strides = [1, 1]} : vector<8x64xf32> to vector<8x16xf32>
    %cst_182 = arith.constant 2.500000e-01 : f32
    %452 = vector.broadcast %cst_182 : f32 to vector<8x16xf32>
    %453 = arith.mulf %451, %452 : vector<8x16xf32>
    %454 = vector.extract_strided_slice %395 {offsets = [0, 48], sizes = [8, 16], strides = [1, 1]} : vector<8x64xf32> to vector<8x16xf32>
    %455 = vector.extract_strided_slice %396 {offsets = [0, 48], sizes = [8, 16], strides = [1, 1]} : vector<8x64xf32> to vector<8x16xf32>
    %cst_183 = arith.constant dense<0.000000e+00> : vector<8x8xf32>
    %456 = tpu.matmul %453, %454, %cst_183 {dimension_numbers = #tpu.dot_dimension_numbers<[1], [1], [0], [0], [0, 0, 1, 0], [], []>} : vector<8x16xf32>, vector<8x16xf32>, vector<8x8xf32> -> vector<8x8xf32>
    %457 = arith.addf %456, %384 : vector<8x8xf32>
    %cst_184 = arith.constant dense<0xFF800000> : vector<8xf32>
    %458 = vector.multi_reduction <maximumf>, %457, %cst_184 [1] : vector<8x8xf32> to vector<8xf32>
    %459 = vector.shape_cast %458 : vector<8xf32> to vector<8x1xf32>
    %460 = vector.broadcast %459 : vector<8x1xf32> to vector<8x8xf32>
    %461 = arith.subf %457, %460 : vector<8x8xf32>
    %462 = math.exp %461 : vector<8x8xf32>
    %cst_185 = arith.constant dense<0.000000e+00> : vector<8xf32>
    %463 = vector.multi_reduction <add>, %462, %cst_185 [1] : vector<8x8xf32> to vector<8xf32>
    %464 = vector.shape_cast %463 : vector<8xf32> to vector<8x1xf32>
    %465 = tpu.reciprocal %464 {approx = true} : vector<8x1xf32> -> vector<8x1xf32>
    %466 = vector.broadcast %465 : vector<8x1xf32> to vector<8x8xf32>
    %467 = arith.mulf %462, %466 : vector<8x8xf32>
    %cst_186 = arith.constant dense<0.000000e+00> : vector<8x16xf32>
    %468 = tpu.matmul %467, %455, %cst_186 {dimension_numbers = #tpu.dot_dimension_numbers<[1], [0], [0], [1], [0, 0, 1, 1], [], []>} : vector<8x8xf32>, vector<8x16xf32>, vector<8x16xf32> -> vector<8x16xf32>
    %469 = tpu.concatenate %414, %432, %450, %468 in 1 : vector<8x16xf32>, vector<8x16xf32>, vector<8x16xf32>, vector<8x16xf32> -> vector<8x64xf32>
    %c0_187 = arith.constant 0 : index
    %c0_188 = arith.constant 0 : index
    %c0_189 = arith.constant 0 : index
    %470 = vector.load %arg19[%c0_187, %c0_188, %c0_189] : memref<2x64x64xf32, #tpu.memory_space<vmem>>, vector<1x64x64xf32>
    %471 = vector.shape_cast %470 : vector<1x64x64xf32> to vector<64x64xf32>
    %cst_190 = arith.constant dense<0.000000e+00> : vector<8x64xf32>
    %472 = tpu.matmul %469, %471, %cst_190 {dimension_numbers = #tpu.dot_dimension_numbers<[1], [0], [0], [1], [0, 0, 1, 1], [], []>} : vector<8x64xf32>, vector<64x64xf32>, vector<8x64xf32> -> vector<8x64xf32>
    %c0_191 = arith.constant 0 : index
    %c0_192 = arith.constant 0 : index
    %c0_193 = arith.constant 0 : index
    %473 = vector.load %arg20[%c0_191, %c0_192, %c0_193] : memref<2x1x64xf32, #tpu.memory_space<vmem>>, vector<1x1x64xf32>
    %474 = vector.shape_cast %473 : vector<1x1x64xf32> to vector<1x64xf32>
    %475 = vector.broadcast %474 : vector<1x64xf32> to vector<8x64xf32>
    %476 = arith.addf %472, %475 : vector<8x64xf32>
    %477 = arith.addf %378, %476 : vector<8x64xf32>
    %478 = vector.extract_strided_slice %386 {offsets = [0, 0], sizes = [1, 64], strides = [1, 1]} : vector<6x64xf32> to vector<1x64xf32>
    %479 = vector.extract_strided_slice %386 {offsets = [1, 0], sizes = [1, 64], strides = [1, 1]} : vector<6x64xf32> to vector<1x64xf32>
    %cst_194 = arith.constant dense<0.000000e+00> : vector<8xf32>
    %480 = vector.multi_reduction <add>, %477, %cst_194 [1] : vector<8x64xf32> to vector<8xf32>
    %481 = vector.shape_cast %480 : vector<8xf32> to vector<8x1xf32>
    %cst_195 = arith.constant 6.400000e+01 : f32
    %482 = vector.broadcast %cst_195 : f32 to vector<8x1xf32>
    %483 = arith.divf %481, %482 : vector<8x1xf32>
    %484 = vector.broadcast %483 : vector<8x1xf32> to vector<8x64xf32>
    %485 = arith.subf %477, %484 : vector<8x64xf32>
    %486 = arith.mulf %485, %485 : vector<8x64xf32>
    %cst_196 = arith.constant dense<0.000000e+00> : vector<8xf32>
    %487 = vector.multi_reduction <add>, %486, %cst_196 [1] : vector<8x64xf32> to vector<8xf32>
    %488 = vector.shape_cast %487 : vector<8xf32> to vector<8x1xf32>
    %cst_197 = arith.constant 6.400000e+01 : f32
    %489 = vector.broadcast %cst_197 : f32 to vector<8x1xf32>
    %490 = arith.divf %488, %489 : vector<8x1xf32>
    %cst_198 = arith.constant 9.99999974E-6 : f32
    %491 = vector.broadcast %cst_198 : f32 to vector<8x1xf32>
    %492 = arith.addf %490, %491 : vector<8x1xf32>
    %493 = math.rsqrt %492 : vector<8x1xf32>
    %494 = vector.broadcast %493 : vector<8x1xf32> to vector<8x64xf32>
    %495 = arith.mulf %485, %494 : vector<8x64xf32>
    %496 = vector.broadcast %478 : vector<1x64xf32> to vector<8x64xf32>
    %497 = arith.mulf %495, %496 : vector<8x64xf32>
    %498 = vector.broadcast %479 : vector<1x64xf32> to vector<8x64xf32>
    %499 = arith.addf %497, %498 : vector<8x64xf32>
    %c0_199 = arith.constant 0 : index
    %c0_200 = arith.constant 0 : index
    %c0_201 = arith.constant 0 : index
    %500 = vector.load %arg21[%c0_199, %c0_200, %c0_201] : memref<2x64x64xf32, #tpu.memory_space<vmem>>, vector<1x64x64xf32>
    %501 = vector.shape_cast %500 : vector<1x64x64xf32> to vector<64x64xf32>
    %cst_202 = arith.constant dense<0.000000e+00> : vector<8x64xf32>
    %502 = tpu.matmul %499, %501, %cst_202 {dimension_numbers = #tpu.dot_dimension_numbers<[1], [0], [0], [1], [0, 0, 1, 1], [], []>} : vector<8x64xf32>, vector<64x64xf32>, vector<8x64xf32> -> vector<8x64xf32>
    %c0_203 = arith.constant 0 : index
    %c0_204 = arith.constant 0 : index
    %c0_205 = arith.constant 0 : index
    %503 = vector.load %arg22[%c0_203, %c0_204, %c0_205] : memref<2x1x64xf32, #tpu.memory_space<vmem>>, vector<1x1x64xf32>
    %504 = vector.shape_cast %503 : vector<1x1x64xf32> to vector<1x64xf32>
    %505 = vector.broadcast %504 : vector<1x64xf32> to vector<8x64xf32>
    %506 = arith.addf %502, %505 : vector<8x64xf32>
    %c0_206 = arith.constant 0 : index
    %c0_207 = arith.constant 0 : index
    %c0_208 = arith.constant 0 : index
    %507 = vector.load %arg23[%c0_206, %c0_207, %c0_208] : memref<2x64x128xf32, #tpu.memory_space<vmem>>, vector<1x64x128xf32>
    %508 = vector.shape_cast %507 : vector<1x64x128xf32> to vector<64x128xf32>
    %cst_209 = arith.constant dense<0.000000e+00> : vector<4x128xf32>
    %509 = tpu.matmul %352, %508, %cst_209 {dimension_numbers = #tpu.dot_dimension_numbers<[1], [0], [0], [1], [0, 0, 1, 1], [], []>} : vector<4x64xf32>, vector<64x128xf32>, vector<4x128xf32> -> vector<4x128xf32>
    %c0_210 = arith.constant 0 : index
    %c0_211 = arith.constant 0 : index
    %c0_212 = arith.constant 0 : index
    %510 = vector.load %arg24[%c0_210, %c0_211, %c0_212] : memref<2x1x128xf32, #tpu.memory_space<vmem>>, vector<1x1x128xf32>
    %511 = vector.shape_cast %510 : vector<1x1x128xf32> to vector<1x128xf32>
    %512 = vector.broadcast %511 : vector<1x128xf32> to vector<4x128xf32>
    %513 = arith.addf %509, %512 : vector<4x128xf32>
    %514 = vector.extract_strided_slice %513 {offsets = [0, 0], sizes = [4, 64], strides = [1, 1]} : vector<4x128xf32> to vector<4x64xf32>
    %515 = vector.extract_strided_slice %513 {offsets = [0, 64], sizes = [4, 64], strides = [1, 1]} : vector<4x128xf32> to vector<4x64xf32>
    %516 = vector.extract_strided_slice %506 {offsets = [0, 0], sizes = [8, 16], strides = [1, 1]} : vector<8x64xf32> to vector<8x16xf32>
    %cst_213 = arith.constant 2.500000e-01 : f32
    %517 = vector.broadcast %cst_213 : f32 to vector<8x16xf32>
    %518 = arith.mulf %516, %517 : vector<8x16xf32>
    %519 = vector.extract_strided_slice %514 {offsets = [0, 0], sizes = [4, 16], strides = [1, 1]} : vector<4x64xf32> to vector<4x16xf32>
    %520 = vector.extract_strided_slice %515 {offsets = [0, 0], sizes = [4, 16], strides = [1, 1]} : vector<4x64xf32> to vector<4x16xf32>
    %cst_214 = arith.constant dense<0.000000e+00> : vector<8x4xf32>
    %521 = tpu.matmul %518, %519, %cst_214 {dimension_numbers = #tpu.dot_dimension_numbers<[1], [1], [0], [0], [0, 0, 1, 0], [], []>} : vector<8x16xf32>, vector<4x16xf32>, vector<8x4xf32> -> vector<8x4xf32>
    %cst_215 = arith.constant dense<0xFF800000> : vector<8xf32>
    %522 = vector.multi_reduction <maximumf>, %521, %cst_215 [1] : vector<8x4xf32> to vector<8xf32>
    %523 = vector.shape_cast %522 : vector<8xf32> to vector<8x1xf32>
    %524 = vector.broadcast %523 : vector<8x1xf32> to vector<8x4xf32>
    %525 = arith.subf %521, %524 : vector<8x4xf32>
    %526 = math.exp %525 : vector<8x4xf32>
    %cst_216 = arith.constant dense<0.000000e+00> : vector<8xf32>
    %527 = vector.multi_reduction <add>, %526, %cst_216 [1] : vector<8x4xf32> to vector<8xf32>
    %528 = vector.shape_cast %527 : vector<8xf32> to vector<8x1xf32>
    %529 = tpu.reciprocal %528 {approx = true} : vector<8x1xf32> -> vector<8x1xf32>
    %530 = vector.broadcast %529 : vector<8x1xf32> to vector<8x4xf32>
    %531 = arith.mulf %526, %530 : vector<8x4xf32>
    %cst_217 = arith.constant dense<0.000000e+00> : vector<8x16xf32>
    %532 = tpu.matmul %531, %520, %cst_217 {dimension_numbers = #tpu.dot_dimension_numbers<[1], [0], [0], [1], [0, 0, 1, 1], [], []>} : vector<8x4xf32>, vector<4x16xf32>, vector<8x16xf32> -> vector<8x16xf32>
    %533 = vector.extract_strided_slice %506 {offsets = [0, 16], sizes = [8, 16], strides = [1, 1]} : vector<8x64xf32> to vector<8x16xf32>
    %cst_218 = arith.constant 2.500000e-01 : f32
    %534 = vector.broadcast %cst_218 : f32 to vector<8x16xf32>
    %535 = arith.mulf %533, %534 : vector<8x16xf32>
    %536 = vector.extract_strided_slice %514 {offsets = [0, 16], sizes = [4, 16], strides = [1, 1]} : vector<4x64xf32> to vector<4x16xf32>
    %537 = vector.extract_strided_slice %515 {offsets = [0, 16], sizes = [4, 16], strides = [1, 1]} : vector<4x64xf32> to vector<4x16xf32>
    %cst_219 = arith.constant dense<0.000000e+00> : vector<8x4xf32>
    %538 = tpu.matmul %535, %536, %cst_219 {dimension_numbers = #tpu.dot_dimension_numbers<[1], [1], [0], [0], [0, 0, 1, 0], [], []>} : vector<8x16xf32>, vector<4x16xf32>, vector<8x4xf32> -> vector<8x4xf32>
    %cst_220 = arith.constant dense<0xFF800000> : vector<8xf32>
    %539 = vector.multi_reduction <maximumf>, %538, %cst_220 [1] : vector<8x4xf32> to vector<8xf32>
    %540 = vector.shape_cast %539 : vector<8xf32> to vector<8x1xf32>
    %541 = vector.broadcast %540 : vector<8x1xf32> to vector<8x4xf32>
    %542 = arith.subf %538, %541 : vector<8x4xf32>
    %543 = math.exp %542 : vector<8x4xf32>
    %cst_221 = arith.constant dense<0.000000e+00> : vector<8xf32>
    %544 = vector.multi_reduction <add>, %543, %cst_221 [1] : vector<8x4xf32> to vector<8xf32>
    %545 = vector.shape_cast %544 : vector<8xf32> to vector<8x1xf32>
    %546 = tpu.reciprocal %545 {approx = true} : vector<8x1xf32> -> vector<8x1xf32>
    %547 = vector.broadcast %546 : vector<8x1xf32> to vector<8x4xf32>
    %548 = arith.mulf %543, %547 : vector<8x4xf32>
    %cst_222 = arith.constant dense<0.000000e+00> : vector<8x16xf32>
    %549 = tpu.matmul %548, %537, %cst_222 {dimension_numbers = #tpu.dot_dimension_numbers<[1], [0], [0], [1], [0, 0, 1, 1], [], []>} : vector<8x4xf32>, vector<4x16xf32>, vector<8x16xf32> -> vector<8x16xf32>
    %550 = vector.extract_strided_slice %506 {offsets = [0, 32], sizes = [8, 16], strides = [1, 1]} : vector<8x64xf32> to vector<8x16xf32>
    %cst_223 = arith.constant 2.500000e-01 : f32
    %551 = vector.broadcast %cst_223 : f32 to vector<8x16xf32>
    %552 = arith.mulf %550, %551 : vector<8x16xf32>
    %553 = vector.extract_strided_slice %514 {offsets = [0, 32], sizes = [4, 16], strides = [1, 1]} : vector<4x64xf32> to vector<4x16xf32>
    %554 = vector.extract_strided_slice %515 {offsets = [0, 32], sizes = [4, 16], strides = [1, 1]} : vector<4x64xf32> to vector<4x16xf32>
    %cst_224 = arith.constant dense<0.000000e+00> : vector<8x4xf32>
    %555 = tpu.matmul %552, %553, %cst_224 {dimension_numbers = #tpu.dot_dimension_numbers<[1], [1], [0], [0], [0, 0, 1, 0], [], []>} : vector<8x16xf32>, vector<4x16xf32>, vector<8x4xf32> -> vector<8x4xf32>
    %cst_225 = arith.constant dense<0xFF800000> : vector<8xf32>
    %556 = vector.multi_reduction <maximumf>, %555, %cst_225 [1] : vector<8x4xf32> to vector<8xf32>
    %557 = vector.shape_cast %556 : vector<8xf32> to vector<8x1xf32>
    %558 = vector.broadcast %557 : vector<8x1xf32> to vector<8x4xf32>
    %559 = arith.subf %555, %558 : vector<8x4xf32>
    %560 = math.exp %559 : vector<8x4xf32>
    %cst_226 = arith.constant dense<0.000000e+00> : vector<8xf32>
    %561 = vector.multi_reduction <add>, %560, %cst_226 [1] : vector<8x4xf32> to vector<8xf32>
    %562 = vector.shape_cast %561 : vector<8xf32> to vector<8x1xf32>
    %563 = tpu.reciprocal %562 {approx = true} : vector<8x1xf32> -> vector<8x1xf32>
    %564 = vector.broadcast %563 : vector<8x1xf32> to vector<8x4xf32>
    %565 = arith.mulf %560, %564 : vector<8x4xf32>
    %cst_227 = arith.constant dense<0.000000e+00> : vector<8x16xf32>
    %566 = tpu.matmul %565, %554, %cst_227 {dimension_numbers = #tpu.dot_dimension_numbers<[1], [0], [0], [1], [0, 0, 1, 1], [], []>} : vector<8x4xf32>, vector<4x16xf32>, vector<8x16xf32> -> vector<8x16xf32>
    %567 = vector.extract_strided_slice %506 {offsets = [0, 48], sizes = [8, 16], strides = [1, 1]} : vector<8x64xf32> to vector<8x16xf32>
    %cst_228 = arith.constant 2.500000e-01 : f32
    %568 = vector.broadcast %cst_228 : f32 to vector<8x16xf32>
    %569 = arith.mulf %567, %568 : vector<8x16xf32>
    %570 = vector.extract_strided_slice %514 {offsets = [0, 48], sizes = [4, 16], strides = [1, 1]} : vector<4x64xf32> to vector<4x16xf32>
    %571 = vector.extract_strided_slice %515 {offsets = [0, 48], sizes = [4, 16], strides = [1, 1]} : vector<4x64xf32> to vector<4x16xf32>
    %cst_229 = arith.constant dense<0.000000e+00> : vector<8x4xf32>
    %572 = tpu.matmul %569, %570, %cst_229 {dimension_numbers = #tpu.dot_dimension_numbers<[1], [1], [0], [0], [0, 0, 1, 0], [], []>} : vector<8x16xf32>, vector<4x16xf32>, vector<8x4xf32> -> vector<8x4xf32>
    %cst_230 = arith.constant dense<0xFF800000> : vector<8xf32>
    %573 = vector.multi_reduction <maximumf>, %572, %cst_230 [1] : vector<8x4xf32> to vector<8xf32>
    %574 = vector.shape_cast %573 : vector<8xf32> to vector<8x1xf32>
    %575 = vector.broadcast %574 : vector<8x1xf32> to vector<8x4xf32>
    %576 = arith.subf %572, %575 : vector<8x4xf32>
    %577 = math.exp %576 : vector<8x4xf32>
    %cst_231 = arith.constant dense<0.000000e+00> : vector<8xf32>
    %578 = vector.multi_reduction <add>, %577, %cst_231 [1] : vector<8x4xf32> to vector<8xf32>
    %579 = vector.shape_cast %578 : vector<8xf32> to vector<8x1xf32>
    %580 = tpu.reciprocal %579 {approx = true} : vector<8x1xf32> -> vector<8x1xf32>
    %581 = vector.broadcast %580 : vector<8x1xf32> to vector<8x4xf32>
    %582 = arith.mulf %577, %581 : vector<8x4xf32>
    %cst_232 = arith.constant dense<0.000000e+00> : vector<8x16xf32>
    %583 = tpu.matmul %582, %571, %cst_232 {dimension_numbers = #tpu.dot_dimension_numbers<[1], [0], [0], [1], [0, 0, 1, 1], [], []>} : vector<8x4xf32>, vector<4x16xf32>, vector<8x16xf32> -> vector<8x16xf32>
    %584 = tpu.concatenate %532, %549, %566, %583 in 1 : vector<8x16xf32>, vector<8x16xf32>, vector<8x16xf32>, vector<8x16xf32> -> vector<8x64xf32>
    %c0_233 = arith.constant 0 : index
    %c0_234 = arith.constant 0 : index
    %c0_235 = arith.constant 0 : index
    %585 = vector.load %arg25[%c0_233, %c0_234, %c0_235] : memref<2x64x64xf32, #tpu.memory_space<vmem>>, vector<1x64x64xf32>
    %586 = vector.shape_cast %585 : vector<1x64x64xf32> to vector<64x64xf32>
    %cst_236 = arith.constant dense<0.000000e+00> : vector<8x64xf32>
    %587 = tpu.matmul %584, %586, %cst_236 {dimension_numbers = #tpu.dot_dimension_numbers<[1], [0], [0], [1], [0, 0, 1, 1], [], []>} : vector<8x64xf32>, vector<64x64xf32>, vector<8x64xf32> -> vector<8x64xf32>
    %c0_237 = arith.constant 0 : index
    %c0_238 = arith.constant 0 : index
    %c0_239 = arith.constant 0 : index
    %588 = vector.load %arg26[%c0_237, %c0_238, %c0_239] : memref<2x1x64xf32, #tpu.memory_space<vmem>>, vector<1x1x64xf32>
    %589 = vector.shape_cast %588 : vector<1x1x64xf32> to vector<1x64xf32>
    %590 = vector.broadcast %589 : vector<1x64xf32> to vector<8x64xf32>
    %591 = arith.addf %587, %590 : vector<8x64xf32>
    %592 = arith.addf %499, %591 : vector<8x64xf32>
    %593 = vector.extract_strided_slice %386 {offsets = [2, 0], sizes = [1, 64], strides = [1, 1]} : vector<6x64xf32> to vector<1x64xf32>
    %594 = vector.extract_strided_slice %386 {offsets = [3, 0], sizes = [1, 64], strides = [1, 1]} : vector<6x64xf32> to vector<1x64xf32>
    %cst_240 = arith.constant dense<0.000000e+00> : vector<8xf32>
    %595 = vector.multi_reduction <add>, %592, %cst_240 [1] : vector<8x64xf32> to vector<8xf32>
    %596 = vector.shape_cast %595 : vector<8xf32> to vector<8x1xf32>
    %cst_241 = arith.constant 6.400000e+01 : f32
    %597 = vector.broadcast %cst_241 : f32 to vector<8x1xf32>
    %598 = arith.divf %596, %597 : vector<8x1xf32>
    %599 = vector.broadcast %598 : vector<8x1xf32> to vector<8x64xf32>
    %600 = arith.subf %592, %599 : vector<8x64xf32>
    %601 = arith.mulf %600, %600 : vector<8x64xf32>
    %cst_242 = arith.constant dense<0.000000e+00> : vector<8xf32>
    %602 = vector.multi_reduction <add>, %601, %cst_242 [1] : vector<8x64xf32> to vector<8xf32>
    %603 = vector.shape_cast %602 : vector<8xf32> to vector<8x1xf32>
    %cst_243 = arith.constant 6.400000e+01 : f32
    %604 = vector.broadcast %cst_243 : f32 to vector<8x1xf32>
    %605 = arith.divf %603, %604 : vector<8x1xf32>
    %cst_244 = arith.constant 9.99999974E-6 : f32
    %606 = vector.broadcast %cst_244 : f32 to vector<8x1xf32>
    %607 = arith.addf %605, %606 : vector<8x1xf32>
    %608 = math.rsqrt %607 : vector<8x1xf32>
    %609 = vector.broadcast %608 : vector<8x1xf32> to vector<8x64xf32>
    %610 = arith.mulf %600, %609 : vector<8x64xf32>
    %611 = vector.broadcast %593 : vector<1x64xf32> to vector<8x64xf32>
    %612 = arith.mulf %610, %611 : vector<8x64xf32>
    %613 = vector.broadcast %594 : vector<1x64xf32> to vector<8x64xf32>
    %614 = arith.addf %612, %613 : vector<8x64xf32>
    %c0_245 = arith.constant 0 : index
    %c0_246 = arith.constant 0 : index
    %c0_247 = arith.constant 0 : index
    %615 = vector.load %arg27[%c0_245, %c0_246, %c0_247] : memref<2x64x128xf32, #tpu.memory_space<vmem>>, vector<1x64x128xf32>
    %616 = vector.shape_cast %615 : vector<1x64x128xf32> to vector<64x128xf32>
    %cst_248 = arith.constant dense<0.000000e+00> : vector<8x128xf32>
    %617 = tpu.matmul %614, %616, %cst_248 {dimension_numbers = #tpu.dot_dimension_numbers<[1], [0], [0], [1], [0, 0, 1, 1], [], []>} : vector<8x64xf32>, vector<64x128xf32>, vector<8x128xf32> -> vector<8x128xf32>
    %c0_249 = arith.constant 0 : index
    %c0_250 = arith.constant 0 : index
    %c0_251 = arith.constant 0 : index
    %618 = vector.load %arg28[%c0_249, %c0_250, %c0_251] : memref<2x1x128xf32, #tpu.memory_space<vmem>>, vector<1x1x128xf32>
    %619 = vector.shape_cast %618 : vector<1x1x128xf32> to vector<1x128xf32>
    %620 = vector.broadcast %619 : vector<1x128xf32> to vector<8x128xf32>
    %621 = arith.addf %617, %620 : vector<8x128xf32>
    %622 = arith.mulf %621, %621 : vector<8x128xf32>
    %623 = arith.mulf %621, %622 : vector<8x128xf32>
    %cst_252 = arith.constant 4.471500e-02 : f32
    %624 = vector.broadcast %cst_252 : f32 to vector<8x128xf32>
    %625 = arith.mulf %624, %623 : vector<8x128xf32>
    %626 = arith.addf %621, %625 : vector<8x128xf32>
    %cst_253 = arith.constant 0.797884583 : f32
    %627 = vector.broadcast %cst_253 : f32 to vector<8x128xf32>
    %628 = arith.mulf %627, %626 : vector<8x128xf32>
    %629 = math.tanh %628 : vector<8x128xf32>
    %cst_254 = arith.constant 1.000000e+00 : f32
    %630 = vector.broadcast %cst_254 : f32 to vector<8x128xf32>
    %631 = arith.addf %630, %629 : vector<8x128xf32>
    %cst_255 = arith.constant 5.000000e-01 : f32
    %632 = vector.broadcast %cst_255 : f32 to vector<8x128xf32>
    %633 = arith.mulf %632, %631 : vector<8x128xf32>
    %634 = arith.mulf %621, %633 : vector<8x128xf32>
    %c0_256 = arith.constant 0 : index
    %c0_257 = arith.constant 0 : index
    %c0_258 = arith.constant 0 : index
    %635 = vector.load %arg29[%c0_256, %c0_257, %c0_258] : memref<2x128x64xf32, #tpu.memory_space<vmem>>, vector<1x128x64xf32>
    %636 = vector.shape_cast %635 : vector<1x128x64xf32> to vector<128x64xf32>
    %cst_259 = arith.constant dense<0.000000e+00> : vector<8x64xf32>
    %637 = tpu.matmul %634, %636, %cst_259 {dimension_numbers = #tpu.dot_dimension_numbers<[1], [0], [0], [1], [0, 0, 1, 1], [], []>} : vector<8x128xf32>, vector<128x64xf32>, vector<8x64xf32> -> vector<8x64xf32>
    %c0_260 = arith.constant 0 : index
    %c0_261 = arith.constant 0 : index
    %c0_262 = arith.constant 0 : index
    %638 = vector.load %arg30[%c0_260, %c0_261, %c0_262] : memref<2x1x64xf32, #tpu.memory_space<vmem>>, vector<1x1x64xf32>
    %639 = vector.shape_cast %638 : vector<1x1x64xf32> to vector<1x64xf32>
    %640 = vector.broadcast %639 : vector<1x64xf32> to vector<8x64xf32>
    %641 = arith.addf %637, %640 : vector<8x64xf32>
    %642 = arith.addf %614, %641 : vector<8x64xf32>
    %643 = vector.extract_strided_slice %386 {offsets = [4, 0], sizes = [1, 64], strides = [1, 1]} : vector<6x64xf32> to vector<1x64xf32>
    %644 = vector.extract_strided_slice %386 {offsets = [5, 0], sizes = [1, 64], strides = [1, 1]} : vector<6x64xf32> to vector<1x64xf32>
    %cst_263 = arith.constant dense<0.000000e+00> : vector<8xf32>
    %645 = vector.multi_reduction <add>, %642, %cst_263 [1] : vector<8x64xf32> to vector<8xf32>
    %646 = vector.shape_cast %645 : vector<8xf32> to vector<8x1xf32>
    %cst_264 = arith.constant 6.400000e+01 : f32
    %647 = vector.broadcast %cst_264 : f32 to vector<8x1xf32>
    %648 = arith.divf %646, %647 : vector<8x1xf32>
    %649 = vector.broadcast %648 : vector<8x1xf32> to vector<8x64xf32>
    %650 = arith.subf %642, %649 : vector<8x64xf32>
    %651 = arith.mulf %650, %650 : vector<8x64xf32>
    %cst_265 = arith.constant dense<0.000000e+00> : vector<8xf32>
    %652 = vector.multi_reduction <add>, %651, %cst_265 [1] : vector<8x64xf32> to vector<8xf32>
    %653 = vector.shape_cast %652 : vector<8xf32> to vector<8x1xf32>
    %cst_266 = arith.constant 6.400000e+01 : f32
    %654 = vector.broadcast %cst_266 : f32 to vector<8x1xf32>
    %655 = arith.divf %653, %654 : vector<8x1xf32>
    %cst_267 = arith.constant 9.99999974E-6 : f32
    %656 = vector.broadcast %cst_267 : f32 to vector<8x1xf32>
    %657 = arith.addf %655, %656 : vector<8x1xf32>
    %658 = math.rsqrt %657 : vector<8x1xf32>
    %659 = vector.broadcast %658 : vector<8x1xf32> to vector<8x64xf32>
    %660 = arith.mulf %650, %659 : vector<8x64xf32>
    %661 = vector.broadcast %643 : vector<1x64xf32> to vector<8x64xf32>
    %662 = arith.mulf %660, %661 : vector<8x64xf32>
    %663 = vector.broadcast %644 : vector<1x64xf32> to vector<8x64xf32>
    %664 = arith.addf %662, %663 : vector<8x64xf32>
    %c1_268 = arith.constant 1 : index
    %c0_269 = arith.constant 0 : index
    %c0_270 = arith.constant 0 : index
    %665 = vector.load %arg31[%c1_268, %c0_269, %c0_270] : memref<2x6x64xf32, #tpu.memory_space<vmem>>, vector<1x6x64xf32>
    %666 = vector.shape_cast %665 : vector<1x6x64xf32> to vector<6x64xf32>
    %c1_271 = arith.constant 1 : index
    %c0_272 = arith.constant 0 : index
    %c0_273 = arith.constant 0 : index
    %667 = vector.load %arg17[%c1_271, %c0_272, %c0_273] : memref<2x64x192xf32, #tpu.memory_space<vmem>>, vector<1x64x192xf32>
    %668 = vector.shape_cast %667 : vector<1x64x192xf32> to vector<64x192xf32>
    %cst_274 = arith.constant dense<0.000000e+00> : vector<8x192xf32>
    %669 = tpu.matmul %664, %668, %cst_274 {dimension_numbers = #tpu.dot_dimension_numbers<[1], [0], [0], [1], [0, 0, 1, 1], [], []>} : vector<8x64xf32>, vector<64x192xf32>, vector<8x192xf32> -> vector<8x192xf32>
    %c1_275 = arith.constant 1 : index
    %c0_276 = arith.constant 0 : index
    %c0_277 = arith.constant 0 : index
    %670 = vector.load %arg18[%c1_275, %c0_276, %c0_277] : memref<2x1x192xf32, #tpu.memory_space<vmem>>, vector<1x1x192xf32>
    %671 = vector.shape_cast %670 : vector<1x1x192xf32> to vector<1x192xf32>
    %672 = vector.broadcast %671 : vector<1x192xf32> to vector<8x192xf32>
    %673 = arith.addf %669, %672 : vector<8x192xf32>
    %674 = vector.extract_strided_slice %673 {offsets = [0, 0], sizes = [8, 64], strides = [1, 1]} : vector<8x192xf32> to vector<8x64xf32>
    %675 = vector.extract_strided_slice %673 {offsets = [0, 64], sizes = [8, 64], strides = [1, 1]} : vector<8x192xf32> to vector<8x64xf32>
    %676 = vector.extract_strided_slice %673 {offsets = [0, 128], sizes = [8, 64], strides = [1, 1]} : vector<8x192xf32> to vector<8x64xf32>
    %677 = vector.extract_strided_slice %674 {offsets = [0, 0], sizes = [8, 16], strides = [1, 1]} : vector<8x64xf32> to vector<8x16xf32>
    %cst_278 = arith.constant 2.500000e-01 : f32
    %678 = vector.broadcast %cst_278 : f32 to vector<8x16xf32>
    %679 = arith.mulf %677, %678 : vector<8x16xf32>
    %680 = vector.extract_strided_slice %675 {offsets = [0, 0], sizes = [8, 16], strides = [1, 1]} : vector<8x64xf32> to vector<8x16xf32>
    %681 = vector.extract_strided_slice %676 {offsets = [0, 0], sizes = [8, 16], strides = [1, 1]} : vector<8x64xf32> to vector<8x16xf32>
    %cst_279 = arith.constant dense<0.000000e+00> : vector<8x8xf32>
    %682 = tpu.matmul %679, %680, %cst_279 {dimension_numbers = #tpu.dot_dimension_numbers<[1], [1], [0], [0], [0, 0, 1, 0], [], []>} : vector<8x16xf32>, vector<8x16xf32>, vector<8x8xf32> -> vector<8x8xf32>
    %683 = arith.addf %682, %384 : vector<8x8xf32>
    %cst_280 = arith.constant dense<0xFF800000> : vector<8xf32>
    %684 = vector.multi_reduction <maximumf>, %683, %cst_280 [1] : vector<8x8xf32> to vector<8xf32>
    %685 = vector.shape_cast %684 : vector<8xf32> to vector<8x1xf32>
    %686 = vector.broadcast %685 : vector<8x1xf32> to vector<8x8xf32>
    %687 = arith.subf %683, %686 : vector<8x8xf32>
    %688 = math.exp %687 : vector<8x8xf32>
    %cst_281 = arith.constant dense<0.000000e+00> : vector<8xf32>
    %689 = vector.multi_reduction <add>, %688, %cst_281 [1] : vector<8x8xf32> to vector<8xf32>
    %690 = vector.shape_cast %689 : vector<8xf32> to vector<8x1xf32>
    %691 = tpu.reciprocal %690 {approx = true} : vector<8x1xf32> -> vector<8x1xf32>
    %692 = vector.broadcast %691 : vector<8x1xf32> to vector<8x8xf32>
    %693 = arith.mulf %688, %692 : vector<8x8xf32>
    %cst_282 = arith.constant dense<0.000000e+00> : vector<8x16xf32>
    %694 = tpu.matmul %693, %681, %cst_282 {dimension_numbers = #tpu.dot_dimension_numbers<[1], [0], [0], [1], [0, 0, 1, 1], [], []>} : vector<8x8xf32>, vector<8x16xf32>, vector<8x16xf32> -> vector<8x16xf32>
    %695 = vector.extract_strided_slice %674 {offsets = [0, 16], sizes = [8, 16], strides = [1, 1]} : vector<8x64xf32> to vector<8x16xf32>
    %cst_283 = arith.constant 2.500000e-01 : f32
    %696 = vector.broadcast %cst_283 : f32 to vector<8x16xf32>
    %697 = arith.mulf %695, %696 : vector<8x16xf32>
    %698 = vector.extract_strided_slice %675 {offsets = [0, 16], sizes = [8, 16], strides = [1, 1]} : vector<8x64xf32> to vector<8x16xf32>
    %699 = vector.extract_strided_slice %676 {offsets = [0, 16], sizes = [8, 16], strides = [1, 1]} : vector<8x64xf32> to vector<8x16xf32>
    %cst_284 = arith.constant dense<0.000000e+00> : vector<8x8xf32>
    %700 = tpu.matmul %697, %698, %cst_284 {dimension_numbers = #tpu.dot_dimension_numbers<[1], [1], [0], [0], [0, 0, 1, 0], [], []>} : vector<8x16xf32>, vector<8x16xf32>, vector<8x8xf32> -> vector<8x8xf32>
    %701 = arith.addf %700, %384 : vector<8x8xf32>
    %cst_285 = arith.constant dense<0xFF800000> : vector<8xf32>
    %702 = vector.multi_reduction <maximumf>, %701, %cst_285 [1] : vector<8x8xf32> to vector<8xf32>
    %703 = vector.shape_cast %702 : vector<8xf32> to vector<8x1xf32>
    %704 = vector.broadcast %703 : vector<8x1xf32> to vector<8x8xf32>
    %705 = arith.subf %701, %704 : vector<8x8xf32>
    %706 = math.exp %705 : vector<8x8xf32>
    %cst_286 = arith.constant dense<0.000000e+00> : vector<8xf32>
    %707 = vector.multi_reduction <add>, %706, %cst_286 [1] : vector<8x8xf32> to vector<8xf32>
    %708 = vector.shape_cast %707 : vector<8xf32> to vector<8x1xf32>
    %709 = tpu.reciprocal %708 {approx = true} : vector<8x1xf32> -> vector<8x1xf32>
    %710 = vector.broadcast %709 : vector<8x1xf32> to vector<8x8xf32>
    %711 = arith.mulf %706, %710 : vector<8x8xf32>
    %cst_287 = arith.constant dense<0.000000e+00> : vector<8x16xf32>
    %712 = tpu.matmul %711, %699, %cst_287 {dimension_numbers = #tpu.dot_dimension_numbers<[1], [0], [0], [1], [0, 0, 1, 1], [], []>} : vector<8x8xf32>, vector<8x16xf32>, vector<8x16xf32> -> vector<8x16xf32>
    %713 = vector.extract_strided_slice %674 {offsets = [0, 32], sizes = [8, 16], strides = [1, 1]} : vector<8x64xf32> to vector<8x16xf32>
    %cst_288 = arith.constant 2.500000e-01 : f32
    %714 = vector.broadcast %cst_288 : f32 to vector<8x16xf32>
    %715 = arith.mulf %713, %714 : vector<8x16xf32>
    %716 = vector.extract_strided_slice %675 {offsets = [0, 32], sizes = [8, 16], strides = [1, 1]} : vector<8x64xf32> to vector<8x16xf32>
    %717 = vector.extract_strided_slice %676 {offsets = [0, 32], sizes = [8, 16], strides = [1, 1]} : vector<8x64xf32> to vector<8x16xf32>
    %cst_289 = arith.constant dense<0.000000e+00> : vector<8x8xf32>
    %718 = tpu.matmul %715, %716, %cst_289 {dimension_numbers = #tpu.dot_dimension_numbers<[1], [1], [0], [0], [0, 0, 1, 0], [], []>} : vector<8x16xf32>, vector<8x16xf32>, vector<8x8xf32> -> vector<8x8xf32>
    %719 = arith.addf %718, %384 : vector<8x8xf32>
    %cst_290 = arith.constant dense<0xFF800000> : vector<8xf32>
    %720 = vector.multi_reduction <maximumf>, %719, %cst_290 [1] : vector<8x8xf32> to vector<8xf32>
    %721 = vector.shape_cast %720 : vector<8xf32> to vector<8x1xf32>
    %722 = vector.broadcast %721 : vector<8x1xf32> to vector<8x8xf32>
    %723 = arith.subf %719, %722 : vector<8x8xf32>
    %724 = math.exp %723 : vector<8x8xf32>
    %cst_291 = arith.constant dense<0.000000e+00> : vector<8xf32>
    %725 = vector.multi_reduction <add>, %724, %cst_291 [1] : vector<8x8xf32> to vector<8xf32>
    %726 = vector.shape_cast %725 : vector<8xf32> to vector<8x1xf32>
    %727 = tpu.reciprocal %726 {approx = true} : vector<8x1xf32> -> vector<8x1xf32>
    %728 = vector.broadcast %727 : vector<8x1xf32> to vector<8x8xf32>
    %729 = arith.mulf %724, %728 : vector<8x8xf32>
    %cst_292 = arith.constant dense<0.000000e+00> : vector<8x16xf32>
    %730 = tpu.matmul %729, %717, %cst_292 {dimension_numbers = #tpu.dot_dimension_numbers<[1], [0], [0], [1], [0, 0, 1, 1], [], []>} : vector<8x8xf32>, vector<8x16xf32>, vector<8x16xf32> -> vector<8x16xf32>
    %731 = vector.extract_strided_slice %674 {offsets = [0, 48], sizes = [8, 16], strides = [1, 1]} : vector<8x64xf32> to vector<8x16xf32>
    %cst_293 = arith.constant 2.500000e-01 : f32
    %732 = vector.broadcast %cst_293 : f32 to vector<8x16xf32>
    %733 = arith.mulf %731, %732 : vector<8x16xf32>
    %734 = vector.extract_strided_slice %675 {offsets = [0, 48], sizes = [8, 16], strides = [1, 1]} : vector<8x64xf32> to vector<8x16xf32>
    %735 = vector.extract_strided_slice %676 {offsets = [0, 48], sizes = [8, 16], strides = [1, 1]} : vector<8x64xf32> to vector<8x16xf32>
    %cst_294 = arith.constant dense<0.000000e+00> : vector<8x8xf32>
    %736 = tpu.matmul %733, %734, %cst_294 {dimension_numbers = #tpu.dot_dimension_numbers<[1], [1], [0], [0], [0, 0, 1, 0], [], []>} : vector<8x16xf32>, vector<8x16xf32>, vector<8x8xf32> -> vector<8x8xf32>
    %737 = arith.addf %736, %384 : vector<8x8xf32>
    %cst_295 = arith.constant dense<0xFF800000> : vector<8xf32>
    %738 = vector.multi_reduction <maximumf>, %737, %cst_295 [1] : vector<8x8xf32> to vector<8xf32>
    %739 = vector.shape_cast %738 : vector<8xf32> to vector<8x1xf32>
    %740 = vector.broadcast %739 : vector<8x1xf32> to vector<8x8xf32>
    %741 = arith.subf %737, %740 : vector<8x8xf32>
    %742 = math.exp %741 : vector<8x8xf32>
    %cst_296 = arith.constant dense<0.000000e+00> : vector<8xf32>
    %743 = vector.multi_reduction <add>, %742, %cst_296 [1] : vector<8x8xf32> to vector<8xf32>
    %744 = vector.shape_cast %743 : vector<8xf32> to vector<8x1xf32>
    %745 = tpu.reciprocal %744 {approx = true} : vector<8x1xf32> -> vector<8x1xf32>
    %746 = vector.broadcast %745 : vector<8x1xf32> to vector<8x8xf32>
    %747 = arith.mulf %742, %746 : vector<8x8xf32>
    %cst_297 = arith.constant dense<0.000000e+00> : vector<8x16xf32>
    %748 = tpu.matmul %747, %735, %cst_297 {dimension_numbers = #tpu.dot_dimension_numbers<[1], [0], [0], [1], [0, 0, 1, 1], [], []>} : vector<8x8xf32>, vector<8x16xf32>, vector<8x16xf32> -> vector<8x16xf32>
    %749 = tpu.concatenate %694, %712, %730, %748 in 1 : vector<8x16xf32>, vector<8x16xf32>, vector<8x16xf32>, vector<8x16xf32> -> vector<8x64xf32>
    %c1_298 = arith.constant 1 : index
    %c0_299 = arith.constant 0 : index
    %c0_300 = arith.constant 0 : index
    %750 = vector.load %arg19[%c1_298, %c0_299, %c0_300] : memref<2x64x64xf32, #tpu.memory_space<vmem>>, vector<1x64x64xf32>
    %751 = vector.shape_cast %750 : vector<1x64x64xf32> to vector<64x64xf32>
    %cst_301 = arith.constant dense<0.000000e+00> : vector<8x64xf32>
    %752 = tpu.matmul %749, %751, %cst_301 {dimension_numbers = #tpu.dot_dimension_numbers<[1], [0], [0], [1], [0, 0, 1, 1], [], []>} : vector<8x64xf32>, vector<64x64xf32>, vector<8x64xf32> -> vector<8x64xf32>
    %c1_302 = arith.constant 1 : index
    %c0_303 = arith.constant 0 : index
    %c0_304 = arith.constant 0 : index
    %753 = vector.load %arg20[%c1_302, %c0_303, %c0_304] : memref<2x1x64xf32, #tpu.memory_space<vmem>>, vector<1x1x64xf32>
    %754 = vector.shape_cast %753 : vector<1x1x64xf32> to vector<1x64xf32>
    %755 = vector.broadcast %754 : vector<1x64xf32> to vector<8x64xf32>
    %756 = arith.addf %752, %755 : vector<8x64xf32>
    %757 = arith.addf %664, %756 : vector<8x64xf32>
    %758 = vector.extract_strided_slice %666 {offsets = [0, 0], sizes = [1, 64], strides = [1, 1]} : vector<6x64xf32> to vector<1x64xf32>
    %759 = vector.extract_strided_slice %666 {offsets = [1, 0], sizes = [1, 64], strides = [1, 1]} : vector<6x64xf32> to vector<1x64xf32>
    %cst_305 = arith.constant dense<0.000000e+00> : vector<8xf32>
    %760 = vector.multi_reduction <add>, %757, %cst_305 [1] : vector<8x64xf32> to vector<8xf32>
    %761 = vector.shape_cast %760 : vector<8xf32> to vector<8x1xf32>
    %cst_306 = arith.constant 6.400000e+01 : f32
    %762 = vector.broadcast %cst_306 : f32 to vector<8x1xf32>
    %763 = arith.divf %761, %762 : vector<8x1xf32>
    %764 = vector.broadcast %763 : vector<8x1xf32> to vector<8x64xf32>
    %765 = arith.subf %757, %764 : vector<8x64xf32>
    %766 = arith.mulf %765, %765 : vector<8x64xf32>
    %cst_307 = arith.constant dense<0.000000e+00> : vector<8xf32>
    %767 = vector.multi_reduction <add>, %766, %cst_307 [1] : vector<8x64xf32> to vector<8xf32>
    %768 = vector.shape_cast %767 : vector<8xf32> to vector<8x1xf32>
    %cst_308 = arith.constant 6.400000e+01 : f32
    %769 = vector.broadcast %cst_308 : f32 to vector<8x1xf32>
    %770 = arith.divf %768, %769 : vector<8x1xf32>
    %cst_309 = arith.constant 9.99999974E-6 : f32
    %771 = vector.broadcast %cst_309 : f32 to vector<8x1xf32>
    %772 = arith.addf %770, %771 : vector<8x1xf32>
    %773 = math.rsqrt %772 : vector<8x1xf32>
    %774 = vector.broadcast %773 : vector<8x1xf32> to vector<8x64xf32>
    %775 = arith.mulf %765, %774 : vector<8x64xf32>
    %776 = vector.broadcast %758 : vector<1x64xf32> to vector<8x64xf32>
    %777 = arith.mulf %775, %776 : vector<8x64xf32>
    %778 = vector.broadcast %759 : vector<1x64xf32> to vector<8x64xf32>
    %779 = arith.addf %777, %778 : vector<8x64xf32>
    %c1_310 = arith.constant 1 : index
    %c0_311 = arith.constant 0 : index
    %c0_312 = arith.constant 0 : index
    %780 = vector.load %arg21[%c1_310, %c0_311, %c0_312] : memref<2x64x64xf32, #tpu.memory_space<vmem>>, vector<1x64x64xf32>
    %781 = vector.shape_cast %780 : vector<1x64x64xf32> to vector<64x64xf32>
    %cst_313 = arith.constant dense<0.000000e+00> : vector<8x64xf32>
    %782 = tpu.matmul %779, %781, %cst_313 {dimension_numbers = #tpu.dot_dimension_numbers<[1], [0], [0], [1], [0, 0, 1, 1], [], []>} : vector<8x64xf32>, vector<64x64xf32>, vector<8x64xf32> -> vector<8x64xf32>
    %c1_314 = arith.constant 1 : index
    %c0_315 = arith.constant 0 : index
    %c0_316 = arith.constant 0 : index
    %783 = vector.load %arg22[%c1_314, %c0_315, %c0_316] : memref<2x1x64xf32, #tpu.memory_space<vmem>>, vector<1x1x64xf32>
    %784 = vector.shape_cast %783 : vector<1x1x64xf32> to vector<1x64xf32>
    %785 = vector.broadcast %784 : vector<1x64xf32> to vector<8x64xf32>
    %786 = arith.addf %782, %785 : vector<8x64xf32>
    %c1_317 = arith.constant 1 : index
    %c0_318 = arith.constant 0 : index
    %c0_319 = arith.constant 0 : index
    %787 = vector.load %arg23[%c1_317, %c0_318, %c0_319] : memref<2x64x128xf32, #tpu.memory_space<vmem>>, vector<1x64x128xf32>
    %788 = vector.shape_cast %787 : vector<1x64x128xf32> to vector<64x128xf32>
    %cst_320 = arith.constant dense<0.000000e+00> : vector<4x128xf32>
    %789 = tpu.matmul %352, %788, %cst_320 {dimension_numbers = #tpu.dot_dimension_numbers<[1], [0], [0], [1], [0, 0, 1, 1], [], []>} : vector<4x64xf32>, vector<64x128xf32>, vector<4x128xf32> -> vector<4x128xf32>
    %c1_321 = arith.constant 1 : index
    %c0_322 = arith.constant 0 : index
    %c0_323 = arith.constant 0 : index
    %790 = vector.load %arg24[%c1_321, %c0_322, %c0_323] : memref<2x1x128xf32, #tpu.memory_space<vmem>>, vector<1x1x128xf32>
    %791 = vector.shape_cast %790 : vector<1x1x128xf32> to vector<1x128xf32>
    %792 = vector.broadcast %791 : vector<1x128xf32> to vector<4x128xf32>
    %793 = arith.addf %789, %792 : vector<4x128xf32>
    %794 = vector.extract_strided_slice %793 {offsets = [0, 0], sizes = [4, 64], strides = [1, 1]} : vector<4x128xf32> to vector<4x64xf32>
    %795 = vector.extract_strided_slice %793 {offsets = [0, 64], sizes = [4, 64], strides = [1, 1]} : vector<4x128xf32> to vector<4x64xf32>
    %796 = vector.extract_strided_slice %786 {offsets = [0, 0], sizes = [8, 16], strides = [1, 1]} : vector<8x64xf32> to vector<8x16xf32>
    %cst_324 = arith.constant 2.500000e-01 : f32
    %797 = vector.broadcast %cst_324 : f32 to vector<8x16xf32>
    %798 = arith.mulf %796, %797 : vector<8x16xf32>
    %799 = vector.extract_strided_slice %794 {offsets = [0, 0], sizes = [4, 16], strides = [1, 1]} : vector<4x64xf32> to vector<4x16xf32>
    %800 = vector.extract_strided_slice %795 {offsets = [0, 0], sizes = [4, 16], strides = [1, 1]} : vector<4x64xf32> to vector<4x16xf32>
    %cst_325 = arith.constant dense<0.000000e+00> : vector<8x4xf32>
    %801 = tpu.matmul %798, %799, %cst_325 {dimension_numbers = #tpu.dot_dimension_numbers<[1], [1], [0], [0], [0, 0, 1, 0], [], []>} : vector<8x16xf32>, vector<4x16xf32>, vector<8x4xf32> -> vector<8x4xf32>
    %cst_326 = arith.constant dense<0xFF800000> : vector<8xf32>
    %802 = vector.multi_reduction <maximumf>, %801, %cst_326 [1] : vector<8x4xf32> to vector<8xf32>
    %803 = vector.shape_cast %802 : vector<8xf32> to vector<8x1xf32>
    %804 = vector.broadcast %803 : vector<8x1xf32> to vector<8x4xf32>
    %805 = arith.subf %801, %804 : vector<8x4xf32>
    %806 = math.exp %805 : vector<8x4xf32>
    %cst_327 = arith.constant dense<0.000000e+00> : vector<8xf32>
    %807 = vector.multi_reduction <add>, %806, %cst_327 [1] : vector<8x4xf32> to vector<8xf32>
    %808 = vector.shape_cast %807 : vector<8xf32> to vector<8x1xf32>
    %809 = tpu.reciprocal %808 {approx = true} : vector<8x1xf32> -> vector<8x1xf32>
    %810 = vector.broadcast %809 : vector<8x1xf32> to vector<8x4xf32>
    %811 = arith.mulf %806, %810 : vector<8x4xf32>
    %cst_328 = arith.constant dense<0.000000e+00> : vector<8x16xf32>
    %812 = tpu.matmul %811, %800, %cst_328 {dimension_numbers = #tpu.dot_dimension_numbers<[1], [0], [0], [1], [0, 0, 1, 1], [], []>} : vector<8x4xf32>, vector<4x16xf32>, vector<8x16xf32> -> vector<8x16xf32>
    %813 = vector.extract_strided_slice %786 {offsets = [0, 16], sizes = [8, 16], strides = [1, 1]} : vector<8x64xf32> to vector<8x16xf32>
    %cst_329 = arith.constant 2.500000e-01 : f32
    %814 = vector.broadcast %cst_329 : f32 to vector<8x16xf32>
    %815 = arith.mulf %813, %814 : vector<8x16xf32>
    %816 = vector.extract_strided_slice %794 {offsets = [0, 16], sizes = [4, 16], strides = [1, 1]} : vector<4x64xf32> to vector<4x16xf32>
    %817 = vector.extract_strided_slice %795 {offsets = [0, 16], sizes = [4, 16], strides = [1, 1]} : vector<4x64xf32> to vector<4x16xf32>
    %cst_330 = arith.constant dense<0.000000e+00> : vector<8x4xf32>
    %818 = tpu.matmul %815, %816, %cst_330 {dimension_numbers = #tpu.dot_dimension_numbers<[1], [1], [0], [0], [0, 0, 1, 0], [], []>} : vector<8x16xf32>, vector<4x16xf32>, vector<8x4xf32> -> vector<8x4xf32>
    %cst_331 = arith.constant dense<0xFF800000> : vector<8xf32>
    %819 = vector.multi_reduction <maximumf>, %818, %cst_331 [1] : vector<8x4xf32> to vector<8xf32>
    %820 = vector.shape_cast %819 : vector<8xf32> to vector<8x1xf32>
    %821 = vector.broadcast %820 : vector<8x1xf32> to vector<8x4xf32>
    %822 = arith.subf %818, %821 : vector<8x4xf32>
    %823 = math.exp %822 : vector<8x4xf32>
    %cst_332 = arith.constant dense<0.000000e+00> : vector<8xf32>
    %824 = vector.multi_reduction <add>, %823, %cst_332 [1] : vector<8x4xf32> to vector<8xf32>
    %825 = vector.shape_cast %824 : vector<8xf32> to vector<8x1xf32>
    %826 = tpu.reciprocal %825 {approx = true} : vector<8x1xf32> -> vector<8x1xf32>
    %827 = vector.broadcast %826 : vector<8x1xf32> to vector<8x4xf32>
    %828 = arith.mulf %823, %827 : vector<8x4xf32>
    %cst_333 = arith.constant dense<0.000000e+00> : vector<8x16xf32>
    %829 = tpu.matmul %828, %817, %cst_333 {dimension_numbers = #tpu.dot_dimension_numbers<[1], [0], [0], [1], [0, 0, 1, 1], [], []>} : vector<8x4xf32>, vector<4x16xf32>, vector<8x16xf32> -> vector<8x16xf32>
    %830 = vector.extract_strided_slice %786 {offsets = [0, 32], sizes = [8, 16], strides = [1, 1]} : vector<8x64xf32> to vector<8x16xf32>
    %cst_334 = arith.constant 2.500000e-01 : f32
    %831 = vector.broadcast %cst_334 : f32 to vector<8x16xf32>
    %832 = arith.mulf %830, %831 : vector<8x16xf32>
    %833 = vector.extract_strided_slice %794 {offsets = [0, 32], sizes = [4, 16], strides = [1, 1]} : vector<4x64xf32> to vector<4x16xf32>
    %834 = vector.extract_strided_slice %795 {offsets = [0, 32], sizes = [4, 16], strides = [1, 1]} : vector<4x64xf32> to vector<4x16xf32>
    %cst_335 = arith.constant dense<0.000000e+00> : vector<8x4xf32>
    %835 = tpu.matmul %832, %833, %cst_335 {dimension_numbers = #tpu.dot_dimension_numbers<[1], [1], [0], [0], [0, 0, 1, 0], [], []>} : vector<8x16xf32>, vector<4x16xf32>, vector<8x4xf32> -> vector<8x4xf32>
    %cst_336 = arith.constant dense<0xFF800000> : vector<8xf32>
    %836 = vector.multi_reduction <maximumf>, %835, %cst_336 [1] : vector<8x4xf32> to vector<8xf32>
    %837 = vector.shape_cast %836 : vector<8xf32> to vector<8x1xf32>
    %838 = vector.broadcast %837 : vector<8x1xf32> to vector<8x4xf32>
    %839 = arith.subf %835, %838 : vector<8x4xf32>
    %840 = math.exp %839 : vector<8x4xf32>
    %cst_337 = arith.constant dense<0.000000e+00> : vector<8xf32>
    %841 = vector.multi_reduction <add>, %840, %cst_337 [1] : vector<8x4xf32> to vector<8xf32>
    %842 = vector.shape_cast %841 : vector<8xf32> to vector<8x1xf32>
    %843 = tpu.reciprocal %842 {approx = true} : vector<8x1xf32> -> vector<8x1xf32>
    %844 = vector.broadcast %843 : vector<8x1xf32> to vector<8x4xf32>
    %845 = arith.mulf %840, %844 : vector<8x4xf32>
    %cst_338 = arith.constant dense<0.000000e+00> : vector<8x16xf32>
    %846 = tpu.matmul %845, %834, %cst_338 {dimension_numbers = #tpu.dot_dimension_numbers<[1], [0], [0], [1], [0, 0, 1, 1], [], []>} : vector<8x4xf32>, vector<4x16xf32>, vector<8x16xf32> -> vector<8x16xf32>
    %847 = vector.extract_strided_slice %786 {offsets = [0, 48], sizes = [8, 16], strides = [1, 1]} : vector<8x64xf32> to vector<8x16xf32>
    %cst_339 = arith.constant 2.500000e-01 : f32
    %848 = vector.broadcast %cst_339 : f32 to vector<8x16xf32>
    %849 = arith.mulf %847, %848 : vector<8x16xf32>
    %850 = vector.extract_strided_slice %794 {offsets = [0, 48], sizes = [4, 16], strides = [1, 1]} : vector<4x64xf32> to vector<4x16xf32>
    %851 = vector.extract_strided_slice %795 {offsets = [0, 48], sizes = [4, 16], strides = [1, 1]} : vector<4x64xf32> to vector<4x16xf32>
    %cst_340 = arith.constant dense<0.000000e+00> : vector<8x4xf32>
    %852 = tpu.matmul %849, %850, %cst_340 {dimension_numbers = #tpu.dot_dimension_numbers<[1], [1], [0], [0], [0, 0, 1, 0], [], []>} : vector<8x16xf32>, vector<4x16xf32>, vector<8x4xf32> -> vector<8x4xf32>
    %cst_341 = arith.constant dense<0xFF800000> : vector<8xf32>
    %853 = vector.multi_reduction <maximumf>, %852, %cst_341 [1] : vector<8x4xf32> to vector<8xf32>
    %854 = vector.shape_cast %853 : vector<8xf32> to vector<8x1xf32>
    %855 = vector.broadcast %854 : vector<8x1xf32> to vector<8x4xf32>
    %856 = arith.subf %852, %855 : vector<8x4xf32>
    %857 = math.exp %856 : vector<8x4xf32>
    %cst_342 = arith.constant dense<0.000000e+00> : vector<8xf32>
    %858 = vector.multi_reduction <add>, %857, %cst_342 [1] : vector<8x4xf32> to vector<8xf32>
    %859 = vector.shape_cast %858 : vector<8xf32> to vector<8x1xf32>
    %860 = tpu.reciprocal %859 {approx = true} : vector<8x1xf32> -> vector<8x1xf32>
    %861 = vector.broadcast %860 : vector<8x1xf32> to vector<8x4xf32>
    %862 = arith.mulf %857, %861 : vector<8x4xf32>
    %cst_343 = arith.constant dense<0.000000e+00> : vector<8x16xf32>
    %863 = tpu.matmul %862, %851, %cst_343 {dimension_numbers = #tpu.dot_dimension_numbers<[1], [0], [0], [1], [0, 0, 1, 1], [], []>} : vector<8x4xf32>, vector<4x16xf32>, vector<8x16xf32> -> vector<8x16xf32>
    %864 = tpu.concatenate %812, %829, %846, %863 in 1 : vector<8x16xf32>, vector<8x16xf32>, vector<8x16xf32>, vector<8x16xf32> -> vector<8x64xf32>
    %c1_344 = arith.constant 1 : index
    %c0_345 = arith.constant 0 : index
    %c0_346 = arith.constant 0 : index
    %865 = vector.load %arg25[%c1_344, %c0_345, %c0_346] : memref<2x64x64xf32, #tpu.memory_space<vmem>>, vector<1x64x64xf32>
    %866 = vector.shape_cast %865 : vector<1x64x64xf32> to vector<64x64xf32>
    %cst_347 = arith.constant dense<0.000000e+00> : vector<8x64xf32>
    %867 = tpu.matmul %864, %866, %cst_347 {dimension_numbers = #tpu.dot_dimension_numbers<[1], [0], [0], [1], [0, 0, 1, 1], [], []>} : vector<8x64xf32>, vector<64x64xf32>, vector<8x64xf32> -> vector<8x64xf32>
    %c1_348 = arith.constant 1 : index
    %c0_349 = arith.constant 0 : index
    %c0_350 = arith.constant 0 : index
    %868 = vector.load %arg26[%c1_348, %c0_349, %c0_350] : memref<2x1x64xf32, #tpu.memory_space<vmem>>, vector<1x1x64xf32>
    %869 = vector.shape_cast %868 : vector<1x1x64xf32> to vector<1x64xf32>
    %870 = vector.broadcast %869 : vector<1x64xf32> to vector<8x64xf32>
    %871 = arith.addf %867, %870 : vector<8x64xf32>
    %872 = arith.addf %779, %871 : vector<8x64xf32>
    %873 = vector.extract_strided_slice %666 {offsets = [2, 0], sizes = [1, 64], strides = [1, 1]} : vector<6x64xf32> to vector<1x64xf32>
    %874 = vector.extract_strided_slice %666 {offsets = [3, 0], sizes = [1, 64], strides = [1, 1]} : vector<6x64xf32> to vector<1x64xf32>
    %cst_351 = arith.constant dense<0.000000e+00> : vector<8xf32>
    %875 = vector.multi_reduction <add>, %872, %cst_351 [1] : vector<8x64xf32> to vector<8xf32>
    %876 = vector.shape_cast %875 : vector<8xf32> to vector<8x1xf32>
    %cst_352 = arith.constant 6.400000e+01 : f32
    %877 = vector.broadcast %cst_352 : f32 to vector<8x1xf32>
    %878 = arith.divf %876, %877 : vector<8x1xf32>
    %879 = vector.broadcast %878 : vector<8x1xf32> to vector<8x64xf32>
    %880 = arith.subf %872, %879 : vector<8x64xf32>
    %881 = arith.mulf %880, %880 : vector<8x64xf32>
    %cst_353 = arith.constant dense<0.000000e+00> : vector<8xf32>
    %882 = vector.multi_reduction <add>, %881, %cst_353 [1] : vector<8x64xf32> to vector<8xf32>
    %883 = vector.shape_cast %882 : vector<8xf32> to vector<8x1xf32>
    %cst_354 = arith.constant 6.400000e+01 : f32
    %884 = vector.broadcast %cst_354 : f32 to vector<8x1xf32>
    %885 = arith.divf %883, %884 : vector<8x1xf32>
    %cst_355 = arith.constant 9.99999974E-6 : f32
    %886 = vector.broadcast %cst_355 : f32 to vector<8x1xf32>
    %887 = arith.addf %885, %886 : vector<8x1xf32>
    %888 = math.rsqrt %887 : vector<8x1xf32>
    %889 = vector.broadcast %888 : vector<8x1xf32> to vector<8x64xf32>
    %890 = arith.mulf %880, %889 : vector<8x64xf32>
    %891 = vector.broadcast %873 : vector<1x64xf32> to vector<8x64xf32>
    %892 = arith.mulf %890, %891 : vector<8x64xf32>
    %893 = vector.broadcast %874 : vector<1x64xf32> to vector<8x64xf32>
    %894 = arith.addf %892, %893 : vector<8x64xf32>
    %c1_356 = arith.constant 1 : index
    %c0_357 = arith.constant 0 : index
    %c0_358 = arith.constant 0 : index
    %895 = vector.load %arg27[%c1_356, %c0_357, %c0_358] : memref<2x64x128xf32, #tpu.memory_space<vmem>>, vector<1x64x128xf32>
    %896 = vector.shape_cast %895 : vector<1x64x128xf32> to vector<64x128xf32>
    %cst_359 = arith.constant dense<0.000000e+00> : vector<8x128xf32>
    %897 = tpu.matmul %894, %896, %cst_359 {dimension_numbers = #tpu.dot_dimension_numbers<[1], [0], [0], [1], [0, 0, 1, 1], [], []>} : vector<8x64xf32>, vector<64x128xf32>, vector<8x128xf32> -> vector<8x128xf32>
    %c1_360 = arith.constant 1 : index
    %c0_361 = arith.constant 0 : index
    %c0_362 = arith.constant 0 : index
    %898 = vector.load %arg28[%c1_360, %c0_361, %c0_362] : memref<2x1x128xf32, #tpu.memory_space<vmem>>, vector<1x1x128xf32>
    %899 = vector.shape_cast %898 : vector<1x1x128xf32> to vector<1x128xf32>
    %900 = vector.broadcast %899 : vector<1x128xf32> to vector<8x128xf32>
    %901 = arith.addf %897, %900 : vector<8x128xf32>
    %902 = arith.mulf %901, %901 : vector<8x128xf32>
    %903 = arith.mulf %901, %902 : vector<8x128xf32>
    %cst_363 = arith.constant 4.471500e-02 : f32
    %904 = vector.broadcast %cst_363 : f32 to vector<8x128xf32>
    %905 = arith.mulf %904, %903 : vector<8x128xf32>
    %906 = arith.addf %901, %905 : vector<8x128xf32>
    %cst_364 = arith.constant 0.797884583 : f32
    %907 = vector.broadcast %cst_364 : f32 to vector<8x128xf32>
    %908 = arith.mulf %907, %906 : vector<8x128xf32>
    %909 = math.tanh %908 : vector<8x128xf32>
    %cst_365 = arith.constant 1.000000e+00 : f32
    %910 = vector.broadcast %cst_365 : f32 to vector<8x128xf32>
    %911 = arith.addf %910, %909 : vector<8x128xf32>
    %cst_366 = arith.constant 5.000000e-01 : f32
    %912 = vector.broadcast %cst_366 : f32 to vector<8x128xf32>
    %913 = arith.mulf %912, %911 : vector<8x128xf32>
    %914 = arith.mulf %901, %913 : vector<8x128xf32>
    %c1_367 = arith.constant 1 : index
    %c0_368 = arith.constant 0 : index
    %c0_369 = arith.constant 0 : index
    %915 = vector.load %arg29[%c1_367, %c0_368, %c0_369] : memref<2x128x64xf32, #tpu.memory_space<vmem>>, vector<1x128x64xf32>
    %916 = vector.shape_cast %915 : vector<1x128x64xf32> to vector<128x64xf32>
    %cst_370 = arith.constant dense<0.000000e+00> : vector<8x64xf32>
    %917 = tpu.matmul %914, %916, %cst_370 {dimension_numbers = #tpu.dot_dimension_numbers<[1], [0], [0], [1], [0, 0, 1, 1], [], []>} : vector<8x128xf32>, vector<128x64xf32>, vector<8x64xf32> -> vector<8x64xf32>
    %c1_371 = arith.constant 1 : index
    %c0_372 = arith.constant 0 : index
    %c0_373 = arith.constant 0 : index
    %918 = vector.load %arg30[%c1_371, %c0_372, %c0_373] : memref<2x1x64xf32, #tpu.memory_space<vmem>>, vector<1x1x64xf32>
    %919 = vector.shape_cast %918 : vector<1x1x64xf32> to vector<1x64xf32>
    %920 = vector.broadcast %919 : vector<1x64xf32> to vector<8x64xf32>
    %921 = arith.addf %917, %920 : vector<8x64xf32>
    %922 = arith.addf %894, %921 : vector<8x64xf32>
    %923 = vector.extract_strided_slice %666 {offsets = [4, 0], sizes = [1, 64], strides = [1, 1]} : vector<6x64xf32> to vector<1x64xf32>
    %924 = vector.extract_strided_slice %666 {offsets = [5, 0], sizes = [1, 64], strides = [1, 1]} : vector<6x64xf32> to vector<1x64xf32>
    %cst_374 = arith.constant dense<0.000000e+00> : vector<8xf32>
    %925 = vector.multi_reduction <add>, %922, %cst_374 [1] : vector<8x64xf32> to vector<8xf32>
    %926 = vector.shape_cast %925 : vector<8xf32> to vector<8x1xf32>
    %cst_375 = arith.constant 6.400000e+01 : f32
    %927 = vector.broadcast %cst_375 : f32 to vector<8x1xf32>
    %928 = arith.divf %926, %927 : vector<8x1xf32>
    %929 = vector.broadcast %928 : vector<8x1xf32> to vector<8x64xf32>
    %930 = arith.subf %922, %929 : vector<8x64xf32>
    %931 = arith.mulf %930, %930 : vector<8x64xf32>
    %cst_376 = arith.constant dense<0.000000e+00> : vector<8xf32>
    %932 = vector.multi_reduction <add>, %931, %cst_376 [1] : vector<8x64xf32> to vector<8xf32>
    %933 = vector.shape_cast %932 : vector<8xf32> to vector<8x1xf32>
    %cst_377 = arith.constant 6.400000e+01 : f32
    %934 = vector.broadcast %cst_377 : f32 to vector<8x1xf32>
    %935 = arith.divf %933, %934 : vector<8x1xf32>
    %cst_378 = arith.constant 9.99999974E-6 : f32
    %936 = vector.broadcast %cst_378 : f32 to vector<8x1xf32>
    %937 = arith.addf %935, %936 : vector<8x1xf32>
    %938 = math.rsqrt %937 : vector<8x1xf32>
    %939 = vector.broadcast %938 : vector<8x1xf32> to vector<8x64xf32>
    %940 = arith.mulf %930, %939 : vector<8x64xf32>
    %941 = vector.broadcast %923 : vector<1x64xf32> to vector<8x64xf32>
    %942 = arith.mulf %940, %941 : vector<8x64xf32>
    %943 = vector.broadcast %924 : vector<1x64xf32> to vector<8x64xf32>
    %944 = arith.addf %942, %943 : vector<8x64xf32>
    %c0_379 = arith.constant 0 : index
    %c0_380 = arith.constant 0 : index
    %945 = vector.load %arg32[%c0_379, %c0_380] : memref<64x32xf32, #tpu.memory_space<vmem>>, vector<64x32xf32>
    %cst_381 = arith.constant dense<0.000000e+00> : vector<8x32xf32>
    %946 = tpu.matmul %944, %945, %cst_381 {dimension_numbers = #tpu.dot_dimension_numbers<[1], [0], [0], [1], [0, 0, 1, 1], [], []>} : vector<8x64xf32>, vector<64x32xf32>, vector<8x32xf32> -> vector<8x32xf32>
    %c0_382 = arith.constant 0 : index
    %c0_383 = arith.constant 0 : index
    %947 = vector.load %arg33[%c0_382, %c0_383] : memref<1x32xf32, #tpu.memory_space<vmem>>, vector<1x32xf32>
    %948 = vector.broadcast %947 : vector<1x32xf32> to vector<8x32xf32>
    %949 = arith.addf %946, %948 : vector<8x32xf32>
    %950 = vector.extract_strided_slice %949 {offsets = [0, 0], sizes = [8, 16], strides = [1, 1]} : vector<8x32xf32> to vector<8x16xf32>
    %cst_384 = arith.constant 9.99999993E-9 : f32
    %951 = vector.broadcast %cst_384 : f32 to vector<8x16xf32>
    %952 = arith.addf %950, %951 : vector<8x16xf32>
    %953 = vector.extract_strided_slice %949 {offsets = [0, 16], sizes = [8, 16], strides = [1, 1]} : vector<8x32xf32> to vector<8x16xf32>
    %cst_385 = arith.constant 0.000000e+00 : f32
    %954 = vector.broadcast %cst_385 : f32 to vector<8x16xf32>
    %955 = arith.maximumf %953, %954 : vector<8x16xf32>
    %956 = vector.broadcast %cst_385 : f32 to vector<8x16xf32>
    %957 = arith.subf %953, %956 : vector<8x16xf32>
    %958 = arith.cmpf one, %957, %957 : vector<8x16xf32>
    %959 = vector.broadcast %cst_385 : f32 to vector<8x16xf32>
    %960 = arith.addf %953, %959 : vector<8x16xf32>
    %961 = math.absf %957 : vector<8x16xf32>
    %cst_386 = arith.constant 0.000000e+00 : f32
    %962 = vector.broadcast %cst_386 : f32 to vector<8x16xf32>
    %963 = arith.subf %962, %961 : vector<8x16xf32>
    %964 = math.exp %963 : vector<8x16xf32>
    %965 = math.log1p %964 : vector<8x16xf32>
    %966 = arith.addf %955, %965 : vector<8x16xf32>
    %967 = arith.select %958, %960, %966 : vector<8x16xi1>, vector<8x16xf32>
    %cst_387 = arith.constant 9.99999993E-9 : f32
    %968 = vector.broadcast %cst_387 : f32 to vector<8x16xf32>
    %969 = arith.addf %967, %968 : vector<8x16xf32>
    %970 = tpu.concatenate %952, %969 in 1 : vector<8x16xf32>, vector<8x16xf32> -> vector<8x32xf32>
    %c0_388 = arith.constant 0 : index
    %c0_389 = arith.constant 0 : index
    %c0_390 = arith.constant 0 : index
    %971 = vector.load %arg34[%c0_388, %c0_389, %c0_390] : memref<1x8x32xf32, #tpu.memory_space<vmem>>, vector<1x8x32xf32>
    %972 = vector.shape_cast %971 : vector<1x8x32xf32> to vector<8x32xf32>
    %973 = vector.shape_cast %970 : vector<8x32xf32> to vector<1x8x32xf32>
    tpu.vector_store %arg34[%c0_388, %c0_389, %c0_390], %973 {strides = array<i32>} : memref<1x8x32xf32, #tpu.memory_space<vmem>>, vector<1x8x32xf32>,
    return
  }
  func.func @transform_0(%arg0: i32) -> (i32, i32, i32) {
    %c0_i32 = arith.constant 0 : i32
    %c0_i32_0 = arith.constant 0 : i32
    %c0_i32_1 = arith.constant 0 : i32
    return %arg0, %c0_i32, %c0_i32_0 : i32, i32, i32
  }
  func.func @transform_1(%arg0: i32) -> (i32, i32, i32) {
    %c0_i32 = arith.constant 0 : i32
    %c0_i32_0 = arith.constant 0 : i32
    %c0_i32_1 = arith.constant 0 : i32
    return %arg0, %c0_i32, %c0_i32_0 : i32, i32, i32
  }
  func.func @transform_2(%arg0: i32) -> (i32, i32) {
    %c0_i32 = arith.constant 0 : i32
    %c0_i32_0 = arith.constant 0 : i32
    %c0_i32_1 = arith.constant 0 : i32
    return %c0_i32, %c0_i32_0 : i32, i32
  }
  func.func @transform_3(%arg0: i32) -> (i32, i32) {
    %c0_i32 = arith.constant 0 : i32
    %c0_i32_0 = arith.constant 0 : i32
    %c0_i32_1 = arith.constant 0 : i32
    return %c0_i32, %c0_i32_0 : i32, i32
  }
  func.func @transform_4(%arg0: i32) -> (i32, i32) {
    %c0_i32 = arith.constant 0 : i32
    %c0_i32_0 = arith.constant 0 : i32
    %c0_i32_1 = arith.constant 0 : i32
    return %c0_i32, %c0_i32_0 : i32, i32
  }
  func.func @transform_5(%arg0: i32) -> (i32, i32) {
    %c0_i32 = arith.constant 0 : i32
    %c0_i32_0 = arith.constant 0 : i32
    %c0_i32_1 = arith.constant 0 : i32
    return %c0_i32, %c0_i32_0 : i32, i32
  }
  func.func @transform_6(%arg0: i32) -> (i32, i32) {
    %c0_i32 = arith.constant 0 : i32
    %c0_i32_0 = arith.constant 0 : i32
    %c0_i32_1 = arith.constant 0 : i32
    return %c0_i32, %c0_i32_0 : i32, i32
  }
  func.func @transform_7(%arg0: i32) -> (i32, i32, i32) {
    %c0_i32 = arith.constant 0 : i32
    %c0_i32_0 = arith.constant 0 : i32
    %c0_i32_1 = arith.constant 0 : i32
    %c0_i32_2 = arith.constant 0 : i32
    return %c0_i32, %c0_i32_0, %c0_i32_1 : i32, i32, i32
  }
  func.func @transform_8(%arg0: i32) -> (i32, i32, i32) {
    %c0_i32 = arith.constant 0 : i32
    %c0_i32_0 = arith.constant 0 : i32
    %c0_i32_1 = arith.constant 0 : i32
    %c0_i32_2 = arith.constant 0 : i32
    return %c0_i32, %c0_i32_0, %c0_i32_1 : i32, i32, i32
  }
  func.func @transform_9(%arg0: i32) -> (i32, i32, i32) {
    %c0_i32 = arith.constant 0 : i32
    %c0_i32_0 = arith.constant 0 : i32
    %c0_i32_1 = arith.constant 0 : i32
    %c0_i32_2 = arith.constant 0 : i32
    return %c0_i32, %c0_i32_0, %c0_i32_1 : i32, i32, i32
  }
  func.func @transform_10(%arg0: i32) -> (i32, i32, i32) {
    %c0_i32 = arith.constant 0 : i32
    %c0_i32_0 = arith.constant 0 : i32
    %c0_i32_1 = arith.constant 0 : i32
    %c0_i32_2 = arith.constant 0 : i32
    return %c0_i32, %c0_i32_0, %c0_i32_1 : i32, i32, i32
  }
  func.func @transform_11(%arg0: i32) -> (i32, i32, i32) {
    %c0_i32 = arith.constant 0 : i32
    %c0_i32_0 = arith.constant 0 : i32
    %c0_i32_1 = arith.constant 0 : i32
    %c0_i32_2 = arith.constant 0 : i32
    return %c0_i32, %c0_i32_0, %c0_i32_1 : i32, i32, i32
  }
  func.func @transform_12(%arg0: i32) -> (i32, i32, i32) {
    %c0_i32 = arith.constant 0 : i32
    %c0_i32_0 = arith.constant 0 : i32
    %c0_i32_1 = arith.constant 0 : i32
    %c0_i32_2 = arith.constant 0 : i32
    return %c0_i32, %c0_i32_0, %c0_i32_1 : i32, i32, i32
  }
  func.func @transform_13(%arg0: i32) -> (i32, i32, i32) {
    %c0_i32 = arith.constant 0 : i32
    %c0_i32_0 = arith.constant 0 : i32
    %c0_i32_1 = arith.constant 0 : i32
    %c0_i32_2 = arith.constant 0 : i32
    return %c0_i32, %c0_i32_0, %c0_i32_1 : i32, i32, i32
  }
  func.func @transform_14(%arg0: i32) -> (i32, i32, i32) {
    %c0_i32 = arith.constant 0 : i32
    %c0_i32_0 = arith.constant 0 : i32
    %c0_i32_1 = arith.constant 0 : i32
    %c0_i32_2 = arith.constant 0 : i32
    return %c0_i32, %c0_i32_0, %c0_i32_1 : i32, i32, i32
  }
  func.func @transform_15(%arg0: i32) -> (i32, i32, i32) {
    %c0_i32 = arith.constant 0 : i32
    %c0_i32_0 = arith.constant 0 : i32
    %c0_i32_1 = arith.constant 0 : i32
    %c0_i32_2 = arith.constant 0 : i32
    return %c0_i32, %c0_i32_0, %c0_i32_1 : i32, i32, i32
  }
  func.func @transform_16(%arg0: i32) -> (i32, i32, i32) {
    %c0_i32 = arith.constant 0 : i32
    %c0_i32_0 = arith.constant 0 : i32
    %c0_i32_1 = arith.constant 0 : i32
    %c0_i32_2 = arith.constant 0 : i32
    return %c0_i32, %c0_i32_0, %c0_i32_1 : i32, i32, i32
  }
  func.func @transform_17(%arg0: i32) -> (i32, i32, i32) {
    %c0_i32 = arith.constant 0 : i32
    %c0_i32_0 = arith.constant 0 : i32
    %c0_i32_1 = arith.constant 0 : i32
    %c0_i32_2 = arith.constant 0 : i32
    return %c0_i32, %c0_i32_0, %c0_i32_1 : i32, i32, i32
  }
  func.func @transform_18(%arg0: i32) -> (i32, i32, i32) {
    %c0_i32 = arith.constant 0 : i32
    %c0_i32_0 = arith.constant 0 : i32
    %c0_i32_1 = arith.constant 0 : i32
    %c0_i32_2 = arith.constant 0 : i32
    return %c0_i32, %c0_i32_0, %c0_i32_1 : i32, i32, i32
  }
  func.func @transform_19(%arg0: i32) -> (i32, i32, i32) {
    %c0_i32 = arith.constant 0 : i32
    %c0_i32_0 = arith.constant 0 : i32
    %c0_i32_1 = arith.constant 0 : i32
    %c0_i32_2 = arith.constant 0 : i32
    return %c0_i32, %c0_i32_0, %c0_i32_1 : i32, i32, i32
  }
  func.func @transform_20(%arg0: i32) -> (i32, i32, i32) {
    %c0_i32 = arith.constant 0 : i32
    %c0_i32_0 = arith.constant 0 : i32
    %c0_i32_1 = arith.constant 0 : i32
    %c0_i32_2 = arith.constant 0 : i32
    return %c0_i32, %c0_i32_0, %c0_i32_1 : i32, i32, i32
  }
  func.func @transform_21(%arg0: i32) -> (i32, i32, i32) {
    %c0_i32 = arith.constant 0 : i32
    %c0_i32_0 = arith.constant 0 : i32
    %c0_i32_1 = arith.constant 0 : i32
    %c0_i32_2 = arith.constant 0 : i32
    return %c0_i32, %c0_i32_0, %c0_i32_1 : i32, i32, i32
  }
  func.func @transform_22(%arg0: i32) -> (i32, i32, i32) {
    %c0_i32 = arith.constant 0 : i32
    %c0_i32_0 = arith.constant 0 : i32
    %c0_i32_1 = arith.constant 0 : i32
    %c0_i32_2 = arith.constant 0 : i32
    return %c0_i32, %c0_i32_0, %c0_i32_1 : i32, i32, i32
  }
  func.func @transform_23(%arg0: i32) -> (i32, i32, i32) {
    %c0_i32 = arith.constant 0 : i32
    %c0_i32_0 = arith.constant 0 : i32
    %c0_i32_1 = arith.constant 0 : i32
    %c0_i32_2 = arith.constant 0 : i32
    return %c0_i32, %c0_i32_0, %c0_i32_1 : i32, i32, i32
  }
  func.func @transform_24(%arg0: i32) -> (i32, i32, i32) {
    %c0_i32 = arith.constant 0 : i32
    %c0_i32_0 = arith.constant 0 : i32
    %c0_i32_1 = arith.constant 0 : i32
    %c0_i32_2 = arith.constant 0 : i32
    return %c0_i32, %c0_i32_0, %c0_i32_1 : i32, i32, i32
  }
  func.func @transform_25(%arg0: i32) -> (i32, i32, i32) {
    %c0_i32 = arith.constant 0 : i32
    %c0_i32_0 = arith.constant 0 : i32
    %c0_i32_1 = arith.constant 0 : i32
    %c0_i32_2 = arith.constant 0 : i32
    return %c0_i32, %c0_i32_0, %c0_i32_1 : i32, i32, i32
  }
  func.func @transform_26(%arg0: i32) -> (i32, i32, i32) {
    %c0_i32 = arith.constant 0 : i32
    %c0_i32_0 = arith.constant 0 : i32
    %c0_i32_1 = arith.constant 0 : i32
    %c0_i32_2 = arith.constant 0 : i32
    return %c0_i32, %c0_i32_0, %c0_i32_1 : i32, i32, i32
  }
  func.func @transform_27(%arg0: i32) -> (i32, i32, i32) {
    %c0_i32 = arith.constant 0 : i32
    %c0_i32_0 = arith.constant 0 : i32
    %c0_i32_1 = arith.constant 0 : i32
    %c0_i32_2 = arith.constant 0 : i32
    return %c0_i32, %c0_i32_0, %c0_i32_1 : i32, i32, i32
  }
  func.func @transform_28(%arg0: i32) -> (i32, i32, i32) {
    %c0_i32 = arith.constant 0 : i32
    %c0_i32_0 = arith.constant 0 : i32
    %c0_i32_1 = arith.constant 0 : i32
    %c0_i32_2 = arith.constant 0 : i32
    return %c0_i32, %c0_i32_0, %c0_i32_1 : i32, i32, i32
  }
  func.func @transform_29(%arg0: i32) -> (i32, i32, i32) {
    %c0_i32 = arith.constant 0 : i32
    %c0_i32_0 = arith.constant 0 : i32
    %c0_i32_1 = arith.constant 0 : i32
    %c0_i32_2 = arith.constant 0 : i32
    return %c0_i32, %c0_i32_0, %c0_i32_1 : i32, i32, i32
  }
  func.func @transform_30(%arg0: i32) -> (i32, i32, i32) {
    %c0_i32 = arith.constant 0 : i32
    %c0_i32_0 = arith.constant 0 : i32
    %c0_i32_1 = arith.constant 0 : i32
    %c0_i32_2 = arith.constant 0 : i32
    return %c0_i32, %c0_i32_0, %c0_i32_1 : i32, i32, i32
  }
  func.func @transform_31(%arg0: i32) -> (i32, i32) {
    %c0_i32 = arith.constant 0 : i32
    %c0_i32_0 = arith.constant 0 : i32
    %c0_i32_1 = arith.constant 0 : i32
    return %c0_i32, %c0_i32_0 : i32, i32
  }
  func.func @transform_32(%arg0: i32) -> (i32, i32) {
    %c0_i32 = arith.constant 0 : i32
    %c0_i32_0 = arith.constant 0 : i32
    %c0_i32_1 = arith.constant 0 : i32
    return %c0_i32, %c0_i32_0 : i32, i32
  }
  func.func @transform_33(%arg0: i32) -> (i32, i32, i32) {
    %c0_i32 = arith.constant 0 : i32
    %c0_i32_0 = arith.constant 0 : i32
    %c0_i32_1 = arith.constant 0 : i32
    return %arg0, %c0_i32, %c0_i32_0 : i32, i32, i32
  }
}

</mosaic_0001>

<bundles_post_ra>
// kernel: tpu_custom_call.1
= control target key start
LH: loop header
LB: loop body
LE: loop exit
PB: predicated region body
PF: predicated region fallthrough
CT: control target
= control target key end

     0   :  { %s10940_s6 = smov 1   ;;  %s10941_s10 = smov 2   ;;  %s12633_s0 = inlined_call_operand.smem [shape: u32[34], index: -1, kind: input, shape index: {}] }
   0x1   :  { %s11025_s5 = sld [smem:[%s12633_s0]]   ;;  %s10942_s14 = smov 3  }
   0x2   :  { %s11030_s9 = sld [smem:[%s12633_s0 + %s10940_s6]]   ;;  %s10943_s18 = smov 4  }
   0x3   :  { %s11035_s13 = sld [smem:[%s12633_s0 + %s10941_s10]]   ;;  %s10944_s22 = smov 5  }
   0x4   :  { %s11040_s17 = sld [smem:[%s12633_s0 + %s10942_s14]]   ;;  %s10945_s26 = smov 6  }
   0x5   :  { %s11045_s21 = sld [smem:[%s12633_s0 + %s10943_s18]]   ;;  %s10946_s30 = smov 7  }
   0x6   :  { %s11050_s25 = sld [smem:[%s12633_s0 + %s10944_s22]]   ;;  %s10947_s4 = smov 8  }
   0x7   :  { %12656 = sst [smem:[#allocation57_spill]] %s11025_s5  ;;  %s10948_s10 = smov 9  }
   0x8   :  { %12657 = sst [smem:[#allocation58_spill]] %s11030_s9  ;;  %s10949_s15 = smov 10  }
   0x9   :  { %12658 = sst [smem:[#allocation59_spill]] %s11035_s13  ;;  %s10950_s20 = smov 11  }
   0xa   :  { %12659 = sst [smem:[#allocation60_spill]] %s11040_s17  ;;  %s10952_s1 = smov 13  }
   0xb   :  { %12660 = sst [smem:[#allocation61_spill]] %s11045_s21  ;;  %s10953_s7 = smov 14  }
   0xc   :  { %s11055_s29 = sld [smem:[%s12633_s0 + %s10945_s26]]   ;;  %s10951_s26 = smov 12  }
   0xd   :  { %s11060_s3 = sld [smem:[%s12633_s0 + %s10946_s30]]   ;;  %s10955_s22 = smov 16  }
   0xe   :  { %s11065_s8 = sld [smem:[%s12633_s0 + %s10947_s4]]   ;;  %s10956_s28 = smov 17  }
   0xf   :  { %s11070_s14 = sld [smem:[%s12633_s0 + %s10948_s10]]  }
  0x10   :  { %s11075_s19 = sld [smem:[%s12633_s0 + %s10949_s15]]   ;;  %s10954_s15 = smov 15  }
  0x11   :  { %s11080_s24 = sld [smem:[%s12633_s0 + %s10950_s20]]  }
  0x12   :  { %s11085_s30 = sld [smem:[%s12633_s0 + %s10951_s26]]  }
  0x13   :  { %12661 = sst [smem:[#allocation62_spill]] %s11060_s3 }
  0x14   :  { %12662 = sst [smem:[#allocation63_spill]] %s11065_s8 }
  0x15   :  { %12663 = sst [smem:[#allocation64_spill]] %s11070_s14 }
  0x16   :  { %12664 = sst [smem:[#allocation65_spill]] %s11075_s19 }
  0x17   :  { %12665 = sst [smem:[#allocation66_spill]] %s11080_s24 }
  0x18   :  { %12666 = sst [smem:[#allocation67_spill]] %s11085_s30 }
  0x19   :  { %s11090_s6 = sld [smem:[%s12633_s0 + %s10952_s1]]  }
  0x1a   :  { %s11095_s12 = sld [smem:[%s12633_s0 + %s10953_s7]]   ;;  %s10957_s7 = smov 18  }
  0x1b   :  { %s11100_s20 = sld [smem:[%s12633_s0 + %s10954_s15]]   ;;  %s10958_s15 = smov 19  }
  0x1c   :  { %s11105_s27 = sld [smem:[%s12633_s0 + %s10955_s22]]   ;;  %s10959_s22 = smov 20  }
  0x1d   :  { %s11110_s4 = sld [smem:[%s12633_s0 + %s10956_s28]]   ;;  %s10960_s28 = smov 21  }
  0x1e   :  { %s11120_s14 = sld [smem:[%s12633_s0 + %s10958_s15]]   ;;  %s10962_s15 = smov 23  }
  0x1f   :  { %12667 = sst [smem:[#allocation68_spill]] %s11090_s6 }
  0x20   :  { %12668 = sst [smem:[#allocation69_spill]] %s11095_s12 }
  0x21   :  { %12669 = sst [smem:[#allocation70_spill]] %s11100_s20 }
  0x22   :  { %12670 = sst [smem:[#allocation71_spill]] %s11105_s27 }
  0x23   :  { %12671 = sst [smem:[#allocation72_spill]] %s11110_s4 }
  0x24   :  { %s11115_s6 = sld [smem:[%s12633_s0 + %s10957_s7]]   ;;  %s10961_s7 = smov 22  }
  0x25   :  { %12673 = sst [smem:[#allocation74_spill]] %s11120_s14 }
  0x26   :  { %s11125_s27 = sld [smem:[%s12633_s0 + %s10959_s22]]   ;;  %s10963_s22 = smov 24  }
  0x27   :  { %s11130_s3 = sld [smem:[%s12633_s0 + %s10960_s28]]   ;;  %s10964_s28 = smov 25  }
  0x28   :  { %s11135_s9 = sld [smem:[%s12633_s0 + %s10961_s7]]   ;;  %s10965_s7 = smov 26  }
  0x29   :  { %s11140_s5 = sld [smem:[%s12633_s0 + %s10962_s15]]   ;;  %s10966_s15 = smov 27  }
  0x2a   :  { %12672 = sst [smem:[#allocation73_spill]] %s11115_s6 }
  0x2b   :  { %s11150_s6 = sld [smem:[%s12633_s0 + %s10964_s28]]   ;;  %s10968_s28 = smov 29  }
  0x2c   :  { %12674 = sst [smem:[#allocation75_spill]] %s11125_s27 }
  0x2d   :  { %12675 = sst [smem:[#allocation76_spill]] %s11130_s3 }
  0x2e   :  { %12676 = sst [smem:[#allocation77_spill]] %s11135_s9 }
  0x2f   :  { %12677 = sst [smem:[#allocation78_spill]] %s11140_s5 }
  0x30   :  { %s11145_s27 = sld [smem:[%s12633_s0 + %s10963_s22]]   ;;  %s10967_s22 = smov 28  }
  0x31   :  { %12679 = sst [smem:[#allocation80_spill]] %s11150_s6 }
  0x32   :  { %s11155_s9 = sld [smem:[%s12633_s0 + %s10965_s7]]   ;;  %s10969_s7 = smov 30  }
  0x33   :  { %s11160_s20 = sld [smem:[%s12633_s0 + %s10966_s15]]   ;;  %s10970_s15 = smov 31  }
  0x34   :  { %s11170_s30 = sld [smem:[%s12633_s0 + %s10968_s28]]   ;;  %s10972_s28 = smov 33  }
  0x35   :  { %s11180_s19 = sld [smem:[%s12633_s0 + %s10970_s15]]  }
  0x36   :  { %12678 = sst [smem:[#allocation79_spill]] %s11145_s27 }
  0x37   :  { %s11165_s27 = sld [smem:[%s12633_s0 + %s10967_s22]]   ;;  %s10971_s22 = smov 32  }
  0x38   :  { %12680 = sst [smem:[#allocation81_spill]] %s11155_s9 }
  0x39   :  { %12681 = sst [smem:[#allocation82_spill]] %s11160_s20 }
  0x3a   :  { %12683 = sst [smem:[#allocation84_spill]] %s11170_s30 }
  0x3b   :  { %s11175_s9 = sld [smem:[%s12633_s0 + %s10969_s7]]  }
  0x3c   :  { %s11190_s30 = sld [smem:[%s12633_s0 + %s10972_s28]]  }
  0x3d   :  { %12682 = sst [smem:[#allocation83_spill]] %s11165_s27 }
  0x3e   :  { %s11185_s27 = sld [smem:[%s12633_s0 + %s10971_s22]]  }
  0x42   :  { %12685 = sst [smem:[#allocation86_spill]] %s11190_s30 }
  0x44   :  { %12684 = sst [smem:[#allocation85_spill]] %s11185_s27 }
  0x45   :  { %72 = vsyncpa [#allocation3], 0 }
  0x46   :  { %74 = vsyncpa [#allocation3 + $0x1], 0 }
  0x47   :  { %75 = vsyncpa [#allocation6], 0 }
  0x48   :  { %77 = vsyncpa [#allocation6 + $0x1], 0 }
  0x49   :  { %78 = vsyncpa [#allocation9], 0 }
  0x4a   :  { %79 = vsyncpa [#allocation12], 0 }
  0x4b   :  { %80 = vsyncpa [#allocation15], 0 }
  0x4c   :  { %81 = vsyncpa [#allocation18], 0 }
  0x4d   :  { %82 = vsyncpa [#allocation21], 0 }
  0x4e   :  { %83 = vsyncpa [#allocation24], 0 }
  0x4f   :  { %84 = vsyncpa [#allocation27], 0 }
  0x50   :  { %85 = vsyncpa [#allocation30], 0 }
  0x51   :  { %86 = vsyncpa [#allocation33], 0 }
  0x52   :  { %87 = vsyncpa [#allocation36], 0 }
  0x53   :  { %88 = vsyncpa [#allocation39], 0 }
  0x54   :  { %89 = vsyncpa [#allocation4], 0 }
  0x55   :  { %91 = vsyncpa [#allocation4 + $0x1], 0  ;;  %s11192_s7 = smov 0   ;;  %s11194_s0 = smov 0  }
  0x56   :  { %s11196_s10 = smov 0   ;;  %s11198_s11 = smov 0  }
  0x57 LB: > { %s10973_s15 = smov [#allocation7]   ;;  %s11213_s18 = sadd.s32 4294967295, %s10938_s11   ;;  %s10938_s11 = sphi %s11198_s11, %s12762_s11   ;;  %s10934_s10 = sphi %s11196_s10, %s12761_s10   ;;  %s10930_s0 = sphi %s11194_s0, %s12760_s0   ;;  %s10926_s7 = sphi %s11192_s7, %s12759_s7  }
  0x58   : > { %s844_s16 = sshll.u32 %s10973_s15, 4  ;;  %p8454_p0 = scmp.ge.s32.totalorder %s10938_s11, 1  ;;  %s845_s16 = int_to_ptr.vmem [resolvable:$true] %s844_s16 }
  0x59   : > { %p12642_p1 = scmp.eq.s32.totalorder %s11213_s18, 0  ;;  %p831_p2 = scmp.lt.s32.totalorder %s10938_s11, 3 }
  0x5a   : > { %s10974_s23 = smov [#allocation8]   ;;  %s10975_s28 = smov [#allocation11]  }
  0x5b   : > { %p11218_p3 = pnand %p8454_p0, %p831_p2  ;;  %s855_s26 = sshll.u32 %s10974_s23, 4  ;;  %s856_s26 = int_to_ptr.vmem [resolvable:$true] %s855_s26 }
  0x5c   : > { %s879_s1 = sshll.u32 %s10975_s28, 4  ;;  %s10976_s15 = smov [#allocation14]   ;;  %s11231_s1 = int_to_ptr.vmem [resolvable:$true] %s879_s1 }
  0x5d   : > { %s12686_s22 = scalar_select %p11218_p3, 1, 0 }
  0x5e   : > { %p9800_p5 = pneg %p11218_p3  ;;  %s11233_s30 = sshll.u32 %s10976_s15, 4  ;;  %s904_s30 = int_to_ptr.vmem [resolvable:$true] %s11233_s30 }
  0x5f   : > { %s10179_s23 = scalar_lea.vmem %s845_s16, 128  ;;  %p10187_p11 = scmp.lt.s32.totalorder %s845_s16, %s845_s16 }
  0x60   : > { %p11227_p6 = pnand %p9800_p5, %p12642_p1  ;;  %p10180_p8 = scmp.ne.s32.totalorder %s845_s16, %s10179_s23 }
  0x61   : > { %p10188_p12 = scmp.lt.s32.totalorder %s10179_s23, %s10179_s23 }
  0x62   : > { %p11237_p7 = pneg %p11227_p6 }
  0x63   : > { %p10189_p13 = por %p10188_p12, %p10187_p11 }
  0x64   : > { %p10182_p9 = pnand %p10180_p8, %p11237_p7 }
  0x66   : > { %p10183_p10 = pneg %p10182_p9 }
  0x68   : > { %p10190_p0 = pnand %p10189_p13, %p10183_p10 }
  0x6a   : > { %10193 = shalt.err (!%p10190_p0)
}
  0x6b   : > { %s12689_s13 = sld [smem:[#allocation59_spill]]  ;;  %s10205_s28 = scalar_lea.vmem %s856_s26, 64 }
  0x6c   : > { %p10206_p2 = scmp.ne.s32.totalorder %s856_s26, %s10205_s28  ;;  %p10213_p1 = scmp.lt.s32.totalorder %s856_s26, %s856_s26 }
  0x6d   : > { %p10214_p3 = scmp.lt.s32.totalorder %s10205_s28, %s10205_s28 }
  0x6e   : > { %p10208_p5 = pnand %p10206_p2, %p11237_p7 }
  0x6f   : > { %p10215_p8 = por %p10214_p3, %p10213_p1 }
  0x70   : > { %p10209_p4 = pneg %p10208_p5 }
  0x71   : > { %9803 = dma.hbm_to_vmem [thread:$0]  (!%p11227_p6), %s12689_s13, 128, %s845_s16, [#allocation6]  }
  0x72   : > { %p10216_p9 = pnand %p10215_p8, %p10209_p4 }
  0x74   : > { %10219 = shalt.err (!%p10216_p9)
}
  0x75   : > { %s12690_s17 = sld [smem:[#allocation60_spill]]  ;;  %s10231_s15 = scalar_lea.vmem %s11231_s1, 128 }
  0x76   : > { %p10232_p10 = scmp.ne.s32.totalorder %s11231_s1, %s10231_s15  ;;  %p10239_p13 = scmp.lt.s32.totalorder %s11231_s1, %s11231_s1 }
  0x77   : > { %p10240_p0 = scmp.lt.s32.totalorder %s10231_s15, %s10231_s15 }
  0x78   : > { %p10234_p11 = pnand %p10232_p10, %p11237_p7 }
  0x79   : > { %p10241_p2 = por %p10240_p0, %p10239_p13 }
  0x7a   : > { %p10235_p12 = pneg %p10234_p11 }
  0x7b   : > { %9806 = dma.hbm_to_vmem [thread:$0]  (!%p11227_p6), %s12690_s17, 64, %s856_s26, [#allocation9]  }
  0x7c   : > { %p10242_p1 = pnand %p10241_p2, %p10235_p12 }
  0x7e   : > { %10245 = shalt.err (!%p10242_p1)
}
  0x7f   : > { %9812 = dma.hbm_to_vmem [thread:$0]  (!%p11227_p6), %s11050_s25, 128, %s11231_s1, [#allocation12]  }
  0x80   : > { %s10257_s16 = scalar_lea.vmem %s904_s30, 64  ;;  %p10265_p8 = scmp.lt.s32.totalorder %s904_s30, %s904_s30 }
  0x81   : > { %p10258_p3 = scmp.ne.s32.totalorder %s904_s30, %s10257_s16  ;;  %p10266_p9 = scmp.lt.s32.totalorder %s10257_s16, %s10257_s16 }
  0x83   : > { %p10260_p4 = pnand %p10258_p3, %p11237_p7  ;;  %p10267_p10 = por %p10266_p9, %p10265_p8 }
  0x85   : > { %p10261_p5 = pneg %p10260_p4 }
  0x87   : > { %p10268_p11 = pnand %p10267_p10, %p10261_p5 }
  0x89   : > { %10271 = shalt.err (!%p10268_p11)
}
  0x8a   : > { %s12644_s26 = smov 32   ;;  %s12691_s8 = sld [smem:[#allocation63_spill]] }
  0x8b   : > { %s12645_s23 = smov 2   ;;  %s10979_s1 = smov [#allocation17]  }
  0x8c   : > { %s932_s28 = sshll.u32 %s10979_s1, 4  ;;  %s933_s28 = int_to_ptr.vmem [resolvable:$true] %s932_s28 }
  0x8d   : > { %s10283_s15 = scalar_lea.vmem %s933_s28, 2048  ;;  %p10291_p2 = scmp.lt.s32.totalorder %s933_s28, %s933_s28 }
  0x8e   : > { %p10284_p12 = scmp.ne.s32.totalorder %s933_s28, %s10283_s15  ;;  %p10292_p1 = scmp.lt.s32.totalorder %s10283_s15, %s10283_s15 }
  0x90   : > { %9818 = dma.hbm_to_vmem [thread:$0]  (!%p11227_p6), %s12691_s8, 64, %s904_s30, [#allocation15], %s12644_s26, %s12644_s26, %s12645_s23  }
  0x91   : > { %p10286_p13 = pnand %p10284_p12, %p11237_p7  ;;  %p10293_p3 = por %p10292_p1, %p10291_p2 }
  0x93   : > { %p10287_p0 = pneg %p10286_p13 }
  0x95   : > { %p10294_p4 = pnand %p10293_p3, %p10287_p0 }
  0x97   : > { %10297 = shalt.err (!%p10294_p4)
}
  0x98   : > { %s12646_s16 = smov 128   ;;  %s12692_s24 = sld [smem:[#allocation66_spill]] }
  0x99   : > { %s12648_s13 = smov 8   ;;  %s10982_s30 = smov [#allocation20]  }
  0x9a   : > { %s961_s1 = sshll.u32 %s10982_s30, 4  ;;  %s10983_s26 = smov [#allocation23]   ;;  %s962_s1 = int_to_ptr.vmem [resolvable:$true] %s961_s1 }
  0x9b   : > { %s990_s23 = sshll.u32 %s10983_s26, 4  ;;  %s10309_s8 = scalar_lea.vmem %s962_s1, 32  ;;  %s991_s23 = int_to_ptr.vmem [resolvable:$true] %s990_s23 }
  0x9c   : > { %p10310_p5 = scmp.ne.s32.totalorder %s962_s1, %s10309_s8  ;;  %p10317_p10 = scmp.lt.s32.totalorder %s962_s1, %s962_s1 }
  0x9d   : > { %p10318_p11 = scmp.lt.s32.totalorder %s10309_s8, %s10309_s8 }
  0x9e   : > { %9824 = dma.hbm_to_vmem [thread:$0]  (!%p11227_p6), %s12692_s24, 2048, %s933_s28, [#allocation18], %s12646_s16, %s12646_s16, %s12648_s13  }
  0x9f   : > { %p10312_p8 = pnand %p10310_p5, %p11237_p7  ;;  %p10319_p12 = por %p10318_p11, %p10317_p10 }
  0xa1   : > { %p10313_p9 = pneg %p10312_p8 }
  0xa3   : > { %p10320_p13 = pnand %p10319_p12, %p10313_p9 }
  0xa5   : > { %10323 = shalt.err (!%p10320_p13)
}
  0xa6   : > { %s12650_s15 = smov 16   ;;  %s12693_s12 = sld [smem:[#allocation69_spill]] }
  0xa7   : > { %s12652_s28 = smov 1   ;;  %s10335_s26 = scalar_lea.vmem %s991_s23, 64 }
  0xa8   : > { %p10336_p0 = scmp.ne.s32.totalorder %s991_s23, %s10335_s26  ;;  %p10343_p3 = scmp.lt.s32.totalorder %s991_s23, %s991_s23 }
  0xa9   : > { %p10344_p4 = scmp.lt.s32.totalorder %s10335_s26, %s10335_s26 }
  0xaa   : > { %p10338_p2 = pnand %p10336_p0, %p11237_p7 }
  0xab   : > { %p10345_p5 = por %p10344_p4, %p10343_p3 }
  0xac   : > { %9830 = dma.hbm_to_vmem [thread:$0]  (!%p11227_p6), %s12693_s12, 32, %s962_s1, [#allocation21], %s12650_s15, %s12650_s15, %s12652_s28  }
  0xad   : > { %p10339_p1 = pneg %p10338_p2 }
  0xaf   : > { %p10346_p8 = pnand %p10345_p5, %p10339_p1 }
  0xb1   : > { %10349 = shalt.err (!%p10346_p8)
}
  0xb2   : > { %s12694_s8 = smov 2   ;;  %s12695_s30 = smov 32  }
  0xb3   : > { %s12696_s4 = sld [smem:[#allocation72_spill]]  ;;  %s10986_s1 = smov [#allocation26]  }
  0xb4   : > { %s1016_s16 = sshll.u32 %s10986_s1, 4  ;;  %s10987_s13 = smov [#allocation29]   ;;  %s1017_s16 = int_to_ptr.vmem [resolvable:$true] %s1016_s16 }
  0xb5   : > { %s1042_s15 = sshll.u32 %s10987_s13, 4  ;;  %s10361_s28 = scalar_lea.vmem %s1017_s16, 32  ;;  %s1043_s15 = int_to_ptr.vmem [resolvable:$true] %s1042_s15 }
  0xb6   : > { %p10362_p9 = scmp.ne.s32.totalorder %s1017_s16, %s10361_s28  ;;  %p10369_p12 = scmp.lt.s32.totalorder %s1017_s16, %s1017_s16 }
  0xb7   : > { %p10370_p13 = scmp.lt.s32.totalorder %s10361_s28, %s10361_s28 }
  0xb8   : > { %p10364_p10 = pnand %p10362_p9, %p11237_p7 }
  0xb9   : > { %9836 = dma.hbm_to_vmem [thread:$0]  (!%p11227_p6), %s12696_s4, 64, %s991_s23, [#allocation24], %s12695_s30, %s12695_s30, %s12694_s8  }
  0xba   : > { %p10365_p11 = pneg %p10364_p10  ;;  %p10371_p0 = por %p10370_p13, %p10369_p12 }
  0xbc   : > { %p10372_p2 = pnand %p10371_p0, %p10365_p11 }
  0xbe   : > { %10375 = shalt.err (!%p10372_p2)
}
  0xbf   : > { %s12697_s26 = smov 1   ;;  %s12698_s12 = smov 16  }
  0xc0   : > { %s12699_s14 = sld [smem:[#allocation74_spill]]  ;;  %s10387_s13 = scalar_lea.vmem %s1043_s15, 32 }
  0xc1   : > { %p10388_p1 = scmp.ne.s32.totalorder %s1043_s15, %s10387_s13  ;;  %p10395_p5 = scmp.lt.s32.totalorder %s1043_s15, %s1043_s15 }
  0xc2   : > { %p10396_p8 = scmp.lt.s32.totalorder %s10387_s13, %s10387_s13 }
  0xc3   : > { %p10390_p3 = pnand %p10388_p1, %p11237_p7 }
  0xc4   : > { %p10397_p9 = por %p10396_p8, %p10395_p5 }
  0xc5   : > { %p10391_p4 = pneg %p10390_p3 }
  0xc6   : > { %9842 = dma.hbm_to_vmem [thread:$0]  (!%p11227_p6), %s12699_s14, 32, %s1017_s16, [#allocation27], %s12698_s12, %s12698_s12, %s12697_s26  }
  0xc7   : > { %p10398_p10 = pnand %p10397_p9, %p10391_p4 }
  0xc9   : > { %10401 = shalt.err (!%p10398_p10)
}
  0xca   : > { %s12700_s3 = sld [smem:[#allocation76_spill]]  ;;  %s10988_s23 = smov [#allocation32]  }
  0xcb   : > { %s1068_s16 = sshll.u32 %s10988_s23, 4  ;;  %s10989_s28 = smov [#allocation35]   ;;  %s1069_s16 = int_to_ptr.vmem [resolvable:$true] %s1068_s16 }
  0xcc   : > { %s1094_s8 = sshll.u32 %s10989_s28, 4  ;;  %s10413_s30 = scalar_lea.vmem %s1069_s16, 32  ;;  %s1095_s8 = int_to_ptr.vmem [resolvable:$true] %s1094_s8 }
  0xcd   : > { %p10414_p11 = scmp.ne.s32.totalorder %s1069_s16, %s10413_s30  ;;  %p10421_p0 = scmp.lt.s32.totalorder %s1069_s16, %s1069_s16 }
  0xce   : > { %p10422_p2 = scmp.lt.s32.totalorder %s10413_s30, %s10413_s30 }
  0xcf   : > { %p10416_p12 = pnand %p10414_p11, %p11237_p7 }
  0xd0   : > { %9848 = dma.hbm_to_vmem [thread:$0]  (!%p11227_p6), %s12700_s3, 32, %s1043_s15, [#allocation30], %s12698_s12, %s12698_s12, %s12697_s26  }
  0xd1   : > { %p10417_p13 = pneg %p10416_p12  ;;  %p10423_p1 = por %p10422_p2, %p10421_p0 }
  0xd3   : > { %p10424_p3 = pnand %p10423_p1, %p10417_p13 }
  0xd5   : > { %10427 = shalt.err (!%p10424_p3)
}
  0xd6   : > { %s12701_s5 = sld [smem:[#allocation78_spill]]  ;;  %s10439_s15 = scalar_lea.vmem %s1095_s8, 32 }
  0xd7   : > { %p10440_p4 = scmp.ne.s32.totalorder %s1095_s8, %s10439_s15  ;;  %p10447_p9 = scmp.lt.s32.totalorder %s1095_s8, %s1095_s8 }
  0xd8   : > { %p10448_p10 = scmp.lt.s32.totalorder %s10439_s15, %s10439_s15 }
  0xd9   : > { %p10442_p5 = pnand %p10440_p4, %p11237_p7 }
  0xda   : > { %p10449_p11 = por %p10448_p10, %p10447_p9 }
  0xdb   : > { %p10443_p8 = pneg %p10442_p5 }
  0xdc   : > { %9854 = dma.hbm_to_vmem [thread:$0]  (!%p11227_p6), %s12701_s5, 32, %s1069_s16, [#allocation33], %s12698_s12, %s12698_s12, %s12697_s26  }
  0xdd   : > { %p10450_p12 = pnand %p10449_p11, %p10443_p8 }
  0xdf   : > { %10453 = shalt.err (!%p10450_p12)
}
  0xe0   : > { %s12702_s6 = sld [smem:[#allocation80_spill]]  ;;  %s10990_s1 = smov [#allocation38]  }
  0xe1   : > { %s1120_s13 = sshll.u32 %s10990_s1, 4  ;;  %s10991_s23 = smov [#allocation10]   ;;  %s1121_s13 = int_to_ptr.vmem [resolvable:$true] %s1120_s13 }
  0xe2   : > { %s865_s16 = sshll.u32 %s10991_s23, 4  ;;  %s10465_s28 = scalar_lea.vmem %s1121_s13, 32  ;;  %s866_s16 = int_to_ptr.vmem [resolvable:$true] %s865_s16 }
  0xe3   : > { %p10466_p13 = scmp.ne.s32.totalorder %s1121_s13, %s10465_s28  ;;  %p10473_p1 = scmp.lt.s32.totalorder %s1121_s13, %s1121_s13 }
  0xe4   : > { %p10474_p3 = scmp.lt.s32.totalorder %s10465_s28, %s10465_s28 }
  0xe5   : > { %p10468_p0 = pnand %p10466_p13, %p11237_p7 }
  0xe6   : > { %9860 = dma.hbm_to_vmem [thread:$0]  (!%p11227_p6), %s12702_s6, 32, %s1095_s8, [#allocation36], %s12698_s12, %s12698_s12, %s12697_s26  }
  0xe7   : > { %p10469_p2 = pneg %p10468_p0  ;;  %p10475_p4 = por %p10474_p3, %p10473_p1 }
  0xe9   : > { %p10476_p5 = pnand %p10475_p4, %p10469_p2 }
  0xeb   : > { %10479 = shalt.err (!%p10476_p5)
}
  0xec   : > { %s12703_s20 = sld [smem:[#allocation82_spill]]  ;;  %s10491_s8 = scalar_lea.vmem %s866_s16, 512 }
  0xed   : > { %p10492_p8 = scmp.ne.s32.totalorder %s866_s16, %s10491_s8  ;;  %p10499_p11 = scmp.lt.s32.totalorder %s866_s16, %s866_s16 }
  0xee   : > { %p10500_p12 = scmp.lt.s32.totalorder %s10491_s8, %s10491_s8 }
  0xef   : > { %p10494_p9 = pnand %p10492_p8, %p11237_p7 }
  0xf0   : > { %p10501_p13 = por %p10500_p12, %p10499_p11 }
  0xf1   : > { %p10495_p10 = pneg %p10494_p9 }
  0xf2   : > { %9866 = dma.hbm_to_vmem [thread:$0]  (!%p11227_p6), %s12703_s20, 32, %s1121_s13, [#allocation39], %s12698_s12, %s12698_s12, %s12697_s26  }
  0xf3   : > { %p10502_p0 = pnand %p10501_p13, %p10495_p10 }
  0xf5   : > { %10505 = shalt.err (!%p10502_p0)
}
  0xf6   : > { %s12704_s30 = smov 8   ;;  %s12705_s15 = smov 128  }
  0xf7   : > { %s12706_s21 = sld [smem:[#allocation61_spill]]  ;;  %s10992_s1 = smov [#allocation13]  }
  0xf8   : > { %s890_s13 = sshll.u32 %s10992_s1, 4  ;;  %s10993_s23 = smov [#allocation16]   ;;  %s891_s13 = int_to_ptr.vmem [resolvable:$true] %s890_s13 }
  0xf9   : > { %s919_s28 = sshll.u32 %s10993_s23, 4  ;;  %s10517_s3 = scalar_lea.vmem %s891_s13, 64  ;;  %s920_s28 = int_to_ptr.vmem [resolvable:$true] %s919_s28 }
  0xfa   : > { %p10518_p2 = scmp.ne.s32.totalorder %s891_s13, %s10517_s3  ;;  %p10525_p4 = scmp.lt.s32.totalorder %s891_s13, %s891_s13 }
  0xfb   : > { %p10526_p5 = scmp.lt.s32.totalorder %s10517_s3, %s10517_s3 }
  0xfc   : > { %p10520_p1 = pnand %p10518_p2, %p11237_p7 }
  0xfd   : > { %9809 = dma.hbm_to_vmem [thread:$0]  (!%p11227_p6), %s12706_s21, 512, %s866_s16, [#allocation9], %s12705_s15, %s12705_s15, %s12704_s30  }
  0xfe   : > { %p10521_p3 = pneg %p10520_p1  ;;  %p10527_p8 = por %p10526_p5, %p10525_p4 }
 0x100   : > { %p10528_p9 = pnand %p10527_p8, %p10521_p3 }
 0x102   : > { %10531 = shalt.err (!%p10528_p9)
}
 0x103   : > { %9815 = dma.hbm_to_vmem [thread:$0]  (!%p11227_p6), %s11055_s29, 64, %s891_s13, [#allocation12]  }
 0x104   : > { %s10543_s16 = scalar_lea.vmem %s920_s28, 32  ;;  %p10551_p13 = scmp.lt.s32.totalorder %s920_s28, %s920_s28 }
 0x105   : > { %p10544_p10 = scmp.ne.s32.totalorder %s920_s28, %s10543_s16  ;;  %p10552_p0 = scmp.lt.s32.totalorder %s10543_s16, %s10543_s16 }
 0x107   : > { %p10546_p11 = pnand %p10544_p10, %p11237_p7  ;;  %p10553_p2 = por %p10552_p0, %p10551_p13 }
 0x109   : > { %p10547_p12 = pneg %p10546_p11 }
 0x10b   : > { %p10554_p1 = pnand %p10553_p2, %p10547_p12 }
 0x10d   : > { %10557 = shalt.err (!%p10554_p1)
}
 0x10e   : > { %s12707_s3 = sld [smem:[#allocation65_spill]]  ;;  %s10994_s8 = smov [#allocation19]  }
 0x10f   : > { %s945_s1 = sshll.u32 %s10994_s8, 4  ;;  %s10995_s13 = smov [#allocation22]   ;;  %s946_s1 = int_to_ptr.vmem [resolvable:$true] %s945_s1 }
 0x110   : > { %s974_s23 = sshll.u32 %s10995_s13, 4  ;;  %s10569_s4 = scalar_lea.vmem %s946_s1, 32  ;;  %s975_s23 = int_to_ptr.vmem [resolvable:$true] %s974_s23 }
 0x111   : > { %p10570_p3 = scmp.ne.s32.totalorder %s946_s1, %s10569_s4  ;;  %p10577_p8 = scmp.lt.s32.totalorder %s946_s1, %s946_s1 }
 0x112   : > { %p10578_p9 = scmp.lt.s32.totalorder %s10569_s4, %s10569_s4 }
 0x113   : > { %p10572_p4 = pnand %p10570_p3, %p11237_p7 }
 0x114   : > { %9821 = dma.hbm_to_vmem [thread:$0]  (!%p11227_p6), %s12707_s3, 32, %s920_s28, [#allocation15], %s12698_s12, %s12698_s12, %s12697_s26  }
 0x115   : > { %p10573_p5 = pneg %p10572_p4  ;;  %p10579_p10 = por %p10578_p9, %p10577_p8 }
 0x117   : > { %p10580_p11 = pnand %p10579_p10, %p10573_p5 }
 0x119   : > { %10583 = shalt.err (!%p10580_p11)
}
 0x11a   : > { %s12708_s28 = sld [smem:[#allocation67_spill]]  ;;  %s10595_s16 = scalar_lea.vmem %s975_s23, 128 }
 0x11b   : > { %p10596_p12 = scmp.ne.s32.totalorder %s975_s23, %s10595_s16  ;;  %p10603_p2 = scmp.lt.s32.totalorder %s975_s23, %s975_s23 }
 0x11c   : > { %p10604_p1 = scmp.lt.s32.totalorder %s10595_s16, %s10595_s16 }
 0x11d   : > { %p10598_p13 = pnand %p10596_p12, %p11237_p7 }
 0x11e   : > { %p10605_p3 = por %p10604_p1, %p10603_p2 }
 0x11f   : > { %p10599_p0 = pneg %p10598_p13 }
 0x120   : > { %9827 = dma.hbm_to_vmem [thread:$0]  (!%p11227_p6), %s12708_s28, 32, %s946_s1, [#allocation18], %s12698_s12, %s12698_s12, %s12697_s26  }
 0x121   : > { %p10606_p4 = pnand %p10605_p3, %p10599_p0 }
 0x123   : > { %10609 = shalt.err (!%p10606_p4)
}
 0x124   : > { %s10996_s4 = smov 64   ;;  %s12709_s3 = sld [smem:[#allocation70_spill]] }
 0x125   : > { %s10997_s8 = smov 4   ;;  %s10998_s13 = smov [#allocation25]  }
 0x126   : > { %s1003_s1 = sshll.u32 %s10998_s13, 4  ;;  %s10999_s28 = smov [#allocation28]   ;;  %s1004_s1 = int_to_ptr.vmem [resolvable:$true] %s1003_s1 }
 0x127   : > { %s1029_s5 = sshll.u32 %s10999_s28, 4  ;;  %s10621_s6 = scalar_lea.vmem %s1004_s1, 2048  ;;  %s1030_s5 = int_to_ptr.vmem [resolvable:$true] %s1029_s5 }
 0x128   : > { %p10622_p5 = scmp.ne.s32.totalorder %s1004_s1, %s10621_s6  ;;  %p10629_p10 = scmp.lt.s32.totalorder %s1004_s1, %s1004_s1 }
 0x129   : > { %p10630_p11 = scmp.lt.s32.totalorder %s10621_s6, %s10621_s6 }
 0x12a   : > { %9833 = dma.hbm_to_vmem [thread:$0]  (!%p11227_p6), %s12709_s3, 128, %s975_s23, [#allocation21], %s10996_s4, %s10996_s4, %s10997_s8  }
 0x12b   : > { %p10624_p8 = pnand %p10622_p5, %p11237_p7  ;;  %p10631_p12 = por %p10630_p11, %p10629_p10 }
 0x12d   : > { %p10625_p9 = pneg %p10624_p8 }
 0x12f   : > { %p10632_p13 = pnand %p10631_p12, %p10625_p9 }
 0x131   : > { %10635 = shalt.err (!%p10632_p13)
}
 0x132   : > { %s12710_s23 = sld [smem:[#allocation73_spill]]  ;;  %s10647_s16 = scalar_lea.vmem %s1030_s5, 2048 }
 0x133   : > { %p10648_p0 = scmp.ne.s32.totalorder %s1030_s5, %s10647_s16  ;;  %p10655_p3 = scmp.lt.s32.totalorder %s1030_s5, %s1030_s5 }
 0x134   : > { %p10656_p4 = scmp.lt.s32.totalorder %s10647_s16, %s10647_s16 }
 0x135   : > { %p10650_p2 = pnand %p10648_p0, %p11237_p7 }
 0x136   : > { %p10657_p5 = por %p10656_p4, %p10655_p3 }
 0x137   : > { %p10651_p1 = pneg %p10650_p2 }
 0x138   : > { %9839 = dma.hbm_to_vmem [thread:$0]  (!%p11227_p6), %s12710_s23, 2048, %s1004_s1, [#allocation24], %s12705_s15, %s12705_s15, %s12704_s30  }
 0x139   : > { %p10658_p8 = pnand %p10657_p5, %p10651_p1 }
 0x13b   : > { %10661 = shalt.err (!%p10658_p8)
}
 0x13c   : > { %s12711_s6 = sld [smem:[#allocation75_spill]]  ;;  %s11000_s4 = smov [#allocation31]  }
 0x13d   : > { %s1055_s3 = sshll.u32 %s11000_s4, 4  ;;  %s11001_s8 = smov [#allocation34]   ;;  %s1056_s3 = int_to_ptr.vmem [resolvable:$true] %s1055_s3 }
 0x13e   : > { %s1081_s13 = sshll.u32 %s11001_s8, 4  ;;  %s10673_s1 = scalar_lea.vmem %s1056_s3, 2048  ;;  %s1082_s13 = int_to_ptr.vmem [resolvable:$true] %s1081_s13 }
 0x13f   : > { %p10674_p9 = scmp.ne.s32.totalorder %s1056_s3, %s10673_s1  ;;  %p10681_p12 = scmp.lt.s32.totalorder %s1056_s3, %s1056_s3 }
 0x140   : > { %p10682_p13 = scmp.lt.s32.totalorder %s10673_s1, %s10673_s1 }
 0x141   : > { %p10676_p10 = pnand %p10674_p9, %p11237_p7 }
 0x142   : > { %9845 = dma.hbm_to_vmem [thread:$0]  (!%p11227_p6), %s12711_s6, 2048, %s1030_s5, [#allocation27], %s12705_s15, %s12705_s15, %s12704_s30  }
 0x143   : > { %p10677_p11 = pneg %p10676_p10  ;;  %p10683_p0 = por %p10682_p13, %p10681_p12 }
 0x145   : > { %p10684_p2 = pnand %p10683_p0, %p10677_p11 }
 0x147   : > { %10687 = shalt.err (!%p10684_p2)
}
 0x148   : > { %s12712_s5 = sld [smem:[#allocation77_spill]]  ;;  %s10699_s28 = scalar_lea.vmem %s1082_s13, 2048 }
 0x149   : > { %p10700_p1 = scmp.ne.s32.totalorder %s1082_s13, %s10699_s28  ;;  %p10707_p5 = scmp.lt.s32.totalorder %s1082_s13, %s1082_s13 }
 0x14a   : > { %p10708_p8 = scmp.lt.s32.totalorder %s10699_s28, %s10699_s28 }
 0x14b   : > { %p10702_p3 = pnand %p10700_p1, %p11237_p7 }
 0x14c   : > { %p10709_p9 = por %p10708_p8, %p10707_p5 }
 0x14d   : > { %p10703_p4 = pneg %p10702_p3 }
 0x14e   : > { %9851 = dma.hbm_to_vmem [thread:$0]  (!%p11227_p6), %s12712_s5, 2048, %s1056_s3, [#allocation30], %s12705_s15, %s12705_s15, %s12704_s30  }
 0x14f   : > { %p10710_p10 = pnand %p10709_p9, %p10703_p4 }
 0x151   : > { %10713 = shalt.err (!%p10710_p10)
}
 0x152   : > { %s12713_s23 = sld [smem:[#allocation79_spill]]  ;;  %s11002_s16 = smov [#allocation37]  }
 0x153   : > { %s1107_s6 = sshll.u32 %s11002_s16, 4  ;;  %s11003_s4 = smov [#allocation40]   ;;  %s1108_s6 = int_to_ptr.vmem [resolvable:$true] %s1107_s6 }
 0x154   : > { %s1136_s3 = sshll.u32 %s11003_s4, 4  ;;  %s10725_s8 = scalar_lea.vmem %s1108_s6, 2048  ;;  %s1137_s3 = int_to_ptr.vmem [resolvable:$true] %s1136_s3 }
 0x155   : > { %p10726_p11 = scmp.ne.s32.totalorder %s1108_s6, %s10725_s8  ;;  %p10733_p0 = scmp.lt.s32.totalorder %s1108_s6, %s1108_s6 }
 0x156   : > { %p10734_p2 = scmp.lt.s32.totalorder %s10725_s8, %s10725_s8 }
 0x157   : > { %p10728_p12 = pnand %p10726_p11, %p11237_p7 }
 0x158   : > { %9857 = dma.hbm_to_vmem [thread:$0]  (!%p11227_p6), %s12713_s23, 2048, %s1082_s13, [#allocation33], %s12705_s15, %s12705_s15, %s12704_s30  }
 0x159   : > { %p10729_p13 = pneg %p10728_p12  ;;  %p10735_p1 = por %p10734_p2, %p10733_p0 }
 0x15b   : > { %p10736_p3 = pnand %p10735_p1, %p10729_p13 }
 0x15d   : > { %10739 = shalt.err (!%p10736_p3)
}
 0x15e   : > { %s12714_s13 = sld [smem:[#allocation81_spill]]  ;;  %s10751_s1 = scalar_lea.vmem %s1137_s3, 32 }
 0x15f   : > { %p10752_p4 = scmp.ne.s32.totalorder %s1137_s3, %s10751_s1  ;;  %p10759_p9 = scmp.lt.s32.totalorder %s1137_s3, %s1137_s3 }
 0x160   : > { %p10760_p10 = scmp.lt.s32.totalorder %s10751_s1, %s10751_s1 }
 0x161   : > { %p10754_p5 = pnand %p10752_p4, %p11237_p7 }
 0x162   : > { %p10761_p11 = por %p10760_p10, %p10759_p9 }
 0x163   : > { %p10755_p8 = pneg %p10754_p5 }
 0x164   : > { %9863 = dma.hbm_to_vmem [thread:$0]  (!%p11227_p6), %s12714_s13, 2048, %s1108_s6, [#allocation36], %s12705_s15, %s12705_s15, %s12704_s30  }
 0x165   : > { %p10762_p12 = pnand %p10761_p11, %p10755_p8 }
 0x167   : > { %10765 = shalt.err (!%p10762_p12)
}
 0x168   : > { %s12715_s5 = sld [smem:[#allocation84_spill]]  ;;  %s8453_s27 = sadd.s32 4294967294, %s10938_s11  }
 0x169   : > { %s11418_s2 = sadd.s32 1, %s10938_s11   ;;  %s104_s30 = sadd.s32 1, %s10934_s10 }
 0x16a   : > { %s101_s15 = ssub.s32 %s10938_s11, %s11418_s2  ;;  %s12716_s28 = sld [smem:[#allocation57_spill]] }
 0x16b   : > { %p111_p7 = scmp.ne.s32.totalorder %s10934_s10, %s10930_s0  ;;  %p102_p13 = scmp.eq.s32.totalorder %s101_s15, 0 }
 0x16c   : > { %p112_p0 = scmp.eq.s32.totalorder %s10938_s11, 0  ;;  %p117_p2 = scmp.ne.s32.totalorder %s10930_s0, %s10926_s7 }
 0x16d   : > { %p818_p1 = scmp.eq.s32.totalorder %s11213_s18, 1  ;;  %p12717_p4 = scmp.eq.s32.totalorder %s11213_s18, 0 }
 0x16e   : > { %9869 = dma.hbm_to_vmem [thread:$0]  (!%p11227_p6), %s12715_s5, 32, %s1137_s3, [#allocation39], %s12698_s12, %s12698_s12, %s12697_s26  }
 0x16f   : > { %s11430_s23 = scalar_select %p102_p13, %s10934_s10, %s104_s30  }
 0x170   : > { %p113_p3 = por %p112_p0, %p111_p7  ;;  %p11434_p6 = por %p12717_p4, %p117_p2 }
 0x171   : > { %p11438_p5 = por %p818_p1, %p111_p7  ;;  %p824_p8 = scmp.eq.s32.totalorder %s8453_s27, 1 }
 0x172   : > { %s12718_s12 = scalar_select %p11434_p6, 1, 0 }
 0x173   : > { %s12719_s26 = scalar_select %p11438_p5, 1, 0 }
 0x174   : > { %p9904_p9 = scmp.lt.s32.totalorder %s10938_s11, 2  ;;  %s11444_s16 = sand.u32 1, %s10934_s10  }
 0x175   : > { %p11446_p10 = por %p824_p8, %p117_p2  ;;  %s8479_s4 = sshll.u32 %s11444_s16, 2 }
 0x176   : > { %s8480_s3 = sshll.u32 %s10938_s11, 6  ;;  %s1163_s13 = scalar_lea.vmem [#allocation2], %s8479_s4 }
 0x177   : > { %s12720_s6 = scalar_select %p11446_p10, 1, 0 }
 0x178   : > { %s11453_s8 = scalar_lea.hbm %s12716_s28, %s8480_s3  ;;  %s1170_s1 = sshll.u32 %s1163_s13, 4  ;;  %s1171_s1 = int_to_ptr.vmem [resolvable:$true] %s1170_s1 }
 0x179   : > { %p11455_p11 = pnand %p9904_p9, %p113_p3  ;;  %s1160_s30 = scalar_lea.sflag [#allocation3], %s11444_s16 }
 0x17a   : > { %s10766_s15 = scalar_lea.hbm %s11453_s8, 64  ;;  %s10771_s3 = scalar_lea.hbm %s12716_s28, 128 }
 0x17b   : > { %p10767_p12 = scmp.ne.s32.totalorder %s11453_s8, %s10766_s15  ;;  %p10768_p7 = pneg %p11455_p11 }
 0x17c   : > { %p10772_p2 = scmp.lt.s32.totalorder %s11453_s8, %s12716_s28  ;;  %p10773_p1 = scmp.lt.s32.totalorder %s10771_s3, %s10766_s15 }
 0x17d   : > { %p10769_p13 = pnand %p10768_p7, %p10767_p12 }
 0x17e   : > { %p10774_p3 = por %p10773_p1, %p10772_p2 }
 0x17f   : > { %p10770_p0 = pneg %p10769_p13 }
 0x181   : > { %p10775_p4 = pnand %p10774_p3, %p10770_p0 }
 0x183   : > { %10778 = shalt.err (!%p10775_p4)
}
 0x184   : > { %s10779_s4 = scalar_lea.vmem %s1171_s1, 64  ;;  %s11004_s13 = smov [#allocation2]  }
 0x185   : > { %p10780_p8 = scmp.ne.s32.totalorder %s1171_s1, %s10779_s4  ;;  %s10784_s27 = sshll.u32 %s11004_s13, 4  ;;  %s10785_s27 = int_to_ptr.vmem [resolvable:$false] %s10784_s27 }
 0x186   : > { %s10786_s14 = scalar_lea.vmem %s10785_s27, 128  ;;  %p10787_p5 = scmp.lt.s32.totalorder %s1171_s1, %s10785_s27 }
 0x187   : > { %p10782_p9 = pnand %p10780_p8, %p10768_p7  ;;  %p10788_p12 = scmp.lt.s32.totalorder %s10786_s14, %s10779_s4 }
 0x189   : > { %p10783_p10 = pneg %p10782_p9  ;;  %p10789_p13 = por %p10788_p12, %p10787_p5 }
 0x18b   : > { %p10790_p6 = pnand %p10789_p13, %p10783_p10 }
 0x18d   : > { %10793 = shalt.err (!%p10790_p6)
}
 0x18e   : > { %s12722_s15 = sld [smem:[#allocation58_spill]]  ;;  %s8481_s3 = sshll.u32 %s11444_s16, 3 }
 0x18f   : > { %9873 = dma.hbm_to_vmem [thread:$0]  (!%p11455_p11), %s11453_s8, 64, %s1171_s1, %s1160_s30  }
 0x190   : > { %s8482_s13 = sshll.u32 %s10938_s11, 7  ;;  %s1181_s14 = scalar_lea.vmem [#allocation5], %s8481_s3 }
 0x191   : > { %s1188_s27 = sshll.u32 %s1181_s14, 4  ;;  %s12723_s4 = sand.u32 1, %s10938_s11   ;;  %s1189_s27 = int_to_ptr.vmem [resolvable:$true] %s1188_s27 }
 0x192   : > { %s1178_s20 = scalar_lea.sflag [#allocation6], %s12723_s4 }
 0x194   : > { %s11480_s17 = scalar_lea.hbm %s12722_s15, %s8482_s13  ;;  %s10799_s24 = scalar_lea.hbm %s12722_s15, 256 }
 0x195   : > { %s10794_s21 = scalar_lea.hbm %s11480_s17, 128  ;;  %p10800_p0 = scmp.lt.s32.totalorder %s11480_s17, %s12722_s15 }
 0x196   : > { %p10795_p6 = scmp.ne.s32.totalorder %s11480_s17, %s10794_s21  ;;  %p10801_p2 = scmp.lt.s32.totalorder %s10799_s24, %s10794_s21 }
 0x198   : > { %p10797_p5 = pnand %p10795_p6, %p10768_p7  ;;  %p10802_p1 = por %p10801_p2, %p10800_p0 }
 0x19a   : > { %p10798_p10 = pneg %p10797_p5 }
 0x19c   : > { %p10803_p3 = pnand %p10802_p1, %p10798_p10 }
 0x19e   : > { %10806 = shalt.err (!%p10803_p3)
}
 0x19f   : > { %s10807_s16 = scalar_lea.vmem %s1189_s27, 128  ;;  %s11005_s8 = smov [#allocation5]  }
 0x1a0   : > { %p10808_p4 = scmp.ne.s32.totalorder %s1189_s27, %s10807_s16  ;;  %s10812_s1 = sshll.u32 %s11005_s8, 4  ;;  %s10813_s1 = int_to_ptr.vmem [resolvable:$false] %s10812_s1 }
 0x1a1   : > { %s10814_s30 = scalar_lea.vmem %s10813_s1, 256  ;;  %p10815_p12 = scmp.lt.s32.totalorder %s1189_s27, %s10813_s1 }
 0x1a2   : > { %p10810_p8 = pnand %p10808_p4, %p10768_p7  ;;  %p10816_p13 = scmp.lt.s32.totalorder %s10814_s30, %s10807_s16 }
 0x1a4   : > { %p10811_p9 = pneg %p10810_p8  ;;  %p10817_p6 = por %p10816_p13, %p10815_p12 }
 0x1a6   : > { %p10818_p5 = pnand %p10817_p6, %p10811_p9 }
 0x1a8   : > { %10821 = shalt.err (!%p10818_p5)
}
 0x1a9   : > { %9876 = dma.hbm_to_vmem [thread:$0]  (!%p11455_p11), %s11480_s17, 128, %s1189_s27, %s1178_s20  }
 0x1aa   : > { %p12724_p10 = scmp.ne.s32.totalorder %s12686_s22, 0 }
 0x1ab   : > { %s11501_s21 = sand.u32 (!%p12724_p10), 1, %s10930_s0   ;;  %p12725_p7 = scmp.ne.s32.totalorder (!%p12724_p10), %s12718_s12, 0 }
 0x1ac   : > { %1197 = sbr.rel (%p12724_p10) target bundleno = 17205 (0x4335), region = 152  ;;  %s8484_s24 = sshll.u32 (!%p12724_p10), %s11501_s21, 2 }
 0x1ad   : > { %s1200_s3 = scalar_lea.sflag (!%p12724_p10), [#allocation3], %s11501_s21  ;;  %s11505_s13 = scalar_lea.vmem (!%p12724_p10), [#allocation2], %s8484_s24 }
 0x1b1   : > { %10865 = dma.done.wait (%p12725_p7), %s1200_s3, 64  }
 0x1b2   : > { %10867 = vsyncadd (%p12725_p7), %s1200_s3, 4294967232  ;;  %s1208_s17 = sand.u32 1, %s11213_s18   ;;  %s8485_s20 = sshll.u32 %s11501_s21, 3 }
 0x1b3   : > { %s1209_s22 = scalar_lea.sflag [#allocation6], %s1208_s17  ;;  %s11515_s5 = scalar_lea.vmem [#allocation5], %s8485_s20 }
 0x1b4   : > { %10869 = dma.done.wait (%p12725_p7), %s1209_s22, 128  }
 0x1b5   : > { %10871 = vsyncadd (%p12725_p7), %s1209_s22, 4294967168  ;;  %p12726_p11 = scmp.eq.s32.totalorder %s11213_s18, 0 }
 0x1b7   : > { %10873 = dma.done.wait (%p12726_p11), [#allocation6], 128   ;;  %p12727_p0 = pmov %p12726_p11 }
 0x1b9   : > { %10875 = vsyncadd (%p12727_p0), [#allocation6], 4294967168  ;;  %p12728_p2 = pmov %p12727_p0 }
 0x1ba   : > { %p12729_p1 = pmov %p12727_p0 }
 0x1bb   : > { %10877 = dma.done.wait (%p12728_p2), [#allocation9], 576  }
 0x1bc   : > { %10879 = vsyncadd (%p12729_p1), [#allocation9], 4294966720  ;;  %p12730_p3 = pmov %p12727_p0 }
 0x1bd   : > { %p12731_p4 = pmov %p12727_p0 }
 0x1be   : > { %10881 = dma.done.wait (%p12730_p3), [#allocation12], 192  }
 0x1bf   : > { %10883 = vsyncadd (%p12731_p4), [#allocation12], 4294967104  ;;  %p12732_p8 = pmov %p12727_p0 }
 0x1c0   : > { %p12733_p9 = pmov %p12727_p0 }
 0x1c1   : > { %10885 = dma.done.wait (%p12732_p8), [#allocation15], 96  }
 0x1c2   : > { %10887 = vsyncadd (%p12733_p9), [#allocation15], 4294967200  ;;  %p12734_p12 = pmov %p12727_p0 }
 0x1c3   : > { %p12735_p13 = pmov %p12727_p0 }
 0x1c4   : > { %10889 = dma.done.wait (%p12734_p12), [#allocation18], 2080  }
 0x1c5   : > { %10891 = vsyncadd (%p12735_p13), [#allocation18], 4294965216  ;;  %p12736_p6 = pmov %p12727_p0 }
 0x1c6   : > { %p12737_p5 = pmov %p12727_p0 }
 0x1c7   : > { %10893 = dma.done.wait (%p12736_p6), [#allocation21], 160  }
 0x1c8   : > { %10895 = vsyncadd (%p12737_p5), [#allocation21], 4294967136  ;;  %p12738_p10 = pmov %p12727_p0 }
 0x1c9   : > { %p12739_p7 = pmov %p12727_p0 }
 0x1ca   : > { %10897 = dma.done.wait (%p12738_p10), [#allocation24], 2112  }
 0x1cb   : > { %10899 = vsyncadd (%p12739_p7), [#allocation24], 4294965184  ;;  %p12740_p11 = pmov %p12727_p0 }
 0x1cd   : > { %10901 = dma.done.wait (%p12740_p11), [#allocation27], 2080  }
 0x1ce   : > { %10903 = vsyncadd (%p12727_p0), [#allocation27], 4294965216  ;;  %p12741_p2 = pmov %p12727_p0 }
 0x1cf   : > { %p12742_p1 = pmov %p12727_p0 }
 0x1d0   : > { %10905 = dma.done.wait (%p12741_p2), [#allocation30], 2080  }
 0x1d1   : > { %10907 = vsyncadd (%p12742_p1), [#allocation30], 4294965216  ;;  %p12743_p3 = pmov %p12727_p0 }
 0x1d2   : > { %p12744_p4 = pmov %p12727_p0 }
 0x1d3   : > { %10909 = dma.done.wait (%p12743_p3), [#allocation33], 2080  }
 0x1d4   : > { %10911 = vsyncadd (%p12744_p4), [#allocation33], 4294965216  ;;  %p12745_p8 = pmov %p12727_p0 }
 0x1d5   : > { %p12746_p9 = pmov %p12727_p0 }
 0x1d6   : > { %10913 = dma.done.wait (%p12745_p8), [#allocation36], 2080  }
 0x1d7   : > { %10915 = vsyncadd (%p12746_p9), [#allocation36], 4294965216  ;;  %p12747_p12 = pmov %p12727_p0 }
 0x1d8   : > { %p12748_p13 = pmov %p12727_p0 }
 0x1d9   : > { %10917 = dma.done.wait (%p12747_p12), [#allocation39], 64  }
 0x1da   : > { %10919 = vsyncadd (%p12748_p13), [#allocation39], 4294967232  ;;  %v11006_v0 = vmov 0.0   ;;  %vm11007_vm0 = vmmov 0   ;;  %vm1397_vm1 = vcmask 64512   ;;  %v1395_v1 = vld [vmem:[#allocation7] sm:$0xff]  ;;  %v1486_v32 = vlaneseq }
 0x1db   : > { %9021 = vmatprep.subr.mxu0 %v11006_v0  ;;  %9023 = vmatprep.mubr.msk.f32.mxu0 %vm11007_vm0, %v11006_v0  ;;  %v1392_v2 = vld [vmem:[%s11505_s13] sm:$0xf]  ;;  %s12749_s12 = sld [smem:[#allocation62_spill]]  ;;  %vm1471_vm2 = vcmask 519168   ;;  %v1394_v35 = vld [vmem:[#allocation13] sm:$0xf] }
 0x1dc   : > { %1593 = vmatprep.mubr.f32.mxu1 %v11006_v0  ;;  %9022 = vmatpush3.msra.mxu0 %v1395_v1  ;;  %v1396_v3 = vld [vmem:[#allocation8] sm:$0xf]  ;;  %v11598_v33 = vshrl.u32 %v1486_v32, 7  ;;  %vm1525_vm3 = vcmask 523264   ;;  %v1513_v43 = vld [vmem:[#allocation14] sm:$0x3] }
 0x1dd   : > { %9024 = vmatmul.mubr.msk.f32.vlgmr.msra.gmra.mxu0 %vm1397_vm1, %v1392_v2  ;;  %9026 = vmatprep.subr.mxu0 %v11006_v0  ;;  %s11008_s14 = smov 64   ;;  %vm1604_vm4 = vcmask 130048   ;;  %vm1696_vm5 = vcmask 1043456   ;;  %vm1680_vm6 = vcmask 27648   ;;  %s11009_s27 = smov 112   ;;  %vm1692_vm7 = vcmask 31744  }
 0x1de   : > { %9028 = vmatprep.mubr.msk.f32.mxu0 %vm11007_vm0, %v11006_v0  ;;  %v11601_v34 = vsub.s32 0, %v11598_v33  ;;  %v11604_v36 = vsub.s32 1, %v11598_v33  ;;  %s11010_s4 = smov 32   ;;  %s11011_s16 = smov 48   ;;  %vm2281_vm8 = vcmask 261120   ;;  %vm2283_vm9 = vcmask 392192  }
 0x1df   : > { %s11012_s8 = smov 96   ;;  %s11013_s1 = smov 16  }
 0x1e0   : > { %v1489_v37 = vrot.slane %v1394_v35, %v11601_v34  ;;  %v1494_v40 = vrot.slane %v1394_v35, %v11604_v36  ;;  %v1518_v44 = vrot.slane %v1513_v43, %v11601_v34  ;;  %v1522_v47 = vrot.slane %v1513_v43, %v11604_v36  ;;  %s11014_s30 = smov 80   ;;  %s12750_s24 = sld [smem:[#allocation64_spill]] }
 0x1e1   : > { %v1512_v13 = vld [vmem:[%s12749_s12 + $0x78] sm:$0xff]  ;;  %v1511_v14 = vld [vmem:[%s12749_s12 + $0x70] sm:$0xff]  ;;  %v1510_v15 = vld [vmem:[%s12749_s12 + $0x68] sm:$0xff]  ;;  %s12751_s3 = sld [smem:[#allocation68_spill]]  ;;  %p12756_p5 = scmp.ne.s32.totalorder %s12719_s26, 0 }
 0x1e2   : > { %1545 = vmatprep.subr.mxu1 %v1512_v13  ;;  %v1509_v16 = vld [vmem:[%s12749_s12 + $0x60] sm:$0xff]  ;;  %v1508_v17 = vld [vmem:[%s12749_s12 + $0x58] sm:$0xff]  ;;  %v1507_v18 = vld [vmem:[%s12749_s12 + $0x50] sm:$0xff]  ;;  %s12752_s13 = sld [smem:[#allocation71_spill]] }
 0x1e3   : > { %1546 = vmatpush1.msra.mxu1 %v1511_v14  ;;  %v1506_v19 = vld [vmem:[%s12749_s12 + $0x48] sm:$0xff]  ;;  %v1505_v20 = vld [vmem:[%s12749_s12 + $0x40] sm:$0xff]  ;;  %v1504_v21 = vld [vmem:[%s12749_s12 + $0x38] sm:$0xff]  ;;  %s12753_s17 = sld [smem:[#allocation83_spill]] }
 0x1e4   : > { %1547 = vmatprep.subr.mxu1 %v1510_v15  ;;  %v1503_v22 = vld [vmem:[%s12749_s12 + $0x30] sm:$0xff]  ;;  %v1502_v23 = vld [vmem:[%s12749_s12 + $0x28] sm:$0xff]  ;;  %v1501_v24 = vld [vmem:[%s12749_s12 + $0x20] sm:$0xff]  ;;  %s12754_s22 = sld [smem:[#allocation85_spill]] }
 0x1e5   : > { %1548 = vmatpush1.msra.mxu1 %v1509_v16  ;;  %v1500_v25 = vld [vmem:[%s12749_s12 + $0x18] sm:$0xff]  ;;  %v1499_v26 = vld [vmem:[%s12749_s12 + $0x10] sm:$0xff]  ;;  %v1498_v27 = vld [vmem:[%s12749_s12 + $0x8] sm:$0xff] }
 0x1e6   : > { %1549 = vmatprep.subr.mxu1 %v1508_v17  ;;  %v1497_v28 = vld [vmem:[%s12749_s12] sm:$0xff] }
 0x1e7   : > { %1550 = vmatpush1.msra.mxu1 %v1507_v18 }
 0x1e8   : > { %1551 = vmatprep.subr.mxu1 %v1506_v19 }
 0x1e9   : > { %1552 = vmatpush1.msra.mxu1 %v1505_v20 }
 0x1ea   : > { %1553 = vmatprep.subr.mxu1 %v1504_v21 }
 0x1eb   : > { %1554 = vmatpush1.msra.mxu1 %v1503_v22 }
 0x1ec   : > { %1555 = vmatprep.subr.mxu1 %v1502_v23 }
 0x1ed   : > { %1556 = vmatpush1.msra.mxu1 %v1501_v24 }
 0x1ee   : > { %1557 = vmatprep.subr.mxu1 %v1500_v25 }
 0x1ef   : > { %1558 = vmatpush1.msra.mxu1 %v1499_v26 }
 0x1f0   : > { %1559 = vmatprep.subr.mxu1 %v1498_v27 }
 0x1f1   : > { %1560 = vmatpush1.msra.mxu1 %v1497_v28 }
 0x1f2   : > { %9066 = vmatprep.subr.mxu1 %v11006_v0 }
 0x29d   : > { %v1467_v4 = vpop.f32.mrf.mxu0 }
 0x29e   : > { %v1468_v5 = vadd.f32 %v1467_v4, %v1396_v3 }
 0x29f   : > { %v9025_v6 = vpop.f32.mrf.mxu0 }
 0x2a0   : > { %v1472_v7 = vsel %vm1471_vm2, %v1468_v5, 0.0 }
 0x2a1   : > { %1473 = vadd.xlane.f32.xlu0 %v1472_v7 }
 0x32a   : > { %v1474_v8 = vpop.xlane.xlu0 %1473 }
 0x32b   : > { %v1476_v9 = vmul.f32 0.015625, %v1474_v8 }
 0x32d   : > { %v1477_v10 = vsub.f32 %v1468_v5, %v1476_v9 }
 0x32f   : > { %v1478_v11 = vmul.f32 %v1477_v10, %v1477_v10 }
 0x331   : > { %v1479_v12 = vsel %vm1471_vm2, %v1478_v11, 0.0 }
 0x332   : > { %1480 = vadd.xlane.f32.xlu0 %v1479_v12 }
 0x3bb   : > { %v1481_v29 = vpop.xlane.xlu0 %1480 }
 0x3bc   : > { %v1482_v30 = vmul.f32 0.015625, %v1481_v29 }
 0x3be   : > { %v1483_v31 = vadd.f32 1e-05, %v1482_v30 }
 0x3c0   : > { %10035 = vrsqrt.f32 %v1483_v31 }
 0x3cd   : > { %v10036_v38 = vpop.eup %10035 }
 0x3ce   : > { %v1485_v39 = vmul.f32 %v10036_v38, %v1477_v10 }
 0x3d0   : > { %v1490_v41 = vmul.f32 %v1489_v37, %v1485_v39 }
 0x3d2   : > { %v11608_v42 = vadd.f32 %v1494_v40, %v1490_v41 }
 0x3d4   : > { %8511 = vmatmul.mubr.msk.f32.vlgmr.msra.gmra.mxu1 %vm1525_vm3, %v11608_v42 }
 0x3d5   : > { %9082 = vmatprep.mubr.msk.f32.mxu1 %vm11007_vm0, %v11006_v0 }
 0x494   : > { %v1595_v45 = vpop.f32.mrf.mxu1 }
 0x495   : > { %v11615_v46 = vadd.f32 %v1595_v45, %v1518_v44 }
 0x496   : > { %v1597_v48 = vpop.f32.mrf.mxu1 }
 0x497   : > { %1602 = vrot.lane.b32.xlu1 %v11615_v46, %s11008_s14  ;;  %v11622_v50 = vmul.f32 0.25, %v11615_v46  ;;  %v11625_v51 = vadd.f32 %v1597_v48, %v1522_v47 }
 0x509   : > { %v1603_v49 = vpop.permute.xlu1 %1602 }
 0x50a   : > { %9027 = vmatpush3.xpose.msk.msra.mxu0 %vm1604_vm4, %v1603_v49 }
 0x50b   : > { %9031 = vmatprep.subr.mxu0 %v11006_v0 }
 0x50d   : > { %9029 = vmatmul.mubr.msk.f32.vlgmr.msra.gmra.mxu0 %vm1604_vm4, %v11622_v50 }
 0x50e   : > { %9032 = vmatpush3.msk.msra.mxu0 %vm1696_vm5, %v11625_v51  ;;  %9033 = vmatprep.mubr.msk.f32.mxu0 %vm11007_vm0, %v11006_v0 }
 0x50f   : > { %9036 = vmatprep.subr.mxu0 %v11006_v0 }
 0x5cd   : > { %v1676_v52 = vpop.f32.mrf.mxu0 }
 0x5ce   : > { %v1681_v53 = vsel %vm1680_vm6, %v1676_v52, -inf }
 0x5cf   : > { %1682 = vmax.xlane.f32.xlu1 %v1681_v53  ;;  %v9030_v54 = vpop.f32.mrf.mxu0 }
 0x5d0   : > { %v2291_v54 = vld [vmem:[%s12750_s24 + $0x30] sm:$0xff] }
 0x5e0   : > { %1859 = vrot.lane.b32.xlu1 %v11625_v51, %s11009_s27 }
 0x5e4   : > { %1938 = vrot.lane.b32.xlu1 %v11615_v46, %s11010_s4 }
 0x658   : > { %v1683_v55 = vpop.xlane.xlu1 %1682 }
 0x659   : > { %v1684_v56 = vsub.f32 %v1676_v52, %v1683_v55  ;;  %v2290_v55 = vld [vmem:[%s12750_s24 + $0x28] sm:$0xff] }
 0x65b   : > { %v1685_v57 = vmul.f32 1.442695, %v1684_v56  ;;  %v2289_v56 = vld [vmem:[%s12750_s24 + $0x20] sm:$0xff] }
 0x65c   : > { %v1860_v2 = vpop.permute.xlu1 %1859 }
 0x65d   : > { %10037 = vpow2.f32 %v1685_v57  ;;  %v2288_v57 = vld [vmem:[%s12750_s24 + $0x18] sm:$0xff] }
 0x660   : > { %v1939_v13 = vpop.permute.xlu1 %1938 }
 0x66a   : > { %v10038_v58 = vpop.eup %10037 }
 0x66b   : > { %v1687_v59 = vsel %vm1680_vm6, %v10038_v58, 0.0 }
 0x66c   : > { %1688 = vadd.xlane.f32.xlu0 %v1687_v59  ;;  %v2286_v59 = vld [vmem:[%s12750_s24 + $0x8] sm:$0xff] }
 0x682   : > { %1772 = vrot.lane.b32.xlu0 %v11615_v46, %s11011_s16 }
 0x686   : > { %1770 = vrot.lane.b32.xlu0 %v11622_v50, %s11009_s27 }
 0x6f5   : > { %v1689_v60 = vpop.xlane.xlu0 %1688 }
 0x6f6   : > { %10039 = vrcp.f32 %v1689_v60  ;;  %v2285_v60 = vld [vmem:[%s12750_s24] sm:$0xff] }
 0x6f9   : > { %v1773_v62 = vpop.permute.xlu0 %1772 }
 0x6fd   : > { %v1771_v1 = vpop.permute.xlu0 %1770 }
 0x703   : > { %v10040_v61 = vpop.eup %10039 }
 0x704   : > { %v1691_v63 = vmul.f32 %v10040_v61, %v10038_v58  ;;  %v2287_v58 = vld [vmem:[%s12750_s24 + $0x10] sm:$0xff] }
 0x706   : > { %9034 = vmatmul.mubr.msk.f32.vlgmr.msra.gmra.mxu0 %vm1692_vm7, %v1691_v63 }
 0x707   : > { %9037 = vmatpush3.xpose.msk.msra.mxu0 %vm1604_vm4, %v1773_v62  ;;  %9038 = vmatprep.mubr.msk.f32.mxu0 %vm11007_vm0, %v11006_v0 }
 0x708   : > { %9041 = vmatprep.subr.mxu0 %v11006_v0 }
 0x70a   : > { %9039 = vmatmul.mubr.msk.f32.vlgmr.msra.gmra.mxu0 %vm1604_vm4, %v1771_v1 }
 0x70b   : > { %9042 = vmatpush3.msk.msra.mxu0 %vm1696_vm5, %v1860_v2  ;;  %9043 = vmatprep.mubr.msk.f32.mxu0 %vm11007_vm0, %v11006_v0 }
 0x70c   : > { %9046 = vmatprep.subr.mxu0 %v11006_v0 }
 0x7c6   : > { %v11654_v3 = vpop.f32.mrf.mxu0 }
 0x7c8   : > { %v9035_v4 = vpop.f32.mrf.mxu0 }
 0x7ca   : > { %v1844_v5 = vpop.f32.mrf.mxu0 }
 0x7cb   : > { %v1848_v6 = vsel %vm1680_vm6, %v1844_v5, -inf }
 0x7cc   : > { %1849 = vmax.xlane.f32.xlu0 %v1848_v6  ;;  %v9040_v7 = vpop.f32.mrf.mxu0 }
 0x7cd   : > { %v8528_v7 = vld [vmem:[#allocation16] ss:$0 sm:$0xff] }
 0x855   : > { %v1850_v8 = vpop.xlane.xlu0 %1849 }
 0x856   : > { %v1851_v9 = vsub.f32 %v1844_v5, %v1850_v8 }
 0x858   : > { %v1852_v10 = vmul.f32 1.442695, %v1851_v9 }
 0x85a   : > { %10041 = vpow2.f32 %v1852_v10 }
 0x867   : > { %v10042_v11 = vpop.eup %10041 }
 0x868   : > { %v1854_v12 = vsel %vm1680_vm6, %v10042_v11, 0.0 }
 0x869   : > { %1855 = vadd.xlane.f32.xlu1 %v1854_v12 }
 0x87a   : > { %1936 = vrot.lane.b32.xlu1 %v11622_v50, %s11012_s8 }
 0x8f2   : > { %v1856_v14 = vpop.xlane.xlu1 %1855 }
 0x8f3   : > { %10043 = vrcp.f32 %v1856_v14 }
 0x8f6   : > { %v1937_v17 = vpop.permute.xlu1 %1936 }
 0x900   : > { %v10044_v15 = vpop.eup %10043 }
 0x901   : > { %v1858_v16 = vmul.f32 %v10044_v15, %v10042_v11 }
 0x903   : > { %9044 = vmatmul.mubr.msk.f32.vlgmr.msra.gmra.mxu0 %vm1692_vm7, %v1858_v16 }
 0x904   : > { %9047 = vmatpush3.xpose.msk.msra.mxu0 %vm1604_vm4, %v1939_v13  ;;  %9048 = vmatprep.mubr.msk.f32.mxu0 %vm11007_vm0, %v11006_v0 }
 0x905   : > { %9051 = vmatprep.subr.mxu0 %v11006_v0 }
 0x907   : > { %9049 = vmatmul.mubr.msk.f32.vlgmr.msra.gmra.mxu0 %vm1604_vm4, %v1937_v17  ;;  %v2404_v17 = vld [vmem:[#allocation17 + $0x38] sm:$0xff] }
 0x908   : > { %9053 = vmatprep.mubr.msk.f32.mxu0 %vm11007_vm0, %v11006_v0 }
 0x9c3   : > { %v1932_v18 = vpop.f32.mrf.mxu0 }
 0x9c5   : > { %v9045_v19 = vpop.f32.mrf.mxu0 }
 0x9c6   : > { %v2402_v19 = vld [vmem:[#allocation17 + $0x28] sm:$0xff] }
 0x9c7   : > { %v2010_v20 = vpop.f32.mrf.mxu0 }
 0x9c8   : > { %v2014_v21 = vsel %vm1680_vm6, %v2010_v20, -inf }
 0x9c9   : > { %2015 = vmax.xlane.f32.xlu0 %v2014_v21  ;;  %v9050_v22 = vpop.f32.mrf.mxu0  ;;  %v2399_v21 = vld [vmem:[#allocation17 + $0x10] sm:$0xff] }
 0x9ca   : > { %v2398_v22 = vld [vmem:[#allocation17 + $0x8] sm:$0xff] }
 0x9df   : > { %2025 = vrot.lane.b32.xlu0 %v11625_v51, %s11012_s8 }
 0x9e3   : > { %2104 = vrot.lane.b32.xlu0 %v11615_v46, %s11013_s1 }
 0x9e7   : > { %2102 = vrot.lane.b32.xlu0 %v11622_v50, %s11014_s30 }
 0xa52   : > { %v2016_v23 = vpop.xlane.xlu0 %2015 }
 0xa53   : > { %v2017_v24 = vsub.f32 %v2010_v20, %v2016_v23  ;;  %v2400_v20 = vld [vmem:[#allocation17 + $0x18] sm:$0xff]  ;;  %v2397_v23 = vld [vmem:[#allocation17] sm:$0xff] }
 0xa55   : > { %v2018_v25 = vmul.f32 1.442695, %v2017_v24 }
 0xa56   : > { %v2026_v26 = vpop.permute.xlu0 %2025 }
 0xa57   : > { %10045 = vpow2.f32 %v2018_v25  ;;  %9052 = vmatpush3.msk.msra.mxu0 %vm1696_vm5, %v2026_v26 }
 0xa58   : > { %9056 = vmatprep.subr.mxu0 %v11006_v0 }
 0xa5a   : > { %v2105_v31 = vpop.permute.xlu0 %2104 }
 0xa5e   : > { %v2103_v37 = vpop.permute.xlu0 %2102 }
 0xa64   : > { %v10046_v27 = vpop.eup %10045 }
 0xa65   : > { %v2020_v28 = vsel %vm1680_vm6, %v10046_v27, 0.0 }
 0xa66   : > { %2021 = vadd.xlane.f32.xlu1 %v2020_v28 }
 0xaef   : > { %v2022_v29 = vpop.xlane.xlu1 %2021 }
 0xaf0   : > { %10047 = vrcp.f32 %v2022_v29 }
 0xafd   : > { %v10048_v30 = vpop.eup %10047 }
 0xafe   : > { %v2024_v35 = vmul.f32 %v10048_v30, %v10046_v27  ;;  %v11731_v27 = vld [vmem:[#allocation22] sm:$0xf] }
 0xaff   : > { %v2390_v28 = vrot.slane %v11731_v27, %v11601_v34 }
 0xb00   : > { %9054 = vmatmul.mubr.msk.f32.vlgmr.msra.gmra.mxu0 %vm1692_vm7, %v2024_v35 }
 0xb01   : > { %9057 = vmatpush3.xpose.msk.msra.mxu0 %vm1604_vm4, %v2105_v31  ;;  %9058 = vmatprep.mubr.msk.f32.mxu0 %vm11007_vm0, %v11006_v0  ;;  %v2395_v31 = vrot.slane %v11731_v27, %v11604_v36 }
 0xb02   : > { %9061 = vmatprep.subr.mxu0 %v11006_v0 }
 0xb04   : > { %9059 = vmatmul.mubr.msk.f32.vlgmr.msra.gmra.mxu0 %vm1604_vm4, %v2103_v37 }
 0xb05   : > { %9063 = vmatprep.mubr.msk.f32.mxu0 %vm11007_vm0, %v11006_v0 }
 0xbc0   : > { %v2098_v38 = vpop.f32.mrf.mxu0 }
 0xbc2   : > { %v9055_v39 = vpop.f32.mrf.mxu0 }
 0xbc3   : > { %v2508_v39 = vld [vmem:[%s12751_s3 + $0x70] sm:$0xff] }
 0xbc4   : > { %v2176_v40 = vpop.f32.mrf.mxu0 }
 0xbc5   : > { %v2180_v41 = vsel %vm1680_vm6, %v2176_v40, -inf }
 0xbc6   : > { %2181 = vmax.xlane.f32.xlu0 %v2180_v41  ;;  %v9060_v43 = vpop.f32.mrf.mxu0  ;;  %v2506_v41 = vld [vmem:[%s12751_s3 + $0x60] sm:$0xff] }
 0xbc7   : > { %v2505_v43 = vld [vmem:[%s12751_s3 + $0x58] sm:$0xff] }
 0xc4f   : > { %v2182_v44 = vpop.xlane.xlu0 %2181 }
 0xc50   : > { %v2183_v45 = vsub.f32 %v2176_v40, %v2182_v44  ;;  %v2507_v40 = vld [vmem:[%s12751_s3 + $0x68] sm:$0xff]  ;;  %v2504_v44 = vld [vmem:[%s12751_s3 + $0x50] sm:$0xff] }
 0xc52   : > { %v2184_v46 = vmul.f32 1.442695, %v2183_v45  ;;  %v2503_v45 = vld [vmem:[%s12751_s3 + $0x48] sm:$0xff] }
 0xc54   : > { %10049 = vpow2.f32 %v2184_v46  ;;  %v2502_v46 = vld [vmem:[%s12751_s3 + $0x40] sm:$0xff] }
 0xc61   : > { %v10050_v47 = vpop.eup %10049 }
 0xc62   : > { %v2186_v48 = vsel %vm1680_vm6, %v10050_v47, 0.0 }
 0xc63   : > { %2187 = vadd.xlane.f32.xlu1 %v2186_v48  ;;  %v2500_v48 = vld [vmem:[%s12751_s3 + $0x30] sm:$0xff] }
 0xc74   : > { %2191 = vrot.lane.b32.xlu1 %v11625_v51, %s11014_s30  ;;  %v2292_v51 = vld [vmem:[%s12750_s24 + $0x38] sm:$0xff] }
 0xc75   : > { %9067 = vmatpush3.msra.mxu1 %v2292_v51  ;;  %v2495_v51 = vld [vmem:[%s12751_s3 + $0x8] sm:$0xff] }
 0xc76   : > { %9068 = vmatprep.subr.mxu1 %v11006_v0 }
 0xc77   : > { %9069 = vmatpush3.msra.mxu1 %v2291_v54  ;;  %v2494_v54 = vld [vmem:[%s12751_s3] sm:$0xff] }
 0xc78   : > { %2269 = vrot.lane.b32.xlu1 %v1932_v18, %s11013_s1  ;;  %9070 = vmatprep.subr.mxu1 %v11006_v0  ;;  %v2403_v18 = vld [vmem:[#allocation17 + $0x30] sm:$0xff] }
 0xc79   : > { %9071 = vmatpush3.msra.mxu1 %v2290_v55  ;;  %v8530_v55 = vld [vmem:[#allocation19] ss:$0 sm:$0xff] }
 0xc7a   : > { %9072 = vmatprep.subr.mxu1 %v11006_v0 }
 0xc7b   : > { %9073 = vmatpush3.msra.mxu1 %v2289_v56 }
 0xc7c   : > { %2273 = vrot.lane.b32.xlu1 %v2098_v38, %s11010_s4  ;;  %9074 = vmatprep.subr.mxu1 %v11006_v0  ;;  %v2509_v38 = vld [vmem:[%s12751_s3 + $0x78] sm:$0xff] }
 0xc7d   : > { %9075 = vmatpush3.msra.mxu1 %v2288_v57 }
 0xc7e   : > { %9076 = vmatprep.subr.mxu1 %v11006_v0 }
 0xc7f   : > { %9077 = vmatpush3.msra.mxu1 %v2287_v58 }
 0xc80   : > { %9078 = vmatprep.subr.mxu1 %v11006_v0 }
 0xc81   : > { %9079 = vmatpush3.msra.mxu1 %v2286_v59 }
 0xc82   : > { %9080 = vmatprep.subr.mxu1 %v11006_v0 }
 0xc83   : > { %9081 = vmatpush3.msra.mxu1 %v2285_v60 }
 0xc84   : > { %9104 = vmatprep.subr.mxu1 %v11006_v0 }
 0xcec   : > { %v2188_v49 = vpop.xlane.xlu1 %2187 }
 0xced   : > { %10051 = vrcp.f32 %v2188_v49  ;;  %v2499_v49 = vld [vmem:[%s12751_s3 + $0x28] sm:$0xff] }
 0xcf0   : > { %v2192_v50 = vpop.permute.xlu1 %2191 }
 0xcf1   : > { %9062 = vmatpush3.msk.msra.mxu0 %vm1696_vm5, %v2192_v50  ;;  %v2498_v50 = vld [vmem:[%s12751_s3 + $0x20] sm:$0xff] }
 0xcf2   : > { %9085 = vmatprep.subr.mxu0 %v11006_v0 }
 0xcf4   : > { %v2270_v63 = vpop.permute.xlu1 %2269 }
 0xcf5   : > { %v2280_v2 = vsel %vm1604_vm4, %v11654_v3, %v2270_v63 }
 0xcf8   : > { %v2274_v1 = vpop.permute.xlu1 %2273 }
 0xcf9   : > { %v2282_v4 = vsel %vm2281_vm8, %v2280_v2, %v2274_v1 }
 0xcfa   : > { %v10052_v52 = vpop.eup %10051 }
 0xcfb   : > { %v2190_v53 = vmul.f32 %v10052_v52, %v10050_v47  ;;  %v2501_v47 = vld [vmem:[%s12751_s3 + $0x38] sm:$0xff] }
 0xcfc   : > { %v2497_v52 = vld [vmem:[%s12751_s3 + $0x18] sm:$0xff] }
 0xcfd   : > { %9064 = vmatmul.mubr.msk.f32.vlgmr.msra.gmra.mxu0 %vm1692_vm7, %v2190_v53  ;;  %v2496_v53 = vld [vmem:[%s12751_s3 + $0x10] sm:$0xff] }
 0xcfe   : > { %9101 = vmatprep.mubr.msk.f32.mxu0 %vm11007_vm0, %v11006_v0  ;;  %9086 = vmatpush3.msra.mxu0 %v2404_v17  ;;  %v8547_v17 = vld [vmem:[%s12749_s12 + $0xf0] sm:$0xff] }
 0xcff   : > { %9087 = vmatprep.subr.mxu0 %v11006_v0 }
 0xd00   : > { %9088 = vmatpush3.msra.mxu0 %v2403_v18  ;;  %v8546_v18 = vld [vmem:[%s12749_s12 + $0xe8] sm:$0xff] }
 0xd01   : > { %9089 = vmatprep.subr.mxu0 %v11006_v0 }
 0xd02   : > { %9090 = vmatpush3.msra.mxu0 %v2402_v19  ;;  %v8545_v19 = vld [vmem:[%s12749_s12 + $0xe0] sm:$0xff] }
 0xd03   : > { %9091 = vmatprep.subr.mxu0 %v11006_v0 }
 0xdbd   : > { %v2264_v61 = vpop.f32.mrf.mxu0 }
 0xdbe   : > { %2277 = vrot.lane.b32.xlu0 %v2264_v61, %s11011_s16 }
 0xdbf   : > { %v9065_v62 = vpop.f32.mrf.mxu0 }
 0xe30   : > { %v2278_v5 = vpop.permute.xlu0 %2277 }
 0xe31   : > { %v2284_v6 = vsel %vm2283_vm9, %v2282_v4, %v2278_v5 }
 0xe32   : > { %9083 = vmatmul.mubr.msk.f32.vlgmr.msra.gmra.mxu1 %vm1525_vm3, %v2284_v6  ;;  %v8532_v6 = vld [vmem:[#allocation20] ss:$0 sm:$0xff] }
 0xe33   : > { %9136 = vmatprep.mubr.msk.f32.mxu1 %vm11007_vm0, %v11006_v0  ;;  %9105 = vmatpush3.msra.mxu1 %v2509_v38 }
 0xe34   : > { %9106 = vmatprep.subr.mxu1 %v11006_v0 }
 0xe35   : > { %9107 = vmatpush3.msra.mxu1 %v2508_v39  ;;  %v11797_v39 = vsub.s32 2, %v11598_v33 }
 0xe36   : > { %9108 = vmatprep.subr.mxu1 %v11006_v0 }
 0xe37   : > { %9109 = vmatpush3.msra.mxu1 %v2507_v40  ;;  %v11800_v40 = vsub.s32 3, %v11598_v33 }
 0xe38   : > { %9110 = vmatprep.subr.mxu1 %v11006_v0 }
 0xe39   : > { %9111 = vmatpush3.msra.mxu1 %v2506_v41  ;;  %v2604_v41 = vrot.slane %v11731_v27, %v11797_v39 }
 0xe3a   : > { %9112 = vmatprep.subr.mxu1 %v11006_v0 }
 0xe3b   : > { %9113 = vmatpush3.msra.mxu1 %v2505_v43 }
 0xe3c   : > { %9114 = vmatprep.subr.mxu1 %v11006_v0 }
 0xe3d   : > { %9115 = vmatpush3.msra.mxu1 %v2504_v44 }
 0xe3e   : > { %9116 = vmatprep.subr.mxu1 %v11006_v0 }
 0xe3f   : > { %9117 = vmatpush3.msra.mxu1 %v2503_v45  ;;  %v2609_v45 = vrot.slane %v11731_v27, %v11800_v40 }
 0xe40   : > { %9118 = vmatprep.subr.mxu1 %v11006_v0 }
 0xe41   : > { %9119 = vmatpush3.msra.mxu1 %v2502_v46 }
 0xe42   : > { %9120 = vmatprep.subr.mxu1 %v11006_v0 }
 0xe43   : > { %9121 = vmatpush3.msra.mxu1 %v2501_v47 }
 0xe44   : > { %9122 = vmatprep.subr.mxu1 %v11006_v0 }
 0xe45   : > { %9123 = vmatpush3.msra.mxu1 %v2500_v48  ;;  %v2631_v48 = vld [vmem:[#allocation14 + $0x2] sm:$0x3] }
 0xe46   : > { %9124 = vmatprep.subr.mxu1 %v11006_v0  ;;  %v2640_v27 = vrot.slane %v2631_v48, %v11604_v36 }
 0xe47   : > { %9125 = vmatpush3.msra.mxu1 %v2499_v49  ;;  %v2636_v49 = vrot.slane %v2631_v48, %v11601_v34 }
 0xe48   : > { %9126 = vmatprep.subr.mxu1 %v11006_v0 }
 0xe49   : > { %9127 = vmatpush3.msra.mxu1 %v2498_v50 }
 0xe4a   : > { %9128 = vmatprep.subr.mxu1 %v11006_v0 }
 0xe4b   : > { %9129 = vmatpush3.msra.mxu1 %v2497_v52 }
 0xe4c   : > { %9130 = vmatprep.subr.mxu1 %v11006_v0 }
 0xe4d   : > { %9131 = vmatpush3.msra.mxu1 %v2496_v53 }
 0xe4e   : > { %9132 = vmatprep.subr.mxu1 %v11006_v0 }
 0xe4f   : > { %9133 = vmatpush3.msra.mxu1 %v2495_v51 }
 0xe50   : > { %9134 = vmatprep.subr.mxu1 %v11006_v0 }
 0xe51   : > { %9135 = vmatpush3.msra.mxu1 %v2494_v54 }
 0xe52   : > { %9159 = vmatprep.subr.mxu1 %v11006_v0 }
 0xef2   : > { %v2369_v8 = vpop.f32.mrf.mxu1 }
 0xef3   : > { %v2370_v9 = vadd.f32 %v8528_v7, %v2369_v8 }
 0xef4   : > { %v9084_v10 = vpop.f32.mrf.mxu1 }
 0xef5   : > { %v2373_v11 = vadd.f32 %v2370_v9, %v11608_v42  ;;  %v2401_v42 = vld [vmem:[#allocation17 + $0x20] sm:$0xff] }
 0xef6   : > { %9092 = vmatpush3.msra.mxu0 %v2401_v42  ;;  %v8544_v42 = vld [vmem:[%s12749_s12 + $0xd8] sm:$0xff] }
 0xef7   : > { %v2374_v12 = vsel %vm1471_vm2, %v2373_v11, 0.0  ;;  %9093 = vmatprep.subr.mxu0 %v11006_v0 }
 0xef8   : > { %2375 = vadd.xlane.f32.xlu1 %v2374_v12  ;;  %9094 = vmatpush3.msra.mxu0 %v2400_v20  ;;  %v8543_v20 = vld [vmem:[%s12749_s12 + $0xd0] sm:$0xff] }
 0xef9   : > { %9095 = vmatprep.subr.mxu0 %v11006_v0 }
 0xefa   : > { %9096 = vmatpush3.msra.mxu0 %v2399_v21  ;;  %v8542_v21 = vld [vmem:[%s12749_s12 + $0xc8] sm:$0xff] }
 0xefb   : > { %9097 = vmatprep.subr.mxu0 %v11006_v0 }
 0xefc   : > { %9098 = vmatpush3.msra.mxu0 %v2398_v22  ;;  %v8541_v22 = vld [vmem:[%s12749_s12 + $0xc0] sm:$0xff] }
 0xefd   : > { %9099 = vmatprep.subr.mxu0 %v11006_v0 }
 0xefe   : > { %9100 = vmatpush3.msra.mxu0 %v2397_v23  ;;  %v8540_v23 = vld [vmem:[%s12749_s12 + $0xb8] sm:$0xff] }
 0xf81   : > { %v2376_v3 = vpop.xlane.xlu1 %2375 }
 0xf82   : > { %v2377_v13 = vmul.f32 0.015625, %v2376_v3 }
 0xf84   : > { %v2378_v14 = vsub.f32 %v2373_v11, %v2377_v13 }
 0xf86   : > { %v2379_v15 = vmul.f32 %v2378_v14, %v2378_v14 }
 0xf88   : > { %v2380_v16 = vsel %vm1471_vm2, %v2379_v15, 0.0 }
 0xf89   : > { %2381 = vadd.xlane.f32.xlu0 %v2380_v16  ;;  %v8548_v16 = vld [vmem:[%s12749_s12 + $0xf8] sm:$0xff] }
 0xf8a   : > { %2662 = vmatprep.subr.mxu0 %v8548_v16 }
0x1012   : > { %v2382_v24 = vpop.xlane.xlu0 %2381 }
0x1013   : > { %v2383_v25 = vmul.f32 0.015625, %v2382_v24  ;;  %v8539_v24 = vld [vmem:[%s12749_s12 + $0xb0] sm:$0xff] }
0x1015   : > { %v2384_v26 = vadd.f32 1e-05, %v2383_v25  ;;  %v8538_v25 = vld [vmem:[%s12749_s12 + $0xa8] sm:$0xff] }
0x1017   : > { %10053 = vrsqrt.f32 %v2384_v26  ;;  %v8537_v26 = vld [vmem:[%s12749_s12 + $0xa0] sm:$0xff] }
0x1024   : > { %v10054_v29 = vpop.eup %10053 }
0x1025   : > { %v2386_v30 = vmul.f32 %v10054_v29, %v2378_v14  ;;  %v8535_v29 = vld [vmem:[%s12749_s12 + $0x90] sm:$0xff] }
0x1027   : > { %v2391_v35 = vmul.f32 %v2390_v28, %v2386_v30  ;;  %v8536_v28 = vld [vmem:[%s12749_s12 + $0x98] sm:$0xff]  ;;  %v8534_v30 = vld [vmem:[%s12749_s12 + $0x88] sm:$0xff] }
0x1029   : > { %v11737_v37 = vadd.f32 %v2395_v31, %v2391_v35  ;;  %v8533_v31 = vld [vmem:[%s12749_s12 + $0x80] sm:$0xff] }
0x102b   : > { %9102 = vmatmul.mubr.msk.f32.vlgmr.msra.gmra.mxu0 %vm1525_vm3, %v11737_v37 }
0x102c   : > { %2710 = vmatprep.mubr.f32.mxu0 %v11006_v0  ;;  %2663 = vmatpush1.msra.mxu0 %v8547_v17 }
0x102d   : > { %2664 = vmatprep.subr.mxu0 %v8546_v18 }
0x102e   : > { %2665 = vmatpush1.msra.mxu0 %v8545_v19 }
0x102f   : > { %2666 = vmatprep.subr.mxu0 %v8544_v42 }
0x1030   : > { %2667 = vmatpush1.msra.mxu0 %v8543_v20 }
0x1031   : > { %2668 = vmatprep.subr.mxu0 %v8542_v21 }
0x1032   : > { %2669 = vmatpush1.msra.mxu0 %v8541_v22 }
0x1033   : > { %2670 = vmatprep.subr.mxu0 %v8540_v23 }
0x1034   : > { %2671 = vmatpush1.msra.mxu0 %v8539_v24 }
0x1035   : > { %2672 = vmatprep.subr.mxu0 %v8538_v25 }
0x1036   : > { %2673 = vmatpush1.msra.mxu0 %v8537_v26 }
0x1037   : > { %2674 = vmatprep.subr.mxu0 %v8536_v28 }
0x1038   : > { %2675 = vmatpush1.msra.mxu0 %v8535_v29 }
0x1039   : > { %2676 = vmatprep.subr.mxu0 %v8534_v30 }
0x103a   : > { %2677 = vmatpush1.msra.mxu0 %v8533_v31 }
0x103b   : > { %9139 = vmatprep.subr.mxu0 %v11006_v0 }
0x10eb   : > { %v2481_v56 = vpop.f32.mrf.mxu0 }
0x10ec   : > { %v2482_v57 = vadd.f32 %v8530_v55, %v2481_v56 }
0x10ed   : > { %v9103_v58 = vpop.f32.mrf.mxu0 }
0x10ee   : > { %v2485_v59 = vmul.f32 %v2482_v57, %v2482_v57 }
0x10f0   : > { %v2486_v60 = vmul.f32 %v2485_v59, %v2482_v57 }
0x10f2   : > { %v2487_v61 = vmul.f32 0.044715, %v2486_v60 }
0x10f4   : > { %v2488_v62 = vadd.f32 %v2487_v61, %v2482_v57 }
0x10f6   : > { %v2489_v63 = vmul.f32 0.7978846, %v2488_v62 }
0x10f8   : > { %10055 = vtanh.f32 %v2489_v63 }
0x1105   : > { %v10056_v1 = vpop.eup %10055 }
0x1106   : > { %v2491_v2 = vadd.f32 1.0, %v10056_v1 }
0x1108   : > { %v2492_v4 = vmul.f32 0.5, %v2491_v2 }
0x110a   : > { %v2493_v5 = vmul.f32 %v2492_v4, %v2482_v57 }
0x110c   : > { %9137 = vmatmul.mubr.f32.vlgmr.msra.gmra.mxu1 %v2493_v5 }
0x110d   : > { %9161 = vmatprep.mubr.msk.f32.mxu1 %vm11007_vm0, %v11006_v0 }
0x11cc   : > { %v2583_v7 = vpop.f32.mrf.mxu1 }
0x11cd   : > { %v2584_v8 = vadd.f32 %v8532_v6, %v2583_v7 }
0x11ce   : > { %v9138_v9 = vpop.f32.mrf.mxu1 }
0x11cf   : > { %v2587_v10 = vadd.f32 %v2584_v8, %v11737_v37 }
0x11d1   : > { %v2588_v11 = vsel %vm1471_vm2, %v2587_v10, 0.0 }
0x11d2   : > { %2589 = vadd.xlane.f32.xlu1 %v2588_v11 }
0x125b   : > { %v2590_v12 = vpop.xlane.xlu1 %2589 }
0x125c   : > { %v2591_v3 = vmul.f32 0.015625, %v2590_v12 }
0x125e   : > { %v2592_v13 = vsub.f32 %v2587_v10, %v2591_v3 }
0x1260   : > { %v2593_v14 = vmul.f32 %v2592_v13, %v2592_v13 }
0x1262   : > { %v2594_v15 = vsel %vm1471_vm2, %v2593_v14, 0.0 }
0x1263   : > { %2595 = vadd.xlane.f32.xlu1 %v2594_v15 }
0x12ec   : > { %v2596_v35 = vpop.xlane.xlu1 %2595 }
0x12ed   : > { %v2597_v37 = vmul.f32 0.015625, %v2596_v35 }
0x12ef   : > { %v2598_v38 = vadd.f32 1e-05, %v2597_v37 }
0x12f1   : > { %10057 = vrsqrt.f32 %v2598_v38 }
0x12fe   : > { %v10058_v43 = vpop.eup %10057 }
0x12ff   : > { %v2600_v44 = vmul.f32 %v10058_v43, %v2592_v13 }
0x1301   : > { %v2605_v46 = vmul.f32 %v2604_v41, %v2600_v44 }
0x1303   : > { %v11806_v47 = vadd.f32 %v2609_v45, %v2605_v46 }
0x1305   : > { %8549 = vmatmul.mubr.msk.f32.vlgmr.msra.gmra.mxu0 %vm1525_vm3, %v11806_v47 }
0x1306   : > { %9141 = vmatprep.mubr.msk.f32.mxu0 %vm11007_vm0, %v11006_v0 }
0x13c5   : > { %v2712_v50 = vpop.f32.mrf.mxu0 }
0x13c6   : > { %v2713_v52 = vadd.f32 %v2712_v50, %v2636_v49 }
0x13c7   : > { %v2714_v51 = vpop.f32.mrf.mxu0 }
0x13c8   : > { %2719 = vrot.lane.b32.xlu1 %v2713_v52, %s11008_s14  ;;  %v2717_v53 = vmul.f32 0.25, %v2713_v52  ;;  %v11822_v55 = vadd.f32 %v2714_v51, %v2640_v27 }
0x13cc   : > { %2883 = vrot.lane.b32.xlu1 %v2717_v53, %s11009_s27 }
0x13d0   : > { %3051 = vrot.lane.b32.xlu1 %v2713_v52, %s11010_s4 }
0x13d4   : > { %3049 = vrot.lane.b32.xlu1 %v2717_v53, %s11012_s8 }
0x13d8   : > { %3217 = vrot.lane.b32.xlu1 %v2713_v52, %s11013_s1 }
0x13dc   : > { %3215 = vrot.lane.b32.xlu1 %v2717_v53, %s11014_s30 }
0x143a   : > { %v2720_v54 = vpop.permute.xlu1 %2719 }
0x143b   : > { %9140 = vmatpush3.xpose.msk.msra.mxu0 %vm1604_vm4, %v2720_v54 }
0x143c   : > { %9144 = vmatprep.subr.mxu0 %v11006_v0 }
0x143e   : > { %v2884_v56 = vpop.permute.xlu1 %2883  ;;  %9142 = vmatmul.mubr.msk.f32.vlgmr.msra.gmra.mxu0 %vm1604_vm4, %v2717_v53 }
0x143f   : > { %9145 = vmatpush3.msk.msra.mxu0 %vm1696_vm5, %v11822_v55  ;;  %9146 = vmatprep.mubr.msk.f32.mxu0 %vm11007_vm0, %v11006_v0 }
0x1440   : > { %9149 = vmatprep.subr.mxu0 %v11006_v0 }
0x1442   : > { %v3052_v57 = vpop.permute.xlu1 %3051 }
0x1443   : > { %9160 = vmatpush3.xpose.msk.msra.mxu1 %vm1604_vm4, %v3052_v57  ;;  %v8571_v57 = vld [vmem:[%s12750_s24 + $0x68] sm:$0xff] }
0x1444   : > { %9169 = vmatprep.subr.mxu1 %v11006_v0 }
0x1446   : > { %v3050_v58 = vpop.permute.xlu1 %3049 }
0x1447   : > { %9162 = vmatmul.mubr.msk.f32.vlgmr.msra.gmra.mxu1 %vm1604_vm4, %v3050_v58  ;;  %v8570_v58 = vld [vmem:[%s12750_s24 + $0x60] sm:$0xff] }
0x1448   : > { %9171 = vmatprep.mubr.msk.f32.mxu1 %vm11007_vm0, %v11006_v0 }
0x144a   : > { %v3218_v59 = vpop.permute.xlu1 %3217 }
0x144b   : > { %9170 = vmatpush3.xpose.msk.msra.mxu1 %vm1604_vm4, %v3218_v59  ;;  %v8569_v59 = vld [vmem:[%s12750_s24 + $0x58] sm:$0xff] }
0x144c   : > { %9179 = vmatprep.subr.mxu1 %v11006_v0 }
0x144e   : > { %v3216_v60 = vpop.permute.xlu1 %3215 }
0x144f   : > { %9172 = vmatmul.mubr.msk.f32.vlgmr.msra.gmra.mxu1 %vm1604_vm4, %v3216_v60  ;;  %v8568_v60 = vld [vmem:[%s12750_s24 + $0x50] sm:$0xff] }
0x1450   : > { %9195 = vmatprep.mubr.msk.f32.mxu1 %vm11007_vm0, %v11006_v0 }
0x14fe   : > { %v2792_v61 = vpop.f32.mrf.mxu0 }
0x14ff   : > { %v2796_v62 = vsel %vm1680_vm6, %v2792_v61, -inf }
0x1500   : > { %2797 = vmax.xlane.f32.xlu0 %v2796_v62  ;;  %v9143_v63 = vpop.f32.mrf.mxu0  ;;  %v8566_v62 = vld [vmem:[%s12750_s24 + $0x40] sm:$0xff] }
0x1507   : > { %v3123_v1 = vpop.f32.mrf.mxu1 }
0x1508   : > { %v3127_v11 = vsel %vm1680_vm6, %v3123_v1, -inf }
0x1509   : > { %v9163_v2 = vpop.f32.mrf.mxu1 }
0x150f   : > { %v3289_v4 = vpop.f32.mrf.mxu1 }
0x1510   : > { %v3293_v12 = vsel %vm1680_vm6, %v3289_v4, -inf }
0x1511   : > { %v9173_v5 = vpop.f32.mrf.mxu1 }
0x1589   : > { %v2798_v6 = vpop.xlane.xlu0 %2797 }
0x158a   : > { %v2799_v7 = vsub.f32 %v2792_v61, %v2798_v6  ;;  %v8567_v61 = vld [vmem:[%s12750_s24 + $0x48] sm:$0xff] }
0x158c   : > { %v2800_v8 = vmul.f32 1.442695, %v2799_v7 }
0x158e   : > { %10059 = vpow2.f32 %v2800_v8 }
0x159b   : > { %v10060_v9 = vpop.eup %10059 }
0x159c   : > { %v2802_v10 = vsel %vm1680_vm6, %v10060_v9, 0.0 }
0x159d   : > { %2803 = vadd.xlane.f32.xlu0 %v2802_v10 }
0x15b3   : > { %2885 = vrot.lane.b32.xlu0 %v2713_v52, %s11011_s16 }
0x15d2   : > { %3128 = vmax.xlane.f32.xlu0 %v3127_v11 }
0x15d6   : > { %3294 = vmax.xlane.f32.xlu0 %v3293_v12 }
0x1626   : > { %v2804_v3 = vpop.xlane.xlu0 %2803 }
0x1627   : > { %10061 = vrcp.f32 %v2804_v3  ;;  %v8574_v3 = vld [vmem:[#allocation16 + $0x1] ss:$0 sm:$0xff] }
0x162a   : > { %v2886_v15 = vpop.permute.xlu0 %2885 }
0x1634   : > { %v10062_v13 = vpop.eup %10061 }
0x1635   : > { %v2806_v14 = vmul.f32 %v10062_v13, %v10060_v9 }
0x1637   : > { %9147 = vmatmul.mubr.msk.f32.vlgmr.msra.gmra.mxu0 %vm1692_vm7, %v2806_v14 }
0x1638   : > { %9150 = vmatpush3.xpose.msk.msra.mxu0 %vm1604_vm4, %v2886_v15  ;;  %9151 = vmatprep.mubr.msk.f32.mxu0 %vm11007_vm0, %v11006_v0 }
0x1639   : > { %9154 = vmatprep.subr.mxu0 %v11006_v0 }
0x163b   : > { %9152 = vmatmul.mubr.msk.f32.vlgmr.msra.gmra.mxu0 %vm1604_vm4, %v2884_v56  ;;  %v8572_v56 = vld [vmem:[%s12750_s24 + $0x70] sm:$0xff] }
0x163c   : > { %9156 = vmatprep.mubr.msk.f32.mxu0 %vm11007_vm0, %v11006_v0 }
0x165b   : > { %v3129_v16 = vpop.xlane.xlu0 %3128 }
0x165c   : > { %v3130_v17 = vsub.f32 %v3123_v1, %v3129_v16 }
0x165e   : > { %v3131_v18 = vmul.f32 1.442695, %v3130_v17 }
0x165f   : > { %v3295_v20 = vpop.xlane.xlu0 %3294 }
0x1660   : > { %10063 = vpow2.f32 %v3131_v18  ;;  %v3296_v21 = vsub.f32 %v3289_v4, %v3295_v20 }
0x1662   : > { %v3297_v22 = vmul.f32 1.442695, %v3296_v21 }
0x1664   : > { %10065 = vpow2.f32 %v3297_v22  ;;  %v3518_v22 = vld [vmem:[#allocation17 + $0x78] sm:$0xff] }
0x166d   : > { %v10064_v19 = vpop.eup %10063 }
0x166e   : > { %v3133_v42 = vsel %vm1680_vm6, %v10064_v19, 0.0 }
0x166f   : > { %3134 = vadd.xlane.f32.xlu0 %v3133_v42 }
0x1671   : > { %v10066_v30 = vpop.eup %10065 }
0x1672   : > { %v3299_v35 = vsel %vm1680_vm6, %v10066_v30, 0.0 }
0x1685   : > { %2972 = vrot.lane.b32.xlu0 %v11822_v55, %s11009_s27 }
0x16f7   : > { %v11856_v23 = vpop.f32.mrf.mxu0 }
0x16f8   : > { %v3135_v24 = vpop.xlane.xlu0 %3134 }
0x16f9   : > { %v9148_v25 = vpop.f32.mrf.mxu0 }
0x16fa   : > { %v3514_v25 = vld [vmem:[#allocation17 + $0x58] sm:$0xff] }
0x16fb   : > { %v2957_v26 = vpop.f32.mrf.mxu0 }
0x16fc   : > { %v2973_v28 = vpop.permute.xlu0 %2972  ;;  %v2961_v29 = vsel %vm1680_vm6, %v2957_v26, -inf }
0x16fd   : > { %9155 = vmatpush3.msk.msra.mxu0 %vm1696_vm5, %v2973_v28  ;;  %2962 = vmax.xlane.f32.xlu1 %v2961_v29  ;;  %v9153_v31 = vpop.f32.mrf.mxu0  ;;  %v3512_v28 = vld [vmem:[#allocation17 + $0x48] sm:$0xff]  ;;  %v3511_v29 = vld [vmem:[#allocation17 + $0x40] sm:$0xff] }
0x16fe   : > { %9164 = vmatprep.subr.mxu0 %v11006_v0 }
0x1701   : > { %3300 = vadd.xlane.f32.xlu1 %v3299_v35 }
0x1712   : > { %3138 = vrot.lane.b32.xlu1 %v11822_v55, %s11012_s8 }
0x1786   : > { %v2963_v37 = vpop.xlane.xlu1 %2962 }
0x1787   : > { %v2964_v38 = vsub.f32 %v2957_v26, %v2963_v37  ;;  %v3513_v26 = vld [vmem:[#allocation17 + $0x50] sm:$0xff]  ;;  %v11917_v37 = vld [vmem:[#allocation22 + $0x4] sm:$0xf] }
0x1789   : > { %v2965_v41 = vmul.f32 1.442695, %v2964_v38  ;;  %v3503_v38 = vrot.slane %v11917_v37, %v11601_v34 }
0x178a   : > { %v3301_v45 = vpop.xlane.xlu1 %3300 }
0x178b   : > { %10067 = vpow2.f32 %v2965_v41 }
0x178e   : > { %v3139_v46 = vpop.permute.xlu1 %3138 }
0x1798   : > { %v10068_v43 = vpop.eup %10067 }
0x1799   : > { %v2967_v44 = vsel %vm1680_vm6, %v10068_v43, 0.0 }
0x179a   : > { %2968 = vadd.xlane.f32.xlu1 %v2967_v44  ;;  %v3508_v44 = vrot.slane %v11917_v37, %v11604_v36 }
0x17ab   : > { %3304 = vrot.lane.b32.xlu1 %v11822_v55, %s11014_s30  ;;  %v8573_v55 = vld [vmem:[%s12750_s24 + $0x78] sm:$0xff] }
0x17ac   : > { %9180 = vmatpush3.msra.mxu1 %v8573_v55  ;;  %v8590_v55 = vld [vmem:[%s12751_s3 + $0xe0] sm:$0xff] }
0x17ad   : > { %9181 = vmatprep.subr.mxu1 %v11006_v0 }
0x17ae   : > { %9182 = vmatpush3.msra.mxu1 %v8572_v56  ;;  %v8589_v56 = vld [vmem:[%s12751_s3 + $0xd8] sm:$0xff] }
0x17af   : > { %9183 = vmatprep.subr.mxu1 %v11006_v0 }
0x17b0   : > { %9184 = vmatpush3.msra.mxu1 %v8571_v57  ;;  %v8588_v57 = vld [vmem:[%s12751_s3 + $0xd0] sm:$0xff] }
0x17b1   : > { %9185 = vmatprep.subr.mxu1 %v11006_v0 }
0x17b2   : > { %9186 = vmatpush3.msra.mxu1 %v8570_v58  ;;  %v8587_v58 = vld [vmem:[%s12751_s3 + $0xc8] sm:$0xff] }
0x17b3   : > { %9187 = vmatprep.subr.mxu1 %v11006_v0 }
0x17b4   : > { %9188 = vmatpush3.msra.mxu1 %v8569_v59  ;;  %v8586_v59 = vld [vmem:[%s12751_s3 + $0xc0] sm:$0xff] }
0x17b5   : > { %9189 = vmatprep.subr.mxu1 %v11006_v0 }
0x17b6   : > { %9190 = vmatpush3.msra.mxu1 %v8568_v60  ;;  %v8585_v60 = vld [vmem:[%s12751_s3 + $0xb8] sm:$0xff] }
0x17b7   : > { %9191 = vmatprep.subr.mxu1 %v11006_v0 }
0x17b8   : > { %9192 = vmatpush3.msra.mxu1 %v8567_v61  ;;  %v8584_v61 = vld [vmem:[%s12751_s3 + $0xb0] sm:$0xff] }
0x17b9   : > { %9193 = vmatprep.subr.mxu1 %v11006_v0 }
0x17ba   : > { %9194 = vmatpush3.msra.mxu1 %v8566_v62  ;;  %v8583_v62 = vld [vmem:[%s12751_s3 + $0xa8] sm:$0xff] }
0x17bb   : > { %9217 = vmatprep.subr.mxu1 %v11006_v0 }
0x1823   : > { %v2969_v48 = vpop.xlane.xlu1 %2968 }
0x1824   : > { %10069 = vrcp.f32 %v2969_v48  ;;  %v3731_v48 = vld [vmem:[#allocation10 + $0x18] sm:$0xff] }
0x1825   : > { %10071 = vrcp.f32 %v3135_v24  ;;  %v3516_v24 = vld [vmem:[#allocation17 + $0x68] sm:$0xff] }
0x1826   : > { %10073 = vrcp.f32 %v3301_v45 }
0x1827   : > { %v3305_v51 = vpop.permute.xlu1 %3304 }
0x1831   : > { %v10070_v49 = vpop.eup %10069 }
0x1832   : > { %v2971_v50 = vmul.f32 %v10070_v49, %v10068_v43  ;;  %v10072_v52 = vpop.eup %10071  ;;  %v3730_v49 = vld [vmem:[#allocation10 + $0x10] sm:$0xff] }
0x1833   : > { %v3137_v53 = vmul.f32 %v10072_v52, %v10064_v19  ;;  %v10074_v27 = vpop.eup %10073  ;;  %v3728_v52 = vld [vmem:[#allocation10] sm:$0xff] }
0x1834   : > { %9157 = vmatmul.mubr.msk.f32.vlgmr.msra.gmra.mxu0 %vm1692_vm7, %v2971_v50  ;;  %v3303_v54 = vmul.f32 %v10074_v27, %v10066_v30  ;;  %v3729_v50 = vld [vmem:[#allocation10 + $0x8] sm:$0xff]  ;;  %v8593_v27 = vld [vmem:[%s12751_s3 + $0xf8] sm:$0xff] }
0x1835   : > { %9165 = vmatpush3.msk.msra.mxu0 %vm1696_vm5, %v3139_v46  ;;  %9166 = vmatprep.mubr.msk.f32.mxu0 %vm11007_vm0, %v11006_v0 }
0x1836   : > { %9174 = vmatprep.subr.mxu0 %v11006_v0 }
0x1838   : > { %9167 = vmatmul.mubr.msk.f32.vlgmr.msra.gmra.mxu0 %vm1692_vm7, %v3137_v53  ;;  %v1393_v53 = vld [vmem:[%s11515_s5] sm:$0xff]  ;;  %s12755_s5 = sld [smem:[#allocation86_spill]] }
0x1839   : > { %9175 = vmatpush3.msk.msra.mxu0 %vm1696_vm5, %v3305_v51  ;;  %9176 = vmatprep.mubr.msk.f32.mxu0 %vm11007_vm0, %v11006_v0  ;;  %v8592_v51 = vld [vmem:[%s12751_s3 + $0xf0] sm:$0xff] }
0x183a   : > { %9198 = vmatprep.subr.mxu0 %v11006_v0 }
0x183c   : > { %9177 = vmatmul.mubr.msk.f32.vlgmr.msra.gmra.mxu0 %vm1692_vm7, %v3303_v54  ;;  %v8591_v54 = vld [vmem:[%s12751_s3 + $0xe8] sm:$0xff] }
0x183d   : > { %9214 = vmatprep.mubr.msk.f32.mxu0 %vm11007_vm0, %v11006_v0  ;;  %9199 = vmatpush3.msra.mxu0 %v3518_v22 }
0x183e   : > { %9200 = vmatprep.subr.mxu0 %v11006_v0 }
0x18f4   : > { %v3045_v63 = vpop.f32.mrf.mxu0 }
0x18f5   : > { %3382 = vrot.lane.b32.xlu0 %v3045_v63, %s11013_s1  ;;  %v8582_v63 = vld [vmem:[%s12751_s3 + $0xa0] sm:$0xff] }
0x18f6   : > { %v9158_v1 = vpop.f32.mrf.mxu0 }
0x18f7   : > { %v8581_v1 = vld [vmem:[%s12751_s3 + $0x98] sm:$0xff] }
0x18f8   : > { %v3211_v2 = vpop.f32.mrf.mxu0 }
0x18f9   : > { %3386 = vrot.lane.b32.xlu1 %v3211_v2, %s11010_s4  ;;  %v8580_v2 = vld [vmem:[%s12751_s3 + $0x90] sm:$0xff] }
0x18fa   : > { %v9168_v4 = vpop.f32.mrf.mxu0 }
0x18fb   : > { %v8579_v4 = vld [vmem:[%s12751_s3 + $0x88] sm:$0xff] }
0x18fc   : > { %v3377_v5 = vpop.f32.mrf.mxu0 }
0x18fd   : > { %3390 = vrot.lane.b32.xlu0 %v3377_v5, %s11011_s16  ;;  %v8578_v5 = vld [vmem:[%s12751_s3 + $0x80] sm:$0xff] }
0x18fe   : > { %v9178_v6 = vpop.f32.mrf.mxu0 }
0x18ff   : > { %v8576_v6 = vld [vmem:[#allocation19 + $0x1] ss:$0 sm:$0xff] }
0x1967   : > { %v3383_v7 = vpop.permute.xlu0 %3382 }
0x1968   : > { %v3393_v9 = vsel %vm1604_vm4, %v11856_v23, %v3383_v7  ;;  %v3517_v23 = vld [vmem:[#allocation17 + $0x70] sm:$0xff] }
0x1969   : > { %9201 = vmatpush3.msra.mxu0 %v3517_v23 }
0x196a   : > { %9202 = vmatprep.subr.mxu0 %v11006_v0 }
0x196b   : > { %v3387_v8 = vpop.permute.xlu1 %3386  ;;  %9203 = vmatpush3.msra.mxu0 %v3516_v24 }
0x196c   : > { %v3394_v10 = vsel %vm2281_vm8, %v3393_v9, %v3387_v8  ;;  %9204 = vmatprep.subr.mxu0 %v11006_v0 }
0x196f   : > { %v3391_v11 = vpop.permute.xlu0 %3390 }
0x1970   : > { %v3395_v12 = vsel %vm2283_vm9, %v3394_v10, %v3391_v11 }
0x1971   : > { %9196 = vmatmul.mubr.msk.f32.vlgmr.msra.gmra.mxu1 %vm1525_vm3, %v3395_v12  ;;  %v3732_v12 = vld [vmem:[#allocation11] sm:$0xff] }
0x1972   : > { %9249 = vmatprep.mubr.msk.f32.mxu1 %vm11007_vm0, %v11006_v0  ;;  %9218 = vmatpush3.msra.mxu1 %v8593_v27 }
0x1973   : > { %9219 = vmatprep.subr.mxu1 %v11006_v0 }
0x1974   : > { %9220 = vmatpush3.msra.mxu1 %v8592_v51 }
0x1975   : > { %9221 = vmatprep.subr.mxu1 %v11006_v0 }
0x1976   : > { %9222 = vmatpush3.msra.mxu1 %v8591_v54 }
0x1977   : > { %9223 = vmatprep.subr.mxu1 %v11006_v0 }
0x1978   : > { %9224 = vmatpush3.msra.mxu1 %v8590_v55 }
0x1979   : > { %9225 = vmatprep.subr.mxu1 %v11006_v0 }
0x197a   : > { %9226 = vmatpush3.msra.mxu1 %v8589_v56 }
0x197b   : > { %9227 = vmatprep.subr.mxu1 %v11006_v0 }
0x197c   : > { %9228 = vmatpush3.msra.mxu1 %v8588_v57  ;;  %v10167_v57 = vld [vmem:[#allocation13] sm:$0xf] }
0x197d   : > { %9229 = vmatprep.subr.mxu1 %v11006_v0 }
0x197e   : > { %9230 = vmatpush3.msra.mxu1 %v8587_v58  ;;  %v3822_v58 = vrot.slane %v10167_v57, %v11797_v39 }
0x197f   : > { %9231 = vmatprep.subr.mxu1 %v11006_v0 }
0x1980   : > { %9232 = vmatpush3.msra.mxu1 %v8586_v59 }
0x1981   : > { %9233 = vmatprep.subr.mxu1 %v11006_v0 }
0x1982   : > { %9234 = vmatpush3.msra.mxu1 %v8585_v60 }
0x1983   : > { %9235 = vmatprep.subr.mxu1 %v11006_v0 }
0x1984   : > { %9236 = vmatpush3.msra.mxu1 %v8584_v61  ;;  %v3827_v61 = vrot.slane %v10167_v57, %v11800_v40 }
0x1985   : > { %9237 = vmatprep.subr.mxu1 %v11006_v0 }
0x1986   : > { %9238 = vmatpush3.msra.mxu1 %v8583_v62 }
0x1987   : > { %9239 = vmatprep.subr.mxu1 %v11006_v0 }
0x1988   : > { %9240 = vmatpush3.msra.mxu1 %v8582_v63 }
0x1989   : > { %9241 = vmatprep.subr.mxu1 %v11006_v0 }
0x198a   : > { %9242 = vmatpush3.msra.mxu1 %v8581_v1  ;;  %v3852_v1 = vld [vmem:[#allocation23] sm:$0x3] }
0x198b   : > { %9243 = vmatprep.subr.mxu1 %v11006_v0 }
0x198c   : > { %9244 = vmatpush3.msra.mxu1 %v8580_v2  ;;  %v3857_v2 = vrot.slane %v3852_v1, %v11601_v34 }
0x198d   : > { %9245 = vmatprep.subr.mxu1 %v11006_v0 }
0x198e   : > { %9246 = vmatpush3.msra.mxu1 %v8579_v4 }
0x198f   : > { %9247 = vmatprep.subr.mxu1 %v11006_v0 }
0x1990   : > { %9248 = vmatpush3.msra.mxu1 %v8578_v5 }
0x1991   : > { %9273 = vmatprep.subr.mxu1 %v11006_v0 }
0x1a31   : > { %v3482_v13 = vpop.f32.mrf.mxu1 }
0x1a32   : > { %v3483_v14 = vadd.f32 %v8574_v3, %v3482_v13 }
0x1a33   : > { %v9197_v15 = vpop.f32.mrf.mxu1 }
0x1a34   : > { %v3486_v16 = vadd.f32 %v3483_v14, %v11806_v47  ;;  %v3515_v47 = vld [vmem:[#allocation17 + $0x60] sm:$0xff] }
0x1a35   : > { %9205 = vmatpush3.msra.mxu0 %v3515_v47 }
0x1a36   : > { %v3487_v17 = vsel %vm1471_vm2, %v3486_v16, 0.0  ;;  %9206 = vmatprep.subr.mxu0 %v11006_v0 }
0x1a37   : > { %3488 = vadd.xlane.f32.xlu1 %v3487_v17  ;;  %9207 = vmatpush3.msra.mxu0 %v3514_v25 }
0x1a38   : > { %9208 = vmatprep.subr.mxu0 %v11006_v0 }
0x1a39   : > { %9209 = vmatpush3.msra.mxu0 %v3513_v26  ;;  %v3851_v26 = vld [vmem:[%s12752_s13 + $0x78] sm:$0xff] }
0x1a3a   : > { %9210 = vmatprep.subr.mxu0 %v11006_v0 }
0x1a3b   : > { %9211 = vmatpush3.msra.mxu0 %v3512_v28  ;;  %v3850_v28 = vld [vmem:[%s12752_s13 + $0x70] sm:$0xff] }
0x1a3c   : > { %9212 = vmatprep.subr.mxu0 %v11006_v0 }
0x1a3d   : > { %9213 = vmatpush3.msra.mxu0 %v3511_v29  ;;  %v3849_v29 = vld [vmem:[%s12752_s13 + $0x68] sm:$0xff] }
0x1a3e   : > { %9252 = vmatprep.subr.mxu0 %v11006_v0 }
0x1ac0   : > { %v3489_v18 = vpop.xlane.xlu1 %3488 }
0x1ac1   : > { %v3490_v19 = vmul.f32 0.015625, %v3489_v18 }
0x1ac3   : > { %v3491_v42 = vsub.f32 %v3486_v16, %v3490_v19 }
0x1ac5   : > { %v3492_v20 = vmul.f32 %v3491_v42, %v3491_v42 }
0x1ac7   : > { %v3493_v21 = vsel %vm1471_vm2, %v3492_v20, 0.0 }
0x1ac8   : > { %3494 = vadd.xlane.f32.xlu0 %v3493_v21 }
0x1b51   : > { %v3495_v30 = vpop.xlane.xlu0 %3494 }
0x1b52   : > { %v3496_v31 = vmul.f32 0.015625, %v3495_v30  ;;  %v3848_v30 = vld [vmem:[%s12752_s13 + $0x60] sm:$0xff] }
0x1b54   : > { %v3497_v35 = vadd.f32 1e-05, %v3496_v31  ;;  %v3847_v31 = vld [vmem:[%s12752_s13 + $0x58] sm:$0xff] }
0x1b56   : > { %10075 = vrsqrt.f32 %v3497_v35  ;;  %v3846_v35 = vld [vmem:[%s12752_s13 + $0x50] sm:$0xff] }
0x1b63   : > { %v10076_v41 = vpop.eup %10075 }
0x1b64   : > { %v3499_v43 = vmul.f32 %v10076_v41, %v3491_v42  ;;  %v3844_v41 = vld [vmem:[%s12752_s13 + $0x40] sm:$0xff] }
0x1b66   : > { %v3504_v45 = vmul.f32 %v3503_v38, %v3499_v43  ;;  %v3845_v38 = vld [vmem:[%s12752_s13 + $0x48] sm:$0xff]  ;;  %v3843_v43 = vld [vmem:[%s12752_s13 + $0x38] sm:$0xff] }
0x1b68   : > { %v11923_v46 = vadd.f32 %v3508_v44, %v3504_v45  ;;  %v3842_v44 = vld [vmem:[%s12752_s13 + $0x30] sm:$0xff]  ;;  %v3841_v45 = vld [vmem:[%s12752_s13 + $0x28] sm:$0xff] }
0x1b6a   : > { %9215 = vmatmul.mubr.msk.f32.vlgmr.msra.gmra.mxu0 %vm1525_vm3, %v11923_v46 }
0x1b6b   : > { %9253 = vmatpush3.msra.mxu0 %v3731_v48  ;;  %9260 = vmatprep.mubr.msk.f32.mxu0 %vm11007_vm0, %v11006_v0  ;;  %v3840_v48 = vld [vmem:[%s12752_s13 + $0x20] sm:$0xff] }
0x1b6c   : > { %9254 = vmatprep.subr.mxu0 %v11006_v0 }
0x1b6d   : > { %9255 = vmatpush3.msra.mxu0 %v3730_v49  ;;  %v3839_v49 = vld [vmem:[%s12752_s13 + $0x18] sm:$0xff] }
0x1b6e   : > { %9256 = vmatprep.subr.mxu0 %v11006_v0 }
0x1b6f   : > { %9257 = vmatpush3.msra.mxu0 %v3729_v50  ;;  %v3838_v50 = vld [vmem:[%s12752_s13 + $0x10] sm:$0xff] }
0x1b70   : > { %9258 = vmatprep.subr.mxu0 %v11006_v0 }
0x1b71   : > { %9259 = vmatpush3.msra.mxu0 %v3728_v52  ;;  %v3837_v52 = vld [vmem:[%s12752_s13 + $0x8] sm:$0xff] }
0x1b72   : > { %9261 = vmatmul.mubr.msk.f32.vlgmr.msra.gmra.mxu0 %vm2281_vm8, %v1393_v53  ;;  %3883 = vmatprep.subr.mxu0 %v3851_v26  ;;  %v3836_v53 = vld [vmem:[%s12752_s13] sm:$0xff] }
0x1b73   : > { %3931 = vmatprep.mubr.f32.mxu0 %v11006_v0  ;;  %3884 = vmatpush1.msra.mxu0 %v3850_v28 }
0x1b74   : > { %3885 = vmatprep.subr.mxu0 %v3849_v29 }
0x1b75   : > { %3886 = vmatpush1.msra.mxu0 %v3848_v30 }
0x1b76   : > { %3887 = vmatprep.subr.mxu0 %v3847_v31 }
0x1b77   : > { %3888 = vmatpush1.msra.mxu0 %v3846_v35 }
0x1b78   : > { %3889 = vmatprep.subr.mxu0 %v3845_v38 }
0x1b79   : > { %3890 = vmatpush1.msra.mxu0 %v3844_v41 }
0x1b7a   : > { %3891 = vmatprep.subr.mxu0 %v3843_v43 }
0x1b7b   : > { %3892 = vmatpush1.msra.mxu0 %v3842_v44 }
0x1b7c   : > { %3893 = vmatprep.subr.mxu0 %v3841_v45 }
0x1b7d   : > { %3894 = vmatpush1.msra.mxu0 %v3840_v48 }
0x1b7e   : > { %3895 = vmatprep.subr.mxu0 %v3839_v49 }
0x1b7f   : > { %3896 = vmatpush1.msra.mxu0 %v3838_v50 }
0x1b80   : > { %3897 = vmatprep.subr.mxu0 %v3837_v52 }
0x1b81   : > { %3898 = vmatpush1.msra.mxu0 %v3836_v53 }
0x1b82   : > { %9263 = vmatprep.subr.mxu0 %v11006_v0 }
0x1c2a   : > { %v3596_v7 = vpop.f32.mrf.mxu0 }
0x1c2b   : > { %v3597_v8 = vadd.f32 %v8576_v6, %v3596_v7  ;;  %v3861_v7 = vrot.slane %v3852_v1, %v11604_v36 }
0x1c2c   : > { %v9216_v9 = vpop.f32.mrf.mxu0 }
0x1c2d   : > { %v3600_v10 = vmul.f32 %v3597_v8, %v3597_v8 }
0x1c2f   : > { %v3601_v11 = vmul.f32 %v3600_v10, %v3597_v8 }
0x1c31   : > { %v3602_v3 = vmul.f32 0.044715, %v3601_v11 }
0x1c32   : > { %v3802_v13 = vpop.f32.mrf.mxu0 }
0x1c33   : > { %v3603_v14 = vadd.f32 %v3602_v3, %v3597_v8  ;;  %v3803_v15 = vadd.f32 %v3802_v13, %v3732_v12 }
0x1c34   : > { %v9262_v16 = vpop.f32.mrf.mxu0 }
0x1c35   : > { %v3604_v17 = vmul.f32 0.7978846, %v3603_v14  ;;  %v3806_v18 = vsel %vm1525_vm3, %v3803_v15, 0.0  ;;  %v3832_v16 = vand.u32 127, %v1486_v32 }
0x1c36   : > { %3807 = vadd.xlane.f32.xlu0 %v3806_v18 }
0x1c37   : > { %10077 = vtanh.f32 %v3604_v17  ;;  %vm3833_vm10 = vcmp.le.s32.totalorder %v3832_v16, %v11598_v33  ;;  %v11015_v17 = vmov -1e+09   ;;  %v4619_v16 = vld [vmem:[#allocation25 + $0x38] sm:$0xff] }
0x1c38   : > { %v12033_v18 = vsel %vm3833_vm10, 0.0, %v11015_v17  ;;  %v4618_v17 = vld [vmem:[#allocation25 + $0x30] sm:$0xff] }
0x1c44   : > { %v10078_v19 = vpop.eup %10077 }
0x1c45   : > { %v3606_v42 = vadd.f32 1.0, %v10078_v19 }
0x1c47   : > { %v3607_v20 = vmul.f32 0.5, %v3606_v42 }
0x1c49   : > { %v3608_v21 = vmul.f32 %v3607_v20, %v3597_v8 }
0x1c4b   : > { %9250 = vmatmul.mubr.f32.vlgmr.msra.gmra.mxu1 %v3608_v21 }
0x1c4c   : > { %9275 = vmatprep.mubr.msk.f32.mxu1 %vm11007_vm0, %v11006_v0 }
0x1cbf   : > { %v3808_v22 = vpop.xlane.xlu0 %3807 }
0x1cc0   : > { %v3809_v23 = vmul.f32 0.015625, %v3808_v22 }
0x1cc2   : > { %v3810_v24 = vsub.f32 %v3803_v15, %v3809_v23 }
0x1cc4   : > { %v3811_v47 = vmul.f32 %v3810_v24, %v3810_v24 }
0x1cc6   : > { %v3812_v25 = vsel %vm1525_vm3, %v3811_v47, 0.0 }
0x1cc7   : > { %3813 = vadd.xlane.f32.xlu1 %v3812_v25 }
0x1d0b   : > { %v11988_v27 = vpop.f32.mrf.mxu1 }
0x1d0d   : > { %v9251_v51 = vpop.f32.mrf.mxu1 }
0x1d50   : > { %v3814_v54 = vpop.xlane.xlu1 %3813 }
0x1d51   : > { %v3815_v55 = vmul.f32 0.015625, %v3814_v54 }
0x1d53   : > { %v3816_v56 = vadd.f32 1e-05, %v3815_v55 }
0x1d55   : > { %10079 = vrsqrt.f32 %v3816_v56 }
0x1d62   : > { %v10080_v59 = vpop.eup %10079 }
0x1d63   : > { %v3818_v60 = vmul.f32 %v10080_v59, %v3810_v24 }
0x1d65   : > { %v3823_v62 = vmul.f32 %v3822_v58, %v3818_v60 }
0x1d67   : > { %v11992_v63 = vadd.f32 %v3827_v61, %v3823_v62 }
0x1d69   : > { %8596 = vmatmul.mubr.msk.f32.vlgmr.msra.gmra.mxu0 %vm1525_vm3, %v11992_v63 }
0x1d6a   : > { %9265 = vmatprep.mubr.msk.f32.mxu0 %vm11007_vm0, %v11006_v0 }
0x1e29   : > { %v3933_v4 = vpop.f32.mrf.mxu0 }
0x1e2a   : > { %v3934_v5 = vadd.f32 %v3933_v4, %v3857_v2 }
0x1e2b   : > { %v3935_v8 = vpop.f32.mrf.mxu0 }
0x1e2c   : > { %4103 = vrot.lane.b32.xlu1 %v3934_v5, %s11011_s16  ;;  %3940 = vrot.lane.b32.xlu0 %v3934_v5, %s11008_s14  ;;  %v3938_v6 = vmul.f32 0.25, %v3934_v5  ;;  %v12011_v11 = vadd.f32 %v3935_v8, %v3861_v7 }
0x1e30   : > { %4269 = vrot.lane.b32.xlu0 %v3934_v5, %s11010_s4  ;;  %4101 = vrot.lane.b32.xlu1 %v3938_v6, %s11009_s27 }
0x1e34   : > { %4434 = vrot.lane.b32.xlu0 %v3934_v5, %s11013_s1  ;;  %4267 = vrot.lane.b32.xlu1 %v3938_v6, %s11012_s8 }
0x1e38   : > { %4432 = vrot.lane.b32.xlu1 %v3938_v6, %s11014_s30 }
0x1e9e   : > { %v4104_v9 = vpop.permute.xlu1 %4103  ;;  %v3941_v10 = vpop.permute.xlu0 %3940 }
0x1e9f   : > { %9264 = vmatpush3.xpose.msk.msra.mxu0 %vm1604_vm4, %v3941_v10  ;;  %9274 = vmatpush3.xpose.msk.msra.mxu1 %vm1604_vm4, %v4104_v9 }
0x1ea0   : > { %9268 = vmatprep.subr.mxu0 %v11006_v0  ;;  %9283 = vmatprep.subr.mxu1 %v11006_v0 }
0x1ea2   : > { %v4270_v12 = vpop.permute.xlu0 %4269  ;;  %v4102_v3 = vpop.permute.xlu1 %4101  ;;  %9266 = vmatmul.mubr.msk.f32.vlgmr.msra.gmra.mxu0 %vm1604_vm4, %v3938_v6 }
0x1ea3   : > { %9269 = vmatpush3.msra.mxu0 %v12011_v11  ;;  %9276 = vmatmul.mubr.msk.f32.vlgmr.msra.gmra.mxu1 %vm1604_vm4, %v4102_v3 }
0x1ea4   : > { %9284 = vmatpush3.xpose.msk.msra.mxu1 %vm1604_vm4, %v4270_v12  ;;  %9285 = vmatprep.mubr.msk.f32.mxu1 %vm11007_vm0, %v11006_v0 }
0x1ea5   : > { %9293 = vmatprep.subr.mxu1 %v11006_v0  ;;  %9270 = vmatprep.mubr.msk.f32.mxu0 %vm11007_vm0, %v11006_v0 }
0x1ea6   : > { %v4435_v13 = vpop.permute.xlu0 %4434  ;;  %v4268_v14 = vpop.permute.xlu1 %4267  ;;  %9278 = vmatprep.subr.mxu0 %v11006_v0 }
0x1ea7   : > { %9286 = vmatmul.mubr.msk.f32.vlgmr.msra.gmra.mxu1 %vm1604_vm4, %v4268_v14 }
0x1ea8   : > { %9294 = vmatpush3.xpose.msk.msra.mxu1 %vm1604_vm4, %v4435_v13  ;;  %9295 = vmatprep.mubr.msk.f32.mxu1 %vm11007_vm0, %v11006_v0 }
0x1ea9   : > { %9303 = vmatprep.subr.mxu1 %v11006_v0 }
0x1eaa   : > { %v4433_v15 = vpop.permute.xlu1 %4432 }
0x1eab   : > { %9296 = vmatmul.mubr.msk.f32.vlgmr.msra.gmra.mxu1 %vm1604_vm4, %v4433_v15 }
0x1eac   : > { %9319 = vmatprep.mubr.msk.f32.mxu1 %vm11007_vm0, %v11006_v0  ;;  %9304 = vmatpush3.msra.mxu1 %v4619_v16 }
0x1ead   : > { %9305 = vmatprep.subr.mxu1 %v11006_v0 }
0x1eae   : > { %9306 = vmatpush3.msra.mxu1 %v4618_v17 }
0x1eaf   : > { %9307 = vmatprep.subr.mxu1 %v11006_v0 }
0x1f62   : > { %v4013_v19 = vpop.f32.mrf.mxu0 }
0x1f63   : > { %v4014_v42 = vadd.f32 %v4013_v19, %v12033_v18  ;;  %v4175_v20 = vpop.f32.mrf.mxu1  ;;  %v4617_v19 = vld [vmem:[#allocation25 + $0x28] sm:$0xff] }
0x1f64   : > { %v4176_v21 = vadd.f32 %v4175_v20, %v12033_v18  ;;  %v9267_v22 = vpop.f32.mrf.mxu0  ;;  %9308 = vmatpush3.msra.mxu1 %v4617_v19  ;;  %v4615_v20 = vld [vmem:[#allocation25 + $0x18] sm:$0xff] }
0x1f65   : > { %v9277_v23 = vpop.f32.mrf.mxu1  ;;  %v4017_v24 = vsel %vm1397_vm1, %v4014_v42, -inf  ;;  %9309 = vmatprep.subr.mxu1 %v11006_v0  ;;  %v4613_v22 = vld [vmem:[#allocation25 + $0x8] sm:$0xff] }
0x1f66   : > { %4018 = vmax.xlane.f32.xlu0 %v4017_v24  ;;  %v4179_v47 = vsel %vm1397_vm1, %v4176_v21, -inf  ;;  %v4612_v24 = vld [vmem:[#allocation25] sm:$0xff] }
0x1f67   : > { %4180 = vmax.xlane.f32.xlu1 %v4179_v47  ;;  %v4341_v32 = vpop.f32.mrf.mxu1 }
0x1f68   : > { %v4342_v25 = vadd.f32 %v4341_v32, %v12033_v18 }
0x1f69   : > { %v9287_v26 = vpop.f32.mrf.mxu1 }
0x1f6a   : > { %v4345_v28 = vsel %vm1397_vm1, %v4342_v25, -inf }
0x1f6b   : > { %v4506_v29 = vpop.f32.mrf.mxu1  ;;  %4346 = vmax.xlane.f32.xlu0 %v4345_v28 }
0x1f6c   : > { %v4507_v30 = vadd.f32 %v4506_v29, %v12033_v18 }
0x1f6d   : > { %v9297_v31 = vpop.f32.mrf.mxu1 }
0x1f6e   : > { %v4510_v35 = vsel %vm1397_vm1, %v4507_v30, -inf  ;;  %v8594_v31 = vld [vmem:[#allocation20 + $0x1] ss:$0 sm:$0xff] }
0x1f6f   : > { %4511 = vmax.xlane.f32.xlu0 %v4510_v35  ;;  %v3701_v35 = vadd.f32 %v8594_v31, %v11988_v27 }
0x1f78   : > { %4191 = vrot.lane.b32.xlu1 %v12011_v11, %s11009_s27 }
0x1fef   : > { %v4019_v38 = vpop.xlane.xlu0 %4018 }
0x1ff0   : > { %v4020_v41 = vsub.f32 %v4014_v42, %v4019_v38  ;;  %v4181_v43 = vpop.xlane.xlu1 %4180  ;;  %v4616_v42 = vld [vmem:[#allocation25 + $0x20] sm:$0xff]  ;;  %v3704_v38 = vadd.f32 %v3701_v35, %v11923_v46 }
0x1ff1   : > { %v4182_v44 = vsub.f32 %v4176_v21, %v4181_v43  ;;  %9310 = vmatpush3.msra.mxu1 %v4616_v42  ;;  %v4614_v21 = vld [vmem:[#allocation25 + $0x10] sm:$0xff]  ;;  %v4731_v42 = vld [vmem:[#allocation28 + $0x38] sm:$0xff] }
0x1ff2   : > { %v4021_v45 = vmul.f32 1.442695, %v4020_v41  ;;  %9311 = vmatprep.subr.mxu1 %v11006_v0  ;;  %v3705_v41 = vsel %vm1471_vm2, %v3704_v38, 0.0 }
0x1ff3   : > { %v4183_v48 = vmul.f32 1.442695, %v4182_v44  ;;  %9312 = vmatpush3.msra.mxu1 %v4615_v20  ;;  %v4729_v20 = vld [vmem:[#allocation28 + $0x28] sm:$0xff] }
0x1ff4   : > { %10081 = vpow2.f32 %v4021_v45  ;;  %v4347_v49 = vpop.xlane.xlu0 %4346  ;;  %v4192_v1 = vpop.permute.xlu1 %4191  ;;  %9313 = vmatprep.subr.mxu1 %v11006_v0 }
0x1ff5   : > { %10083 = vpow2.f32 %v4183_v48  ;;  %v4348_v50 = vsub.f32 %v4342_v25, %v4347_v49  ;;  %9314 = vmatpush3.msra.mxu1 %v4614_v21  ;;  %v4728_v21 = vld [vmem:[#allocation28 + $0x20] sm:$0xff] }
0x1ff6   : > { %9315 = vmatprep.subr.mxu1 %v11006_v0 }
0x1ff7   : > { %v4349_v52 = vmul.f32 1.442695, %v4348_v50  ;;  %9316 = vmatpush3.msra.mxu1 %v4613_v22  ;;  %v4727_v22 = vld [vmem:[#allocation28 + $0x18] sm:$0xff] }
0x1ff8   : > { %v4512_v53 = vpop.xlane.xlu0 %4511  ;;  %9317 = vmatprep.subr.mxu1 %v11006_v0 }
0x1ff9   : > { %10085 = vpow2.f32 %v4349_v52  ;;  %v4513_v51 = vsub.f32 %v4507_v30, %v4512_v53  ;;  %9318 = vmatpush3.msra.mxu1 %v4612_v24  ;;  %v4725_v24 = vld [vmem:[#allocation28 + $0x8] sm:$0xff] }
0x1ffa   : > { %9341 = vmatprep.subr.mxu1 %v11006_v0 }
0x1ffb   : > { %v4514_v54 = vmul.f32 1.442695, %v4513_v51 }
0x1ffd   : > { %10087 = vpow2.f32 %v4514_v54  ;;  %v4819_v54 = vld [vmem:[#allocation31 + $0x38] sm:$0xff] }
0x2001   : > { %v10082_v55 = vpop.eup %10081 }
0x2002   : > { %v10084_v56 = vpop.eup %10083  ;;  %v4023_v57 = vsel %vm1397_vm1, %v10082_v55, 0.0 }
0x2003   : > { %4024 = vadd.xlane.f32.xlu1 %v4023_v57  ;;  %v4185_v58 = vsel %vm1397_vm1, %v10084_v56, 0.0  ;;  %v4816_v57 = vld [vmem:[#allocation31 + $0x20] sm:$0xff] }
0x2004   : > { %4186 = vadd.xlane.f32.xlu0 %v4185_v58  ;;  %v4815_v58 = vld [vmem:[#allocation31 + $0x18] sm:$0xff] }
0x2006   : > { %v10086_v59 = vpop.eup %10085 }
0x2007   : > { %v4351_v60 = vsel %vm1397_vm1, %v10086_v59, 0.0 }
0x2008   : > { %4352 = vadd.xlane.f32.xlu1 %v4351_v60  ;;  %v4813_v60 = vld [vmem:[#allocation31 + $0x8] sm:$0xff] }
0x200a   : > { %v10088_v61 = vpop.eup %10087 }
0x200b   : > { %v4516_v62 = vsel %vm1397_vm1, %v10088_v61, 0.0 }
0x200c   : > { %4517 = vadd.xlane.f32.xlu0 %v4516_v62  ;;  %v8609_v62 = vld [vmem:[#allocation26] ss:$0 sm:$0xff] }
0x2019   : > { %4521 = vrot.lane.b32.xlu1 %v12011_v11, %s11014_s30 }
0x2022   : > { %4356 = vrot.lane.b32.xlu0 %v12011_v11, %s11012_s8 }
0x208c   : > { %v4025_v2 = vpop.xlane.xlu1 %4024 }
0x208d   : > { %10089 = vrcp.f32 %v4025_v2  ;;  %v4187_v4 = vpop.xlane.xlu0 %4186 }
0x208e   : > { %10091 = vrcp.f32 %v4187_v4 }
0x2091   : > { %v4353_v5 = vpop.xlane.xlu1 %4352 }
0x2092   : > { %10093 = vrcp.f32 %v4353_v5 }
0x2095   : > { %v4518_v6 = vpop.xlane.xlu0 %4517  ;;  %v4522_v14 = vpop.permute.xlu1 %4521 }
0x2096   : > { %10095 = vrcp.f32 %v4518_v6 }
0x2099   : > { %v4357_v12 = vpop.permute.xlu0 %4356 }
0x209a   : > { %v10090_v7 = vpop.eup %10089 }
0x209b   : > { %v4027_v8 = vmul.f32 %v10090_v7, %v10082_v55  ;;  %v10092_v9 = vpop.eup %10091  ;;  %v4818_v55 = vld [vmem:[#allocation31 + $0x30] sm:$0xff] }
0x209c   : > { %v4189_v10 = vmul.f32 %v10092_v9, %v10084_v56  ;;  %v4817_v56 = vld [vmem:[#allocation31 + $0x28] sm:$0xff] }
0x209d   : > { %9271 = vmatmul.mubr.msk.f32.vlgmr.msra.gmra.mxu0 %vm1397_vm1, %v4027_v8 }
0x209e   : > { %9279 = vmatpush3.msra.mxu0 %v4192_v1  ;;  %9280 = vmatprep.mubr.msk.f32.mxu0 %vm11007_vm0, %v11006_v0 }
0x209f   : > { %9288 = vmatprep.subr.mxu0 %v11006_v0  ;;  %v10094_v11 = vpop.eup %10093 }
0x20a0   : > { %v4355_v3 = vmul.f32 %v10094_v11, %v10086_v59  ;;  %v4814_v59 = vld [vmem:[#allocation31 + $0x10] sm:$0xff] }
0x20a1   : > { %9281 = vmatmul.mubr.msk.f32.vlgmr.msra.gmra.mxu0 %vm1397_vm1, %v4189_v10  ;;  %v3721_v10 = vrot.slane %v11917_v37, %v11797_v39 }
0x20a2   : > { %9289 = vmatpush3.msra.mxu0 %v4357_v12  ;;  %9290 = vmatprep.mubr.msk.f32.mxu0 %vm11007_vm0, %v11006_v0 }
0x20a3   : > { %9298 = vmatprep.subr.mxu0 %v11006_v0  ;;  %v10096_v13 = vpop.eup %10095 }
0x20a4   : > { %v4520_v15 = vmul.f32 %v10096_v13, %v10088_v61  ;;  %v4812_v61 = vld [vmem:[#allocation31] sm:$0xff] }
0x20a5   : > { %9291 = vmatmul.mubr.msk.f32.vlgmr.msra.gmra.mxu0 %vm1397_vm1, %v4355_v3  ;;  %v3726_v3 = vrot.slane %v11917_v37, %v11800_v40  ;;  %v4730_v37 = vld [vmem:[#allocation28 + $0x30] sm:$0xff] }
0x20a6   : > { %9299 = vmatpush3.msra.mxu0 %v4522_v14  ;;  %9300 = vmatprep.mubr.msk.f32.mxu0 %vm11007_vm0, %v11006_v0 }
0x20a7   : > { %9322 = vmatprep.subr.mxu0 %v11006_v0 }
0x20a9   : > { %9301 = vmatmul.mubr.msk.f32.vlgmr.msra.gmra.mxu0 %vm1397_vm1, %v4520_v15 }
0x20aa   : > { %9338 = vmatprep.mubr.msk.f32.mxu0 %vm11007_vm0, %v11006_v0  ;;  %9323 = vmatpush3.msra.mxu0 %v4731_v42 }
0x20ab   : > { %9324 = vmatprep.subr.mxu0 %v11006_v0 }
0x20ac   : > { %9325 = vmatpush3.msra.mxu0 %v4730_v37 }
0x20ad   : > { %9326 = vmatprep.subr.mxu0 %v11006_v0 }
0x20ae   : > { %9327 = vmatpush3.msra.mxu0 %v4729_v20 }
0x20af   : > { %9328 = vmatprep.subr.mxu0 %v11006_v0 }
0x20b0   : > { %9329 = vmatpush3.msra.mxu0 %v4728_v21 }
0x20b1   : > { %9330 = vmatprep.subr.mxu0 %v11006_v0 }
0x20b2   : > { %9331 = vmatpush3.msra.mxu0 %v4727_v22 }
0x20b3   : > { %9332 = vmatprep.subr.mxu0 %v11006_v0 }
0x215d   : > { %v4097_v23 = vpop.f32.mrf.mxu0 }
0x215f   : > { %v9272_v47 = vpop.f32.mrf.mxu0 }
0x2160   : > { %v4724_v47 = vld [vmem:[#allocation28] sm:$0xff] }
0x2161   : > { %v4263_v32 = vpop.f32.mrf.mxu0 }
0x2162   : > { %4598 = vrot.lane.b32.xlu1 %v4263_v32, %s11013_s1 }
0x2163   : > { %v9282_v25 = vpop.f32.mrf.mxu0 }
0x2165   : > { %v4428_v26 = vpop.f32.mrf.mxu0 }
0x2166   : > { %4602 = vrot.lane.b32.xlu0 %v4428_v26, %s11010_s4 }
0x2167   : > { %v9292_v28 = vpop.f32.mrf.mxu0 }
0x2169   : > { %v4593_v29 = vpop.f32.mrf.mxu0 }
0x216a   : > { %4606 = vrot.lane.b32.xlu1 %v4593_v29, %s11011_s16 }
0x216b   : > { %v9302_v30 = vpop.f32.mrf.mxu0 }
0x216c   : > { %v12119_v30 = vld [vmem:[%s11175_s9] sm:$0x3f] }
0x216d   : > { %v4717_v31 = vrot.slane %v12119_v30, %v11601_v34 }
0x2185   : > { %3706 = vadd.xlane.f32.xlu0 %v3705_v41  ;;  %v4722_v41 = vrot.slane %v12119_v30, %v11604_v36 }
0x21d4   : > { %v4599_v43 = vpop.permute.xlu1 %4598 }
0x21d5   : > { %v4609_v45 = vsel %vm1604_vm4, %v4097_v23, %v4599_v43  ;;  %v4726_v23 = vld [vmem:[#allocation28 + $0x10] sm:$0xff]  ;;  %v8613_v43 = vld [vmem:[#allocation32] ss:$0 sm:$0xff] }
0x21d6   : > { %9333 = vmatpush3.msra.mxu0 %v4726_v23 }
0x21d7   : > { %9334 = vmatprep.subr.mxu0 %v11006_v0 }
0x21d8   : > { %v4603_v44 = vpop.permute.xlu0 %4602  ;;  %9335 = vmatpush3.msra.mxu0 %v4725_v24 }
0x21d9   : > { %v4610_v48 = vsel %vm2281_vm8, %v4609_v45, %v4603_v44  ;;  %9336 = vmatprep.subr.mxu0 %v11006_v0 }
0x21da   : > { %9337 = vmatpush3.msra.mxu0 %v4724_v47 }
0x21db   : > { %9360 = vmatprep.subr.mxu0 %v11006_v0 }
0x21dc   : > { %v4607_v49 = vpop.permute.xlu1 %4606 }
0x21dd   : > { %v4611_v50 = vsel %vm2283_vm9, %v4610_v48, %v4607_v49  ;;  %v8611_v49 = vld [vmem:[#allocation29] ss:$0 sm:$0xff] }
0x21de   : > { %9320 = vmatmul.mubr.msk.f32.vlgmr.msra.gmra.mxu1 %vm1525_vm3, %v4611_v50 }
0x21df   : > { %9357 = vmatprep.mubr.msk.f32.mxu1 %vm11007_vm0, %v11006_v0  ;;  %9342 = vmatpush3.msra.mxu1 %v4819_v54 }
0x21e0   : > { %9343 = vmatprep.subr.mxu1 %v11006_v0 }
0x21e1   : > { %9344 = vmatpush3.msra.mxu1 %v4818_v55 }
0x21e2   : > { %9345 = vmatprep.subr.mxu1 %v11006_v0 }
0x21e3   : > { %9346 = vmatpush3.msra.mxu1 %v4817_v56 }
0x21e4   : > { %9347 = vmatprep.subr.mxu1 %v11006_v0 }
0x21e5   : > { %9348 = vmatpush3.msra.mxu1 %v4816_v57 }
0x21e6   : > { %9349 = vmatprep.subr.mxu1 %v11006_v0 }
0x21e7   : > { %9350 = vmatpush3.msra.mxu1 %v4815_v58 }
0x21e8   : > { %9351 = vmatprep.subr.mxu1 %v11006_v0 }
0x21e9   : > { %9352 = vmatpush3.msra.mxu1 %v4814_v59 }
0x21ea   : > { %9353 = vmatprep.subr.mxu1 %v11006_v0 }
0x21eb   : > { %9354 = vmatpush3.msra.mxu1 %v4813_v60 }
0x21ec   : > { %9355 = vmatprep.subr.mxu1 %v11006_v0 }
0x21ed   : > { %9356 = vmatpush3.msra.mxu1 %v4812_v61 }
0x21ee   : > { %9380 = vmatprep.subr.mxu1 %v11006_v0 }
0x220e   : > { %v3707_v27 = vpop.xlane.xlu0 %3706 }
0x220f   : > { %v3708_v52 = vmul.f32 0.015625, %v3707_v27 }
0x2211   : > { %v3709_v46 = vsub.f32 %v3704_v38, %v3708_v52 }
0x2213   : > { %v3710_v53 = vmul.f32 %v3709_v46, %v3709_v46 }
0x2215   : > { %v3711_v51 = vsel %vm1471_vm2, %v3710_v53, 0.0 }
0x2216   : > { %3712 = vadd.xlane.f32.xlu0 %v3711_v51 }
0x229e   : > { %v4696_v1 = vpop.f32.mrf.mxu1 }
0x229f   : > { %v4697_v2 = vadd.f32 %v8609_v62, %v4696_v1  ;;  %v3713_v4 = vpop.xlane.xlu0 %3712 }
0x22a0   : > { %v3714_v5 = vmul.f32 0.015625, %v3713_v4  ;;  %v9321_v6 = vpop.f32.mrf.mxu1 }
0x22a1   : > { %v4700_v7 = vadd.f32 %v4697_v2, %v11992_v63 }
0x22a2   : > { %v3715_v8 = vadd.f32 1e-05, %v3714_v5 }
0x22a3   : > { %v4701_v9 = vsel %vm1525_vm3, %v4700_v7, 0.0 }
0x22a4   : > { %10097 = vrsqrt.f32 %v3715_v8  ;;  %4702 = vadd.xlane.f32.xlu1 %v4701_v9 }
0x22b1   : > { %v10098_v11 = vpop.eup %10097 }
0x22b2   : > { %v3717_v12 = vmul.f32 %v10098_v11, %v3709_v46 }
0x22b4   : > { %v3722_v13 = vmul.f32 %v3721_v10, %v3717_v12 }
0x22b6   : > { %v12103_v14 = vadd.f32 %v3726_v3, %v3722_v13 }
0x22b8   : > { %9358 = vmatmul.mubr.msk.f32.vlgmr.msra.gmra.mxu1 %vm1525_vm3, %v12103_v14 }
0x22b9   : > { %9382 = vmatprep.mubr.msk.f32.mxu1 %vm11007_vm0, %v11006_v0 }
0x232d   : > { %v4703_v63 = vpop.xlane.xlu1 %4702 }
0x232e   : > { %v4704_v15 = vmul.f32 0.015625, %v4703_v63 }
0x2330   : > { %v4705_v16 = vsub.f32 %v4700_v7, %v4704_v15 }
0x2332   : > { %v4706_v17 = vmul.f32 %v4705_v16, %v4705_v16 }
0x2334   : > { %v4707_v19 = vsel %vm1525_vm3, %v4706_v17, 0.0 }
0x2335   : > { %4708 = vadd.xlane.f32.xlu0 %v4707_v19 }
0x2378   : > { %v4896_v32 = vpop.f32.mrf.mxu1 }
0x2379   : > { %v12127_v48 = vadd.f32 %v8613_v43, %v4896_v32 }
0x237a   : > { %v9359_v25 = vpop.f32.mrf.mxu1 }
0x23be   : > { %v4709_v26 = vpop.xlane.xlu0 %4708 }
0x23bf   : > { %v4710_v28 = vmul.f32 0.015625, %v4709_v26 }
0x23c1   : > { %v4711_v29 = vadd.f32 1e-05, %v4710_v28 }
0x23c3   : > { %10099 = vrsqrt.f32 %v4711_v29 }
0x23d0   : > { %v10100_v35 = vpop.eup %10099 }
0x23d1   : > { %v4713_v38 = vmul.f32 %v10100_v35, %v4705_v16 }
0x23d3   : > { %v4718_v44 = vmul.f32 %v4717_v31, %v4713_v38 }
0x23d5   : > { %v12125_v45 = vadd.f32 %v4722_v41, %v4718_v44 }
0x23d7   : > { %9339 = vmatmul.mubr.msk.f32.vlgmr.msra.gmra.mxu0 %vm1525_vm3, %v12125_v45 }
0x23d8   : > { %9361 = vmatpush3.xpose.msk.msra.mxu0 %vm1604_vm4, %v12127_v48  ;;  %9362 = vmatprep.mubr.msk.f32.mxu0 %vm11007_vm0, %v11006_v0 }
0x23d9   : > { %9365 = vmatprep.subr.mxu0 %v11006_v0 }
0x2497   : > { %v4808_v50 = vpop.f32.mrf.mxu0 }
0x2498   : > { %v4809_v27 = vadd.f32 %v8611_v49, %v4808_v50 }
0x2499   : > { %v9340_v52 = vpop.f32.mrf.mxu0 }
0x249a   : > { %v4900_v46 = vmul.f32 0.25, %v4809_v27 }
0x249c   : > { %9363 = vmatmul.mubr.msk.f32.vlgmr.msra.gmra.mxu0 %vm1604_vm4, %v4900_v46 }
0x249d   : > { %9367 = vmatprep.mubr.msk.f32.mxu0 %vm11007_vm0, %v11006_v0 }
0x255c   : > { %v4973_v53 = vpop.f32.mrf.mxu0 }
0x255d   : > { %v4977_v51 = vsel %vm1692_vm7, %v4973_v53, -inf }
0x255e   : > { %4978 = vmax.xlane.f32.xlu1 %v4977_v51  ;;  %v9364_v54 = vpop.f32.mrf.mxu0 }
0x255f   : > { %v5585_v54 = vld [vmem:[#allocation34 + $0x38] sm:$0xff] }
0x256f   : > { %4988 = vrot.lane.b32.xlu1 %v12127_v48, %s11008_s14 }
0x2573   : > { %5065 = vrot.lane.b32.xlu1 %v4900_v46, %s11009_s27 }
0x2577   : > { %5233 = vrot.lane.b32.xlu1 %v12127_v48, %s11012_s8 }
0x257b   : > { %5399 = vrot.lane.b32.xlu1 %v12127_v48, %s11014_s30 }
0x25e7   : > { %v4979_v55 = vpop.xlane.xlu1 %4978 }
0x25e8   : > { %v4980_v56 = vsub.f32 %v4973_v53, %v4979_v55  ;;  %v5584_v55 = vld [vmem:[#allocation34 + $0x30] sm:$0xff] }
0x25ea   : > { %v4981_v57 = vmul.f32 1.442695, %v4980_v56  ;;  %v5583_v56 = vld [vmem:[#allocation34 + $0x28] sm:$0xff] }
0x25eb   : > { %v4989_v58 = vpop.permute.xlu1 %4988 }
0x25ec   : > { %10101 = vpow2.f32 %v4981_v57  ;;  %9366 = vmatpush3.msk.msra.mxu0 %vm1696_vm5, %v4989_v58  ;;  %v5582_v57 = vld [vmem:[#allocation34 + $0x20] sm:$0xff]  ;;  %v5581_v58 = vld [vmem:[#allocation34 + $0x18] sm:$0xff] }
0x25ed   : > { %9370 = vmatprep.subr.mxu0 %v11006_v0 }
0x25ef   : > { %v5066_v59 = vpop.permute.xlu1 %5065 }
0x25f3   : > { %v5234_v60 = vpop.permute.xlu1 %5233 }
0x25f4   : > { %9381 = vmatpush3.xpose.msk.msra.mxu1 %vm1604_vm4, %v5234_v60  ;;  %v5579_v60 = vld [vmem:[#allocation34 + $0x8] sm:$0xff] }
0x25f5   : > { %9390 = vmatprep.subr.mxu1 %v11006_v0 }
0x25f7   : > { %v5400_v5 = vpop.permute.xlu1 %5399 }
0x25f9   : > { %v10102_v61 = vpop.eup %10101 }
0x25fa   : > { %v4983_v62 = vsel %vm1692_vm7, %v10102_v61, 0.0 }
0x25fb   : > { %4984 = vadd.xlane.f32.xlu0 %v4983_v62 }
0x2611   : > { %5067 = vrot.lane.b32.xlu0 %v12127_v48, %s11009_s27 }
0x2615   : > { %5231 = vrot.lane.b32.xlu0 %v4900_v46, %s11012_s8 }
0x2619   : > { %5397 = vrot.lane.b32.xlu0 %v4900_v46, %s11014_s30 }
0x2684   : > { %v4985_v1 = vpop.xlane.xlu0 %4984 }
0x2685   : > { %10103 = vrcp.f32 %v4985_v1 }
0x2688   : > { %v5068_v2 = vpop.permute.xlu0 %5067 }
0x268c   : > { %v5232_v4 = vpop.permute.xlu0 %5231 }
0x268d   : > { %9383 = vmatmul.mubr.msk.f32.vlgmr.msra.gmra.mxu1 %vm1604_vm4, %v5232_v4 }
0x268e   : > { %9391 = vmatpush3.xpose.msk.msra.mxu1 %vm1604_vm4, %v5400_v5  ;;  %9392 = vmatprep.mubr.msk.f32.mxu1 %vm11007_vm0, %v11006_v0 }
0x268f   : > { %9400 = vmatprep.subr.mxu1 %v11006_v0 }
0x2690   : > { %v5398_v6 = vpop.permute.xlu0 %5397 }
0x2691   : > { %9393 = vmatmul.mubr.msk.f32.vlgmr.msra.gmra.mxu1 %vm1604_vm4, %v5398_v6 }
0x2692   : > { %v10104_v7 = vpop.eup %10103  ;;  %9416 = vmatprep.mubr.msk.f32.mxu1 %vm11007_vm0, %v11006_v0  ;;  %9401 = vmatpush3.msra.mxu1 %v5585_v54  ;;  %v5795_v54 = vld [vmem:[%s12753_s17 + $0x40] sm:$0xff] }
0x2693   : > { %v4987_v8 = vmul.f32 %v10104_v7, %v10102_v61  ;;  %9402 = vmatprep.subr.mxu1 %v11006_v0  ;;  %v5578_v61 = vld [vmem:[#allocation34] sm:$0xff] }
0x2694   : > { %9403 = vmatpush3.msra.mxu1 %v5584_v55  ;;  %v5794_v55 = vld [vmem:[%s12753_s17 + $0x38] sm:$0xff] }
0x2695   : > { %9368 = vmatmul.mubr.msk.f32.vlgmr.msra.gmra.mxu0 %vm1692_vm7, %v4987_v8  ;;  %9404 = vmatprep.subr.mxu1 %v11006_v0 }
0x2696   : > { %9371 = vmatpush3.xpose.msk.msra.mxu0 %vm1604_vm4, %v5068_v2  ;;  %9372 = vmatprep.mubr.msk.f32.mxu0 %vm11007_vm0, %v11006_v0 }
0x2697   : > { %9375 = vmatprep.subr.mxu0 %v11006_v0  ;;  %9405 = vmatpush3.msra.mxu1 %v5583_v56  ;;  %v5793_v56 = vld [vmem:[%s12753_s17 + $0x30] sm:$0xff] }
0x2698   : > { %9406 = vmatprep.subr.mxu1 %v11006_v0 }
0x2699   : > { %9373 = vmatmul.mubr.msk.f32.vlgmr.msra.gmra.mxu0 %vm1604_vm4, %v5066_v59  ;;  %9407 = vmatpush3.msra.mxu1 %v5582_v57  ;;  %v5580_v59 = vld [vmem:[#allocation34 + $0x10] sm:$0xff]  ;;  %v5792_v57 = vld [vmem:[%s12753_s17 + $0x28] sm:$0xff] }
0x269a   : > { %9377 = vmatprep.mubr.msk.f32.mxu0 %vm11007_vm0, %v11006_v0  ;;  %9408 = vmatprep.subr.mxu1 %v11006_v0 }
0x269b   : > { %9409 = vmatpush3.msra.mxu1 %v5581_v58  ;;  %v5791_v58 = vld [vmem:[%s12753_s17 + $0x20] sm:$0xff] }
0x269c   : > { %9410 = vmatprep.subr.mxu1 %v11006_v0 }
0x269d   : > { %9411 = vmatpush3.msra.mxu1 %v5580_v59  ;;  %v5790_v59 = vld [vmem:[%s12753_s17 + $0x18] sm:$0xff] }
0x269e   : > { %9412 = vmatprep.subr.mxu1 %v11006_v0 }
0x269f   : > { %9413 = vmatpush3.msra.mxu1 %v5579_v60  ;;  %v5789_v60 = vld [vmem:[%s12753_s17 + $0x10] sm:$0xff] }
0x26a0   : > { %9414 = vmatprep.subr.mxu1 %v11006_v0 }
0x26a1   : > { %9415 = vmatpush3.msra.mxu1 %v5578_v61  ;;  %v5788_v61 = vld [vmem:[%s12753_s17 + $0x8] sm:$0xff] }
0x26a2   : > { %9438 = vmatprep.subr.mxu1 %v11006_v0 }
0x274d   : > { %v5305_v9 = vpop.f32.mrf.mxu1 }
0x274e   : > { %v5309_v10 = vsel %vm1692_vm7, %v5305_v9, -inf }
0x274f   : > { %5310 = vmax.xlane.f32.xlu0 %v5309_v10  ;;  %v9384_v11 = vpop.f32.mrf.mxu1 }
0x2751   : > { %v5471_v12 = vpop.f32.mrf.mxu1 }
0x2752   : > { %v5475_v3 = vsel %vm1692_vm7, %v5471_v12, -inf }
0x2753   : > { %5476 = vmax.xlane.f32.xlu0 %v5475_v3  ;;  %v9394_v13 = vpop.f32.mrf.mxu1  ;;  %v8631_v3 = vld [vmem:[#allocation35] ss:$0 sm:$0xff] }
0x2755   : > { %v12174_v63 = vpop.f32.mrf.mxu0 }
0x2757   : > { %v9369_v15 = vpop.f32.mrf.mxu0 }
0x2759   : > { %v5139_v16 = vpop.f32.mrf.mxu0 }
0x275a   : > { %v5143_v17 = vsel %vm1692_vm7, %v5139_v16, -inf }
0x275b   : > { %5144 = vmax.xlane.f32.xlu1 %v5143_v17  ;;  %v9374_v19 = vpop.f32.mrf.mxu0 }
0x27d8   : > { %v5311_v42 = vpop.xlane.xlu0 %5310 }
0x27d9   : > { %v5312_v37 = vsub.f32 %v5305_v9, %v5311_v42 }
0x27db   : > { %v5313_v20 = vmul.f32 1.442695, %v5312_v37 }
0x27dc   : > { %v5477_v21 = vpop.xlane.xlu0 %5476 }
0x27dd   : > { %10105 = vpow2.f32 %v5313_v20  ;;  %v5478_v22 = vsub.f32 %v5471_v12, %v5477_v21 }
0x27df   : > { %v5479_v23 = vmul.f32 1.442695, %v5478_v22  ;;  %v5697_v22 = vld [vmem:[#allocation37 + $0x38] sm:$0xff] }
0x27e1   : > { %10107 = vpow2.f32 %v5479_v23  ;;  %v5696_v23 = vld [vmem:[#allocation37 + $0x30] sm:$0xff] }
0x27e4   : > { %v5145_v26 = vpop.xlane.xlu1 %5144 }
0x27e5   : > { %v5146_v28 = vsub.f32 %v5139_v16, %v5145_v26  ;;  %v5690_v26 = vld [vmem:[#allocation37] sm:$0xff] }
0x27e7   : > { %v5147_v29 = vmul.f32 1.442695, %v5146_v28 }
0x27e9   : > { %10109 = vpow2.f32 %v5147_v29 }
0x27ea   : > { %v10106_v24 = vpop.eup %10105 }
0x27eb   : > { %v5315_v47 = vsel %vm1692_vm7, %v10106_v24, 0.0 }
0x27ec   : > { %5316 = vadd.xlane.f32.xlu0 %v5315_v47  ;;  %v5693_v47 = vld [vmem:[#allocation37 + $0x18] sm:$0xff] }
0x27ee   : > { %v10108_v32 = vpop.eup %10107 }
0x27ef   : > { %v5481_v25 = vsel %vm1692_vm7, %v10108_v32, 0.0 }
0x27f0   : > { %5482 = vadd.xlane.f32.xlu1 %v5481_v25  ;;  %v5691_v25 = vld [vmem:[#allocation37 + $0x8] sm:$0xff] }
0x27f6   : > { %v10110_v31 = vpop.eup %10109 }
0x27f7   : > { %v5149_v35 = vsel %vm1692_vm7, %v10110_v31, 0.0 }
0x2801   : > { %5320 = vrot.lane.b32.xlu1 %v12127_v48, %s11010_s4 }
0x2802   : > { %5154 = vrot.lane.b32.xlu0 %v12127_v48, %s11011_s16 }
0x2825   : > { %5150 = vadd.xlane.f32.xlu1 %v5149_v35  ;;  %v5683_v35 = vrot.slane %v12119_v30, %v11797_v39 }
0x2836   : > { %5486 = vrot.lane.b32.xlu1 %v12127_v48, %s11013_s1 }
0x2875   : > { %v5317_v38 = vpop.xlane.xlu0 %5316 }
0x2879   : > { %v5155_v41 = vpop.permute.xlu0 %5154  ;;  %v5483_v43 = vpop.xlane.xlu1 %5482 }
0x287a   : > { %9376 = vmatpush3.msk.msra.mxu0 %vm1696_vm5, %v5155_v41 }
0x287b   : > { %9385 = vmatprep.subr.mxu0 %v11006_v0 }
0x287d   : > { %v5321_v44 = vpop.permute.xlu1 %5320 }
0x28ae   : > { %v5151_v49 = vpop.xlane.xlu1 %5150 }
0x28af   : > { %10111 = vrcp.f32 %v5151_v49 }
0x28b0   : > { %10113 = vrcp.f32 %v5317_v38 }
0x28b1   : > { %10115 = vrcp.f32 %v5483_v43  ;;  %v5688_v43 = vrot.slane %v12119_v30, %v11800_v40 }
0x28b2   : > { %v5487_v53 = vpop.permute.xlu1 %5486 }
0x28bc   : > { %v10112_v50 = vpop.eup %10111 }
0x28bd   : > { %v5153_v27 = vmul.f32 %v10112_v50, %v10110_v31  ;;  %v10114_v52 = vpop.eup %10113  ;;  %v5802_v50 = vld [vmem:[%s12753_s17 + $0x78] sm:$0xff] }
0x28be   : > { %v5319_v48 = vmul.f32 %v10114_v52, %v10106_v24  ;;  %v10116_v46 = vpop.eup %10115  ;;  %v5695_v24 = vld [vmem:[#allocation37 + $0x28] sm:$0xff]  ;;  %v5800_v52 = vld [vmem:[%s12753_s17 + $0x68] sm:$0xff] }
0x28bf   : > { %9378 = vmatmul.mubr.msk.f32.vlgmr.msra.gmra.mxu0 %vm1692_vm7, %v5153_v27  ;;  %v5485_v51 = vmul.f32 %v10116_v46, %v10108_v32  ;;  %v5692_v32 = vld [vmem:[#allocation37 + $0x10] sm:$0xff]  ;;  %v5801_v27 = vld [vmem:[%s12753_s17 + $0x70] sm:$0xff] }
0x28c0   : > { %9386 = vmatpush3.msk.msra.mxu0 %vm1696_vm5, %v5321_v44  ;;  %9387 = vmatprep.mubr.msk.f32.mxu0 %vm11007_vm0, %v11006_v0  ;;  %v5798_v46 = vld [vmem:[%s12753_s17 + $0x58] sm:$0xff] }
0x28c1   : > { %9395 = vmatprep.subr.mxu0 %v11006_v0 }
0x28c3   : > { %9388 = vmatmul.mubr.msk.f32.vlgmr.msra.gmra.mxu0 %vm1692_vm7, %v5319_v48  ;;  %v5799_v48 = vld [vmem:[%s12753_s17 + $0x60] sm:$0xff] }
0x28c4   : > { %9396 = vmatpush3.msk.msra.mxu0 %vm1696_vm5, %v5487_v53  ;;  %9397 = vmatprep.mubr.msk.f32.mxu0 %vm11007_vm0, %v11006_v0  ;;  %v5797_v53 = vld [vmem:[%s12753_s17 + $0x50] sm:$0xff] }
0x28c5   : > { %9419 = vmatprep.subr.mxu0 %v11006_v0 }
0x28c7   : > { %9398 = vmatmul.mubr.msk.f32.vlgmr.msra.gmra.mxu0 %vm1692_vm7, %v5485_v51  ;;  %v5796_v51 = vld [vmem:[%s12753_s17 + $0x48] sm:$0xff] }
0x28c8   : > { %9435 = vmatprep.mubr.msk.f32.mxu0 %vm11007_vm0, %v11006_v0  ;;  %9420 = vmatpush3.msra.mxu0 %v5697_v22 }
0x28c9   : > { %9421 = vmatprep.subr.mxu0 %v11006_v0 }
0x28ca   : > { %9422 = vmatpush3.msra.mxu0 %v5696_v23 }
0x28cb   : > { %9423 = vmatprep.subr.mxu0 %v11006_v0 }
0x28cc   : > { %9424 = vmatpush3.msra.mxu0 %v5695_v24  ;;  %v8652_v24 = vld [vmem:[%s12752_s13 + $0xf8] sm:$0xff] }
0x28cd   : > { %9425 = vmatprep.subr.mxu0 %v11006_v0 }
0x297f   : > { %v5227_v62 = vpop.f32.mrf.mxu0 }
0x2980   : > { %5564 = vrot.lane.b32.xlu0 %v5227_v62, %s11013_s1  ;;  %v5787_v62 = vld [vmem:[%s12753_s17] sm:$0xff] }
0x2981   : > { %v9379_v1 = vpop.f32.mrf.mxu0 }
0x2982   : > { %v8633_v1 = vld [vmem:[#allocation38] ss:$0 sm:$0xff] }
0x2983   : > { %v5393_v2 = vpop.f32.mrf.mxu0 }
0x2984   : > { %5568 = vrot.lane.b32.xlu1 %v5393_v2, %s11010_s4 }
0x2985   : > { %v9389_v4 = vpop.f32.mrf.mxu0 }
0x2987   : > { %v5559_v5 = vpop.f32.mrf.mxu0 }
0x2988   : > { %5572 = vrot.lane.b32.xlu0 %v5559_v5, %s11011_s16 }
0x2989   : > { %v9399_v6 = vpop.f32.mrf.mxu0 }
0x29f2   : > { %v5565_v7 = vpop.permute.xlu0 %5564 }
0x29f3   : > { %v5575_v9 = vsel %vm1604_vm4, %v12174_v63, %v5565_v7 }
0x29f6   : > { %v5569_v8 = vpop.permute.xlu1 %5568 }
0x29f7   : > { %v5576_v10 = vsel %vm2281_vm8, %v5575_v9, %v5569_v8 }
0x29fa   : > { %v5573_v11 = vpop.permute.xlu0 %5572 }
0x29fb   : > { %v5577_v12 = vsel %vm2283_vm9, %v5576_v10, %v5573_v11 }
0x29fc   : > { %9417 = vmatmul.mubr.msk.f32.vlgmr.msra.gmra.mxu1 %vm1525_vm3, %v5577_v12 }
0x29fd   : > { %9470 = vmatprep.mubr.msk.f32.mxu1 %vm11007_vm0, %v11006_v0  ;;  %9439 = vmatpush3.msra.mxu1 %v5802_v50  ;;  %v8637_v50 = vld [vmem:[%s12752_s13 + $0x80] sm:$0xff] }
0x29fe   : > { %9440 = vmatprep.subr.mxu1 %v11006_v0 }
0x29ff   : > { %9441 = vmatpush3.msra.mxu1 %v5801_v27 }
0x2a00   : > { %9442 = vmatprep.subr.mxu1 %v11006_v0 }
0x2a01   : > { %9443 = vmatpush3.msra.mxu1 %v5800_v52 }
0x2a02   : > { %9444 = vmatprep.subr.mxu1 %v11006_v0 }
0x2a03   : > { %9445 = vmatpush3.msra.mxu1 %v5799_v48 }
0x2a04   : > { %9446 = vmatprep.subr.mxu1 %v11006_v0 }
0x2a05   : > { %9447 = vmatpush3.msra.mxu1 %v5798_v46  ;;  %v5896_v46 = vsub.s32 4, %v11598_v33 }
0x2a06   : > { %9448 = vmatprep.subr.mxu1 %v11006_v0 }
0x2a07   : > { %9449 = vmatpush3.msra.mxu1 %v5797_v53  ;;  %v5901_v53 = vsub.s32 5, %v11598_v33 }
0x2a08   : > { %9450 = vmatprep.subr.mxu1 %v11006_v0 }
0x2a09   : > { %9451 = vmatpush3.msra.mxu1 %v5796_v51  ;;  %v5897_v51 = vrot.slane %v12119_v30, %v5896_v46 }
0x2a0a   : > { %9452 = vmatprep.subr.mxu1 %v11006_v0 }
0x2a0b   : > { %9453 = vmatpush3.msra.mxu1 %v5795_v54 }
0x2a0c   : > { %9454 = vmatprep.subr.mxu1 %v11006_v0 }
0x2a0d   : > { %9455 = vmatpush3.msra.mxu1 %v5794_v55 }
0x2a0e   : > { %9456 = vmatprep.subr.mxu1 %v11006_v0 }
0x2a0f   : > { %9457 = vmatpush3.msra.mxu1 %v5793_v56  ;;  %v5902_v56 = vrot.slane %v12119_v30, %v5901_v53 }
0x2a10   : > { %9458 = vmatprep.subr.mxu1 %v11006_v0 }
0x2a11   : > { %9459 = vmatpush3.msra.mxu1 %v5792_v57 }
0x2a12   : > { %9460 = vmatprep.subr.mxu1 %v11006_v0 }
0x2a13   : > { %9461 = vmatpush3.msra.mxu1 %v5791_v58 }
0x2a14   : > { %9462 = vmatprep.subr.mxu1 %v11006_v0 }
0x2a15   : > { %9463 = vmatpush3.msra.mxu1 %v5790_v59  ;;  %v5924_v59 = vld [vmem:[#allocation23 + $0x2] sm:$0x3] }
0x2a16   : > { %9464 = vmatprep.subr.mxu1 %v11006_v0  ;;  %v5933_v30 = vrot.slane %v5924_v59, %v11604_v36 }
0x2a17   : > { %9465 = vmatpush3.msra.mxu1 %v5789_v60  ;;  %v5929_v60 = vrot.slane %v5924_v59, %v11601_v34 }
0x2a18   : > { %9466 = vmatprep.subr.mxu1 %v11006_v0 }
0x2a19   : > { %9467 = vmatpush3.msra.mxu1 %v5788_v61 }
0x2a1a   : > { %9468 = vmatprep.subr.mxu1 %v11006_v0 }
0x2a1b   : > { %9469 = vmatpush3.msra.mxu1 %v5787_v62 }
0x2a1c   : > { %9493 = vmatprep.subr.mxu1 %v11006_v0 }
0x2abc   : > { %v5662_v13 = vpop.f32.mrf.mxu1 }
0x2abd   : > { %v5663_v15 = vadd.f32 %v8631_v3, %v5662_v13 }
0x2abe   : > { %v9418_v16 = vpop.f32.mrf.mxu1 }
0x2abf   : > { %v5666_v17 = vadd.f32 %v5663_v15, %v12125_v45  ;;  %v5694_v45 = vld [vmem:[#allocation37 + $0x20] sm:$0xff] }
0x2ac0   : > { %9426 = vmatpush3.msra.mxu0 %v5694_v45  ;;  %v8635_v15 = vld [vmem:[#allocation40] ss:$0 sm:$0xff] }
0x2ac1   : > { %v5667_v19 = vsel %vm1525_vm3, %v5666_v17, 0.0  ;;  %9427 = vmatprep.subr.mxu0 %v11006_v0  ;;  %v8651_v45 = vld [vmem:[%s12752_s13 + $0xf0] sm:$0xff] }
0x2ac2   : > { %5668 = vadd.xlane.f32.xlu1 %v5667_v19  ;;  %9428 = vmatpush3.msra.mxu0 %v5693_v47  ;;  %v8650_v47 = vld [vmem:[%s12752_s13 + $0xe8] sm:$0xff] }
0x2ac3   : > { %9429 = vmatprep.subr.mxu0 %v11006_v0 }
0x2ac4   : > { %9430 = vmatpush3.msra.mxu0 %v5692_v32  ;;  %v8649_v32 = vld [vmem:[%s12752_s13 + $0xe0] sm:$0xff] }
0x2ac5   : > { %9431 = vmatprep.subr.mxu0 %v11006_v0 }
0x2ac6   : > { %9432 = vmatpush3.msra.mxu0 %v5691_v25  ;;  %v8648_v25 = vld [vmem:[%s12752_s13 + $0xd8] sm:$0xff] }
0x2ac7   : > { %9433 = vmatprep.subr.mxu0 %v11006_v0 }
0x2ac8   : > { %9434 = vmatpush3.msra.mxu0 %v5690_v26  ;;  %v8647_v26 = vld [vmem:[%s12752_s13 + $0xd0] sm:$0xff] }
0x2ac9   : > { %5955 = vmatprep.subr.mxu0 %v8652_v24 }
0x2b4b   : > { %v5669_v63 = vpop.xlane.xlu1 %5668 }
0x2b4c   : > { %v5670_v42 = vmul.f32 0.015625, %v5669_v63 }
0x2b4e   : > { %v5671_v37 = vsub.f32 %v5666_v17, %v5670_v42 }
0x2b50   : > { %v5672_v20 = vmul.f32 %v5671_v37, %v5671_v37 }
0x2b52   : > { %v5673_v21 = vsel %vm1525_vm3, %v5672_v20, 0.0 }
0x2b53   : > { %5674 = vadd.xlane.f32.xlu0 %v5673_v21 }
0x2bdc   : > { %v5675_v28 = vpop.xlane.xlu0 %5674 }
0x2bdd   : > { %v5676_v29 = vmul.f32 0.015625, %v5675_v28  ;;  %v8646_v28 = vld [vmem:[%s12752_s13 + $0xc8] sm:$0xff] }
0x2bdf   : > { %v5677_v31 = vadd.f32 1e-05, %v5676_v29  ;;  %v8645_v29 = vld [vmem:[%s12752_s13 + $0xc0] sm:$0xff] }
0x2be1   : > { %10117 = vrsqrt.f32 %v5677_v31  ;;  %v8644_v31 = vld [vmem:[%s12752_s13 + $0xb8] sm:$0xff] }
0x2bee   : > { %v10118_v38 = vpop.eup %10117 }
0x2bef   : > { %v5679_v41 = vmul.f32 %v10118_v38, %v5671_v37  ;;  %v8642_v38 = vld [vmem:[%s12752_s13 + $0xa8] sm:$0xff] }
0x2bf1   : > { %v5684_v44 = vmul.f32 %v5683_v35, %v5679_v41  ;;  %v8643_v35 = vld [vmem:[%s12752_s13 + $0xb0] sm:$0xff]  ;;  %v8641_v41 = vld [vmem:[%s12752_s13 + $0xa0] sm:$0xff] }
0x2bf3   : > { %v12233_v49 = vadd.f32 %v5688_v43, %v5684_v44  ;;  %v8640_v43 = vld [vmem:[%s12752_s13 + $0x98] sm:$0xff]  ;;  %v8639_v44 = vld [vmem:[%s12752_s13 + $0x90] sm:$0xff] }
0x2bf5   : > { %9436 = vmatmul.mubr.msk.f32.vlgmr.msra.gmra.mxu0 %vm1525_vm3, %v12233_v49 }
0x2bf6   : > { %6003 = vmatprep.mubr.f32.mxu0 %v11006_v0  ;;  %5956 = vmatpush1.msra.mxu0 %v8651_v45 }
0x2bf7   : > { %5957 = vmatprep.subr.mxu0 %v8650_v47 }
0x2bf8   : > { %5958 = vmatpush1.msra.mxu0 %v8649_v32 }
0x2bf9   : > { %5959 = vmatprep.subr.mxu0 %v8648_v25 }
0x2bfa   : > { %5960 = vmatpush1.msra.mxu0 %v8647_v26 }
0x2bfb   : > { %5961 = vmatprep.subr.mxu0 %v8646_v28 }
0x2bfc   : > { %5962 = vmatpush1.msra.mxu0 %v8645_v29 }
0x2bfd   : > { %5963 = vmatprep.subr.mxu0 %v8644_v31 }
0x2bfe   : > { %5964 = vmatpush1.msra.mxu0 %v8643_v35 }
0x2bff   : > { %5965 = vmatprep.subr.mxu0 %v8642_v38 }
0x2c00   : > { %5966 = vmatpush1.msra.mxu0 %v8641_v41 }
0x2c01   : > { %5967 = vmatprep.subr.mxu0 %v8640_v43 }
0x2c02   : > { %5968 = vmatpush1.msra.mxu0 %v8639_v44 }
0x2cb5   : > { %v5774_v2 = vpop.f32.mrf.mxu0 }
0x2cb6   : > { %v5775_v4 = vadd.f32 %v8633_v1, %v5774_v2 }
0x2cb7   : > { %v9437_v5 = vpop.f32.mrf.mxu0 }
0x2cb8   : > { %v5778_v6 = vmul.f32 %v5775_v4, %v5775_v4 }
0x2cba   : > { %v5779_v7 = vmul.f32 %v5778_v6, %v5775_v4 }
0x2cbc   : > { %v5780_v8 = vmul.f32 0.044715, %v5779_v7 }
0x2cbe   : > { %v5781_v9 = vadd.f32 %v5780_v8, %v5775_v4 }
0x2cc0   : > { %v5782_v10 = vmul.f32 0.7978846, %v5781_v9 }
0x2cc2   : > { %10119 = vtanh.f32 %v5782_v10 }
0x2ccf   : > { %v10120_v11 = vpop.eup %10119 }
0x2cd0   : > { %v5784_v12 = vadd.f32 1.0, %v10120_v11 }
0x2cd2   : > { %v5785_v3 = vmul.f32 0.5, %v5784_v12 }
0x2cd4   : > { %v5786_v13 = vmul.f32 %v5785_v3, %v5775_v4 }
0x2cd6   : > { %9471 = vmatmul.mubr.f32.vlgmr.msra.gmra.mxu1 %v5786_v13 }
0x2cd7   : > { %9495 = vmatprep.mubr.msk.f32.mxu1 %vm11007_vm0, %v11006_v0 }
0x2d96   : > { %v5876_v16 = vpop.f32.mrf.mxu1 }
0x2d97   : > { %v5877_v17 = vadd.f32 %v8635_v15, %v5876_v16 }
0x2d98   : > { %v9472_v19 = vpop.f32.mrf.mxu1 }
0x2d99   : > { %v5880_v63 = vadd.f32 %v5877_v17, %v12233_v49  ;;  %v8638_v49 = vld [vmem:[%s12752_s13 + $0x88] sm:$0xff] }
0x2d9a   : > { %5969 = vmatprep.subr.mxu0 %v8638_v49 }
0x2d9b   : > { %v5881_v42 = vsel %vm1525_vm3, %v5880_v63, 0.0  ;;  %5970 = vmatpush1.msra.mxu0 %v8637_v50 }
0x2d9c   : > { %5882 = vadd.xlane.f32.xlu0 %v5881_v42  ;;  %9473 = vmatprep.subr.mxu0 %v11006_v0 }
0x2e25   : > { %v5883_v37 = vpop.xlane.xlu0 %5882 }
0x2e26   : > { %v5884_v20 = vmul.f32 0.015625, %v5883_v37 }
0x2e28   : > { %v5885_v21 = vsub.f32 %v5880_v63, %v5884_v20 }
0x2e2a   : > { %v5886_v22 = vmul.f32 %v5885_v21, %v5885_v21 }
0x2e2c   : > { %v5887_v23 = vsel %vm1525_vm3, %v5886_v22, 0.0 }
0x2e2d   : > { %5888 = vadd.xlane.f32.xlu1 %v5887_v23 }
0x2eb6   : > { %v5889_v27 = vpop.xlane.xlu1 %5888 }
0x2eb7   : > { %v5890_v52 = vmul.f32 0.015625, %v5889_v27 }
0x2eb9   : > { %v5891_v48 = vadd.f32 1e-05, %v5890_v52 }
0x2ebb   : > { %10121 = vrsqrt.f32 %v5891_v48 }
0x2ec8   : > { %v10122_v54 = vpop.eup %10121 }
0x2ec9   : > { %v5893_v55 = vmul.f32 %v10122_v54, %v5885_v21 }
0x2ecb   : > { %v5898_v57 = vmul.f32 %v5897_v51, %v5893_v55 }
0x2ecd   : > { %v12300_v58 = vadd.f32 %v5902_v56, %v5898_v57 }
0x2ecf   : > { %8653 = vmatmul.mubr.msk.f32.vlgmr.msra.gmra.mxu0 %vm1525_vm3, %v12300_v58 }
0x2ed0   : > { %9475 = vmatprep.mubr.msk.f32.mxu0 %vm11007_vm0, %v11006_v0 }
0x2f8f   : > { %v6005_v61 = vpop.f32.mrf.mxu0 }
0x2f90   : > { %v6006_v62 = vadd.f32 %v6005_v61, %v5929_v60 }
0x2f91   : > { %v6007_v2 = vpop.f32.mrf.mxu0 }
0x2f92   : > { %6012 = vrot.lane.b32.xlu0 %v6006_v62, %s11008_s14  ;;  %v6010_v1 = vmul.f32 0.25, %v6006_v62  ;;  %v12314_v5 = vadd.f32 %v6007_v2, %v5933_v30 }
0x2f96   : > { %6173 = vrot.lane.b32.xlu0 %v6010_v1, %s11009_s27 }
0x2f9a   : > { %6341 = vrot.lane.b32.xlu0 %v6006_v62, %s11010_s4 }
0x2f9e   : > { %6506 = vrot.lane.b32.xlu0 %v6006_v62, %s11013_s1 }
0x3004   : > { %v6013_v4 = vpop.permute.xlu0 %6012 }
0x3005   : > { %9474 = vmatpush3.xpose.msk.msra.mxu0 %vm1604_vm4, %v6013_v4 }
0x3006   : > { %9478 = vmatprep.subr.mxu0 %v11006_v0 }
0x3008   : > { %v6174_v6 = vpop.permute.xlu0 %6173  ;;  %9476 = vmatmul.mubr.msk.f32.vlgmr.msra.gmra.mxu0 %vm1604_vm4, %v6010_v1 }
0x3009   : > { %9479 = vmatpush3.msra.mxu0 %v12314_v5  ;;  %9480 = vmatprep.mubr.msk.f32.mxu0 %vm11007_vm0, %v11006_v0 }
0x300a   : > { %9483 = vmatprep.subr.mxu0 %v11006_v0 }
0x300c   : > { %v6342_v7 = vpop.permute.xlu0 %6341 }
0x300d   : > { %9494 = vmatpush3.xpose.msk.msra.mxu1 %vm1604_vm4, %v6342_v7 }
0x300e   : > { %9503 = vmatprep.subr.mxu1 %v11006_v0 }
0x3010   : > { %v6507_v42 = vpop.permute.xlu0 %6506 }
0x30c8   : > { %v6085_v8 = vpop.f32.mrf.mxu0 }
0x30c9   : > { %v6086_v9 = vadd.f32 %v6085_v8, %v12033_v18 }
0x30ca   : > { %v9477_v10 = vpop.f32.mrf.mxu0 }
0x30cb   : > { %v6089_v11 = vsel %vm1397_vm1, %v6086_v9, -inf }
0x30cc   : > { %6090 = vmax.xlane.f32.xlu1 %v6089_v11  ;;  %v6692_v11 = vld [vmem:[#allocation25 + $0x78] sm:$0xff] }
0x30dd   : > { %6175 = vrot.lane.b32.xlu1 %v6006_v62, %s11011_s16 }
0x3155   : > { %v6091_v12 = vpop.xlane.xlu1 %6090 }
0x3156   : > { %v6092_v3 = vsub.f32 %v6086_v9, %v6091_v12  ;;  %v6691_v12 = vld [vmem:[#allocation25 + $0x70] sm:$0xff] }
0x3158   : > { %v6093_v13 = vmul.f32 1.442695, %v6092_v3  ;;  %v6690_v3 = vld [vmem:[#allocation25 + $0x68] sm:$0xff] }
0x3159   : > { %v6176_v17 = vpop.permute.xlu1 %6175 }
0x315a   : > { %10123 = vpow2.f32 %v6093_v13  ;;  %v6689_v13 = vld [vmem:[#allocation25 + $0x60] sm:$0xff] }
0x3167   : > { %v10124_v15 = vpop.eup %10123 }
0x3168   : > { %v6095_v16 = vsel %vm1397_vm1, %v10124_v15, 0.0 }
0x3169   : > { %6096 = vadd.xlane.f32.xlu1 %v6095_v16  ;;  %v6687_v16 = vld [vmem:[#allocation25 + $0x50] sm:$0xff] }
0x317a   : > { %6339 = vrot.lane.b32.xlu1 %v6010_v1, %s11012_s8 }
0x317e   : > { %6504 = vrot.lane.b32.xlu1 %v6010_v1, %s11014_s30 }
0x31f2   : > { %v6097_v19 = vpop.xlane.xlu1 %6096 }
0x31f3   : > { %10125 = vrcp.f32 %v6097_v19  ;;  %v6685_v19 = vld [vmem:[#allocation25 + $0x40] sm:$0xff] }
0x31f6   : > { %v6340_v63 = vpop.permute.xlu1 %6339 }
0x31f7   : > { %9496 = vmatmul.mubr.msk.f32.vlgmr.msra.gmra.mxu1 %vm1604_vm4, %v6340_v63 }
0x31f8   : > { %9504 = vmatpush3.xpose.msk.msra.mxu1 %vm1604_vm4, %v6507_v42  ;;  %9505 = vmatprep.mubr.msk.f32.mxu1 %vm11007_vm0, %v11006_v0 }
0x31f9   : > { %9513 = vmatprep.subr.mxu1 %v11006_v0 }
0x31fa   : > { %v6505_v37 = vpop.permute.xlu1 %6504 }
0x31fb   : > { %9506 = vmatmul.mubr.msk.f32.vlgmr.msra.gmra.mxu1 %vm1604_vm4, %v6505_v37 }
0x31fc   : > { %9529 = vmatprep.mubr.msk.f32.mxu1 %vm11007_vm0, %v11006_v0  ;;  %9514 = vmatpush3.msra.mxu1 %v6692_v11 }
0x31fd   : > { %9515 = vmatprep.subr.mxu1 %v11006_v0 }
0x31fe   : > { %9516 = vmatpush3.msra.mxu1 %v6691_v12 }
0x31ff   : > { %9517 = vmatprep.subr.mxu1 %v11006_v0 }
0x3200   : > { %v10126_v20 = vpop.eup %10125  ;;  %9518 = vmatpush3.msra.mxu1 %v6690_v3 }
0x3201   : > { %v6099_v21 = vmul.f32 %v10126_v20, %v10124_v15  ;;  %9519 = vmatprep.subr.mxu1 %v11006_v0  ;;  %v6688_v15 = vld [vmem:[#allocation25 + $0x58] sm:$0xff] }
0x3202   : > { %9520 = vmatpush3.msra.mxu1 %v6689_v13 }
0x3203   : > { %9481 = vmatmul.mubr.msk.f32.vlgmr.msra.gmra.mxu0 %vm1397_vm1, %v6099_v21  ;;  %9521 = vmatprep.subr.mxu1 %v11006_v0 }
0x3204   : > { %9484 = vmatpush3.xpose.msk.msra.mxu0 %vm1604_vm4, %v6176_v17  ;;  %9485 = vmatprep.mubr.msk.f32.mxu0 %vm11007_vm0, %v11006_v0  ;;  %v6686_v17 = vld [vmem:[#allocation25 + $0x48] sm:$0xff] }
0x3205   : > { %9488 = vmatprep.subr.mxu0 %v11006_v0  ;;  %9522 = vmatpush3.msra.mxu1 %v6688_v15 }
0x3206   : > { %9523 = vmatprep.subr.mxu1 %v11006_v0 }
0x3207   : > { %9486 = vmatmul.mubr.msk.f32.vlgmr.msra.gmra.mxu0 %vm1604_vm4, %v6174_v6  ;;  %9524 = vmatpush3.msra.mxu1 %v6687_v16 }
0x3208   : > { %9490 = vmatprep.mubr.msk.f32.mxu0 %vm11007_vm0, %v11006_v0  ;;  %9525 = vmatprep.subr.mxu1 %v11006_v0 }
0x3209   : > { %9526 = vmatpush3.msra.mxu1 %v6686_v17 }
0x320a   : > { %9527 = vmatprep.subr.mxu1 %v11006_v0 }
0x320b   : > { %9528 = vmatpush3.msra.mxu1 %v6685_v19 }
0x320c   : > { %9551 = vmatprep.subr.mxu1 %v11006_v0 }
0x32b7   : > { %v6413_v22 = vpop.f32.mrf.mxu1 }
0x32b8   : > { %v6414_v23 = vadd.f32 %v6413_v22, %v12033_v18 }
0x32b9   : > { %v9497_v24 = vpop.f32.mrf.mxu1 }
0x32ba   : > { %v6417_v45 = vsel %vm1397_vm1, %v6414_v23, -inf }
0x32bb   : > { %6418 = vmax.xlane.f32.xlu1 %v6417_v45  ;;  %v6578_v47 = vpop.f32.mrf.mxu1 }
0x32bc   : > { %v6579_v35 = vadd.f32 %v6578_v47, %v12033_v18 }
0x32bd   : > { %v9507_v32 = vpop.f32.mrf.mxu1 }
0x32be   : > { %v6582_v41 = vsel %vm1397_vm1, %v6579_v35, -inf }
0x32c3   : > { %v12347_v25 = vpop.f32.mrf.mxu0 }
0x32c5   : > { %v9482_v26 = vpop.f32.mrf.mxu0 }
0x32c6   : > { %v6896_v26 = vld [vmem:[#allocation31 + $0x78] sm:$0xff] }
0x32c7   : > { %v6247_v28 = vpop.f32.mrf.mxu0 }
0x32c8   : > { %v6248_v29 = vadd.f32 %v6247_v28, %v12033_v18 }
0x32c9   : > { %v9487_v31 = vpop.f32.mrf.mxu0 }
0x32ca   : > { %v6251_v38 = vsel %vm1397_vm1, %v6248_v29, -inf  ;;  %v6894_v31 = vld [vmem:[#allocation31 + $0x68] sm:$0xff] }
0x32cb   : > { %6252 = vmax.xlane.f32.xlu0 %v6251_v38  ;;  %v6891_v38 = vld [vmem:[#allocation31 + $0x50] sm:$0xff] }
0x32cf   : > { %6583 = vmax.xlane.f32.xlu0 %v6582_v41  ;;  %v6890_v41 = vld [vmem:[#allocation31 + $0x48] sm:$0xff] }
0x3344   : > { %v6419_v43 = vpop.xlane.xlu1 %6418 }
0x3345   : > { %v6420_v44 = vsub.f32 %v6414_v23, %v6419_v43  ;;  %v6889_v43 = vld [vmem:[#allocation31 + $0x40] sm:$0xff] }
0x3347   : > { %v6421_v49 = vmul.f32 1.442695, %v6420_v44  ;;  %v8666_v44 = vld [vmem:[#allocation26 + $0x1] ss:$0 sm:$0xff] }
0x3349   : > { %10127 = vpow2.f32 %v6421_v49 }
0x3354   : > { %v6253_v50 = vpop.xlane.xlu0 %6252 }
0x3355   : > { %v6254_v52 = vsub.f32 %v6248_v29, %v6253_v50  ;;  %v6895_v29 = vld [vmem:[#allocation31 + $0x70] sm:$0xff] }
0x3356   : > { %v10128_v27 = vpop.eup %10127 }
0x3357   : > { %v6423_v48 = vsel %vm1397_vm1, %v10128_v27, 0.0  ;;  %v6255_v55 = vmul.f32 1.442695, %v6254_v52 }
0x3358   : > { %6424 = vadd.xlane.f32.xlu1 %v6423_v48  ;;  %v6584_v51 = vpop.xlane.xlu0 %6583 }
0x3359   : > { %v6585_v54 = vsub.f32 %v6579_v35, %v6584_v51  ;;  %v6892_v35 = vld [vmem:[#allocation31 + $0x58] sm:$0xff] }
0x335b   : > { %v6586_v18 = vmul.f32 1.442695, %v6585_v54 }
0x335d   : > { %10129 = vpow2.f32 %v6586_v18 }
0x335e   : > { %10131 = vpow2.f32 %v6255_v55 }
0x3369   : > { %6263 = vrot.lane.b32.xlu1 %v12314_v5, %s11009_s27 }
0x336a   : > { %v10130_v56 = vpop.eup %10129 }
0x336b   : > { %v6588_v57 = vsel %vm1397_vm1, %v10130_v56, 0.0  ;;  %v10132_v59 = vpop.eup %10131 }
0x336c   : > { %6589 = vadd.xlane.f32.xlu0 %v6588_v57  ;;  %v6257_v60 = vsel %vm1397_vm1, %v10132_v59, 0.0 }
0x336d   : > { %6593 = vrot.lane.b32.xlu1 %v12314_v5, %s11014_s30 }
0x3370   : > { %6258 = vadd.xlane.f32.xlu0 %v6257_v60 }
0x3386   : > { %6428 = vrot.lane.b32.xlu0 %v12314_v5, %s11012_s8 }
0x33e1   : > { %v6425_v61 = vpop.xlane.xlu1 %6424 }
0x33e5   : > { %v6264_v62 = vpop.permute.xlu1 %6263 }
0x33e6   : > { %9489 = vmatpush3.msra.mxu0 %v6264_v62  ;;  %v6804_v62 = vld [vmem:[#allocation28 + $0x68] sm:$0xff] }
0x33e7   : > { %9498 = vmatprep.subr.mxu0 %v11006_v0 }
0x33e9   : > { %v6594_v9 = vpop.permute.xlu1 %6593 }
0x33f5   : > { %v6590_v1 = vpop.xlane.xlu0 %6589 }
0x33f9   : > { %v6259_v30 = vpop.xlane.xlu0 %6258 }
0x33fa   : > { %10133 = vrcp.f32 %v6259_v30  ;;  %v6802_v30 = vld [vmem:[#allocation28 + $0x58] sm:$0xff] }
0x33fb   : > { %10135 = vrcp.f32 %v6425_v61  ;;  %v6806_v61 = vld [vmem:[#allocation28 + $0x78] sm:$0xff] }
0x33fc   : > { %10137 = vrcp.f32 %v6590_v1  ;;  %v6803_v1 = vld [vmem:[#allocation28 + $0x60] sm:$0xff] }
0x33fd   : > { %v6429_v7 = vpop.permute.xlu0 %6428 }
0x3407   : > { %v10134_v2 = vpop.eup %10133 }
0x3408   : > { %v6261_v4 = vmul.f32 %v10134_v2, %v10132_v59  ;;  %v10136_v6 = vpop.eup %10135  ;;  %v8670_v59 = vld [vmem:[#allocation32 + $0x1] ss:$0 sm:$0xff]  ;;  %v6801_v2 = vld [vmem:[#allocation28 + $0x50] sm:$0xff] }
0x3409   : > { %v6427_v5 = vmul.f32 %v10136_v6, %v10128_v27  ;;  %v10138_v8 = vpop.eup %10137  ;;  %v6799_v6 = vld [vmem:[#allocation28 + $0x40] sm:$0xff] }
0x340a   : > { %9491 = vmatmul.mubr.msk.f32.vlgmr.msra.gmra.mxu0 %vm1397_vm1, %v6261_v4  ;;  %v6592_v10 = vmul.f32 %v10138_v8, %v10130_v56  ;;  %v6800_v4 = vld [vmem:[#allocation28 + $0x48] sm:$0xff] }
0x340b   : > { %9499 = vmatpush3.msra.mxu0 %v6429_v7  ;;  %9500 = vmatprep.mubr.msk.f32.mxu0 %vm11007_vm0, %v11006_v0 }
0x340c   : > { %9508 = vmatprep.subr.mxu0 %v11006_v0 }
0x340e   : > { %9501 = vmatmul.mubr.msk.f32.vlgmr.msra.gmra.mxu0 %vm1397_vm1, %v6427_v5 }
0x340f   : > { %9509 = vmatpush3.msra.mxu0 %v6594_v9  ;;  %9510 = vmatprep.mubr.msk.f32.mxu0 %vm11007_vm0, %v11006_v0  ;;  %v12420_v9 = vld [vmem:[%s11175_s9 + $0x8] sm:$0x3f] }
0x3410   : > { %9532 = vmatprep.subr.mxu0 %v11006_v0  ;;  %v6796_v3 = vrot.slane %v12420_v9, %v11604_v36 }
0x3412   : > { %9511 = vmatmul.mubr.msk.f32.vlgmr.msra.gmra.mxu0 %vm1397_vm1, %v6592_v10  ;;  %v6791_v10 = vrot.slane %v12420_v9, %v11601_v34  ;;  %v8668_v34 = vld [vmem:[#allocation29 + $0x1] ss:$0 sm:$0xff] }
0x3413   : > { %9548 = vmatprep.mubr.msk.f32.mxu0 %vm11007_vm0, %v11006_v0  ;;  %9533 = vmatpush3.msra.mxu0 %v6806_v61 }
0x3414   : > { %9534 = vmatprep.subr.mxu0 %v11006_v0 }
0x34ca   : > { %v6335_v63 = vpop.f32.mrf.mxu0 }
0x34cb   : > { %6670 = vrot.lane.b32.xlu1 %v6335_v63, %s11013_s1 }
0x34cc   : > { %v9492_v42 = vpop.f32.mrf.mxu0 }
0x34ce   : > { %v6500_v37 = vpop.f32.mrf.mxu0 }
0x34cf   : > { %6674 = vrot.lane.b32.xlu0 %v6500_v37, %s11010_s4 }
0x34d0   : > { %v9502_v20 = vpop.f32.mrf.mxu0 }
0x34d2   : > { %v6665_v21 = vpop.f32.mrf.mxu0 }
0x34d3   : > { %6678 = vrot.lane.b32.xlu1 %v6665_v21, %s11011_s16 }
0x34d4   : > { %v9512_v22 = vpop.f32.mrf.mxu0 }
0x353d   : > { %v6671_v23 = vpop.permute.xlu1 %6670 }
0x353e   : > { %v6681_v45 = vsel %vm1604_vm4, %v12347_v25, %v6671_v23  ;;  %v6893_v25 = vld [vmem:[#allocation31 + $0x60] sm:$0xff] }
0x3541   : > { %v6675_v24 = vpop.permute.xlu0 %6674 }
0x3542   : > { %v6682_v47 = vsel %vm2281_vm8, %v6681_v45, %v6675_v24 }
0x3545   : > { %v6679_v32 = vpop.permute.xlu1 %6678 }
0x3546   : > { %v6683_v28 = vsel %vm2283_vm9, %v6682_v47, %v6679_v32 }
0x3547   : > { %9530 = vmatmul.mubr.msk.f32.vlgmr.msra.gmra.mxu1 %vm1525_vm3, %v6683_v28 }
0x3548   : > { %9552 = vmatpush3.msra.mxu1 %v6896_v26  ;;  %9567 = vmatprep.mubr.msk.f32.mxu1 %vm11007_vm0, %v11006_v0 }
0x3549   : > { %9553 = vmatprep.subr.mxu1 %v11006_v0 }
0x354a   : > { %9554 = vmatpush3.msra.mxu1 %v6895_v29 }
0x354b   : > { %9555 = vmatprep.subr.mxu1 %v11006_v0 }
0x354c   : > { %9556 = vmatpush3.msra.mxu1 %v6894_v31 }
0x354d   : > { %9557 = vmatprep.subr.mxu1 %v11006_v0 }
0x354e   : > { %9558 = vmatpush3.msra.mxu1 %v6893_v25 }
0x354f   : > { %9559 = vmatprep.subr.mxu1 %v11006_v0 }
0x3550   : > { %9560 = vmatpush3.msra.mxu1 %v6892_v35 }
0x3551   : > { %9561 = vmatprep.subr.mxu1 %v11006_v0 }
0x3552   : > { %9562 = vmatpush3.msra.mxu1 %v6891_v38 }
0x3553   : > { %9563 = vmatprep.subr.mxu1 %v11006_v0 }
0x3554   : > { %9564 = vmatpush3.msra.mxu1 %v6890_v41 }
0x3555   : > { %9565 = vmatprep.subr.mxu1 %v11006_v0 }
0x3556   : > { %9566 = vmatpush3.msra.mxu1 %v6889_v43 }
0x3557   : > { %9568 = vmatmul.mubr.msk.f32.vlgmr.msra.gmra.mxu1 %vm1525_vm3, %v12103_v14  ;;  %9590 = vmatprep.subr.mxu1 %v11006_v0 }
0x3558   : > { %9592 = vmatprep.mubr.msk.f32.mxu1 %vm11007_vm0, %v11006_v0 }
0x3607   : > { %v6770_v49 = vpop.f32.mrf.mxu1 }
0x3608   : > { %v6771_v50 = vadd.f32 %v8666_v44, %v6770_v49 }
0x3609   : > { %v9531_v27 = vpop.f32.mrf.mxu1 }
0x360a   : > { %v6774_v52 = vadd.f32 %v6771_v50, %v12300_v58  ;;  %v6805_v58 = vld [vmem:[#allocation28 + $0x70] sm:$0xff] }
0x360b   : > { %9535 = vmatpush3.msra.mxu0 %v6805_v58 }
0x360c   : > { %v6775_v48 = vsel %vm1525_vm3, %v6774_v52, 0.0  ;;  %9536 = vmatprep.subr.mxu0 %v11006_v0 }
0x360d   : > { %6776 = vadd.xlane.f32.xlu0 %v6775_v48  ;;  %9537 = vmatpush3.msra.mxu0 %v6804_v62 }
0x360e   : > { %9538 = vmatprep.subr.mxu0 %v11006_v0 }
0x360f   : > { %9539 = vmatpush3.msra.mxu0 %v6803_v1 }
0x3610   : > { %9540 = vmatprep.subr.mxu0 %v11006_v0 }
0x3611   : > { %9541 = vmatpush3.msra.mxu0 %v6802_v30 }
0x3612   : > { %9542 = vmatprep.subr.mxu0 %v11006_v0 }
0x3613   : > { %9543 = vmatpush3.msra.mxu0 %v6801_v2 }
0x3614   : > { %9544 = vmatprep.subr.mxu0 %v11006_v0 }
0x3615   : > { %9545 = vmatpush3.msra.mxu0 %v6800_v4 }
0x3616   : > { %9546 = vmatprep.subr.mxu0 %v11006_v0 }
0x3617   : > { %v6971_v51 = vpop.f32.mrf.mxu1  ;;  %9547 = vmatpush3.msra.mxu0 %v6799_v6 }
0x3618   : > { %v12407_v60 = vadd.f32 %v8670_v59, %v6971_v51  ;;  %9570 = vmatprep.subr.mxu0 %v11006_v0 }
0x3619   : > { %v9569_v54 = vpop.f32.mrf.mxu1 }
0x3696   : > { %v6777_v55 = vpop.xlane.xlu0 %6776 }
0x3697   : > { %v6778_v18 = vmul.f32 0.015625, %v6777_v55 }
0x3699   : > { %v6779_v56 = vsub.f32 %v6774_v52, %v6778_v18 }
0x369b   : > { %v6780_v14 = vmul.f32 %v6779_v56, %v6779_v56 }
0x369d   : > { %v6781_v57 = vsel %vm1525_vm3, %v6780_v14, 0.0 }
0x369e   : > { %6782 = vadd.xlane.f32.xlu1 %v6781_v57 }
0x36af   : > { %7063 = vrot.lane.b32.xlu1 %v12407_v60, %s11008_s14  ;;  %s8712_s14 = sshll.u32 %s11213_s18, 7  ;;  %s11016_s18 = smov [#allocation41]  }
0x3727   : > { %v6783_v7 = vpop.xlane.xlu1 %6782 }
0x3728   : > { %v6784_v5 = vmul.f32 0.015625, %v6783_v7 }
0x372a   : > { %v6785_v8 = vadd.f32 1e-05, %v6784_v5 }
0x372b   : > { %v7064_v36 = vpop.permute.xlu1 %7063 }
0x372c   : > { %10139 = vrsqrt.f32 %v6785_v8 }
0x3739   : > { %v10140_v11 = vpop.eup %10139 }
0x373a   : > { %v6787_v12 = vmul.f32 %v10140_v11, %v6779_v56 }
0x373c   : > { %v6792_v13 = vmul.f32 %v6791_v10, %v6787_v12 }
0x373e   : > { %v12426_v15 = vadd.f32 %v6796_v3, %v6792_v13 }
0x3740   : > { %9549 = vmatmul.mubr.msk.f32.vlgmr.msra.gmra.mxu0 %vm1525_vm3, %v12426_v15 }
0x3741   : > { %9571 = vmatpush3.xpose.msk.msra.mxu0 %vm1604_vm4, %v12407_v60  ;;  %9572 = vmatprep.mubr.msk.f32.mxu0 %vm11007_vm0, %v11006_v0 }
0x3742   : > { %9575 = vmatprep.subr.mxu0 %v11006_v0 }
0x3800   : > { %v6884_v16 = vpop.f32.mrf.mxu0 }
0x3801   : > { %v6885_v17 = vadd.f32 %v8668_v34, %v6884_v16 }
0x3802   : > { %v9550_v19 = vpop.f32.mrf.mxu0 }
0x3803   : > { %v6975_v63 = vmul.f32 0.25, %v6885_v17 }
0x3805   : > { %7140 = vrot.lane.b32.xlu1 %v6975_v63, %s11009_s27  ;;  %9573 = vmatmul.mubr.msk.f32.vlgmr.msra.gmra.mxu0 %vm1604_vm4, %v6975_v63 }
0x3806   : > { %9576 = vmatpush3.msk.msra.mxu0 %vm1696_vm5, %v7064_v36  ;;  %9577 = vmatprep.mubr.msk.f32.mxu0 %vm11007_vm0, %v11006_v0  ;;  %v7661_v36 = vld [vmem:[#allocation34 + $0x78] sm:$0xff] }
0x3807   : > { %9580 = vmatprep.subr.mxu0 %v11006_v0 }
0x3809   : > { %7308 = vrot.lane.b32.xlu1 %v12407_v60, %s11012_s8 }
0x380d   : > { %7474 = vrot.lane.b32.xlu1 %v12407_v60, %s11014_s30 }
0x3877   : > { %v7141_v42 = vpop.permute.xlu1 %7140 }
0x387b   : > { %v7309_v37 = vpop.permute.xlu1 %7308 }
0x387c   : > { %9591 = vmatpush3.xpose.msk.msra.mxu1 %vm1604_vm4, %v7309_v37  ;;  %v7659_v37 = vld [vmem:[#allocation34 + $0x68] sm:$0xff] }
0x387d   : > { %9600 = vmatprep.subr.mxu1 %v11006_v0 }
0x387f   : > { %v7475_v31 = vpop.permute.xlu1 %7474 }
0x38c5   : > { %v7048_v20 = vpop.f32.mrf.mxu0 }
0x38c6   : > { %v7052_v21 = vsel %vm1692_vm7, %v7048_v20, -inf }
0x38c7   : > { %7053 = vmax.xlane.f32.xlu0 %v7052_v21  ;;  %v9574_v22 = vpop.f32.mrf.mxu0  ;;  %v7657_v21 = vld [vmem:[#allocation34 + $0x58] sm:$0xff] }
0x38c8   : > { %v7656_v22 = vld [vmem:[#allocation34 + $0x50] sm:$0xff] }
0x3950   : > { %v7054_v23 = vpop.xlane.xlu0 %7053 }
0x3951   : > { %v7055_v24 = vsub.f32 %v7048_v20, %v7054_v23  ;;  %v7658_v20 = vld [vmem:[#allocation34 + $0x60] sm:$0xff]  ;;  %v7655_v23 = vld [vmem:[#allocation34 + $0x48] sm:$0xff] }
0x3953   : > { %v7056_v45 = vmul.f32 1.442695, %v7055_v24  ;;  %v7654_v24 = vld [vmem:[#allocation34 + $0x40] sm:$0xff] }
0x3955   : > { %10141 = vpow2.f32 %v7056_v45 }
0x3962   : > { %v10142_v47 = vpop.eup %10141 }
0x3963   : > { %v7058_v32 = vsel %vm1692_vm7, %v10142_v47, 0.0 }
0x3964   : > { %7059 = vadd.xlane.f32.xlu0 %v7058_v32 }
0x397a   : > { %7142 = vrot.lane.b32.xlu0 %v12407_v60, %s11009_s27  ;;  %s1391_s27 = scalar_lea.vmem [#allocation41], %s8485_s20 }
0x397e   : > { %7306 = vrot.lane.b32.xlu0 %v6975_v63, %s11012_s8  ;;  %s8096_s8 = scalar_lea.sflag [#allocation4], %s11501_s21 }
0x3982   : > { %7472 = vrot.lane.b32.xlu0 %v6975_v63, %s11014_s30  ;;  %s10826_s30 = sshll.u32 %s11016_s18, 4  ;;  %s10827_s30 = int_to_ptr.vmem [resolvable:$false] %s10826_s30 }
0x3983   : > { %s10828_s20 = scalar_lea.vmem %s10827_s30, 256 }
0x39ed   : > { %v7060_v26 = vpop.xlane.xlu0 %7059 }
0x39ee   : > { %10143 = vrcp.f32 %v7060_v26 }
0x39f1   : > { %v7143_v28 = vpop.permute.xlu0 %7142 }
0x39f5   : > { %v7307_v29 = vpop.permute.xlu0 %7306 }
0x39f6   : > { %9593 = vmatmul.mubr.msk.f32.vlgmr.msra.gmra.mxu1 %vm1604_vm4, %v7307_v29 }
0x39f7   : > { %9601 = vmatpush3.xpose.msk.msra.mxu1 %vm1604_vm4, %v7475_v31  ;;  %9602 = vmatprep.mubr.msk.f32.mxu1 %vm11007_vm0, %v11006_v0 }
0x39f8   : > { %9610 = vmatprep.subr.mxu1 %v11006_v0 }
0x39f9   : > { %v7473_v25 = vpop.permute.xlu0 %7472 }
0x39fa   : > { %9603 = vmatmul.mubr.msk.f32.vlgmr.msra.gmra.mxu1 %vm1604_vm4, %v7473_v25 }
0x39fb   : > { %v10144_v35 = vpop.eup %10143  ;;  %9626 = vmatprep.mubr.msk.f32.mxu1 %vm11007_vm0, %v11006_v0  ;;  %9611 = vmatpush3.msra.mxu1 %v7661_v36  ;;  %v8696_v36 = vld [vmem:[%s12753_s17 + $0xa0] sm:$0xff] }
0x39fc   : > { %v7062_v38 = vmul.f32 %v10144_v35, %v10142_v47  ;;  %9612 = vmatprep.subr.mxu1 %v11006_v0 }
0x39fe   : > { %9578 = vmatmul.mubr.msk.f32.vlgmr.msra.gmra.mxu0 %vm1692_vm7, %v7062_v38 }
0x39ff   : > { %9581 = vmatpush3.xpose.msk.msra.mxu0 %vm1604_vm4, %v7143_v28  ;;  %9582 = vmatprep.mubr.msk.f32.mxu0 %vm11007_vm0, %v11006_v0 }
0x3a00   : > { %9585 = vmatprep.subr.mxu0 %v11006_v0 }
0x3a02   : > { %9583 = vmatmul.mubr.msk.f32.vlgmr.msra.gmra.mxu0 %vm1604_vm4, %v7141_v42  ;;  %v7660_v42 = vld [vmem:[#allocation34 + $0x70] sm:$0xff] }
0x3a03   : > { %9587 = vmatprep.mubr.msk.f32.mxu0 %vm11007_vm0, %v11006_v0  ;;  %9613 = vmatpush3.msra.mxu1 %v7660_v42  ;;  %v8695_v42 = vld [vmem:[%s12753_s17 + $0x98] sm:$0xff] }
0x3a04   : > { %9614 = vmatprep.subr.mxu1 %v11006_v0 }
0x3a05   : > { %9615 = vmatpush3.msra.mxu1 %v7659_v37  ;;  %v8694_v37 = vld [vmem:[%s12753_s17 + $0x90] sm:$0xff] }
0x3a06   : > { %9616 = vmatprep.subr.mxu1 %v11006_v0 }
0x3a07   : > { %9617 = vmatpush3.msra.mxu1 %v7658_v20  ;;  %v8693_v20 = vld [vmem:[%s12753_s17 + $0x88] sm:$0xff] }
0x3a08   : > { %9618 = vmatprep.subr.mxu1 %v11006_v0 }
0x3a09   : > { %9619 = vmatpush3.msra.mxu1 %v7657_v21  ;;  %v8692_v21 = vld [vmem:[%s12753_s17 + $0x80] sm:$0xff] }
0x3a0a   : > { %9620 = vmatprep.subr.mxu1 %v11006_v0 }
0x3a0b   : > { %9621 = vmatpush3.msra.mxu1 %v7656_v22  ;;  %v8690_v22 = vld [vmem:[#allocation38 + $0x1] ss:$0 sm:$0xff] }
0x3a0c   : > { %9622 = vmatprep.subr.mxu1 %v11006_v0 }
0x3a0d   : > { %9623 = vmatpush3.msra.mxu1 %v7655_v23 }
0x3a0e   : > { %9624 = vmatprep.subr.mxu1 %v11006_v0 }
0x3a0f   : > { %9625 = vmatpush3.msra.mxu1 %v7654_v24 }
0x3a10   : > { %9648 = vmatprep.subr.mxu1 %v11006_v0 }
0x3ab6   : > { %v7380_v41 = vpop.f32.mrf.mxu1 }
0x3ab7   : > { %v7384_v43 = vsel %vm1692_vm7, %v7380_v41, -inf }
0x3ab8   : > { %7385 = vmax.xlane.f32.xlu0 %v7384_v43  ;;  %v9594_v44 = vpop.f32.mrf.mxu1 }
0x3ab9   : > { %v8688_v44 = vld [vmem:[#allocation35 + $0x1] ss:$0 sm:$0xff] }
0x3aba   : > { %v7546_v49 = vpop.f32.mrf.mxu1 }
0x3abb   : > { %v7550_v50 = vsel %vm1692_vm7, %v7546_v49, -inf }
0x3abc   : > { %7551 = vmax.xlane.f32.xlu0 %v7550_v50  ;;  %v9604_v27 = vpop.f32.mrf.mxu1 }
0x3abe   : > { %v12471_v52 = vpop.f32.mrf.mxu0 }
0x3ac0   : > { %v9579_v48 = vpop.f32.mrf.mxu0 }
0x3ac2   : > { %v7214_v51 = vpop.f32.mrf.mxu0 }
0x3ac3   : > { %v7218_v54 = vsel %vm1692_vm7, %v7214_v51, -inf }
0x3ac4   : > { %7219 = vmax.xlane.f32.xlu1 %v7218_v54  ;;  %v9584_v55 = vpop.f32.mrf.mxu0 }
0x3b41   : > { %v7386_v18 = vpop.xlane.xlu0 %7385 }
0x3b42   : > { %v7387_v56 = vsub.f32 %v7380_v41, %v7386_v18 }
0x3b44   : > { %v7388_v14 = vmul.f32 1.442695, %v7387_v56 }
0x3b45   : > { %v7552_v57 = vpop.xlane.xlu0 %7551 }
0x3b46   : > { %10145 = vpow2.f32 %v7388_v14  ;;  %v7553_v59 = vsub.f32 %v7546_v49, %v7552_v57  ;;  %v7775_v14 = vld [vmem:[#allocation37 + $0x78] sm:$0xff]  ;;  %v7774_v57 = vld [vmem:[#allocation37 + $0x70] sm:$0xff] }
0x3b48   : > { %v7554_v61 = vmul.f32 1.442695, %v7553_v59  ;;  %v7773_v59 = vld [vmem:[#allocation37 + $0x68] sm:$0xff] }
0x3b4a   : > { %10147 = vpow2.f32 %v7554_v61  ;;  %v7771_v61 = vld [vmem:[#allocation37 + $0x58] sm:$0xff] }
0x3b4d   : > { %v7220_v2 = vpop.xlane.xlu1 %7219 }
0x3b4e   : > { %v7221_v4 = vsub.f32 %v7214_v51, %v7220_v2 }
0x3b50   : > { %v7222_v6 = vmul.f32 1.442695, %v7221_v4 }
0x3b52   : > { %10149 = vpow2.f32 %v7222_v6  ;;  %v7760_v6 = vrot.slane %v12420_v9, %v11797_v39  ;;  %v8706_v39 = vld [vmem:[%s12753_s17 + $0xf0] sm:$0xff] }
0x3b53   : > { %v10146_v58 = vpop.eup %10145 }
0x3b54   : > { %v7390_v62 = vsel %vm1692_vm7, %v10146_v58, 0.0 }
0x3b55   : > { %7391 = vadd.xlane.f32.xlu0 %v7390_v62  ;;  %v7769_v62 = vld [vmem:[#allocation37 + $0x48] sm:$0xff] }
0x3b57   : > { %v10148_v1 = vpop.eup %10147 }
0x3b58   : > { %v7556_v30 = vsel %vm1692_vm7, %v10148_v1, 0.0 }
0x3b59   : > { %7557 = vadd.xlane.f32.xlu1 %v7556_v30 }
0x3b5f   : > { %v10150_v7 = vpop.eup %10149 }
0x3b60   : > { %v7224_v5 = vsel %vm1692_vm7, %v10150_v7, 0.0 }
0x3b6a   : > { %7395 = vrot.lane.b32.xlu1 %v12407_v60, %s11010_s4 }
0x3b6b   : > { %7229 = vrot.lane.b32.xlu0 %v12407_v60, %s11011_s16 }
0x3b8e   : > { %7225 = vadd.xlane.f32.xlu1 %v7224_v5 }
0x3b9f   : > { %7561 = vrot.lane.b32.xlu1 %v12407_v60, %s11013_s1 }
0x3bde   : > { %v7392_v8 = vpop.xlane.xlu0 %7391 }
0x3be2   : > { %v7230_v10 = vpop.permute.xlu0 %7229  ;;  %v7558_v11 = vpop.xlane.xlu1 %7557 }
0x3be3   : > { %9586 = vmatpush3.msk.msra.mxu0 %vm1696_vm5, %v7230_v10 }
0x3be4   : > { %9595 = vmatprep.subr.mxu0 %v11006_v0 }
0x3be6   : > { %v7396_v12 = vpop.permute.xlu1 %7395 }
0x3c17   : > { %v7226_v3 = vpop.xlane.xlu1 %7225 }
0x3c18   : > { %10151 = vrcp.f32 %v7226_v3  ;;  %v8704_v3 = vld [vmem:[%s12753_s17 + $0xe0] sm:$0xff] }
0x3c19   : > { %10153 = vrcp.f32 %v7392_v8  ;;  %v7765_v8 = vrot.slane %v12420_v9, %v11800_v40  ;;  %v8705_v40 = vld [vmem:[%s12753_s17 + $0xe8] sm:$0xff] }
0x3c1a   : > { %10155 = vrcp.f32 %v7558_v11 }
0x3c1b   : > { %v7562_v19 = vpop.permute.xlu1 %7561 }
0x3c25   : > { %v10152_v13 = vpop.eup %10151 }
0x3c26   : > { %v7228_v34 = vmul.f32 %v10152_v13, %v10150_v7  ;;  %v10154_v16 = vpop.eup %10153  ;;  %v8703_v13 = vld [vmem:[%s12753_s17 + $0xd8] sm:$0xff] }
0x3c27   : > { %v7394_v60 = vmul.f32 %v10154_v16, %v10146_v58  ;;  %v10156_v17 = vpop.eup %10155  ;;  %v7770_v58 = vld [vmem:[#allocation37 + $0x50] sm:$0xff]  ;;  %v8701_v16 = vld [vmem:[%s12753_s17 + $0xc8] sm:$0xff] }
0x3c28   : > { %9588 = vmatmul.mubr.msk.f32.vlgmr.msra.gmra.mxu0 %vm1692_vm7, %v7228_v34  ;;  %v7560_v63 = vmul.f32 %v10156_v17, %v10148_v1  ;;  %v7768_v1 = vld [vmem:[#allocation37 + $0x40] sm:$0xff]  ;;  %v8699_v17 = vld [vmem:[%s12753_s17 + $0xb8] sm:$0xff] }
0x3c29   : > { %9596 = vmatpush3.msk.msra.mxu0 %vm1696_vm5, %v7396_v12  ;;  %9597 = vmatprep.mubr.msk.f32.mxu0 %vm11007_vm0, %v11006_v0  ;;  %v8707_v12 = vld [vmem:[%s12753_s17 + $0xf8] sm:$0xff]  ;;  %v8702_v34 = vld [vmem:[%s12753_s17 + $0xd0] sm:$0xff] }
0x3c2a   : > { %9605 = vmatprep.subr.mxu0 %v11006_v0 }
0x3c2c   : > { %9598 = vmatmul.mubr.msk.f32.vlgmr.msra.gmra.mxu0 %vm1692_vm7, %v7394_v60  ;;  %v8700_v60 = vld [vmem:[%s12753_s17 + $0xc0] sm:$0xff] }
0x3c2d   : > { %9606 = vmatpush3.msk.msra.mxu0 %vm1696_vm5, %v7562_v19  ;;  %9607 = vmatprep.mubr.msk.f32.mxu0 %vm11007_vm0, %v11006_v0  ;;  %v8698_v19 = vld [vmem:[%s12753_s17 + $0xb0] sm:$0xff] }
0x3c2e   : > { %9629 = vmatprep.subr.mxu0 %v11006_v0 }
0x3c30   : > { %9608 = vmatmul.mubr.msk.f32.vlgmr.msra.gmra.mxu0 %vm1692_vm7, %v7560_v63  ;;  %v8697_v63 = vld [vmem:[%s12753_s17 + $0xa8] sm:$0xff] }
0x3c31   : > { %9645 = vmatprep.mubr.msk.f32.mxu0 %vm11007_vm0, %v11006_v0  ;;  %9630 = vmatpush3.msra.mxu0 %v7775_v14  ;;  %v7990_v14 = vld [vmem:[%s11180_s19 + $0x28] sm:$0xff] }
0x3c32   : > { %9631 = vmatprep.subr.mxu0 %v11006_v0 }
0x3c33   : > { %9632 = vmatpush3.msra.mxu0 %v7774_v57  ;;  %v7989_v57 = vld [vmem:[%s11180_s19 + $0x20] sm:$0xff] }
0x3c34   : > { %9633 = vmatprep.subr.mxu0 %v11006_v0 }
0x3c35   : > { %9634 = vmatpush3.msra.mxu0 %v7773_v59  ;;  %v7988_v59 = vld [vmem:[%s11180_s19 + $0x18] sm:$0xff] }
0x3c36   : > { %9635 = vmatprep.subr.mxu0 %v11006_v0 }
0x3ce8   : > { %v7302_v45 = vpop.f32.mrf.mxu0 }
0x3ce9   : > { %7639 = vrot.lane.b32.xlu0 %v7302_v45, %s11013_s1 }
0x3cea   : > { %v9589_v47 = vpop.f32.mrf.mxu0 }
0x3cec   : > { %v7468_v32 = vpop.f32.mrf.mxu0 }
0x3ced   : > { %7643 = vrot.lane.b32.xlu1 %v7468_v32, %s11010_s4  ;;  %s8109_s4 = sshll.u32 %s1391_s27, 4  ;;  %s8110_s4 = int_to_ptr.vmem [resolvable:$true] %s8109_s4 }
0x3cee   : > { %v9599_v26 = vpop.f32.mrf.mxu0  ;;  %s10822_s1 = scalar_lea.vmem %s8110_s4, 128  ;;  %p10829_p11 = scmp.lt.s32.totalorder %s8110_s4, %s10827_s30 }
0x3cef   : > { %p10823_p6 = scmp.ne.s32.totalorder %s8110_s4, %s10822_s1  ;;  %p10830_p0 = scmp.lt.s32.totalorder %s10828_s20, %s10822_s1 }
0x3cf0   : > { %v7634_v28 = vpop.f32.mrf.mxu0 }
0x3cf1   : > { %7647 = vrot.lane.b32.xlu0 %v7634_v28, %s11011_s16  ;;  %s12598_s16 = scalar_lea.hbm %s12755_s5, %s8712_s14  ;;  %p10824_p10 = pnand %p10823_p6, %p12756_p5 }
0x3cf2   : > { %v9609_v29 = vpop.f32.mrf.mxu0  ;;  %p10831_p2 = por %p10830_p0, %p10829_p11 }
0x3cf3   : > { %p10825_p7 = pneg %p10824_p10 }
0x3cf5   : > { %p10832_p1 = pnand %p10831_p2, %p10825_p7 }
0x3d5b   : > { %v7640_v31 = vpop.permute.xlu0 %7639 }
0x3d5c   : > { %v7650_v35 = vsel %vm1604_vm4, %v12471_v52, %v7640_v31 }
0x3d5f   : > { %v7644_v25 = vpop.permute.xlu1 %7643 }
0x3d60   : > { %v7651_v38 = vsel %vm2281_vm8, %v7650_v35, %v7644_v25 }
0x3d63   : > { %v7648_v41 = vpop.permute.xlu0 %7647 }
0x3d64   : > { %v7652_v43 = vsel %vm2283_vm9, %v7651_v38, %v7648_v41  ;;  %v8708_v41 = vld [vmem:[#allocation40 + $0x1] ss:$0 sm:$0xff] }
0x3d65   : > { %9627 = vmatmul.mubr.msk.f32.vlgmr.msra.gmra.mxu1 %vm1525_vm3, %v7652_v43 }
0x3d66   : > { %9680 = vmatprep.mubr.msk.f32.mxu1 %vm11007_vm0, %v11006_v0  ;;  %9649 = vmatpush3.msra.mxu1 %v8707_v12 }
0x3d67   : > { %9650 = vmatprep.subr.mxu1 %v11006_v0 }
0x3d68   : > { %9651 = vmatpush3.msra.mxu1 %v8706_v39 }
0x3d69   : > { %9652 = vmatprep.subr.mxu1 %v11006_v0 }
0x3d6a   : > { %9653 = vmatpush3.msra.mxu1 %v8705_v40 }
0x3d6b   : > { %9654 = vmatprep.subr.mxu1 %v11006_v0 }
0x3d6c   : > { %9655 = vmatpush3.msra.mxu1 %v8704_v3 }
0x3d6d   : > { %9656 = vmatprep.subr.mxu1 %v11006_v0 }
0x3d6e   : > { %9657 = vmatpush3.msra.mxu1 %v8703_v13 }
0x3d6f   : > { %9658 = vmatprep.subr.mxu1 %v11006_v0 }
0x3d70   : > { %9659 = vmatpush3.msra.mxu1 %v8702_v34 }
0x3d71   : > { %9660 = vmatprep.subr.mxu1 %v11006_v0 }
0x3d72   : > { %9661 = vmatpush3.msra.mxu1 %v8701_v16 }
0x3d73   : > { %9662 = vmatprep.subr.mxu1 %v11006_v0 }
0x3d74   : > { %9663 = vmatpush3.msra.mxu1 %v8700_v60 }
0x3d75   : > { %9664 = vmatprep.subr.mxu1 %v11006_v0 }
0x3d76   : > { %9665 = vmatpush3.msra.mxu1 %v8699_v17 }
0x3d77   : > { %9666 = vmatprep.subr.mxu1 %v11006_v0 }
0x3d78   : > { %9667 = vmatpush3.msra.mxu1 %v8698_v19 }
0x3d79   : > { %9668 = vmatprep.subr.mxu1 %v11006_v0 }
0x3d7a   : > { %9669 = vmatpush3.msra.mxu1 %v8697_v63 }
0x3d7b   : > { %9670 = vmatprep.subr.mxu1 %v11006_v0 }
0x3d7c   : > { %9671 = vmatpush3.msra.mxu1 %v8696_v36 }
0x3d7d   : > { %9672 = vmatprep.subr.mxu1 %v11006_v0 }
0x3d7e   : > { %9673 = vmatpush3.msra.mxu1 %v8695_v42 }
0x3d7f   : > { %9674 = vmatprep.subr.mxu1 %v11006_v0 }
0x3d80   : > { %9675 = vmatpush3.msra.mxu1 %v8694_v37 }
0x3d81   : > { %9676 = vmatprep.subr.mxu1 %v11006_v0 }
0x3d82   : > { %9677 = vmatpush3.msra.mxu1 %v8693_v20 }
0x3d83   : > { %9678 = vmatprep.subr.mxu1 %v11006_v0 }
0x3d84   : > { %9679 = vmatpush3.msra.mxu1 %v8692_v21 }
0x3e25   : > { %v7739_v49 = vpop.f32.mrf.mxu1 }
0x3e26   : > { %v7740_v50 = vadd.f32 %v8688_v44, %v7739_v49 }
0x3e27   : > { %v9628_v27 = vpop.f32.mrf.mxu1 }
0x3e28   : > { %v7743_v48 = vadd.f32 %v7740_v50, %v12426_v15  ;;  %v7772_v15 = vld [vmem:[#allocation37 + $0x60] sm:$0xff] }
0x3e29   : > { %9636 = vmatpush3.msra.mxu0 %v7772_v15  ;;  %v7987_v15 = vld [vmem:[%s11180_s19 + $0x10] sm:$0xff] }
0x3e2a   : > { %v7744_v51 = vsel %vm1525_vm3, %v7743_v48, 0.0  ;;  %9637 = vmatprep.subr.mxu0 %v11006_v0 }
0x3e2b   : > { %7745 = vadd.xlane.f32.xlu1 %v7744_v51  ;;  %9638 = vmatpush3.msra.mxu0 %v7771_v61  ;;  %v7986_v61 = vld [vmem:[%s11180_s19 + $0x8] sm:$0xff] }
0x3e2c   : > { %9639 = vmatprep.subr.mxu0 %v11006_v0 }
0x3e2d   : > { %9640 = vmatpush3.msra.mxu0 %v7770_v58  ;;  %v7985_v58 = vld [vmem:[%s11180_s19] sm:$0xff] }
0x3e2e   : > { %9641 = vmatprep.subr.mxu0 %v11006_v0 }
0x3e2f   : > { %9642 = vmatpush3.msra.mxu0 %v7769_v62 }
0x3e30   : > { %9643 = vmatprep.subr.mxu0 %v11006_v0 }
0x3e31   : > { %9644 = vmatpush3.msra.mxu0 %v7768_v1 }
0x3e32   : > { %9683 = vmatprep.subr.mxu0 %v11006_v0 }
0x3eb4   : > { %v7746_v52 = vpop.xlane.xlu1 %7745 }
0x3eb5   : > { %v7747_v54 = vmul.f32 0.015625, %v7746_v52 }
0x3eb7   : > { %v7748_v55 = vsub.f32 %v7743_v48, %v7747_v54 }
0x3eb9   : > { %v7749_v18 = vmul.f32 %v7748_v55, %v7748_v55 }
0x3ebb   : > { %v7750_v56 = vsel %vm1525_vm3, %v7749_v18, 0.0  ;;  %v7992_v18 = vld [vmem:[%s11180_s19 + $0x38] sm:$0xff] }
0x3ebc   : > { %7751 = vadd.xlane.f32.xlu0 %v7750_v56  ;;  %v7991_v56 = vld [vmem:[%s11180_s19 + $0x30] sm:$0xff] }
0x3f45   : > { %v7752_v30 = vpop.xlane.xlu0 %7751 }
0x3f46   : > { %v7753_v2 = vmul.f32 0.015625, %v7752_v30 }
0x3f48   : > { %v7754_v4 = vadd.f32 1e-05, %v7753_v2  ;;  %v7978_v2 = vrot.slane %v12420_v9, %v5896_v46 }
0x3f4a   : > { %10157 = vrsqrt.f32 %v7754_v4 }
0x3f57   : > { %v10158_v7 = vpop.eup %10157 }
0x3f58   : > { %v7756_v5 = vmul.f32 %v10158_v7, %v7748_v55  ;;  %v7983_v7 = vrot.slane %v12420_v9, %v5901_v53 }
0x3f5a   : > { %v7761_v10 = vmul.f32 %v7760_v6, %v7756_v5 }
0x3f5c   : > { %v12531_v11 = vadd.f32 %v7765_v8, %v7761_v10 }
0x3f5e   : > { %9646 = vmatmul.mubr.msk.f32.vlgmr.msra.gmra.mxu0 %vm1525_vm3, %v12531_v11 }
0x3f5f   : > { %9699 = vmatprep.mubr.msk.f32.mxu0 %vm11007_vm0, %v11006_v0  ;;  %9684 = vmatpush3.msra.mxu0 %v7992_v18 }
0x3f60   : > { %9685 = vmatprep.subr.mxu0 %v11006_v0 }
0x3f61   : > { %9686 = vmatpush3.msra.mxu0 %v7991_v56 }
0x3f62   : > { %9687 = vmatprep.subr.mxu0 %v11006_v0 }
0x3f63   : > { %9688 = vmatpush3.msra.mxu0 %v7990_v14 }
0x3f64   : > { %9689 = vmatprep.subr.mxu0 %v11006_v0 }
0x3f65   : > { %9690 = vmatpush3.msra.mxu0 %v7989_v57 }
0x3f66   : > { %9691 = vmatprep.subr.mxu0 %v11006_v0 }
0x3f67   : > { %9692 = vmatpush3.msra.mxu0 %v7988_v59 }
0x3f68   : > { %9693 = vmatprep.subr.mxu0 %v11006_v0 }
0x3f69   : > { %9694 = vmatpush3.msra.mxu0 %v7987_v15 }
0x3f6a   : > { %9695 = vmatprep.subr.mxu0 %v11006_v0 }
0x3f6b   : > { %9696 = vmatpush3.msra.mxu0 %v7986_v61 }
0x3f6c   : > { %9697 = vmatprep.subr.mxu0 %v11006_v0  ;;  %v8709_v0 = vld [vmem:[%s12754_s22] ss:$0 sm:$0xff] }
0x3f6d   : > { %9698 = vmatpush3.msra.mxu0 %v7985_v58 }
0x401e   : > { %v7853_v23 = vpop.f32.mrf.mxu0 }
0x401f   : > { %v7854_v24 = vadd.f32 %v8690_v22, %v7853_v23 }
0x4020   : > { %v9647_v45 = vpop.f32.mrf.mxu0 }
0x4021   : > { %v7857_v47 = vmul.f32 %v7854_v24, %v7854_v24 }
0x4023   : > { %v7858_v32 = vmul.f32 %v7857_v47, %v7854_v24 }
0x4025   : > { %v7859_v26 = vmul.f32 0.044715, %v7858_v32 }
0x4027   : > { %v7860_v28 = vadd.f32 %v7859_v26, %v7854_v24 }
0x4029   : > { %v7861_v29 = vmul.f32 0.7978846, %v7860_v28 }
0x402b   : > { %10159 = vtanh.f32 %v7861_v29 }
0x4038   : > { %v10160_v31 = vpop.eup %10159 }
0x4039   : > { %v7863_v25 = vadd.f32 1.0, %v10160_v31 }
0x403b   : > { %v7864_v35 = vmul.f32 0.5, %v7863_v25 }
0x403d   : > { %v7865_v38 = vmul.f32 %v7864_v35, %v7854_v24 }
0x403f   : > { %9681 = vmatmul.mubr.f32.vlgmr.msra.gmra.mxu1 %v7865_v38 }
0x40ff   : > { %v7957_v43 = vpop.f32.mrf.mxu1 }
0x4100   : > { %v7958_v44 = vadd.f32 %v8708_v41, %v7957_v43 }
0x4101   : > { %v9682_v49 = vpop.f32.mrf.mxu1 }
0x4102   : > { %v7961_v50 = vadd.f32 %v7958_v44, %v12531_v11 }
0x4104   : > { %v7962_v27 = vsel %vm1525_vm3, %v7961_v50, 0.0 }
0x4105   : > { %7963 = vadd.xlane.f32.xlu0 %v7962_v27 }
0x418e   : > { %v7964_v48 = vpop.xlane.xlu0 %7963 }
0x418f   : > { %v7965_v51 = vmul.f32 0.015625, %v7964_v48 }
0x4191   : > { %v7966_v52 = vsub.f32 %v7961_v50, %v7965_v51 }
0x4193   : > { %v7967_v54 = vmul.f32 %v7966_v52, %v7966_v52 }
0x4195   : > { %v7968_v55 = vsel %vm1525_vm3, %v7967_v54, 0.0 }
0x4196   : > { %7969 = vadd.xlane.f32.xlu1 %v7968_v55 }
0x421f   : > { %v7970_v62 = vpop.xlane.xlu1 %7969 }
0x4220   : > { %v7971_v1 = vmul.f32 0.015625, %v7970_v62 }
0x4222   : > { %v7972_v30 = vadd.f32 1e-05, %v7971_v1 }
0x4224   : > { %10161 = vrsqrt.f32 %v7972_v30 }
0x4231   : > { %v10162_v4 = vpop.eup %10161 }
0x4232   : > { %v7974_v6 = vmul.f32 %v10162_v4, %v7966_v52 }
0x4234   : > { %v7979_v5 = vmul.f32 %v7978_v2, %v7974_v6 }
0x4236   : > { %v7984_v8 = vadd.f32 %v7983_v7, %v7979_v5 }
0x4238   : > { %9700 = vmatmul.mubr.msk.f32.vlgmr.msra.gmra.mxu0 %vm1525_vm3, %v7984_v8 }
0x42f8   : > { %v8069_v10 = vpop.f32.mrf.mxu0 }
0x42f9   : > { %v8070_v11 = vadd.f32 %v8709_v0, %v8069_v10 }
0x42fa   : > { %v9701_v12 = vpop.f32.mrf.mxu0 }
0x42fb   : > { %v8077_v39 = vand.u32 2147483647, %v8070_v11  ;;  %v8074_v17 = vmax.f32 %v8070_v11, 0.0  ;;  %vm8075_vm12 = vcmp.ne.f32.partialorder %v8070_v11, %v8070_v11  ;;  %v8073_v42 = vadd.f32 1e-08, %v8070_v11 }
0x42fd   : > { %v8078_v40 = vsub.f32 0.0, %v8077_v39 }
0x42ff   : > { %v8079_v3 = vmul.f32 1.442695, %v8078_v40 }
0x4301   : > { %10163 = vpow2.f32 %v8079_v3 }
0x430e   : > { %v10164_v46 = vpop.eup %10163 }
0x430f   : > { %v8081_v13 = vadd.f32 1.0, %v10164_v46  ;;  %v8084_v33 = vmul.f32 -0.5, %v10164_v46  ;;  %v8087_v53 = vand.u32 2147483647, %v10164_v46 }
0x4311   : > { %10165 = vlog2.f32 %v8081_v13  ;;  %v8085_v34 = vadd.f32 1.0, %v8084_v33  ;;  %vm8088_vm11 = vcmp.lt.f32.partialorder %v8087_v53, 0.0004427343 }
0x4313   : > { %v8086_v60 = vmul.f32 %v10164_v46, %v8085_v34 }
0x431e   : > { %v10166_v9 = vpop.eup %10165 }
0x431f   : > { %v8083_v16 = vmul.f32 0.6931472, %v10166_v9 }
0x4321   : > { %v8089_v19 = vsel %vm8088_vm11, %v8086_v60, %v8083_v16 }
0x4322   : > { %v8090_v63 = vadd.f32 %v8089_v19, %v8074_v17 }
0x4324   : > { %v8091_v36 = vsel %vm8075_vm12, %v8070_v11, %v8090_v63 }
0x4325   : > { %v8092_v37 = vadd.f32 1e-08, %v8091_v36 }
0x4327   : > { %v8093_v20 = vsel %vm1604_vm4, %v8073_v42, %v8092_v37 }
0x4328   : > { %8094 = vst.msk [vmem:[%s1391_s27] sm:$0xff] %vm2281_vm8, %v8093_v20 }
0x4329   : > { %10835 = shalt.err (!%p10832_p1)
}
0x432a   : > { %s10836_s21 = scalar_lea.hbm %s12598_s16, 128  ;;  %s10840_s22 = scalar_lea.hbm %s12755_s5, 256 }
0x432b   : > { %p10837_p3 = scmp.ne.s32.totalorder %s12598_s16, %s10836_s21  ;;  %p10841_p9 = scmp.lt.s32.totalorder %s12598_s16, %s12755_s5 }
0x432c   : > { %p10842_p12 = scmp.lt.s32.totalorder %s10840_s22, %s10836_s21 }
0x432d   : > { %p10838_p4 = pnand %p10837_p3, %p12756_p5 }
0x432e   : > { %p10843_p13 = por %p10842_p12, %p10841_p9 }
0x432f   : > { %p10839_p8 = pneg %p10838_p4 }
0x4331   : > { %p10844_p6 = pnand %p10843_p13, %p10839_p8 }
0x4333   : > { %10847 = shalt.err (!%p10844_p6)
}
0x4334   : > { %9798 = dma.vmem_to_hbm [thread:$0]  (%p12756_p5), %s8110_s4, 128, %s12598_s16, %s8096_s8  }
0x4335 PF: > { %s8121_s14 = sand.u32 1, %s10926_s7   ;;  %p12757_p10 = scmp.ne.s32.totalorder %s12720_s6, 0 }
0x4336   : > { %p12758_p7 = scmp.ge.s32.totalorder %s10938_s11, 2  ;;  %s8122_s27 = scalar_lea.sflag [#allocation4], %s8121_s14 }
0x4338   : > { %p9878_p11 = pnand %p12758_p7, %p12757_p10 }
0x433a   : > { %p9879_p0 = pneg %p9878_p11 }
0x433c   : > { %10921 = dma.done.wait (%p9879_p0), %s8122_s27, 128  }
0x433d   : > { %10923 = vsyncadd (%p9879_p0), %s8122_s27, 4294967168  ;;  %p94_p2 = scmp.ge.s32.totalorder %s11418_s2, 4   ;;  %s12759_s7 = smov %s10930_s0 }
0x433e   : > { %s12760_s0 = smov %s10934_s10  ;;  %s12761_s10 = smov %s11430_s23 }
0x433f   : > { %s12762_s11 = smov %s11418_s2  ;;  %96 = sbr.rel (!%p94_p2) target bundleno = 87 (0x57), region = 359 }
0x4344   :  { %8127 = vsyncpa [#allocation3], 1 }
0x4345   :  { %8129 = vsyncpa [#allocation3 + $0x1], 1 }
0x4346   :  { %8130 = vsyncpa [#allocation6], 1 }
0x4347   :  { %8132 = vsyncpa [#allocation6 + $0x1], 1 }
0x4348   :  { %8133 = vsyncpa [#allocation9], 1 }
0x4349   :  { %8134 = vsyncpa [#allocation12], 1 }
0x434a   :  { %8135 = vsyncpa [#allocation15], 1 }
0x434b   :  { %8136 = vsyncpa [#allocation18], 1 }
0x434c   :  { %8137 = vsyncpa [#allocation21], 1 }
0x434d   :  { %8138 = vsyncpa [#allocation24], 1 }
0x434e   :  { %8139 = vsyncpa [#allocation27], 1 }
0x434f   :  { %8140 = vsyncpa [#allocation30], 1 }
0x4350   :  { %8141 = vsyncpa [#allocation33], 1 }
0x4351   :  { %8142 = vsyncpa [#allocation36], 1 }
0x4352   :  { %8143 = vsyncpa [#allocation39], 1 }
0x4353   :  { %8144 = vsyncpa [#allocation4], 1 }
0x4354   :  { %8146 = vsyncpa [#allocation4 + $0x1], 1 }

</bundles_post_ra>
